<compile_context>
chip_gen: v6e
topology: v6e:2x2x1
jax: 0.10.0
libtpu: 0.0.40
codegen_flags: <defaults>
</compile_context>

<pallas_src>
import jax
import jax.numpy as jnp
from jax.experimental import pallas as pl
from jax.experimental.pallas import tpu as pltpu

# ---------------------------------------------------------------------------
# fixed geometry (the module requires 6272 = 32 * 14 * 14 fc1 input features,
# i.e. a (N, 3, 32, 32) input)
# ---------------------------------------------------------------------------
H_IN = 32                 # input H = W
H1 = 30                   # conv1 output H = W
H2 = 28                   # conv2 output H = W
HP = 14                   # pooled H = W
C1 = 32                   # conv output channels
C1P = 3 * C1              # 96: conv1 channels x 3 row-shifted copies
L0 = H_IN * H_IN          # 1024 rows per image in the input slab frame
L1P = (H2 - 1) * H_IN + H2 + 2 * H_IN   # 956 packed-conv1 frame rows needed
L2V = (H2 - 1) * H_IN + H2              # 892 conv2 frame rows to compute
L3V = (H2 - 2) * H_IN + (H2 - 2) + 1    # 859 pool-base frame rows
KP = 81                   # packed conv1 contraction: 3 copies * 9 taps * 3 cin
FEAT = HP * HP * C1       # 6272
NPAD = 128                # padded fc2 output width (lane-dense store)


# ---------------------------------------------------------------------------
# Pallas kernels
# ---------------------------------------------------------------------------
def _conv_pool_kernel(p_ref, w1_ref, b1_ref, w2_ref, b2_ref, o_ref,
                      h1_ref, z2_ref, pm_ref):
    # p_ref : (1, 956, 81) packed conv1 patches for one image.
    #         row r = frame pixel (h*32 + w); lane 27*j + 9*dh + 3*dw + cin
    #         holds x[r + j + dh*32 + dw, cin]  (j = row-shift of the copy).
    # w1_ref: (81, 96)   block-diagonal conv1 weight (3 shifted copies).
    # b1_ref: (1, 96)    conv1 bias tiled over the 3 copies.
    # w2_ref: (3, 96, 32) conv2 taps packed as [dh, 32*dw + cin, cout].
    # b2_ref: (1, 32)
    # o_ref : (1, 196, 32) pooled features, row = ph*14 + pw, lane = channel.
    # h1_ref/z2_ref/pm_ref : VMEM scratch slabs (32-wide row frame).

    # ---- conv1 (3x3, VALID) + bias + ReLU: ONE matmul emits the activation
    #      and its two row-shifted copies side by side in lanes.
    h1 = jnp.dot(p_ref[0], w1_ref[...], preferred_element_type=jnp.float32)
    h1_ref[pl.ds(0, L1P), :] = jnp.maximum(h1 + b1_ref[...], 0.0)

    # ---- conv2 (3x3, VALID) + bias + ReLU: 3 matmuls (one per dh), K = 96
    #      contracts (dw, cin) in one pass thanks to the lane packing above.
    acc2 = jnp.dot(h1_ref[pl.ds(0, L2V), :], w2_ref[0],
                   preferred_element_type=jnp.float32)
    acc2 = acc2 + jnp.dot(h1_ref[pl.ds(H_IN, L2V), :], w2_ref[1],
                          preferred_element_type=jnp.float32)
    acc2 = acc2 + jnp.dot(h1_ref[pl.ds(2 * H_IN, L2V), :], w2_ref[2],
                          preferred_element_type=jnp.float32)
    z2_ref[pl.ds(0, L2V), :] = jnp.maximum(acc2 + b2_ref[...], 0.0)

    # ---- 2x2 max-pool: window max relative to every base pixel (VPU work)
    a = jnp.maximum(z2_ref[pl.ds(0, L3V), :], z2_ref[pl.ds(1, L3V), :])
    b = jnp.maximum(z2_ref[pl.ds(H_IN, L3V), :], z2_ref[pl.ds(H_IN + 1, L3V), :])
    pm_ref[pl.ds(0, L3V), :] = jnp.maximum(a, b)

    # ---- decimate to the 14x14 pooled grid (base row = 2*ph*32 + 2*pw) and
    #      emit (ph, pw, c)-ordered features for this image
    for ph in range(HP):
        o_ref[0, pl.ds(ph * HP, HP), :] = pm_ref[pl.ds(2 * ph * H_IN, HP, stride=2), :]


def _head_kernel(f_ref, w1_ref, b1_ref, w2_ref, b2_ref, o_ref):
    # fc1 -> batchnorm (batch stats, affine=False, eps=1e-5) -> relu -> fc2
    h = jnp.dot(f_ref[...], w1_ref[...], preferred_element_type=jnp.float32)
    h = h + b1_ref[...]
    mean = jnp.mean(h, axis=0, keepdims=True)
    var = jnp.mean(jnp.square(h - mean), axis=0, keepdims=True)   # biased var
    h = jnp.maximum((h - mean) * jax.lax.rsqrt(var + 1e-5), 0.0)
    out = jnp.dot(h, w2_ref[...], preferred_element_type=jnp.float32)
    o_ref[...] = out + b2_ref[...]


# ---------------------------------------------------------------------------
# wrappers
# ---------------------------------------------------------------------------
def prepare_params(params):
    """One-time re-layout of PyTorch-style parameters into kernel layout."""
    # conv1: block-diagonal (81, 96) weight -> one matmul emits 3 row-shifted
    # copies of the conv1 activation (lane group j = rows shifted by j).
    w1 = params["w_conv1"].reshape(27, C1)              # [9*dh+3*dw+cin, cout]
    w1bd = jnp.zeros((KP, C1P), jnp.float32)
    for j in range(3):
        w1bd = w1bd.at[27 * j:27 * (j + 1), C1 * j:C1 * (j + 1)].set(w1)
    b1 = jnp.tile(params["b_conv1"].reshape(1, C1), (1, 3))          # (1, 96)
    # conv2: taps packed per dh row: [dh, 32*dw + cin, cout]
    w2p = params["w_conv2"].reshape(3, C1P, C1)
    b2 = params["b_conv2"].reshape(1, C1)
    # fc1: permute input features from torch's CHW flatten to our HWC flatten
    w_fc1 = params["w_fc1"].reshape(C1, HP, HP, 128)          # (c, h, w, out)
    w_fc1 = jnp.transpose(w_fc1, (1, 2, 0, 3)).reshape(FEAT, 128)
    b_fc1 = params["b_fc1"].reshape(1, 128)
    # fc2: zero-pad 100 -> 128 outputs for a lane-dense store
    w_fc2 = jnp.pad(params["w_fc2"], ((0, 0), (0, NPAD - 100)))
    b_fc2 = jnp.pad(params["b_fc2"], (0, NPAD - 100)).reshape(1, NPAD)
    return dict(w1bd=w1bd, b1=b1, w2p=w2p, b2=b2,
                w_fc1=w_fc1, b_fc1=b_fc1, w_fc2=w_fc2, b_fc2=b_fc2)


def net_forward(prep, x_nchw):
    N, C, H, W = x_nchw.shape
    assert (C, H, W) == (3, H_IN, H_IN)
    # Layout plumbing only (no compute) in XLA: NCHW -> (N, H*W, 3) row slab,
    # then gather the 27 shifted row-slices feeding conv1 and its two
    # row-shifted copies.  Lane index = 27*j + 9*dh + 3*dw + cin.
    x = jnp.transpose(x_nchw, (0, 2, 3, 1)).reshape(N, L0, 3)
    slabs = [x[:, j + dh * H_IN + dw: j + dh * H_IN + dw + L1P, :]
             for j in range(3) for dh in range(3) for dw in range(3)]
    patches = jnp.concatenate(slabs, axis=-1)               # (N, 956, 81)

    feats = pl.pallas_call(
        _conv_pool_kernel,
        grid=(N,),
        in_specs=[
            pl.BlockSpec((1, L1P, KP), lambda n: (n, 0, 0)),
            pl.BlockSpec((KP, C1P), lambda n: (0, 0)),
            pl.BlockSpec((1, C1P), lambda n: (0, 0)),
            pl.BlockSpec((3, C1P, C1), lambda n: (0, 0, 0)),
            pl.BlockSpec((1, C1), lambda n: (0, 0)),
        ],
        out_specs=pl.BlockSpec((1, HP * HP, C1), lambda n: (n, 0, 0)),
        out_shape=jax.ShapeDtypeStruct((N, HP * HP, C1), jnp.float32),
        scratch_shapes=[
            pltpu.VMEM((960, C1P), jnp.float32),  # packed conv1 activation slab
            pltpu.VMEM((896, C1), jnp.float32),   # conv2 activation slab
            pltpu.VMEM((864, C1), jnp.float32),   # 2x2-window max slab
        ],
        compiler_params=pltpu.CompilerParams(
            dimension_semantics=("parallel",)),
    )(patches, prep["w1bd"], prep["b1"], prep["w2p"], prep["b2"])

    flat = feats.reshape(N, FEAT)                 # contiguous, HWC order

    out = pl.pallas_call(
        _head_kernel,
        grid=(1,),
        in_specs=[
            pl.BlockSpec((N, FEAT), lambda i: (0, 0)),
            pl.BlockSpec((FEAT, 128), lambda i: (0, 0)),
            pl.BlockSpec((1, 128), lambda i: (0, 0)),
            pl.BlockSpec((128, NPAD), lambda i: (0, 0)),
            pl.BlockSpec((1, NPAD), lambda i: (0, 0)),
        ],
        out_specs=pl.BlockSpec((N, NPAD), lambda i: (0, 0)),
        out_shape=jax.ShapeDtypeStruct((N, NPAD), jnp.float32),
    )(flat, prep["w_fc1"], prep["b_fc1"], prep["w_fc2"], prep["b_fc2"])
    return out[:, :100]


# ---------------------------------------------------------------------------
# parameters (deterministic synthetic init; conv weights stored HWIO)
# ---------------------------------------------------------------------------
def init_params(key):
    ks = jax.random.split(key, 8)
    s = 0.05
    return dict(
        w_conv1=jax.random.normal(ks[0], (3, 3, 3, 32), jnp.float32) * s,
        b_conv1=jax.random.normal(ks[1], (32,), jnp.float32) * s,
        w_conv2=jax.random.normal(ks[2], (3, 3, 32, 32), jnp.float32) * s,
        b_conv2=jax.random.normal(ks[3], (32,), jnp.float32) * s,
        w_fc1=jax.random.normal(ks[4], (6272, 128), jnp.float32) * s,
        b_fc1=jax.random.normal(ks[5], (128,), jnp.float32) * s,
        w_fc2=jax.random.normal(ks[6], (128, 100), jnp.float32) * s,
        b_fc2=jax.random.normal(ks[7], (100,), jnp.float32) * s,
    )


# ---------------------------------------------------------------------------
# pure-JAX reference (PyTorch semantics: NCHW flatten, batch-stat batchnorm)
# ---------------------------------------------------------------------------
def reference_forward(params, x_nchw):
    hp = jax.lax.Precision.HIGHEST
    x = jnp.transpose(x_nchw, (0, 2, 3, 1))
    x = jax.lax.conv_general_dilated(
        x, params["w_conv1"], (1, 1), "VALID",
        dimension_numbers=("NHWC", "HWIO", "NHWC"), precision=hp)
    x = jax.nn.relu(x + params["b_conv1"])
    x = jax.lax.conv_general_dilated(
        x, params["w_conv2"], (1, 1), "VALID",
        dimension_numbers=("NHWC", "HWIO", "NHWC"), precision=hp)
    x = jax.nn.relu(x + params["b_conv2"])
    x = jax.lax.reduce_window(x, -jnp.inf, jax.lax.max,
                              (1, 2, 2, 1), (1, 2, 2, 1), "VALID")
    x = jnp.transpose(x, (0, 3, 1, 2)).reshape(x.shape[0], -1)
    h = jnp.dot(x, params["w_fc1"], precision=hp) + params["b_fc1"]
    mean = jnp.mean(h, axis=0, keepdims=True)
    var = jnp.mean(jnp.square(h - mean), axis=0, keepdims=True)
    h = jax.nn.relu((h - mean) * jax.lax.rsqrt(var + 1e-5))
    return jnp.dot(h, params["w_fc2"], precision=hp) + params["b_fc2"]


# ---------------------------------------------------------------------------
if __name__ == "__main__":
    key = jax.random.PRNGKey(0)
    k_param, k_x = jax.random.split(key)
    params = init_params(k_param)
    prep = prepare_params(params)            # one-time weight re-layout
    # fc1 expects 6272 = 32 * 14 * 14 features -> input must be (N, 3, 32, 32)
    x = jax.random.normal(k_x, (2, 3, 32, 32), jnp.float32)

    fwd = jax.jit(net_forward)
    out = jax.block_until_ready(fwd(prep, x))
    assert out.shape == (2, 100) and out.dtype == jnp.float32

    ref = jax.block_until_ready(reference_forward(params, x))
    err = float(jnp.max(jnp.abs(out - ref)))
    assert err < 1e-2, f"max abs diff vs reference: {err}"

    print("KERNEL_OK")
</pallas_src>

<mosaic_0001>
module attributes {stable_mosaic.version = 11 : i64} {
  func.func @_conv_pool_kernel(%arg0: i32, %arg1: memref<1x956x81xf32, #tpu.memory_space<vmem>>, %arg2: memref<81x96xf32, #tpu.memory_space<vmem>>, %arg3: memref<1x96xf32, #tpu.memory_space<vmem>>, %arg4: memref<3x96x32xf32, #tpu.memory_space<vmem>>, %arg5: memref<1x32xf32, #tpu.memory_space<vmem>>, %arg6: memref<1x196x32xf32, #tpu.memory_space<vmem>>, %arg7: memref<960x96xf32, #tpu.memory_space<vmem>>, %arg8: memref<896x32xf32, #tpu.memory_space<vmem>>, %arg9: memref<864x32xf32, #tpu.memory_space<vmem>>) attributes {dimension_semantics = [#tpu.dimension_semantics<parallel>], iteration_bounds = array<i64: 2>, scalar_prefetch = 0 : i64, scratch_operands = 3 : i64, tpu.core_type = #tpu.core_type<tc>, window_params = [{transform_indices = @transform_0, window_bounds = array<i64: 1, 956, 81>}, {pipeline_mode = #tpu.pipeline_mode<synchronous>, transform_indices = @transform_1, window_bounds = array<i64: 81, 96>}, {pipeline_mode = #tpu.pipeline_mode<synchronous>, transform_indices = @transform_2, window_bounds = array<i64: 1, 96>}, {pipeline_mode = #tpu.pipeline_mode<synchronous>, transform_indices = @transform_3, window_bounds = array<i64: 3, 96, 32>}, {pipeline_mode = #tpu.pipeline_mode<synchronous>, transform_indices = @transform_4, window_bounds = array<i64: 1, 32>}, {transform_indices = @transform_5, window_bounds = array<i64: 1, 196, 32>}]} {
    %c0 = arith.constant 0 : index
    %c0_0 = arith.constant 0 : index
    %c0_1 = arith.constant 0 : index
    %0 = vector.load %arg1[%c0, %c0_0, %c0_1] : memref<1x956x81xf32, #tpu.memory_space<vmem>>, vector<1x956x81xf32>
    %1 = vector.shape_cast %0 : vector<1x956x81xf32> to vector<956x81xf32>
    %c0_2 = arith.constant 0 : index
    %c0_3 = arith.constant 0 : index
    %2 = vector.load %arg2[%c0_2, %c0_3] : memref<81x96xf32, #tpu.memory_space<vmem>>, vector<81x96xf32>
    %cst = arith.constant dense<0.000000e+00> : vector<956x96xf32>
    %3 = tpu.matmul %1, %2, %cst {dimension_numbers = #tpu.dot_dimension_numbers<[1], [0], [0], [1], [0, 0, 1, 1], [], []>} : vector<956x81xf32>, vector<81x96xf32>, vector<956x96xf32> -> vector<956x96xf32>
    %c0_4 = arith.constant 0 : index
    %c0_5 = arith.constant 0 : index
    %4 = vector.load %arg3[%c0_4, %c0_5] : memref<1x96xf32, #tpu.memory_space<vmem>>, vector<1x96xf32>
    %5 = vector.broadcast %4 : vector<1x96xf32> to vector<956x96xf32>
    %6 = arith.addf %3, %5 : vector<956x96xf32>
    %cst_6 = arith.constant 0.000000e+00 : f32
    %7 = vector.broadcast %cst_6 : f32 to vector<956x96xf32>
    %8 = arith.maximumf %6, %7 : vector<956x96xf32>
    %c0_7 = arith.constant 0 : index
    %c0_8 = arith.constant 0 : index
    %9 = vector.load %arg7[%c0_7, %c0_8] : memref<960x96xf32, #tpu.memory_space<vmem>>, vector<956x96xf32>
    tpu.vector_store %arg7[%c0_7, %c0_8], %8 {strides = array<i32>} : memref<960x96xf32, #tpu.memory_space<vmem>>, vector<956x96xf32>,
    %c0_9 = arith.constant 0 : index
    %c0_10 = arith.constant 0 : index
    %10 = vector.load %arg7[%c0_9, %c0_10] : memref<960x96xf32, #tpu.memory_space<vmem>>, vector<892x96xf32>
    %c0_11 = arith.constant 0 : index
    %c0_12 = arith.constant 0 : index
    %c0_13 = arith.constant 0 : index
    %11 = vector.load %arg4[%c0_11, %c0_12, %c0_13] : memref<3x96x32xf32, #tpu.memory_space<vmem>>, vector<1x96x32xf32>
    %12 = vector.shape_cast %11 : vector<1x96x32xf32> to vector<96x32xf32>
    %cst_14 = arith.constant dense<0.000000e+00> : vector<892x32xf32>
    %13 = tpu.matmul %10, %12, %cst_14 {dimension_numbers = #tpu.dot_dimension_numbers<[1], [0], [0], [1], [0, 0, 1, 1], [], []>} : vector<892x96xf32>, vector<96x32xf32>, vector<892x32xf32> -> vector<892x32xf32>
    %c32 = arith.constant 32 : index
    %c0_15 = arith.constant 0 : index
    %14 = vector.load %arg7[%c32, %c0_15] : memref<960x96xf32, #tpu.memory_space<vmem>>, vector<892x96xf32>
    %c1 = arith.constant 1 : index
    %c0_16 = arith.constant 0 : index
    %c0_17 = arith.constant 0 : index
    %15 = vector.load %arg4[%c1, %c0_16, %c0_17] : memref<3x96x32xf32, #tpu.memory_space<vmem>>, vector<1x96x32xf32>
    %16 = vector.shape_cast %15 : vector<1x96x32xf32> to vector<96x32xf32>
    %cst_18 = arith.constant dense<0.000000e+00> : vector<892x32xf32>
    %17 = tpu.matmul %14, %16, %cst_18 {dimension_numbers = #tpu.dot_dimension_numbers<[1], [0], [0], [1], [0, 0, 1, 1], [], []>} : vector<892x96xf32>, vector<96x32xf32>, vector<892x32xf32> -> vector<892x32xf32>
    %18 = arith.addf %13, %17 : vector<892x32xf32>
    %c64 = arith.constant 64 : index
    %c0_19 = arith.constant 0 : index
    %19 = vector.load %arg7[%c64, %c0_19] : memref<960x96xf32, #tpu.memory_space<vmem>>, vector<892x96xf32>
    %c2 = arith.constant 2 : index
    %c0_20 = arith.constant 0 : index
    %c0_21 = arith.constant 0 : index
    %20 = vector.load %arg4[%c2, %c0_20, %c0_21] : memref<3x96x32xf32, #tpu.memory_space<vmem>>, vector<1x96x32xf32>
    %21 = vector.shape_cast %20 : vector<1x96x32xf32> to vector<96x32xf32>
    %cst_22 = arith.constant dense<0.000000e+00> : vector<892x32xf32>
    %22 = tpu.matmul %19, %21, %cst_22 {dimension_numbers = #tpu.dot_dimension_numbers<[1], [0], [0], [1], [0, 0, 1, 1], [], []>} : vector<892x96xf32>, vector<96x32xf32>, vector<892x32xf32> -> vector<892x32xf32>
    %23 = arith.addf %18, %22 : vector<892x32xf32>
    %c0_23 = arith.constant 0 : index
    %c0_24 = arith.constant 0 : index
    %24 = vector.load %arg5[%c0_23, %c0_24] : memref<1x32xf32, #tpu.memory_space<vmem>>, vector<1x32xf32>
    %25 = vector.broadcast %24 : vector<1x32xf32> to vector<892x32xf32>
    %26 = arith.addf %23, %25 : vector<892x32xf32>
    %cst_25 = arith.constant 0.000000e+00 : f32
    %27 = vector.broadcast %cst_25 : f32 to vector<892x32xf32>
    %28 = arith.maximumf %26, %27 : vector<892x32xf32>
    %c0_26 = arith.constant 0 : index
    %c0_27 = arith.constant 0 : index
    %29 = vector.load %arg8[%c0_26, %c0_27] : memref<896x32xf32, #tpu.memory_space<vmem>>, vector<892x32xf32>
    tpu.vector_store %arg8[%c0_26, %c0_27], %28 {strides = array<i32>} : memref<896x32xf32, #tpu.memory_space<vmem>>, vector<892x32xf32>,
    %c0_28 = arith.constant 0 : index
    %c0_29 = arith.constant 0 : index
    %30 = vector.load %arg8[%c0_28, %c0_29] : memref<896x32xf32, #tpu.memory_space<vmem>>, vector<859x32xf32>
    %c1_30 = arith.constant 1 : index
    %c0_31 = arith.constant 0 : index
    %31 = vector.load %arg8[%c1_30, %c0_31] : memref<896x32xf32, #tpu.memory_space<vmem>>, vector<859x32xf32>
    %32 = arith.maximumf %30, %31 : vector<859x32xf32>
    %c32_32 = arith.constant 32 : index
    %c0_33 = arith.constant 0 : index
    %33 = vector.load %arg8[%c32_32, %c0_33] : memref<896x32xf32, #tpu.memory_space<vmem>>, vector<859x32xf32>
    %c33 = arith.constant 33 : index
    %c0_34 = arith.constant 0 : index
    %34 = vector.load %arg8[%c33, %c0_34] : memref<896x32xf32, #tpu.memory_space<vmem>>, vector<859x32xf32>
    %35 = arith.maximumf %33, %34 : vector<859x32xf32>
    %36 = arith.maximumf %32, %35 : vector<859x32xf32>
    %c0_35 = arith.constant 0 : index
    %c0_36 = arith.constant 0 : index
    %37 = vector.load %arg9[%c0_35, %c0_36] : memref<864x32xf32, #tpu.memory_space<vmem>>, vector<859x32xf32>
    tpu.vector_store %arg9[%c0_35, %c0_36], %36 {strides = array<i32>} : memref<864x32xf32, #tpu.memory_space<vmem>>, vector<859x32xf32>,
    %c0_37 = arith.constant 0 : index
    %c0_38 = arith.constant 0 : index
    %38 = tpu.strided_load %arg9[%c0_37, %c0_38] {strides = array<i32: 2, 1>} : memref<864x32xf32, #tpu.memory_space<vmem>>, vector<14x32xf32>
    %c0_39 = arith.constant 0 : index
    %c0_40 = arith.constant 0 : index
    %c0_41 = arith.constant 0 : index
    %39 = vector.load %arg6[%c0_39, %c0_40, %c0_41] : memref<1x196x32xf32, #tpu.memory_space<vmem>>, vector<1x14x32xf32>
    %40 = vector.shape_cast %39 : vector<1x14x32xf32> to vector<14x32xf32>
    %41 = vector.shape_cast %38 : vector<14x32xf32> to vector<1x14x32xf32>
    tpu.vector_store %arg6[%c0_39, %c0_40, %c0_41], %41 {strides = array<i32>} : memref<1x196x32xf32, #tpu.memory_space<vmem>>, vector<1x14x32xf32>,
    %c64_42 = arith.constant 64 : index
    %c0_43 = arith.constant 0 : index
    %42 = tpu.strided_load %arg9[%c64_42, %c0_43] {strides = array<i32: 2, 1>} : memref<864x32xf32, #tpu.memory_space<vmem>>, vector<14x32xf32>
    %c0_44 = arith.constant 0 : index
    %c14 = arith.constant 14 : index
    %c0_45 = arith.constant 0 : index
    %43 = vector.load %arg6[%c0_44, %c14, %c0_45] : memref<1x196x32xf32, #tpu.memory_space<vmem>>, vector<1x14x32xf32>
    %44 = vector.shape_cast %43 : vector<1x14x32xf32> to vector<14x32xf32>
    %45 = vector.shape_cast %42 : vector<14x32xf32> to vector<1x14x32xf32>
    tpu.vector_store %arg6[%c0_44, %c14, %c0_45], %45 {strides = array<i32>} : memref<1x196x32xf32, #tpu.memory_space<vmem>>, vector<1x14x32xf32>,
    %c128 = arith.constant 128 : index
    %c0_46 = arith.constant 0 : index
    %46 = tpu.strided_load %arg9[%c128, %c0_46] {strides = array<i32: 2, 1>} : memref<864x32xf32, #tpu.memory_space<vmem>>, vector<14x32xf32>
    %c0_47 = arith.constant 0 : index
    %c28 = arith.constant 28 : index
    %c0_48 = arith.constant 0 : index
    %47 = vector.load %arg6[%c0_47, %c28, %c0_48] : memref<1x196x32xf32, #tpu.memory_space<vmem>>, vector<1x14x32xf32>
    %48 = vector.shape_cast %47 : vector<1x14x32xf32> to vector<14x32xf32>
    %49 = vector.shape_cast %46 : vector<14x32xf32> to vector<1x14x32xf32>
    tpu.vector_store %arg6[%c0_47, %c28, %c0_48], %49 {strides = array<i32>} : memref<1x196x32xf32, #tpu.memory_space<vmem>>, vector<1x14x32xf32>,
    %c192 = arith.constant 192 : index
    %c0_49 = arith.constant 0 : index
    %50 = tpu.strided_load %arg9[%c192, %c0_49] {strides = array<i32: 2, 1>} : memref<864x32xf32, #tpu.memory_space<vmem>>, vector<14x32xf32>
    %c0_50 = arith.constant 0 : index
    %c42 = arith.constant 42 : index
    %c0_51 = arith.constant 0 : index
    %51 = vector.load %arg6[%c0_50, %c42, %c0_51] : memref<1x196x32xf32, #tpu.memory_space<vmem>>, vector<1x14x32xf32>
    %52 = vector.shape_cast %51 : vector<1x14x32xf32> to vector<14x32xf32>
    %53 = vector.shape_cast %50 : vector<14x32xf32> to vector<1x14x32xf32>
    tpu.vector_store %arg6[%c0_50, %c42, %c0_51], %53 {strides = array<i32>} : memref<1x196x32xf32, #tpu.memory_space<vmem>>, vector<1x14x32xf32>,
    %c256 = arith.constant 256 : index
    %c0_52 = arith.constant 0 : index
    %54 = tpu.strided_load %arg9[%c256, %c0_52] {strides = array<i32: 2, 1>} : memref<864x32xf32, #tpu.memory_space<vmem>>, vector<14x32xf32>
    %c0_53 = arith.constant 0 : index
    %c56 = arith.constant 56 : index
    %c0_54 = arith.constant 0 : index
    %55 = vector.load %arg6[%c0_53, %c56, %c0_54] : memref<1x196x32xf32, #tpu.memory_space<vmem>>, vector<1x14x32xf32>
    %56 = vector.shape_cast %55 : vector<1x14x32xf32> to vector<14x32xf32>
    %57 = vector.shape_cast %54 : vector<14x32xf32> to vector<1x14x32xf32>
    tpu.vector_store %arg6[%c0_53, %c56, %c0_54], %57 {strides = array<i32>} : memref<1x196x32xf32, #tpu.memory_space<vmem>>, vector<1x14x32xf32>,
    %c320 = arith.constant 320 : index
    %c0_55 = arith.constant 0 : index
    %58 = tpu.strided_load %arg9[%c320, %c0_55] {strides = array<i32: 2, 1>} : memref<864x32xf32, #tpu.memory_space<vmem>>, vector<14x32xf32>
    %c0_56 = arith.constant 0 : index
    %c70 = arith.constant 70 : index
    %c0_57 = arith.constant 0 : index
    %59 = vector.load %arg6[%c0_56, %c70, %c0_57] : memref<1x196x32xf32, #tpu.memory_space<vmem>>, vector<1x14x32xf32>
    %60 = vector.shape_cast %59 : vector<1x14x32xf32> to vector<14x32xf32>
    %61 = vector.shape_cast %58 : vector<14x32xf32> to vector<1x14x32xf32>
    tpu.vector_store %arg6[%c0_56, %c70, %c0_57], %61 {strides = array<i32>} : memref<1x196x32xf32, #tpu.memory_space<vmem>>, vector<1x14x32xf32>,
    %c384 = arith.constant 384 : index
    %c0_58 = arith.constant 0 : index
    %62 = tpu.strided_load %arg9[%c384, %c0_58] {strides = array<i32: 2, 1>} : memref<864x32xf32, #tpu.memory_space<vmem>>, vector<14x32xf32>
    %c0_59 = arith.constant 0 : index
    %c84 = arith.constant 84 : index
    %c0_60 = arith.constant 0 : index
    %63 = vector.load %arg6[%c0_59, %c84, %c0_60] : memref<1x196x32xf32, #tpu.memory_space<vmem>>, vector<1x14x32xf32>
    %64 = vector.shape_cast %63 : vector<1x14x32xf32> to vector<14x32xf32>
    %65 = vector.shape_cast %62 : vector<14x32xf32> to vector<1x14x32xf32>
    tpu.vector_store %arg6[%c0_59, %c84, %c0_60], %65 {strides = array<i32>} : memref<1x196x32xf32, #tpu.memory_space<vmem>>, vector<1x14x32xf32>,
    %c448 = arith.constant 448 : index
    %c0_61 = arith.constant 0 : index
    %66 = tpu.strided_load %arg9[%c448, %c0_61] {strides = array<i32: 2, 1>} : memref<864x32xf32, #tpu.memory_space<vmem>>, vector<14x32xf32>
    %c0_62 = arith.constant 0 : index
    %c98 = arith.constant 98 : index
    %c0_63 = arith.constant 0 : index
    %67 = vector.load %arg6[%c0_62, %c98, %c0_63] : memref<1x196x32xf32, #tpu.memory_space<vmem>>, vector<1x14x32xf32>
    %68 = vector.shape_cast %67 : vector<1x14x32xf32> to vector<14x32xf32>
    %69 = vector.shape_cast %66 : vector<14x32xf32> to vector<1x14x32xf32>
    tpu.vector_store %arg6[%c0_62, %c98, %c0_63], %69 {strides = array<i32>} : memref<1x196x32xf32, #tpu.memory_space<vmem>>, vector<1x14x32xf32>,
    %c512 = arith.constant 512 : index
    %c0_64 = arith.constant 0 : index
    %70 = tpu.strided_load %arg9[%c512, %c0_64] {strides = array<i32: 2, 1>} : memref<864x32xf32, #tpu.memory_space<vmem>>, vector<14x32xf32>
    %c0_65 = arith.constant 0 : index
    %c112 = arith.constant 112 : index
    %c0_66 = arith.constant 0 : index
    %71 = vector.load %arg6[%c0_65, %c112, %c0_66] : memref<1x196x32xf32, #tpu.memory_space<vmem>>, vector<1x14x32xf32>
    %72 = vector.shape_cast %71 : vector<1x14x32xf32> to vector<14x32xf32>
    %73 = vector.shape_cast %70 : vector<14x32xf32> to vector<1x14x32xf32>
    tpu.vector_store %arg6[%c0_65, %c112, %c0_66], %73 {strides = array<i32>} : memref<1x196x32xf32, #tpu.memory_space<vmem>>, vector<1x14x32xf32>,
    %c576 = arith.constant 576 : index
    %c0_67 = arith.constant 0 : index
    %74 = tpu.strided_load %arg9[%c576, %c0_67] {strides = array<i32: 2, 1>} : memref<864x32xf32, #tpu.memory_space<vmem>>, vector<14x32xf32>
    %c0_68 = arith.constant 0 : index
    %c126 = arith.constant 126 : index
    %c0_69 = arith.constant 0 : index
    %75 = vector.load %arg6[%c0_68, %c126, %c0_69] : memref<1x196x32xf32, #tpu.memory_space<vmem>>, vector<1x14x32xf32>
    %76 = vector.shape_cast %75 : vector<1x14x32xf32> to vector<14x32xf32>
    %77 = vector.shape_cast %74 : vector<14x32xf32> to vector<1x14x32xf32>
    tpu.vector_store %arg6[%c0_68, %c126, %c0_69], %77 {strides = array<i32>} : memref<1x196x32xf32, #tpu.memory_space<vmem>>, vector<1x14x32xf32>,
    %c640 = arith.constant 640 : index
    %c0_70 = arith.constant 0 : index
    %78 = tpu.strided_load %arg9[%c640, %c0_70] {strides = array<i32: 2, 1>} : memref<864x32xf32, #tpu.memory_space<vmem>>, vector<14x32xf32>
    %c0_71 = arith.constant 0 : index
    %c140 = arith.constant 140 : index
    %c0_72 = arith.constant 0 : index
    %79 = vector.load %arg6[%c0_71, %c140, %c0_72] : memref<1x196x32xf32, #tpu.memory_space<vmem>>, vector<1x14x32xf32>
    %80 = vector.shape_cast %79 : vector<1x14x32xf32> to vector<14x32xf32>
    %81 = vector.shape_cast %78 : vector<14x32xf32> to vector<1x14x32xf32>
    tpu.vector_store %arg6[%c0_71, %c140, %c0_72], %81 {strides = array<i32>} : memref<1x196x32xf32, #tpu.memory_space<vmem>>, vector<1x14x32xf32>,
    %c704 = arith.constant 704 : index
    %c0_73 = arith.constant 0 : index
    %82 = tpu.strided_load %arg9[%c704, %c0_73] {strides = array<i32: 2, 1>} : memref<864x32xf32, #tpu.memory_space<vmem>>, vector<14x32xf32>
    %c0_74 = arith.constant 0 : index
    %c154 = arith.constant 154 : index
    %c0_75 = arith.constant 0 : index
    %83 = vector.load %arg6[%c0_74, %c154, %c0_75] : memref<1x196x32xf32, #tpu.memory_space<vmem>>, vector<1x14x32xf32>
    %84 = vector.shape_cast %83 : vector<1x14x32xf32> to vector<14x32xf32>
    %85 = vector.shape_cast %82 : vector<14x32xf32> to vector<1x14x32xf32>
    tpu.vector_store %arg6[%c0_74, %c154, %c0_75], %85 {strides = array<i32>} : memref<1x196x32xf32, #tpu.memory_space<vmem>>, vector<1x14x32xf32>,
    %c768 = arith.constant 768 : index
    %c0_76 = arith.constant 0 : index
    %86 = tpu.strided_load %arg9[%c768, %c0_76] {strides = array<i32: 2, 1>} : memref<864x32xf32, #tpu.memory_space<vmem>>, vector<14x32xf32>
    %c0_77 = arith.constant 0 : index
    %c168 = arith.constant 168 : index
    %c0_78 = arith.constant 0 : index
    %87 = vector.load %arg6[%c0_77, %c168, %c0_78] : memref<1x196x32xf32, #tpu.memory_space<vmem>>, vector<1x14x32xf32>
    %88 = vector.shape_cast %87 : vector<1x14x32xf32> to vector<14x32xf32>
    %89 = vector.shape_cast %86 : vector<14x32xf32> to vector<1x14x32xf32>
    tpu.vector_store %arg6[%c0_77, %c168, %c0_78], %89 {strides = array<i32>} : memref<1x196x32xf32, #tpu.memory_space<vmem>>, vector<1x14x32xf32>,
    %c832 = arith.constant 832 : index
    %c0_79 = arith.constant 0 : index
    %90 = tpu.strided_load %arg9[%c832, %c0_79] {strides = array<i32: 2, 1>} : memref<864x32xf32, #tpu.memory_space<vmem>>, vector<14x32xf32>
    %c0_80 = arith.constant 0 : index
    %c182 = arith.constant 182 : index
    %c0_81 = arith.constant 0 : index
    %91 = vector.load %arg6[%c0_80, %c182, %c0_81] : memref<1x196x32xf32, #tpu.memory_space<vmem>>, vector<1x14x32xf32>
    %92 = vector.shape_cast %91 : vector<1x14x32xf32> to vector<14x32xf32>
    %93 = vector.shape_cast %90 : vector<14x32xf32> to vector<1x14x32xf32>
    tpu.vector_store %arg6[%c0_80, %c182, %c0_81], %93 {strides = array<i32>} : memref<1x196x32xf32, #tpu.memory_space<vmem>>, vector<1x14x32xf32>,
    return
  }
  func.func @transform_0(%arg0: i32) -> (i32, i32, i32) {
    %c0_i32 = arith.constant 0 : i32
    %c0_i32_0 = arith.constant 0 : i32
    %c0_i32_1 = arith.constant 0 : i32
    return %arg0, %c0_i32, %c0_i32_0 : i32, i32, i32
  }
  func.func @transform_1(%arg0: i32) -> (i32, i32) {
    %c0_i32 = arith.constant 0 : i32
    %c0_i32_0 = arith.constant 0 : i32
    %c0_i32_1 = arith.constant 0 : i32
    return %c0_i32, %c0_i32_0 : i32, i32
  }
  func.func @transform_2(%arg0: i32) -> (i32, i32) {
    %c0_i32 = arith.constant 0 : i32
    %c0_i32_0 = arith.constant 0 : i32
    %c0_i32_1 = arith.constant 0 : i32
    return %c0_i32, %c0_i32_0 : i32, i32
  }
  func.func @transform_3(%arg0: i32) -> (i32, i32, i32) {
    %c0_i32 = arith.constant 0 : i32
    %c0_i32_0 = arith.constant 0 : i32
    %c0_i32_1 = arith.constant 0 : i32
    %c0_i32_2 = arith.constant 0 : i32
    return %c0_i32, %c0_i32_0, %c0_i32_1 : i32, i32, i32
  }
  func.func @transform_4(%arg0: i32) -> (i32, i32) {
    %c0_i32 = arith.constant 0 : i32
    %c0_i32_0 = arith.constant 0 : i32
    %c0_i32_1 = arith.constant 0 : i32
    return %c0_i32, %c0_i32_0 : i32, i32
  }
  func.func @transform_5(%arg0: i32) -> (i32, i32, i32) {
    %c0_i32 = arith.constant 0 : i32
    %c0_i32_0 = arith.constant 0 : i32
    %c0_i32_1 = arith.constant 0 : i32
    return %arg0, %c0_i32, %c0_i32_0 : i32, i32, i32
  }
}

module attributes {stable_mosaic.version = 11 : i64} {
  func.func @_head_kernel(%arg0: i32, %arg1: memref<2x6272xf32, #tpu.memory_space<vmem>>, %arg2: memref<6272x128xf32, #tpu.memory_space<vmem>>, %arg3: memref<1x128xf32, #tpu.memory_space<vmem>>, %arg4: memref<128x128xf32, #tpu.memory_space<vmem>>, %arg5: memref<1x128xf32, #tpu.memory_space<vmem>>, %arg6: memref<2x128xf32, #tpu.memory_space<vmem>>) attributes {dimension_semantics = [#tpu.dimension_semantics<arbitrary>], iteration_bounds = array<i64: 1>, scalar_prefetch = 0 : i64, scratch_operands = 0 : i64, tpu.core_type = #tpu.core_type<tc>, window_params = [{pipeline_mode = #tpu.pipeline_mode<synchronous>, transform_indices = @transform_0, window_bounds = array<i64: 2, 6272>}, {pipeline_mode = #tpu.pipeline_mode<synchronous>, transform_indices = @transform_1, window_bounds = array<i64: 6272, 128>}, {pipeline_mode = #tpu.pipeline_mode<synchronous>, transform_indices = @transform_2, window_bounds = array<i64: 1, 128>}, {pipeline_mode = #tpu.pipeline_mode<synchronous>, transform_indices = @transform_3, window_bounds = array<i64: 128, 128>}, {pipeline_mode = #tpu.pipeline_mode<synchronous>, transform_indices = @transform_4, window_bounds = array<i64: 1, 128>}, {pipeline_mode = #tpu.pipeline_mode<synchronous>, transform_indices = @transform_5, window_bounds = array<i64: 2, 128>}]} {
    %c0 = arith.constant 0 : index
    %c0_0 = arith.constant 0 : index
    %0 = vector.load %arg1[%c0, %c0_0] : memref<2x6272xf32, #tpu.memory_space<vmem>>, vector<2x6272xf32>
    %c0_1 = arith.constant 0 : index
    %c0_2 = arith.constant 0 : index
    %1 = vector.load %arg2[%c0_1, %c0_2] : memref<6272x128xf32, #tpu.memory_space<vmem>>, vector<6272x128xf32>
    %cst = arith.constant dense<0.000000e+00> : vector<2x128xf32>
    %2 = tpu.matmul %0, %1, %cst {dimension_numbers = #tpu.dot_dimension_numbers<[1], [0], [0], [1], [0, 0, 1, 1], [], []>} : vector<2x6272xf32>, vector<6272x128xf32>, vector<2x128xf32> -> vector<2x128xf32>
    %c0_3 = arith.constant 0 : index
    %c0_4 = arith.constant 0 : index
    %3 = vector.load %arg3[%c0_3, %c0_4] : memref<1x128xf32, #tpu.memory_space<vmem>>, vector<1x128xf32>
    %4 = vector.broadcast %3 : vector<1x128xf32> to vector<2x128xf32>
    %5 = arith.addf %2, %4 : vector<2x128xf32>
    %cst_5 = arith.constant dense<0.000000e+00> : vector<128xf32>
    %6 = vector.multi_reduction <add>, %5, %cst_5 [0] : vector<2x128xf32> to vector<128xf32>
    %7 = vector.shape_cast %6 : vector<128xf32> to vector<1x128xf32>
    %cst_6 = arith.constant 2.000000e+00 : f32
    %8 = vector.broadcast %cst_6 : f32 to vector<1x128xf32>
    %9 = arith.divf %7, %8 : vector<1x128xf32>
    %10 = vector.broadcast %9 : vector<1x128xf32> to vector<2x128xf32>
    %11 = arith.subf %5, %10 : vector<2x128xf32>
    %12 = arith.mulf %11, %11 : vector<2x128xf32>
    %cst_7 = arith.constant dense<0.000000e+00> : vector<128xf32>
    %13 = vector.multi_reduction <add>, %12, %cst_7 [0] : vector<2x128xf32> to vector<128xf32>
    %14 = vector.shape_cast %13 : vector<128xf32> to vector<1x128xf32>
    %cst_8 = arith.constant 2.000000e+00 : f32
    %15 = vector.broadcast %cst_8 : f32 to vector<1x128xf32>
    %16 = arith.divf %14, %15 : vector<1x128xf32>
    %17 = vector.broadcast %9 : vector<1x128xf32> to vector<2x128xf32>
    %18 = arith.subf %5, %17 : vector<2x128xf32>
    %cst_9 = arith.constant 9.99999974E-6 : f32
    %19 = vector.broadcast %cst_9 : f32 to vector<1x128xf32>
    %20 = arith.addf %16, %19 : vector<1x128xf32>
    %21 = math.rsqrt %20 : vector<1x128xf32>
    %22 = vector.broadcast %21 : vector<1x128xf32> to vector<2x128xf32>
    %23 = arith.mulf %18, %22 : vector<2x128xf32>
    %cst_10 = arith.constant 0.000000e+00 : f32
    %24 = vector.broadcast %cst_10 : f32 to vector<2x128xf32>
    %25 = arith.maximumf %23, %24 : vector<2x128xf32>
    %c0_11 = arith.constant 0 : index
    %c0_12 = arith.constant 0 : index
    %26 = vector.load %arg4[%c0_11, %c0_12] : memref<128x128xf32, #tpu.memory_space<vmem>>, vector<128x128xf32>
    %cst_13 = arith.constant dense<0.000000e+00> : vector<2x128xf32>
    %27 = tpu.matmul %25, %26, %cst_13 {dimension_numbers = #tpu.dot_dimension_numbers<[1], [0], [0], [1], [0, 0, 1, 1], [], []>} : vector<2x128xf32>, vector<128x128xf32>, vector<2x128xf32> -> vector<2x128xf32>
    %c0_14 = arith.constant 0 : index
    %c0_15 = arith.constant 0 : index
    %28 = vector.load %arg5[%c0_14, %c0_15] : memref<1x128xf32, #tpu.memory_space<vmem>>, vector<1x128xf32>
    %29 = vector.broadcast %28 : vector<1x128xf32> to vector<2x128xf32>
    %30 = arith.addf %27, %29 : vector<2x128xf32>
    %c0_16 = arith.constant 0 : index
    %c0_17 = arith.constant 0 : index
    %31 = vector.load %arg6[%c0_16, %c0_17] : memref<2x128xf32, #tpu.memory_space<vmem>>, vector<2x128xf32>
    tpu.vector_store %arg6[%c0_16, %c0_17], %30 {strides = array<i32>} : memref<2x128xf32, #tpu.memory_space<vmem>>, vector<2x128xf32>,
    return
  }
  func.func @transform_0(%arg0: i32) -> (i32, i32) {
    %c0_i32 = arith.constant 0 : i32
    %c0_i32_0 = arith.constant 0 : i32
    %c0_i32_1 = arith.constant 0 : i32
    return %c0_i32, %c0_i32_0 : i32, i32
  }
  func.func @transform_1(%arg0: i32) -> (i32, i32) {
    %c0_i32 = arith.constant 0 : i32
    %c0_i32_0 = arith.constant 0 : i32
    %c0_i32_1 = arith.constant 0 : i32
    return %c0_i32, %c0_i32_0 : i32, i32
  }
  func.func @transform_2(%arg0: i32) -> (i32, i32) {
    %c0_i32 = arith.constant 0 : i32
    %c0_i32_0 = arith.constant 0 : i32
    %c0_i32_1 = arith.constant 0 : i32
    return %c0_i32, %c0_i32_0 : i32, i32
  }
  func.func @transform_3(%arg0: i32) -> (i32, i32) {
    %c0_i32 = arith.constant 0 : i32
    %c0_i32_0 = arith.constant 0 : i32
    %c0_i32_1 = arith.constant 0 : i32
    return %c0_i32, %c0_i32_0 : i32, i32
  }
  func.func @transform_4(%arg0: i32) -> (i32, i32) {
    %c0_i32 = arith.constant 0 : i32
    %c0_i32_0 = arith.constant 0 : i32
    %c0_i32_1 = arith.constant 0 : i32
    return %c0_i32, %c0_i32_0 : i32, i32
  }
  func.func @transform_5(%arg0: i32) -> (i32, i32) {
    %c0_i32 = arith.constant 0 : i32
    %c0_i32_0 = arith.constant 0 : i32
    %c0_i32_1 = arith.constant 0 : i32
    return %c0_i32, %c0_i32_0 : i32, i32
  }
}

</mosaic_0001>

<bundles_post_ra>
// kernel: net_forward.3
= control target key start
LH: loop header
LB: loop body
LE: loop exit
PB: predicated region body
PF: predicated region fallthrough
CT: control target
= control target key end

     0   :  { %v3967_v27 = vmov 1983009808   ;;  %v842_v29 = vlaneseq  ;;  %s6509_s0 = inlined_call_operand.vmem [shape: f32[2,6272], index: 0, kind: input, shape index: {}]   ;;  %s6510_s1 = inlined_call_operand.vmem [shape: f32[6272,128], index: 1, kind: input, shape index: {}]   ;;  %s6511_s2 = inlined_call_operand.vmem [shape: f32[1,128], index: 2, kind: input, shape index: {}]   ;;  %s6512_s3 = inlined_call_operand.vmem [shape: f32[128,128], index: 3, kind: input, shape index: {}]   ;;  %s6513_s4 = inlined_call_operand.vmem [shape: f32[1,128], index: 4, kind: input, shape index: {}]   ;;  %s6514_s5 = inlined_call_operand.hbm [shape: f32[2,128], index: 5, kind: output, shape index: {}]  }
   0x1   :  { %v65_v0 = vld [vmem:[%s6510_s1 + $0xf8] sm:$0xff]  ;;  %v64_v2 = vld [vmem:[%s6510_s1 + $0xf0] sm:$0xff]  ;;  %v63_v6 = vld [vmem:[%s6510_s1 + $0xe8] sm:$0xff]  ;;  %v840_v28 = vunpack.c.l.s4 %v3967_v27 }
   0x2   :  { %v49_v1 = vld [vmem:[%s6510_s1 + $0x78] sm:$0xff]  ;;  %2983 = vmatprep.subr.mxu0 %v65_v0  ;;  %v48_v4 = vld [vmem:[%s6510_s1 + $0x70] sm:$0xff]  ;;  %v47_v8 = vld [vmem:[%s6510_s1 + $0x68] sm:$0xff]  ;;  %v843_v39 = vshrl.u32 %v842_v29, 7 }
   0x3   :  { %v97_v3 = vld [vmem:[%s6510_s1 + $0x1f8] sm:$0xff]  ;;  %2984 = vmatpush3.msra.mxu0 %v49_v1  ;;  %v96_v7 = vld [vmem:[%s6510_s1 + $0x1f0] sm:$0xff]  ;;  %v95_v10 = vld [vmem:[%s6510_s1 + $0x1e8] sm:$0xff]  ;;  %v841_v38 = vunpack.c.0.s8 %v840_v28 }
   0x4   :  { %v81_v5 = vld [vmem:[%s6510_s1 + $0x178] sm:$0xff]  ;;  %3018 = vmatprep.subr.mxu1 %v97_v3  ;;  %2985 = vmatprep.subr.mxu0 %v64_v2  ;;  %v80_v9 = vld [vmem:[%s6510_s1 + $0x170] sm:$0xff]  ;;  %v62_v11 = vld [vmem:[%s6510_s1 + $0xe0] sm:$0xff] }
   0x5   :  { %3019 = vmatpush3.msra.mxu1 %v81_v5  ;;  %2986 = vmatpush3.msra.mxu0 %v48_v4  ;;  %v79_v12 = vld [vmem:[%s6510_s1 + $0x168] sm:$0xff]  ;;  %v46_v13 = vld [vmem:[%s6510_s1 + $0x60] sm:$0xff]  ;;  %v61_v15 = vld [vmem:[%s6510_s1 + $0xd8] sm:$0xff]  ;;  %v4130_v48 = vsub.s32 %v841_v38, %v843_v39 }
   0x6   :  { %3020 = vmatprep.subr.mxu1 %v96_v7  ;;  %2987 = vmatprep.subr.mxu0 %v63_v6  ;;  %v94_v14 = vld [vmem:[%s6510_s1 + $0x1e0] sm:$0xff]  ;;  %v45_v17 = vld [vmem:[%s6510_s1 + $0x58] sm:$0xff]  ;;  %v60_v19 = vld [vmem:[%s6510_s1 + $0xd0] sm:$0xff] }
   0x7   :  { %3021 = vmatpush3.msra.mxu1 %v80_v9  ;;  %2988 = vmatpush3.msra.mxu0 %v47_v8  ;;  %v78_v16 = vld [vmem:[%s6510_s1 + $0x160] sm:$0xff]  ;;  %v93_v18 = vld [vmem:[%s6510_s1 + $0x1d8] sm:$0xff]  ;;  %v44_v21 = vld [vmem:[%s6510_s1 + $0x50] sm:$0xff] }
   0x8   :  { %3022 = vmatprep.subr.mxu1 %v95_v10  ;;  %2989 = vmatprep.subr.mxu0 %v62_v11  ;;  %v77_v20 = vld [vmem:[%s6510_s1 + $0x158] sm:$0xff]  ;;  %v92_v22 = vld [vmem:[%s6510_s1 + $0x1d0] sm:$0xff]  ;;  %v59_v23 = vld [vmem:[%s6510_s1 + $0xc8] sm:$0xff] }
   0x9   :  { %3023 = vmatpush3.msra.mxu1 %v79_v12  ;;  %2990 = vmatpush3.msra.mxu0 %v46_v13  ;;  %v76_v24 = vld [vmem:[%s6510_s1 + $0x150] sm:$0xff]  ;;  %v43_v25 = vld [vmem:[%s6510_s1 + $0x48] sm:$0xff]  ;;  %v58_v30 = vld [vmem:[%s6510_s1 + $0xc0] sm:$0xff] }
   0xa   :  { %3024 = vmatprep.subr.mxu1 %v94_v14  ;;  %2991 = vmatprep.subr.mxu0 %v61_v15  ;;  %v91_v26 = vld [vmem:[%s6510_s1 + $0x1c8] sm:$0xff]  ;;  %v42_v32 = vld [vmem:[%s6510_s1 + $0x40] sm:$0xff]  ;;  %v57_v34 = vld [vmem:[%s6510_s1 + $0xb8] sm:$0xff] }
   0xb   :  { %3025 = vmatpush3.msra.mxu1 %v78_v16  ;;  %2992 = vmatpush3.msra.mxu0 %v45_v17  ;;  %v75_v31 = vld [vmem:[%s6510_s1 + $0x148] sm:$0xff]  ;;  %v90_v33 = vld [vmem:[%s6510_s1 + $0x1c0] sm:$0xff]  ;;  %v41_v36 = vld [vmem:[%s6510_s1 + $0x38] sm:$0xff] }
   0xc   :  { %3026 = vmatprep.subr.mxu1 %v93_v18  ;;  %2993 = vmatprep.subr.mxu0 %v60_v19  ;;  %v74_v35 = vld [vmem:[%s6510_s1 + $0x140] sm:$0xff]  ;;  %v89_v37 = vld [vmem:[%s6510_s1 + $0x1b8] sm:$0xff]  ;;  %v56_v40 = vld [vmem:[%s6510_s1 + $0xb0] sm:$0xff] }
   0xd   :  { %3027 = vmatpush3.msra.mxu1 %v77_v20  ;;  %2994 = vmatpush3.msra.mxu0 %v44_v21  ;;  %v73_v41 = vld [vmem:[%s6510_s1 + $0x138] sm:$0xff]  ;;  %v40_v42 = vld [vmem:[%s6510_s1 + $0x30] sm:$0xff]  ;;  %v55_v44 = vld [vmem:[%s6510_s1 + $0xa8] sm:$0xff] }
   0xe   :  { %3028 = vmatprep.subr.mxu1 %v92_v22  ;;  %2995 = vmatprep.subr.mxu0 %v59_v23  ;;  %v88_v43 = vld [vmem:[%s6510_s1 + $0x1b0] sm:$0xff]  ;;  %v39_v46 = vld [vmem:[%s6510_s1 + $0x28] sm:$0xff]  ;;  %v54_v49 = vld [vmem:[%s6510_s1 + $0xa0] sm:$0xff] }
   0xf   :  { %3029 = vmatpush3.msra.mxu1 %v76_v24  ;;  %2996 = vmatpush3.msra.mxu0 %v43_v25  ;;  %v72_v45 = vld [vmem:[%s6510_s1 + $0x130] sm:$0xff]  ;;  %v87_v47 = vld [vmem:[%s6510_s1 + $0x1a8] sm:$0xff]  ;;  %v21_v51 = vld [vmem:[%s6509_s0] sm:$0xff] }
  0x10   :  { %3030 = vmatprep.subr.mxu1 %v91_v26  ;;  %2997 = vmatprep.subr.mxu0 %v58_v30  ;;  %v71_v50 = vld [vmem:[%s6510_s1 + $0x128] sm:$0xff]  ;;  %v38_v52 = vld [vmem:[%s6510_s1 + $0x20] sm:$0xff]  ;;  %v53_v54 = vld [vmem:[%s6510_s1 + $0x98] sm:$0xff]  ;;  %v845_v58 = vrot.slane %v21_v51, %v4130_v48  ;;  %v838_v59 = vcombine.high %v21_v51, %v21_v51 }
  0x11   :  { %3031 = vmatpush3.msra.mxu1 %v75_v31  ;;  %2998 = vmatpush3.msra.mxu0 %v42_v32  ;;  %v86_v53 = vld [vmem:[%s6510_s1 + $0x1a0] sm:$0xff]  ;;  %v37_v56 = vld [vmem:[%s6510_s1 + $0x18] sm:$0xff]  ;;  %v52_v60 = vld [vmem:[%s6510_s1 + $0x90] sm:$0xff] }
  0x12   :  { %3032 = vmatprep.subr.mxu1 %v90_v33  ;;  %2999 = vmatprep.subr.mxu0 %v57_v34  ;;  %v70_v55 = vld [vmem:[%s6510_s1 + $0x120] sm:$0xff]  ;;  %v85_v57 = vld [vmem:[%s6510_s1 + $0x198] sm:$0xff]  ;;  %v36_v62 = vld [vmem:[%s6510_s1 + $0x10] sm:$0xff]  ;;  %v853_v4 = vcombine.high %v845_v58, %v845_v58  ;;  %v852_v5 = vrot.slane %v838_v59, %v4130_v48 }
  0x13   :  { %3033 = vmatpush3.msra.mxu1 %v74_v35  ;;  %3000 = vmatpush3.msra.mxu0 %v41_v36  ;;  %v69_v61 = vld [vmem:[%s6510_s1 + $0x118] sm:$0xff]  ;;  %v84_v63 = vld [vmem:[%s6510_s1 + $0x190] sm:$0xff]  ;;  %v51_v0 = vld [vmem:[%s6510_s1 + $0x88] sm:$0xff] }
  0x14   :  { %3034 = vmatprep.subr.mxu1 %v89_v37  ;;  %3001 = vmatprep.subr.mxu0 %v56_v40  ;;  %v68_v1 = vld [vmem:[%s6510_s1 + $0x110] sm:$0xff]  ;;  %v35_v2 = vld [vmem:[%s6510_s1 + $0x8] sm:$0xff]  ;;  %v50_v6 = vld [vmem:[%s6510_s1 + $0x80] sm:$0xff]  ;;  %v854_v12 = vcombine.high %v852_v5, %v852_v5 }
  0x15   :  { %3035 = vmatpush3.msra.mxu1 %v73_v41  ;;  %3002 = vmatpush3.msra.mxu0 %v40_v42  ;;  %v83_v3 = vld [vmem:[%s6510_s1 + $0x188] sm:$0xff]  ;;  %v34_v7 = vld [vmem:[%s6510_s1] sm:$0xff]  ;;  %v129_v10 = vld [vmem:[%s6510_s1 + $0x2f8] sm:$0xff] }
  0x16   :  { %3036 = vmatprep.subr.mxu1 %v88_v43  ;;  %3003 = vmatprep.subr.mxu0 %v55_v44  ;;  %v67_v8 = vld [vmem:[%s6510_s1 + $0x108] sm:$0xff]  ;;  %v82_v9 = vld [vmem:[%s6510_s1 + $0x180] sm:$0xff]  ;;  %v113_v13 = vld [vmem:[%s6510_s1 + $0x278] sm:$0xff] }
  0x17   :  { %3037 = vmatpush3.msra.mxu1 %v72_v45  ;;  %3004 = vmatpush3.msra.mxu0 %v39_v46  ;;  %v66_v11 = vld [vmem:[%s6510_s1 + $0x100] sm:$0xff]  ;;  %v128_v14 = vld [vmem:[%s6510_s1 + $0x2f0] sm:$0xff]  ;;  %v161_v15 = vld [vmem:[%s6510_s1 + $0x3f8] sm:$0xff] }
  0x18   :  { %3038 = vmatprep.subr.mxu1 %v87_v47  ;;  %3005 = vmatprep.subr.mxu0 %v54_v49  ;;  %v112_v16 = vld [vmem:[%s6510_s1 + $0x270] sm:$0xff]  ;;  %v145_v17 = vld [vmem:[%s6510_s1 + $0x378] sm:$0xff]  ;;  %v127_v18 = vld [vmem:[%s6510_s1 + $0x2e8] sm:$0xff] }
  0x19   :  { %3039 = vmatpush3.msra.mxu1 %v71_v50  ;;  %3006 = vmatpush3.msra.mxu0 %v38_v52  ;;  %v160_v19 = vld [vmem:[%s6510_s1 + $0x3f0] sm:$0xff]  ;;  %v111_v20 = vld [vmem:[%s6510_s1 + $0x268] sm:$0xff]  ;;  %v126_v22 = vld [vmem:[%s6510_s1 + $0x2e0] sm:$0xff] }
  0x1a   :  { %3040 = vmatprep.subr.mxu1 %v86_v53  ;;  %3007 = vmatprep.subr.mxu0 %v53_v54  ;;  %v144_v21 = vld [vmem:[%s6510_s1 + $0x370] sm:$0xff]  ;;  %v159_v23 = vld [vmem:[%s6510_s1 + $0x3e8] sm:$0xff]  ;;  %v110_v24 = vld [vmem:[%s6510_s1 + $0x260] sm:$0xff] }
  0x1b   :  { %3041 = vmatpush3.msra.mxu1 %v70_v55  ;;  %3008 = vmatpush3.msra.mxu0 %v37_v56  ;;  %v143_v25 = vld [vmem:[%s6510_s1 + $0x368] sm:$0xff]  ;;  %v125_v26 = vld [vmem:[%s6510_s1 + $0x2d8] sm:$0xff]  ;;  %v158_v27 = vld [vmem:[%s6510_s1 + $0x3e0] sm:$0xff] }
  0x1c   :  { %3042 = vmatprep.subr.mxu1 %v85_v57  ;;  %3009 = vmatprep.subr.mxu0 %v52_v60  ;;  %v109_v28 = vld [vmem:[%s6510_s1 + $0x258] sm:$0xff]  ;;  %v142_v29 = vld [vmem:[%s6510_s1 + $0x360] sm:$0xff]  ;;  %v124_v30 = vld [vmem:[%s6510_s1 + $0x2d0] sm:$0xff] }
  0x1d   :  { %3043 = vmatpush3.msra.mxu1 %v69_v61  ;;  %3010 = vmatpush3.msra.mxu0 %v36_v62  ;;  %v157_v31 = vld [vmem:[%s6510_s1 + $0x3d8] sm:$0xff]  ;;  %v108_v32 = vld [vmem:[%s6510_s1 + $0x250] sm:$0xff]  ;;  %v123_v34 = vld [vmem:[%s6510_s1 + $0x2c8] sm:$0xff] }
  0x1e   :  { %3044 = vmatprep.subr.mxu1 %v84_v63  ;;  %3011 = vmatprep.subr.mxu0 %v51_v0  ;;  %v141_v33 = vld [vmem:[%s6510_s1 + $0x358] sm:$0xff]  ;;  %v156_v35 = vld [vmem:[%s6510_s1 + $0x3d0] sm:$0xff]  ;;  %v107_v36 = vld [vmem:[%s6510_s1 + $0x248] sm:$0xff] }
  0x1f   :  { %3045 = vmatpush3.msra.mxu1 %v68_v1  ;;  %3012 = vmatpush3.msra.mxu0 %v35_v2  ;;  %v140_v37 = vld [vmem:[%s6510_s1 + $0x350] sm:$0xff]  ;;  %v122_v38 = vld [vmem:[%s6510_s1 + $0x2c0] sm:$0xff]  ;;  %v155_v39 = vld [vmem:[%s6510_s1 + $0x3c8] sm:$0xff] }
  0x20   :  { %3046 = vmatprep.subr.mxu1 %v83_v3  ;;  %3013 = vmatprep.subr.mxu0 %v50_v6  ;;  %v106_v40 = vld [vmem:[%s6510_s1 + $0x240] sm:$0xff]  ;;  %v139_v41 = vld [vmem:[%s6510_s1 + $0x348] sm:$0xff]  ;;  %v121_v42 = vld [vmem:[%s6510_s1 + $0x2b8] sm:$0xff] }
  0x21   :  { %1162 = vmatprep.mubr.f32.mxu0 %v853_v4  ;;  %3014 = vmatpush3.msra.mxu0 %v34_v7  ;;  %v154_v43 = vld [vmem:[%s6510_s1 + $0x3c0] sm:$0xff]  ;;  %v105_v44 = vld [vmem:[%s6510_s1 + $0x238] sm:$0xff]  ;;  %v120_v46 = vld [vmem:[%s6510_s1 + $0x2b0] sm:$0xff] }
  0x22   :  { %3047 = vmatpush3.msra.mxu1 %v67_v8  ;;  %1163 = vmatmul.mubr.f32.vlgmr.msra.gmra.mxu0 %v845_v58  ;;  %v138_v45 = vld [vmem:[%s6510_s1 + $0x340] sm:$0xff]  ;;  %v153_v47 = vld [vmem:[%s6510_s1 + $0x3b8] sm:$0xff]  ;;  %v104_v49 = vld [vmem:[%s6510_s1 + $0x230] sm:$0xff] }
  0x23   :  { %3048 = vmatprep.subr.mxu1 %v82_v9  ;;  %3053 = vmatprep.subr.mxu0 %v129_v10  ;;  %v137_v50 = vld [vmem:[%s6510_s1 + $0x338] sm:$0xff]  ;;  %v119_v51 = vld [vmem:[%s6510_s1 + $0x2a8] sm:$0xff]  ;;  %v152_v52 = vld [vmem:[%s6510_s1 + $0x3b0] sm:$0xff] }
  0x24   :  { %3049 = vmatpush3.msra.mxu1 %v66_v11  ;;  %1232 = vmatprep.mubr.f32.mxu1 %v854_v12  ;;  %v103_v53 = vld [vmem:[%s6510_s1 + $0x228] sm:$0xff]  ;;  %v136_v54 = vld [vmem:[%s6510_s1 + $0x330] sm:$0xff]  ;;  %v118_v55 = vld [vmem:[%s6510_s1 + $0x2a0] sm:$0xff] }
  0x25   :  { %3054 = vmatpush3.msra.mxu0 %v113_v13  ;;  %1233 = vmatmul.mubr.f32.vlgmr.msra.gmra.mxu1 %v852_v5  ;;  %v151_v56 = vld [vmem:[%s6510_s1 + $0x3a8] sm:$0xff]  ;;  %v102_v57 = vld [vmem:[%s6510_s1 + $0x220] sm:$0xff]  ;;  %v117_v60 = vld [vmem:[%s6510_s1 + $0x298] sm:$0xff] }
  0x26   :  { %3055 = vmatprep.subr.mxu0 %v128_v14  ;;  %3088 = vmatprep.subr.mxu1 %v161_v15  ;;  %v22_v58 = vld [vmem:[%s6509_s0 + $0x8] sm:$0xff]  ;;  %v150_v61 = vld [vmem:[%s6510_s1 + $0x3a0] sm:$0xff]  ;;  %v101_v62 = vld [vmem:[%s6510_s1 + $0x218] sm:$0xff] }
  0x27   :  { %3056 = vmatpush3.msra.mxu0 %v112_v16  ;;  %3089 = vmatpush3.msra.mxu1 %v145_v17  ;;  %v135_v59 = vld [vmem:[%s6510_s1 + $0x328] sm:$0xff]  ;;  %v134_v63 = vld [vmem:[%s6510_s1 + $0x320] sm:$0xff]  ;;  %v116_v0 = vld [vmem:[%s6510_s1 + $0x290] sm:$0xff]  ;;  %v855_v1 = vcombine.high %v22_v58, %v22_v58  ;;  %v862_v4 = vrot.slane %v22_v58, %v4130_v48 }
  0x28   :  { %3057 = vmatprep.subr.mxu0 %v127_v18  ;;  %3090 = vmatprep.subr.mxu1 %v160_v19  ;;  %v149_v2 = vld [vmem:[%s6510_s1 + $0x398] sm:$0xff]  ;;  %v100_v3 = vld [vmem:[%s6510_s1 + $0x210] sm:$0xff]  ;;  %v115_v6 = vld [vmem:[%s6510_s1 + $0x288] sm:$0xff] }
  0x29   :  { %3058 = vmatpush3.msra.mxu0 %v111_v20  ;;  %3091 = vmatpush3.msra.mxu1 %v144_v21  ;;  %v133_v5 = vld [vmem:[%s6510_s1 + $0x318] sm:$0xff]  ;;  %v148_v7 = vld [vmem:[%s6510_s1 + $0x390] sm:$0xff]  ;;  %v99_v8 = vld [vmem:[%s6510_s1 + $0x208] sm:$0xff]  ;;  %v869_v11 = vrot.slane %v855_v1, %v4130_v48  ;;  %v870_v14 = vcombine.high %v862_v4, %v862_v4 }
  0x2a   :  { %3059 = vmatprep.subr.mxu0 %v126_v22  ;;  %3092 = vmatprep.subr.mxu1 %v159_v23  ;;  %v132_v9 = vld [vmem:[%s6510_s1 + $0x310] sm:$0xff]  ;;  %v114_v10 = vld [vmem:[%s6510_s1 + $0x280] sm:$0xff]  ;;  %v147_v12 = vld [vmem:[%s6510_s1 + $0x388] sm:$0xff] }
  0x2b   :  { %3060 = vmatpush3.msra.mxu0 %v110_v24  ;;  %3093 = vmatpush3.msra.mxu1 %v143_v25  ;;  %v98_v13 = vld [vmem:[%s6510_s1 + $0x200] sm:$0xff]  ;;  %v131_v15 = vld [vmem:[%s6510_s1 + $0x308] sm:$0xff]  ;;  %v193_v17 = vld [vmem:[%s6510_s1 + $0x4f8] sm:$0xff]  ;;  %v871_v19 = vcombine.high %v869_v11, %v869_v11 }
  0x2c   :  { %3061 = vmatprep.subr.mxu0 %v125_v26  ;;  %3094 = vmatprep.subr.mxu1 %v158_v27  ;;  %v146_v16 = vld [vmem:[%s6510_s1 + $0x380] sm:$0xff]  ;;  %v177_v20 = vld [vmem:[%s6510_s1 + $0x478] sm:$0xff]  ;;  %v192_v21 = vld [vmem:[%s6510_s1 + $0x4f0] sm:$0xff] }
  0x2d   :  { %3062 = vmatpush3.msra.mxu0 %v109_v28  ;;  %3095 = vmatpush3.msra.mxu1 %v142_v29  ;;  %v130_v18 = vld [vmem:[%s6510_s1 + $0x300] sm:$0xff]  ;;  %v225_v22 = vld [vmem:[%s6510_s1 + $0x5f8] sm:$0xff]  ;;  %v176_v23 = vld [vmem:[%s6510_s1 + $0x470] sm:$0xff] }
  0x2e   :  { %3063 = vmatprep.subr.mxu0 %v124_v30  ;;  %3096 = vmatprep.subr.mxu1 %v157_v31  ;;  %v209_v24 = vld [vmem:[%s6510_s1 + $0x578] sm:$0xff]  ;;  %v191_v25 = vld [vmem:[%s6510_s1 + $0x4e8] sm:$0xff]  ;;  %v224_v26 = vld [vmem:[%s6510_s1 + $0x5f0] sm:$0xff] }
  0x2f   :  { %3064 = vmatpush3.msra.mxu0 %v108_v32  ;;  %3097 = vmatpush3.msra.mxu1 %v141_v33  ;;  %v175_v27 = vld [vmem:[%s6510_s1 + $0x468] sm:$0xff]  ;;  %v208_v28 = vld [vmem:[%s6510_s1 + $0x570] sm:$0xff]  ;;  %v190_v29 = vld [vmem:[%s6510_s1 + $0x4e0] sm:$0xff] }
  0x30   :  { %3065 = vmatprep.subr.mxu0 %v123_v34  ;;  %3098 = vmatprep.subr.mxu1 %v156_v35  ;;  %v223_v30 = vld [vmem:[%s6510_s1 + $0x5e8] sm:$0xff]  ;;  %v174_v31 = vld [vmem:[%s6510_s1 + $0x460] sm:$0xff]  ;;  %v189_v33 = vld [vmem:[%s6510_s1 + $0x4d8] sm:$0xff] }
  0x31   :  { %3066 = vmatpush3.msra.mxu0 %v107_v36  ;;  %3099 = vmatpush3.msra.mxu1 %v140_v37  ;;  %v207_v32 = vld [vmem:[%s6510_s1 + $0x568] sm:$0xff]  ;;  %v222_v34 = vld [vmem:[%s6510_s1 + $0x5e0] sm:$0xff]  ;;  %v173_v35 = vld [vmem:[%s6510_s1 + $0x458] sm:$0xff] }
  0x32   :  { %3067 = vmatprep.subr.mxu0 %v122_v38  ;;  %3100 = vmatprep.subr.mxu1 %v155_v39  ;;  %v206_v36 = vld [vmem:[%s6510_s1 + $0x560] sm:$0xff]  ;;  %v188_v37 = vld [vmem:[%s6510_s1 + $0x4d0] sm:$0xff]  ;;  %v221_v38 = vld [vmem:[%s6510_s1 + $0x5d8] sm:$0xff] }
  0x33   :  { %3068 = vmatpush3.msra.mxu0 %v106_v40  ;;  %3101 = vmatpush3.msra.mxu1 %v139_v41  ;;  %v172_v39 = vld [vmem:[%s6510_s1 + $0x450] sm:$0xff]  ;;  %v205_v40 = vld [vmem:[%s6510_s1 + $0x558] sm:$0xff]  ;;  %v187_v41 = vld [vmem:[%s6510_s1 + $0x4c8] sm:$0xff] }
  0x34   :  { %3069 = vmatprep.subr.mxu0 %v121_v42  ;;  %3102 = vmatprep.subr.mxu1 %v154_v43  ;;  %v220_v42 = vld [vmem:[%s6510_s1 + $0x5d0] sm:$0xff]  ;;  %v171_v43 = vld [vmem:[%s6510_s1 + $0x448] sm:$0xff] }
  0x35   :  { %3070 = vmatpush3.msra.mxu0 %v105_v44  ;;  %3103 = vmatpush3.msra.mxu1 %v138_v45  ;;  %v204_v44 = vld [vmem:[%s6510_s1 + $0x550] sm:$0xff]  ;;  %v186_v45 = vld [vmem:[%s6510_s1 + $0x4c0] sm:$0xff]  ;;  %v183_v58 = vld [vmem:[%s6510_s1 + $0x4a8] sm:$0xff] }
  0x36   :  { %3071 = vmatprep.subr.mxu0 %v120_v46  ;;  %3104 = vmatprep.subr.mxu1 %v153_v47  ;;  %v219_v46 = vld [vmem:[%s6510_s1 + $0x5c8] sm:$0xff]  ;;  %v170_v47 = vld [vmem:[%s6510_s1 + $0x440] sm:$0xff]  ;;  %v23_v1 = vld [vmem:[%s6509_s0 + $0x10] sm:$0xff] }
  0x37   :  { %3072 = vmatpush3.msra.mxu0 %v104_v49  ;;  %3105 = vmatpush3.msra.mxu1 %v137_v50  ;;  %v203_v49 = vld [vmem:[%s6510_s1 + $0x548] sm:$0xff]  ;;  %v185_v50 = vld [vmem:[%s6510_s1 + $0x4b8] sm:$0xff] }
  0x38   :  { %3073 = vmatprep.subr.mxu0 %v119_v51  ;;  %3106 = vmatprep.subr.mxu1 %v152_v52  ;;  %v218_v51 = vld [vmem:[%s6510_s1 + $0x5c0] sm:$0xff]  ;;  %v169_v52 = vld [vmem:[%s6510_s1 + $0x438] sm:$0xff] }
  0x39   :  { %3074 = vmatpush3.msra.mxu0 %v103_v53  ;;  %3107 = vmatpush3.msra.mxu1 %v136_v54  ;;  %v202_v53 = vld [vmem:[%s6510_s1 + $0x540] sm:$0xff]  ;;  %v184_v54 = vld [vmem:[%s6510_s1 + $0x4b0] sm:$0xff] }
  0x3a   :  { %3075 = vmatprep.subr.mxu0 %v118_v55  ;;  %3108 = vmatprep.subr.mxu1 %v151_v56  ;;  %v217_v55 = vld [vmem:[%s6510_s1 + $0x5b8] sm:$0xff]  ;;  %v168_v56 = vld [vmem:[%s6510_s1 + $0x430] sm:$0xff] }
  0x3b   :  { %3076 = vmatpush3.msra.mxu0 %v102_v57  ;;  %3109 = vmatpush3.msra.mxu1 %v135_v59  ;;  %v201_v57 = vld [vmem:[%s6510_s1 + $0x538] sm:$0xff]  ;;  %v216_v59 = vld [vmem:[%s6510_s1 + $0x5b0] sm:$0xff] }
  0x3c   :  { %3077 = vmatprep.subr.mxu0 %v117_v60  ;;  %3110 = vmatprep.subr.mxu1 %v150_v61  ;;  %v167_v60 = vld [vmem:[%s6510_s1 + $0x428] sm:$0xff]  ;;  %v200_v61 = vld [vmem:[%s6510_s1 + $0x530] sm:$0xff] }
  0x3d   :  { %3078 = vmatpush3.msra.mxu0 %v101_v62  ;;  %3111 = vmatpush3.msra.mxu1 %v134_v63  ;;  %v182_v62 = vld [vmem:[%s6510_s1 + $0x4a0] sm:$0xff]  ;;  %v215_v63 = vld [vmem:[%s6510_s1 + $0x5a8] sm:$0xff] }
  0x3e   :  { %3079 = vmatprep.subr.mxu0 %v116_v0  ;;  %3112 = vmatprep.subr.mxu1 %v149_v2  ;;  %v166_v0 = vld [vmem:[%s6510_s1 + $0x420] sm:$0xff]  ;;  %v199_v2 = vld [vmem:[%s6510_s1 + $0x528] sm:$0xff] }
  0x3f   :  { %3080 = vmatpush3.msra.mxu0 %v100_v3  ;;  %3113 = vmatpush3.msra.mxu1 %v133_v5  ;;  %v181_v3 = vld [vmem:[%s6510_s1 + $0x498] sm:$0xff] }
  0x40   :  { %3081 = vmatprep.subr.mxu0 %v115_v6  ;;  %3114 = vmatprep.subr.mxu1 %v148_v7  ;;  %v165_v5 = vld [vmem:[%s6510_s1 + $0x418] sm:$0xff]  ;;  %v198_v6 = vld [vmem:[%s6510_s1 + $0x520] sm:$0xff]  ;;  %v180_v7 = vld [vmem:[%s6510_s1 + $0x490] sm:$0xff] }
  0x41   :  { %3082 = vmatpush3.msra.mxu0 %v99_v8  ;;  %3115 = vmatpush3.msra.mxu1 %v132_v9  ;;  %v872_v8 = vcombine.high %v23_v1, %v23_v1  ;;  %v213_v9 = vld [vmem:[%s6510_s1 + $0x598] sm:$0xff] }
  0x42   :  { %3083 = vmatprep.subr.mxu0 %v114_v10  ;;  %3116 = vmatprep.subr.mxu1 %v147_v12  ;;  %v164_v10 = vld [vmem:[%s6510_s1 + $0x410] sm:$0xff]  ;;  %v197_v12 = vld [vmem:[%s6510_s1 + $0x518] sm:$0xff] }
  0x43   :  { %3084 = vmatpush3.msra.mxu0 %v98_v13  ;;  %1302 = vmatprep.mubr.f32.mxu0 %v870_v14  ;;  %v179_v13 = vld [vmem:[%s6510_s1 + $0x488] sm:$0xff]  ;;  %v212_v14 = vld [vmem:[%s6510_s1 + $0x590] sm:$0xff] }
  0x44   :  { %3117 = vmatpush3.msra.mxu1 %v131_v15  ;;  %1303 = vmatmul.mubr.f32.vlgmr.msra.gmra.mxu0 %v862_v4  ;;  %v214_v4 = vld [vmem:[%s6510_s1 + $0x5a0] sm:$0xff]  ;;  %v163_v15 = vld [vmem:[%s6510_s1 + $0x408] sm:$0xff] }
  0x45   :  { %3118 = vmatprep.subr.mxu1 %v146_v16  ;;  %3123 = vmatprep.subr.mxu0 %v193_v17  ;;  %v196_v16 = vld [vmem:[%s6510_s1 + $0x510] sm:$0xff]  ;;  %v178_v17 = vld [vmem:[%s6510_s1 + $0x480] sm:$0xff] }
  0x46   :  { %3119 = vmatpush3.msra.mxu1 %v130_v18  ;;  %1372 = vmatprep.mubr.f32.mxu1 %v871_v19  ;;  %v886_v18 = vrot.slane %v872_v8, %v4130_v48  ;;  %v211_v19 = vld [vmem:[%s6510_s1 + $0x588] sm:$0xff]  ;;  %v24_v8 = vld [vmem:[%s6509_s0 + $0x18] sm:$0xff] }
  0x47   :  { %3124 = vmatpush3.msra.mxu0 %v177_v20  ;;  %1373 = vmatmul.mubr.f32.vlgmr.msra.gmra.mxu1 %v869_v11  ;;  %v879_v11 = vrot.slane %v23_v1, %v4130_v48  ;;  %v162_v20 = vld [vmem:[%s6510_s1 + $0x400] sm:$0xff]  ;;  %v247_v1 = vld [vmem:[%s6510_s1 + $0x6a8] sm:$0xff] }
  0x48   :  { %3125 = vmatprep.subr.mxu0 %v192_v21  ;;  %3158 = vmatprep.subr.mxu1 %v225_v22  ;;  %v195_v22 = vld [vmem:[%s6510_s1 + $0x508] sm:$0xff] }
  0x49   :  { %3126 = vmatpush3.msra.mxu0 %v176_v23  ;;  %3159 = vmatpush3.msra.mxu1 %v209_v24  ;;  %v887_v21 = vcombine.high %v879_v11, %v879_v11  ;;  %v210_v23 = vld [vmem:[%s6510_s1 + $0x580] sm:$0xff]  ;;  %v257_v24 = vld [vmem:[%s6510_s1 + $0x6f8] sm:$0xff] }
  0x4a   :  { %3127 = vmatprep.subr.mxu0 %v191_v25  ;;  %3160 = vmatprep.subr.mxu1 %v224_v26  ;;  %v194_v25 = vld [vmem:[%s6510_s1 + $0x500] sm:$0xff]  ;;  %v888_v26 = vcombine.high %v886_v18, %v886_v18 }
  0x4b   :  { %3128 = vmatpush3.msra.mxu0 %v175_v27  ;;  %3161 = vmatpush3.msra.mxu1 %v208_v28  ;;  %v241_v27 = vld [vmem:[%s6510_s1 + $0x678] sm:$0xff]  ;;  %v256_v28 = vld [vmem:[%s6510_s1 + $0x6f0] sm:$0xff] }
  0x4c   :  { %3129 = vmatprep.subr.mxu0 %v190_v29  ;;  %3162 = vmatprep.subr.mxu1 %v223_v30  ;;  %v289_v29 = vld [vmem:[%s6510_s1 + $0x7f8] sm:$0xff]  ;;  %v240_v30 = vld [vmem:[%s6510_s1 + $0x670] sm:$0xff] }
  0x4d   :  { %3130 = vmatpush3.msra.mxu0 %v174_v31  ;;  %3163 = vmatpush3.msra.mxu1 %v207_v32  ;;  %v273_v31 = vld [vmem:[%s6510_s1 + $0x778] sm:$0xff]  ;;  %v255_v32 = vld [vmem:[%s6510_s1 + $0x6e8] sm:$0xff] }
  0x4e   :  { %3131 = vmatprep.subr.mxu0 %v189_v33  ;;  %3164 = vmatprep.subr.mxu1 %v222_v34  ;;  %v288_v33 = vld [vmem:[%s6510_s1 + $0x7f0] sm:$0xff]  ;;  %v239_v34 = vld [vmem:[%s6510_s1 + $0x668] sm:$0xff] }
  0x4f   :  { %3132 = vmatpush3.msra.mxu0 %v173_v35  ;;  %3165 = vmatpush3.msra.mxu1 %v206_v36  ;;  %v272_v35 = vld [vmem:[%s6510_s1 + $0x770] sm:$0xff]  ;;  %v254_v36 = vld [vmem:[%s6510_s1 + $0x6e0] sm:$0xff] }
  0x50   :  { %3133 = vmatprep.subr.mxu0 %v188_v37  ;;  %3166 = vmatprep.subr.mxu1 %v221_v38  ;;  %v287_v37 = vld [vmem:[%s6510_s1 + $0x7e8] sm:$0xff]  ;;  %v238_v38 = vld [vmem:[%s6510_s1 + $0x660] sm:$0xff] }
  0x51   :  { %3134 = vmatpush3.msra.mxu0 %v172_v39  ;;  %3167 = vmatpush3.msra.mxu1 %v205_v40  ;;  %v271_v39 = vld [vmem:[%s6510_s1 + $0x768] sm:$0xff]  ;;  %v253_v40 = vld [vmem:[%s6510_s1 + $0x6d8] sm:$0xff] }
  0x52   :  { %3135 = vmatprep.subr.mxu0 %v187_v41  ;;  %3168 = vmatprep.subr.mxu1 %v220_v42  ;;  %v286_v41 = vld [vmem:[%s6510_s1 + $0x7e0] sm:$0xff]  ;;  %v237_v42 = vld [vmem:[%s6510_s1 + $0x658] sm:$0xff] }
  0x53   :  { %3136 = vmatpush3.msra.mxu0 %v171_v43  ;;  %3169 = vmatpush3.msra.mxu1 %v204_v44  ;;  %v270_v43 = vld [vmem:[%s6510_s1 + $0x760] sm:$0xff]  ;;  %v252_v44 = vld [vmem:[%s6510_s1 + $0x6d0] sm:$0xff] }
  0x54   :  { %3137 = vmatprep.subr.mxu0 %v186_v45  ;;  %3170 = vmatprep.subr.mxu1 %v219_v46  ;;  %v285_v45 = vld [vmem:[%s6510_s1 + $0x7d8] sm:$0xff]  ;;  %v236_v46 = vld [vmem:[%s6510_s1 + $0x650] sm:$0xff] }
  0x55   :  { %3138 = vmatpush3.msra.mxu0 %v170_v47  ;;  %3171 = vmatpush3.msra.mxu1 %v203_v49  ;;  %v269_v47 = vld [vmem:[%s6510_s1 + $0x758] sm:$0xff]  ;;  %v251_v49 = vld [vmem:[%s6510_s1 + $0x6c8] sm:$0xff] }
  0x56   :  { %3139 = vmatprep.subr.mxu0 %v185_v50  ;;  %3172 = vmatprep.subr.mxu1 %v218_v51  ;;  %v284_v50 = vld [vmem:[%s6510_s1 + $0x7d0] sm:$0xff]  ;;  %v235_v51 = vld [vmem:[%s6510_s1 + $0x648] sm:$0xff] }
  0x57   :  { %3140 = vmatpush3.msra.mxu0 %v169_v52  ;;  %3173 = vmatpush3.msra.mxu1 %v202_v53  ;;  %v268_v52 = vld [vmem:[%s6510_s1 + $0x750] sm:$0xff]  ;;  %v250_v53 = vld [vmem:[%s6510_s1 + $0x6c0] sm:$0xff] }
  0x58   :  { %3141 = vmatprep.subr.mxu0 %v184_v54  ;;  %3174 = vmatprep.subr.mxu1 %v217_v55  ;;  %v283_v54 = vld [vmem:[%s6510_s1 + $0x7c8] sm:$0xff]  ;;  %v234_v55 = vld [vmem:[%s6510_s1 + $0x640] sm:$0xff] }
  0x59   :  { %3142 = vmatpush3.msra.mxu0 %v168_v56  ;;  %3175 = vmatpush3.msra.mxu1 %v201_v57  ;;  %v267_v56 = vld [vmem:[%s6510_s1 + $0x748] sm:$0xff]  ;;  %v249_v57 = vld [vmem:[%s6510_s1 + $0x6b8] sm:$0xff] }
  0x5a   :  { %3143 = vmatprep.subr.mxu0 %v183_v58  ;;  %3176 = vmatprep.subr.mxu1 %v216_v59  ;;  %v282_v58 = vld [vmem:[%s6510_s1 + $0x7c0] sm:$0xff]  ;;  %v233_v59 = vld [vmem:[%s6510_s1 + $0x638] sm:$0xff] }
  0x5b   :  { %3144 = vmatpush3.msra.mxu0 %v167_v60  ;;  %3177 = vmatpush3.msra.mxu1 %v200_v61  ;;  %v266_v60 = vld [vmem:[%s6510_s1 + $0x740] sm:$0xff]  ;;  %v248_v61 = vld [vmem:[%s6510_s1 + $0x6b0] sm:$0xff] }
  0x5c   :  { %3145 = vmatprep.subr.mxu0 %v182_v62  ;;  %3178 = vmatprep.subr.mxu1 %v215_v63  ;;  %v281_v62 = vld [vmem:[%s6510_s1 + $0x7b8] sm:$0xff]  ;;  %v232_v63 = vld [vmem:[%s6510_s1 + $0x630] sm:$0xff] }
  0x5d   :  { %3146 = vmatpush3.msra.mxu0 %v166_v0  ;;  %3179 = vmatpush3.msra.mxu1 %v199_v2  ;;  %v265_v0 = vld [vmem:[%s6510_s1 + $0x738] sm:$0xff]  ;;  %v280_v2 = vld [vmem:[%s6510_s1 + $0x7b0] sm:$0xff] }
  0x5e   :  { %3147 = vmatprep.subr.mxu0 %v181_v3  ;;  %3180 = vmatprep.subr.mxu1 %v214_v4  ;;  %v231_v3 = vld [vmem:[%s6510_s1 + $0x628] sm:$0xff]  ;;  %v264_v4 = vld [vmem:[%s6510_s1 + $0x730] sm:$0xff] }
  0x5f   :  { %3148 = vmatpush3.msra.mxu0 %v165_v5  ;;  %3181 = vmatpush3.msra.mxu1 %v198_v6  ;;  %v246_v5 = vld [vmem:[%s6510_s1 + $0x6a0] sm:$0xff]  ;;  %v279_v6 = vld [vmem:[%s6510_s1 + $0x7a8] sm:$0xff] }
  0x60   :  { %3149 = vmatprep.subr.mxu0 %v180_v7  ;;  %3182 = vmatprep.subr.mxu1 %v213_v9  ;;  %v230_v7 = vld [vmem:[%s6510_s1 + $0x620] sm:$0xff]  ;;  %v263_v9 = vld [vmem:[%s6510_s1 + $0x728] sm:$0xff] }
  0x61   :  { %3150 = vmatpush3.msra.mxu0 %v164_v10  ;;  %3183 = vmatpush3.msra.mxu1 %v197_v12  ;;  %v245_v10 = vld [vmem:[%s6510_s1 + $0x698] sm:$0xff] }
  0x62   :  { %3151 = vmatprep.subr.mxu0 %v179_v13  ;;  %3184 = vmatprep.subr.mxu1 %v212_v14  ;;  %v229_v12 = vld [vmem:[%s6510_s1 + $0x618] sm:$0xff]  ;;  %v262_v13 = vld [vmem:[%s6510_s1 + $0x720] sm:$0xff]  ;;  %v244_v14 = vld [vmem:[%s6510_s1 + $0x690] sm:$0xff] }
  0x63   :  { %3152 = vmatpush3.msra.mxu0 %v163_v15  ;;  %3185 = vmatpush3.msra.mxu1 %v196_v16  ;;  %v889_v15 = vcombine.high %v24_v8, %v24_v8  ;;  %v277_v16 = vld [vmem:[%s6510_s1 + $0x798] sm:$0xff] }
  0x64   :  { %3153 = vmatprep.subr.mxu0 %v178_v17  ;;  %3186 = vmatprep.subr.mxu1 %v211_v19  ;;  %v228_v17 = vld [vmem:[%s6510_s1 + $0x610] sm:$0xff]  ;;  %v261_v19 = vld [vmem:[%s6510_s1 + $0x718] sm:$0xff] }
  0x65   :  { %3154 = vmatpush3.msra.mxu0 %v162_v20  ;;  %1442 = vmatprep.mubr.f32.mxu0 %v887_v21  ;;  %v243_v20 = vld [vmem:[%s6510_s1 + $0x688] sm:$0xff]  ;;  %v276_v21 = vld [vmem:[%s6510_s1 + $0x790] sm:$0xff] }
  0x66   :  { %3187 = vmatpush3.msra.mxu1 %v195_v22  ;;  %1443 = vmatmul.mubr.f32.vlgmr.msra.gmra.mxu0 %v879_v11  ;;  %v278_v11 = vld [vmem:[%s6510_s1 + $0x7a0] sm:$0xff]  ;;  %v227_v22 = vld [vmem:[%s6510_s1 + $0x608] sm:$0xff] }
  0x67   :  { %3188 = vmatprep.subr.mxu1 %v210_v23  ;;  %3193 = vmatprep.subr.mxu0 %v257_v24  ;;  %v260_v23 = vld [vmem:[%s6510_s1 + $0x710] sm:$0xff]  ;;  %v242_v24 = vld [vmem:[%s6510_s1 + $0x680] sm:$0xff] }
  0x68   :  { %3189 = vmatpush3.msra.mxu1 %v194_v25  ;;  %1512 = vmatprep.mubr.f32.mxu1 %v888_v26  ;;  %v903_v25 = vrot.slane %v889_v15, %v4130_v48  ;;  %v275_v26 = vld [vmem:[%s6510_s1 + $0x788] sm:$0xff]  ;;  %v25_v15 = vld [vmem:[%s6509_s0 + $0x20] sm:$0xff] }
  0x69   :  { %3194 = vmatpush3.msra.mxu0 %v241_v27  ;;  %1513 = vmatmul.mubr.f32.vlgmr.msra.gmra.mxu1 %v886_v18  ;;  %v896_v18 = vrot.slane %v24_v8, %v4130_v48  ;;  %v226_v27 = vld [vmem:[%s6510_s1 + $0x600] sm:$0xff]  ;;  %v311_v8 = vld [vmem:[%s6510_s1 + $0x8a8] sm:$0xff] }
  0x6a   :  { %3195 = vmatprep.subr.mxu0 %v256_v28  ;;  %3228 = vmatprep.subr.mxu1 %v289_v29  ;;  %v259_v29 = vld [vmem:[%s6510_s1 + $0x708] sm:$0xff] }
  0x6b   :  { %3196 = vmatpush3.msra.mxu0 %v240_v30  ;;  %3229 = vmatpush3.msra.mxu1 %v273_v31  ;;  %v904_v28 = vcombine.high %v896_v18, %v896_v18  ;;  %v274_v30 = vld [vmem:[%s6510_s1 + $0x780] sm:$0xff]  ;;  %v321_v31 = vld [vmem:[%s6510_s1 + $0x8f8] sm:$0xff] }
  0x6c   :  { %3197 = vmatprep.subr.mxu0 %v255_v32  ;;  %3230 = vmatprep.subr.mxu1 %v288_v33  ;;  %v258_v32 = vld [vmem:[%s6510_s1 + $0x700] sm:$0xff]  ;;  %v905_v33 = vcombine.high %v903_v25, %v903_v25 }
  0x6d   :  { %3198 = vmatpush3.msra.mxu0 %v239_v34  ;;  %3231 = vmatpush3.msra.mxu1 %v272_v35  ;;  %v305_v34 = vld [vmem:[%s6510_s1 + $0x878] sm:$0xff]  ;;  %v320_v35 = vld [vmem:[%s6510_s1 + $0x8f0] sm:$0xff] }
  0x6e   :  { %3199 = vmatprep.subr.mxu0 %v254_v36  ;;  %3232 = vmatprep.subr.mxu1 %v287_v37  ;;  %v353_v36 = vld [vmem:[%s6510_s1 + $0x9f8] sm:$0xff]  ;;  %v304_v37 = vld [vmem:[%s6510_s1 + $0x870] sm:$0xff] }
  0x6f   :  { %3200 = vmatpush3.msra.mxu0 %v238_v38  ;;  %3233 = vmatpush3.msra.mxu1 %v271_v39  ;;  %v337_v38 = vld [vmem:[%s6510_s1 + $0x978] sm:$0xff]  ;;  %v319_v39 = vld [vmem:[%s6510_s1 + $0x8e8] sm:$0xff] }
  0x70   :  { %3201 = vmatprep.subr.mxu0 %v253_v40  ;;  %3234 = vmatprep.subr.mxu1 %v286_v41  ;;  %v352_v40 = vld [vmem:[%s6510_s1 + $0x9f0] sm:$0xff]  ;;  %v303_v41 = vld [vmem:[%s6510_s1 + $0x868] sm:$0xff] }
  0x71   :  { %3202 = vmatpush3.msra.mxu0 %v237_v42  ;;  %3235 = vmatpush3.msra.mxu1 %v270_v43  ;;  %v336_v42 = vld [vmem:[%s6510_s1 + $0x970] sm:$0xff]  ;;  %v318_v43 = vld [vmem:[%s6510_s1 + $0x8e0] sm:$0xff] }
  0x72   :  { %3203 = vmatprep.subr.mxu0 %v252_v44  ;;  %3236 = vmatprep.subr.mxu1 %v285_v45  ;;  %v351_v44 = vld [vmem:[%s6510_s1 + $0x9e8] sm:$0xff]  ;;  %v302_v45 = vld [vmem:[%s6510_s1 + $0x860] sm:$0xff] }
  0x73   :  { %3204 = vmatpush3.msra.mxu0 %v236_v46  ;;  %3237 = vmatpush3.msra.mxu1 %v269_v47  ;;  %v335_v46 = vld [vmem:[%s6510_s1 + $0x968] sm:$0xff]  ;;  %v317_v47 = vld [vmem:[%s6510_s1 + $0x8d8] sm:$0xff] }
  0x74   :  { %3205 = vmatprep.subr.mxu0 %v251_v49  ;;  %3238 = vmatprep.subr.mxu1 %v284_v50  ;;  %v350_v49 = vld [vmem:[%s6510_s1 + $0x9e0] sm:$0xff]  ;;  %v301_v50 = vld [vmem:[%s6510_s1 + $0x858] sm:$0xff] }
  0x75   :  { %3206 = vmatpush3.msra.mxu0 %v235_v51  ;;  %3239 = vmatpush3.msra.mxu1 %v268_v52  ;;  %v334_v51 = vld [vmem:[%s6510_s1 + $0x960] sm:$0xff]  ;;  %v316_v52 = vld [vmem:[%s6510_s1 + $0x8d0] sm:$0xff] }
  0x76   :  { %3207 = vmatprep.subr.mxu0 %v250_v53  ;;  %3240 = vmatprep.subr.mxu1 %v283_v54  ;;  %v349_v53 = vld [vmem:[%s6510_s1 + $0x9d8] sm:$0xff]  ;;  %v300_v54 = vld [vmem:[%s6510_s1 + $0x850] sm:$0xff] }
  0x77   :  { %3208 = vmatpush3.msra.mxu0 %v234_v55  ;;  %3241 = vmatpush3.msra.mxu1 %v267_v56  ;;  %v333_v55 = vld [vmem:[%s6510_s1 + $0x958] sm:$0xff]  ;;  %v315_v56 = vld [vmem:[%s6510_s1 + $0x8c8] sm:$0xff] }
  0x78   :  { %3209 = vmatprep.subr.mxu0 %v249_v57  ;;  %3242 = vmatprep.subr.mxu1 %v282_v58  ;;  %v348_v57 = vld [vmem:[%s6510_s1 + $0x9d0] sm:$0xff]  ;;  %v299_v58 = vld [vmem:[%s6510_s1 + $0x848] sm:$0xff] }
  0x79   :  { %3210 = vmatpush3.msra.mxu0 %v233_v59  ;;  %3243 = vmatpush3.msra.mxu1 %v266_v60  ;;  %v332_v59 = vld [vmem:[%s6510_s1 + $0x950] sm:$0xff]  ;;  %v314_v60 = vld [vmem:[%s6510_s1 + $0x8c0] sm:$0xff] }
  0x7a   :  { %3211 = vmatprep.subr.mxu0 %v248_v61  ;;  %3244 = vmatprep.subr.mxu1 %v281_v62  ;;  %v347_v61 = vld [vmem:[%s6510_s1 + $0x9c8] sm:$0xff]  ;;  %v298_v62 = vld [vmem:[%s6510_s1 + $0x840] sm:$0xff] }
  0x7b   :  { %3212 = vmatpush3.msra.mxu0 %v232_v63  ;;  %3245 = vmatpush3.msra.mxu1 %v265_v0  ;;  %v331_v63 = vld [vmem:[%s6510_s1 + $0x948] sm:$0xff]  ;;  %v313_v0 = vld [vmem:[%s6510_s1 + $0x8b8] sm:$0xff] }
  0x7c   :  { %3213 = vmatprep.subr.mxu0 %v247_v1  ;;  %3246 = vmatprep.subr.mxu1 %v280_v2  ;;  %v346_v1 = vld [vmem:[%s6510_s1 + $0x9c0] sm:$0xff]  ;;  %v297_v2 = vld [vmem:[%s6510_s1 + $0x838] sm:$0xff] }
  0x7d   :  { %3214 = vmatpush3.msra.mxu0 %v231_v3  ;;  %3247 = vmatpush3.msra.mxu1 %v264_v4  ;;  %v330_v3 = vld [vmem:[%s6510_s1 + $0x940] sm:$0xff]  ;;  %v312_v4 = vld [vmem:[%s6510_s1 + $0x8b0] sm:$0xff] }
  0x7e   :  { %3215 = vmatprep.subr.mxu0 %v246_v5  ;;  %3248 = vmatprep.subr.mxu1 %v279_v6  ;;  %v345_v5 = vld [vmem:[%s6510_s1 + $0x9b8] sm:$0xff]  ;;  %v296_v6 = vld [vmem:[%s6510_s1 + $0x830] sm:$0xff] }
  0x7f   :  { %3216 = vmatpush3.msra.mxu0 %v230_v7  ;;  %3249 = vmatpush3.msra.mxu1 %v263_v9  ;;  %v329_v7 = vld [vmem:[%s6510_s1 + $0x938] sm:$0xff]  ;;  %v344_v9 = vld [vmem:[%s6510_s1 + $0x9b0] sm:$0xff] }
  0x80   :  { %3217 = vmatprep.subr.mxu0 %v245_v10  ;;  %3250 = vmatprep.subr.mxu1 %v278_v11  ;;  %v295_v10 = vld [vmem:[%s6510_s1 + $0x828] sm:$0xff]  ;;  %v328_v11 = vld [vmem:[%s6510_s1 + $0x930] sm:$0xff] }
  0x81   :  { %3218 = vmatpush3.msra.mxu0 %v229_v12  ;;  %3251 = vmatpush3.msra.mxu1 %v262_v13  ;;  %v310_v12 = vld [vmem:[%s6510_s1 + $0x8a0] sm:$0xff]  ;;  %v343_v13 = vld [vmem:[%s6510_s1 + $0x9a8] sm:$0xff] }
  0x82   :  { %3219 = vmatprep.subr.mxu0 %v244_v14  ;;  %3252 = vmatprep.subr.mxu1 %v277_v16  ;;  %v294_v14 = vld [vmem:[%s6510_s1 + $0x820] sm:$0xff]  ;;  %v327_v16 = vld [vmem:[%s6510_s1 + $0x928] sm:$0xff] }
  0x83   :  { %3220 = vmatpush3.msra.mxu0 %v228_v17  ;;  %3253 = vmatpush3.msra.mxu1 %v261_v19  ;;  %v309_v17 = vld [vmem:[%s6510_s1 + $0x898] sm:$0xff] }
  0x84   :  { %3221 = vmatprep.subr.mxu0 %v243_v20  ;;  %3254 = vmatprep.subr.mxu1 %v276_v21  ;;  %v293_v19 = vld [vmem:[%s6510_s1 + $0x818] sm:$0xff]  ;;  %v326_v20 = vld [vmem:[%s6510_s1 + $0x920] sm:$0xff]  ;;  %v308_v21 = vld [vmem:[%s6510_s1 + $0x890] sm:$0xff] }
  0x85   :  { %3222 = vmatpush3.msra.mxu0 %v227_v22  ;;  %3255 = vmatpush3.msra.mxu1 %v260_v23  ;;  %v906_v22 = vcombine.high %v25_v15, %v25_v15  ;;  %v341_v23 = vld [vmem:[%s6510_s1 + $0x998] sm:$0xff] }
  0x86   :  { %3223 = vmatprep.subr.mxu0 %v242_v24  ;;  %3256 = vmatprep.subr.mxu1 %v275_v26  ;;  %v292_v24 = vld [vmem:[%s6510_s1 + $0x810] sm:$0xff]  ;;  %v325_v26 = vld [vmem:[%s6510_s1 + $0x918] sm:$0xff] }
  0x87   :  { %3224 = vmatpush3.msra.mxu0 %v226_v27  ;;  %1582 = vmatprep.mubr.f32.mxu0 %v904_v28  ;;  %v307_v27 = vld [vmem:[%s6510_s1 + $0x888] sm:$0xff]  ;;  %v340_v28 = vld [vmem:[%s6510_s1 + $0x990] sm:$0xff] }
  0x88   :  { %3257 = vmatpush3.msra.mxu1 %v259_v29  ;;  %1583 = vmatmul.mubr.f32.vlgmr.msra.gmra.mxu0 %v896_v18  ;;  %v342_v18 = vld [vmem:[%s6510_s1 + $0x9a0] sm:$0xff]  ;;  %v291_v29 = vld [vmem:[%s6510_s1 + $0x808] sm:$0xff] }
  0x89   :  { %3258 = vmatprep.subr.mxu1 %v274_v30  ;;  %3263 = vmatprep.subr.mxu0 %v321_v31  ;;  %v324_v30 = vld [vmem:[%s6510_s1 + $0x910] sm:$0xff]  ;;  %v306_v31 = vld [vmem:[%s6510_s1 + $0x880] sm:$0xff] }
  0x8a   :  { %3259 = vmatpush3.msra.mxu1 %v258_v32  ;;  %1652 = vmatprep.mubr.f32.mxu1 %v905_v33  ;;  %v920_v32 = vrot.slane %v906_v22, %v4130_v48  ;;  %v339_v33 = vld [vmem:[%s6510_s1 + $0x988] sm:$0xff] }
  0x8b   :  { %3264 = vmatpush3.msra.mxu0 %v305_v34  ;;  %1653 = vmatmul.mubr.f32.vlgmr.msra.gmra.mxu1 %v903_v25  ;;  %v913_v25 = vrot.slane %v25_v15, %v4130_v48  ;;  %v290_v34 = vld [vmem:[%s6510_s1 + $0x800] sm:$0xff]  ;;  %v375_v15 = vld [vmem:[%s6510_s1 + $0xaa8] sm:$0xff] }
  0x8c   :  { %3265 = vmatprep.subr.mxu0 %v320_v35  ;;  %3298 = vmatprep.subr.mxu1 %v353_v36  ;;  %v323_v36 = vld [vmem:[%s6510_s1 + $0x908] sm:$0xff] }
  0x8d   :  { %3266 = vmatpush3.msra.mxu0 %v304_v37  ;;  %3299 = vmatpush3.msra.mxu1 %v337_v38  ;;  %v921_v35 = vcombine.high %v913_v25, %v913_v25  ;;  %v338_v37 = vld [vmem:[%s6510_s1 + $0x980] sm:$0xff]  ;;  %v385_v38 = vld [vmem:[%s6510_s1 + $0xaf8] sm:$0xff]  ;;  %v26_v22 = vld [vmem:[%s6509_s0 + $0x28] sm:$0xff] }
  0x8e   :  { %3267 = vmatprep.subr.mxu0 %v319_v39  ;;  %3300 = vmatprep.subr.mxu1 %v352_v40  ;;  %v322_v39 = vld [vmem:[%s6510_s1 + $0x900] sm:$0xff]  ;;  %v922_v40 = vcombine.high %v920_v32, %v920_v32 }
  0x8f   :  { %3268 = vmatpush3.msra.mxu0 %v303_v41  ;;  %3301 = vmatpush3.msra.mxu1 %v336_v42  ;;  %v369_v41 = vld [vmem:[%s6510_s1 + $0xa78] sm:$0xff]  ;;  %v384_v42 = vld [vmem:[%s6510_s1 + $0xaf0] sm:$0xff] }
  0x90   :  { %3269 = vmatprep.subr.mxu0 %v318_v43  ;;  %3302 = vmatprep.subr.mxu1 %v351_v44  ;;  %v417_v43 = vld [vmem:[%s6510_s1 + $0xbf8] sm:$0xff]  ;;  %v368_v44 = vld [vmem:[%s6510_s1 + $0xa70] sm:$0xff] }
  0x91   :  { %3270 = vmatpush3.msra.mxu0 %v302_v45  ;;  %3303 = vmatpush3.msra.mxu1 %v335_v46  ;;  %v401_v45 = vld [vmem:[%s6510_s1 + $0xb78] sm:$0xff]  ;;  %v383_v46 = vld [vmem:[%s6510_s1 + $0xae8] sm:$0xff] }
  0x92   :  { %3271 = vmatprep.subr.mxu0 %v317_v47  ;;  %3304 = vmatprep.subr.mxu1 %v350_v49  ;;  %v416_v47 = vld [vmem:[%s6510_s1 + $0xbf0] sm:$0xff]  ;;  %v367_v49 = vld [vmem:[%s6510_s1 + $0xa68] sm:$0xff] }
  0x93   :  { %3272 = vmatpush3.msra.mxu0 %v301_v50  ;;  %3305 = vmatpush3.msra.mxu1 %v334_v51  ;;  %v400_v50 = vld [vmem:[%s6510_s1 + $0xb70] sm:$0xff]  ;;  %v382_v51 = vld [vmem:[%s6510_s1 + $0xae0] sm:$0xff] }
  0x94   :  { %3273 = vmatprep.subr.mxu0 %v316_v52  ;;  %3306 = vmatprep.subr.mxu1 %v349_v53  ;;  %v415_v52 = vld [vmem:[%s6510_s1 + $0xbe8] sm:$0xff]  ;;  %v366_v53 = vld [vmem:[%s6510_s1 + $0xa60] sm:$0xff] }
  0x95   :  { %3274 = vmatpush3.msra.mxu0 %v300_v54  ;;  %3307 = vmatpush3.msra.mxu1 %v333_v55  ;;  %v399_v54 = vld [vmem:[%s6510_s1 + $0xb68] sm:$0xff]  ;;  %v381_v55 = vld [vmem:[%s6510_s1 + $0xad8] sm:$0xff] }
  0x96   :  { %3275 = vmatprep.subr.mxu0 %v315_v56  ;;  %3308 = vmatprep.subr.mxu1 %v348_v57  ;;  %v414_v56 = vld [vmem:[%s6510_s1 + $0xbe0] sm:$0xff]  ;;  %v365_v57 = vld [vmem:[%s6510_s1 + $0xa58] sm:$0xff] }
  0x97   :  { %3276 = vmatpush3.msra.mxu0 %v299_v58  ;;  %3309 = vmatpush3.msra.mxu1 %v332_v59  ;;  %v398_v58 = vld [vmem:[%s6510_s1 + $0xb60] sm:$0xff]  ;;  %v380_v59 = vld [vmem:[%s6510_s1 + $0xad0] sm:$0xff] }
  0x98   :  { %3277 = vmatprep.subr.mxu0 %v314_v60  ;;  %3310 = vmatprep.subr.mxu1 %v347_v61  ;;  %v413_v60 = vld [vmem:[%s6510_s1 + $0xbd8] sm:$0xff]  ;;  %v364_v61 = vld [vmem:[%s6510_s1 + $0xa50] sm:$0xff] }
  0x99   :  { %3278 = vmatpush3.msra.mxu0 %v298_v62  ;;  %3311 = vmatpush3.msra.mxu1 %v331_v63  ;;  %v397_v62 = vld [vmem:[%s6510_s1 + $0xb58] sm:$0xff]  ;;  %v379_v63 = vld [vmem:[%s6510_s1 + $0xac8] sm:$0xff] }
  0x9a   :  { %3279 = vmatprep.subr.mxu0 %v313_v0  ;;  %3312 = vmatprep.subr.mxu1 %v346_v1  ;;  %v412_v0 = vld [vmem:[%s6510_s1 + $0xbd0] sm:$0xff]  ;;  %v363_v1 = vld [vmem:[%s6510_s1 + $0xa48] sm:$0xff] }
  0x9b   :  { %3280 = vmatpush3.msra.mxu0 %v297_v2  ;;  %3313 = vmatpush3.msra.mxu1 %v330_v3  ;;  %v396_v2 = vld [vmem:[%s6510_s1 + $0xb50] sm:$0xff]  ;;  %v378_v3 = vld [vmem:[%s6510_s1 + $0xac0] sm:$0xff] }
  0x9c   :  { %3281 = vmatprep.subr.mxu0 %v312_v4  ;;  %3314 = vmatprep.subr.mxu1 %v345_v5  ;;  %v411_v4 = vld [vmem:[%s6510_s1 + $0xbc8] sm:$0xff]  ;;  %v362_v5 = vld [vmem:[%s6510_s1 + $0xa40] sm:$0xff] }
  0x9d   :  { %3282 = vmatpush3.msra.mxu0 %v296_v6  ;;  %3315 = vmatpush3.msra.mxu1 %v329_v7  ;;  %v395_v6 = vld [vmem:[%s6510_s1 + $0xb48] sm:$0xff]  ;;  %v377_v7 = vld [vmem:[%s6510_s1 + $0xab8] sm:$0xff] }
  0x9e   :  { %3283 = vmatprep.subr.mxu0 %v311_v8  ;;  %3316 = vmatprep.subr.mxu1 %v344_v9  ;;  %v410_v8 = vld [vmem:[%s6510_s1 + $0xbc0] sm:$0xff]  ;;  %v361_v9 = vld [vmem:[%s6510_s1 + $0xa38] sm:$0xff] }
  0x9f   :  { %3284 = vmatpush3.msra.mxu0 %v295_v10  ;;  %3317 = vmatpush3.msra.mxu1 %v328_v11  ;;  %v394_v10 = vld [vmem:[%s6510_s1 + $0xb40] sm:$0xff]  ;;  %v376_v11 = vld [vmem:[%s6510_s1 + $0xab0] sm:$0xff] }
  0xa0   :  { %3285 = vmatprep.subr.mxu0 %v310_v12  ;;  %3318 = vmatprep.subr.mxu1 %v343_v13  ;;  %v409_v12 = vld [vmem:[%s6510_s1 + $0xbb8] sm:$0xff]  ;;  %v360_v13 = vld [vmem:[%s6510_s1 + $0xa30] sm:$0xff] }
  0xa1   :  { %3286 = vmatpush3.msra.mxu0 %v294_v14  ;;  %3319 = vmatpush3.msra.mxu1 %v327_v16  ;;  %v393_v14 = vld [vmem:[%s6510_s1 + $0xb38] sm:$0xff]  ;;  %v408_v16 = vld [vmem:[%s6510_s1 + $0xbb0] sm:$0xff] }
  0xa2   :  { %3287 = vmatprep.subr.mxu0 %v309_v17  ;;  %3320 = vmatprep.subr.mxu1 %v342_v18  ;;  %v359_v17 = vld [vmem:[%s6510_s1 + $0xa28] sm:$0xff]  ;;  %v392_v18 = vld [vmem:[%s6510_s1 + $0xb30] sm:$0xff] }
  0xa3   :  { %3288 = vmatpush3.msra.mxu0 %v293_v19  ;;  %3321 = vmatpush3.msra.mxu1 %v326_v20  ;;  %v374_v19 = vld [vmem:[%s6510_s1 + $0xaa0] sm:$0xff]  ;;  %v407_v20 = vld [vmem:[%s6510_s1 + $0xba8] sm:$0xff] }
  0xa4   :  { %3289 = vmatprep.subr.mxu0 %v308_v21  ;;  %3322 = vmatprep.subr.mxu1 %v341_v23  ;;  %v358_v21 = vld [vmem:[%s6510_s1 + $0xa20] sm:$0xff]  ;;  %v391_v23 = vld [vmem:[%s6510_s1 + $0xb28] sm:$0xff] }
  0xa5   :  { %3290 = vmatpush3.msra.mxu0 %v292_v24  ;;  %3323 = vmatpush3.msra.mxu1 %v325_v26  ;;  %v373_v24 = vld [vmem:[%s6510_s1 + $0xa98] sm:$0xff] }
  0xa6   :  { %3291 = vmatprep.subr.mxu0 %v307_v27  ;;  %3324 = vmatprep.subr.mxu1 %v340_v28  ;;  %v357_v26 = vld [vmem:[%s6510_s1 + $0xa18] sm:$0xff]  ;;  %v390_v27 = vld [vmem:[%s6510_s1 + $0xb20] sm:$0xff]  ;;  %v372_v28 = vld [vmem:[%s6510_s1 + $0xa90] sm:$0xff] }
  0xa7   :  { %3292 = vmatpush3.msra.mxu0 %v291_v29  ;;  %3325 = vmatpush3.msra.mxu1 %v324_v30  ;;  %v923_v29 = vcombine.high %v26_v22, %v26_v22  ;;  %v405_v30 = vld [vmem:[%s6510_s1 + $0xb98] sm:$0xff] }
  0xa8   :  { %3293 = vmatprep.subr.mxu0 %v306_v31  ;;  %3326 = vmatprep.subr.mxu1 %v339_v33  ;;  %v356_v31 = vld [vmem:[%s6510_s1 + $0xa10] sm:$0xff]  ;;  %v389_v33 = vld [vmem:[%s6510_s1 + $0xb18] sm:$0xff] }
  0xa9   :  { %3294 = vmatpush3.msra.mxu0 %v290_v34  ;;  %1722 = vmatprep.mubr.f32.mxu0 %v921_v35  ;;  %v371_v34 = vld [vmem:[%s6510_s1 + $0xa88] sm:$0xff]  ;;  %v404_v35 = vld [vmem:[%s6510_s1 + $0xb90] sm:$0xff] }
  0xaa   :  { %3327 = vmatpush3.msra.mxu1 %v323_v36  ;;  %1723 = vmatmul.mubr.f32.vlgmr.msra.gmra.mxu0 %v913_v25  ;;  %v406_v25 = vld [vmem:[%s6510_s1 + $0xba0] sm:$0xff]  ;;  %v355_v36 = vld [vmem:[%s6510_s1 + $0xa08] sm:$0xff] }
  0xab   :  { %3328 = vmatprep.subr.mxu1 %v338_v37  ;;  %3333 = vmatprep.subr.mxu0 %v385_v38  ;;  %v388_v37 = vld [vmem:[%s6510_s1 + $0xb10] sm:$0xff]  ;;  %v370_v38 = vld [vmem:[%s6510_s1 + $0xa80] sm:$0xff] }
  0xac   :  { %3329 = vmatpush3.msra.mxu1 %v322_v39  ;;  %1792 = vmatprep.mubr.f32.mxu1 %v922_v40  ;;  %v937_v39 = vrot.slane %v923_v29, %v4130_v48  ;;  %v403_v40 = vld [vmem:[%s6510_s1 + $0xb88] sm:$0xff]  ;;  %v27_v29 = vld [vmem:[%s6509_s0 + $0x30] sm:$0xff] }
  0xad   :  { %3334 = vmatpush3.msra.mxu0 %v369_v41  ;;  %1793 = vmatmul.mubr.f32.vlgmr.msra.gmra.mxu1 %v920_v32  ;;  %v930_v32 = vrot.slane %v26_v22, %v4130_v48  ;;  %v354_v41 = vld [vmem:[%s6510_s1 + $0xa00] sm:$0xff]  ;;  %v439_v22 = vld [vmem:[%s6510_s1 + $0xca8] sm:$0xff] }
  0xae   :  { %3335 = vmatprep.subr.mxu0 %v384_v42  ;;  %3368 = vmatprep.subr.mxu1 %v417_v43  ;;  %v387_v43 = vld [vmem:[%s6510_s1 + $0xb08] sm:$0xff] }
  0xaf   :  { %3336 = vmatpush3.msra.mxu0 %v368_v44  ;;  %3369 = vmatpush3.msra.mxu1 %v401_v45  ;;  %v938_v42 = vcombine.high %v930_v32, %v930_v32  ;;  %v402_v44 = vld [vmem:[%s6510_s1 + $0xb80] sm:$0xff]  ;;  %v449_v45 = vld [vmem:[%s6510_s1 + $0xcf8] sm:$0xff] }
  0xb0   :  { %3337 = vmatprep.subr.mxu0 %v383_v46  ;;  %3370 = vmatprep.subr.mxu1 %v416_v47  ;;  %v386_v46 = vld [vmem:[%s6510_s1 + $0xb00] sm:$0xff]  ;;  %v939_v47 = vcombine.high %v937_v39, %v937_v39 }
  0xb1   :  { %3338 = vmatpush3.msra.mxu0 %v367_v49  ;;  %3371 = vmatpush3.msra.mxu1 %v400_v50  ;;  %v433_v49 = vld [vmem:[%s6510_s1 + $0xc78] sm:$0xff]  ;;  %v448_v50 = vld [vmem:[%s6510_s1 + $0xcf0] sm:$0xff] }
  0xb2   :  { %3339 = vmatprep.subr.mxu0 %v382_v51  ;;  %3372 = vmatprep.subr.mxu1 %v415_v52  ;;  %v481_v51 = vld [vmem:[%s6510_s1 + $0xdf8] sm:$0xff]  ;;  %v432_v52 = vld [vmem:[%s6510_s1 + $0xc70] sm:$0xff] }
  0xb3   :  { %3340 = vmatpush3.msra.mxu0 %v366_v53  ;;  %3373 = vmatpush3.msra.mxu1 %v399_v54  ;;  %v465_v53 = vld [vmem:[%s6510_s1 + $0xd78] sm:$0xff]  ;;  %v447_v54 = vld [vmem:[%s6510_s1 + $0xce8] sm:$0xff] }
  0xb4   :  { %3341 = vmatprep.subr.mxu0 %v381_v55  ;;  %3374 = vmatprep.subr.mxu1 %v414_v56  ;;  %v480_v55 = vld [vmem:[%s6510_s1 + $0xdf0] sm:$0xff]  ;;  %v431_v56 = vld [vmem:[%s6510_s1 + $0xc68] sm:$0xff] }
  0xb5   :  { %3342 = vmatpush3.msra.mxu0 %v365_v57  ;;  %3375 = vmatpush3.msra.mxu1 %v398_v58  ;;  %v464_v57 = vld [vmem:[%s6510_s1 + $0xd70] sm:$0xff]  ;;  %v446_v58 = vld [vmem:[%s6510_s1 + $0xce0] sm:$0xff] }
  0xb6   :  { %3343 = vmatprep.subr.mxu0 %v380_v59  ;;  %3376 = vmatprep.subr.mxu1 %v413_v60  ;;  %v479_v59 = vld [vmem:[%s6510_s1 + $0xde8] sm:$0xff]  ;;  %v430_v60 = vld [vmem:[%s6510_s1 + $0xc60] sm:$0xff] }
  0xb7   :  { %3344 = vmatpush3.msra.mxu0 %v364_v61  ;;  %3377 = vmatpush3.msra.mxu1 %v397_v62  ;;  %v463_v61 = vld [vmem:[%s6510_s1 + $0xd68] sm:$0xff]  ;;  %v445_v62 = vld [vmem:[%s6510_s1 + $0xcd8] sm:$0xff] }
  0xb8   :  { %3345 = vmatprep.subr.mxu0 %v379_v63  ;;  %3378 = vmatprep.subr.mxu1 %v412_v0  ;;  %v478_v63 = vld [vmem:[%s6510_s1 + $0xde0] sm:$0xff]  ;;  %v429_v0 = vld [vmem:[%s6510_s1 + $0xc58] sm:$0xff] }
  0xb9   :  { %3346 = vmatpush3.msra.mxu0 %v363_v1  ;;  %3379 = vmatpush3.msra.mxu1 %v396_v2  ;;  %v462_v1 = vld [vmem:[%s6510_s1 + $0xd60] sm:$0xff]  ;;  %v444_v2 = vld [vmem:[%s6510_s1 + $0xcd0] sm:$0xff] }
  0xba   :  { %3347 = vmatprep.subr.mxu0 %v378_v3  ;;  %3380 = vmatprep.subr.mxu1 %v411_v4  ;;  %v477_v3 = vld [vmem:[%s6510_s1 + $0xdd8] sm:$0xff]  ;;  %v428_v4 = vld [vmem:[%s6510_s1 + $0xc50] sm:$0xff] }
  0xbb   :  { %3348 = vmatpush3.msra.mxu0 %v362_v5  ;;  %3381 = vmatpush3.msra.mxu1 %v395_v6  ;;  %v461_v5 = vld [vmem:[%s6510_s1 + $0xd58] sm:$0xff]  ;;  %v443_v6 = vld [vmem:[%s6510_s1 + $0xcc8] sm:$0xff] }
  0xbc   :  { %3349 = vmatprep.subr.mxu0 %v377_v7  ;;  %3382 = vmatprep.subr.mxu1 %v410_v8  ;;  %v476_v7 = vld [vmem:[%s6510_s1 + $0xdd0] sm:$0xff]  ;;  %v427_v8 = vld [vmem:[%s6510_s1 + $0xc48] sm:$0xff] }
  0xbd   :  { %3350 = vmatpush3.msra.mxu0 %v361_v9  ;;  %3383 = vmatpush3.msra.mxu1 %v394_v10  ;;  %v460_v9 = vld [vmem:[%s6510_s1 + $0xd50] sm:$0xff]  ;;  %v442_v10 = vld [vmem:[%s6510_s1 + $0xcc0] sm:$0xff] }
  0xbe   :  { %3351 = vmatprep.subr.mxu0 %v376_v11  ;;  %3384 = vmatprep.subr.mxu1 %v409_v12  ;;  %v475_v11 = vld [vmem:[%s6510_s1 + $0xdc8] sm:$0xff]  ;;  %v426_v12 = vld [vmem:[%s6510_s1 + $0xc40] sm:$0xff] }
  0xbf   :  { %3352 = vmatpush3.msra.mxu0 %v360_v13  ;;  %3385 = vmatpush3.msra.mxu1 %v393_v14  ;;  %v459_v13 = vld [vmem:[%s6510_s1 + $0xd48] sm:$0xff]  ;;  %v441_v14 = vld [vmem:[%s6510_s1 + $0xcb8] sm:$0xff] }
  0xc0   :  { %3353 = vmatprep.subr.mxu0 %v375_v15  ;;  %3386 = vmatprep.subr.mxu1 %v408_v16  ;;  %v474_v15 = vld [vmem:[%s6510_s1 + $0xdc0] sm:$0xff]  ;;  %v425_v16 = vld [vmem:[%s6510_s1 + $0xc38] sm:$0xff] }
  0xc1   :  { %3354 = vmatpush3.msra.mxu0 %v359_v17  ;;  %3387 = vmatpush3.msra.mxu1 %v392_v18  ;;  %v458_v17 = vld [vmem:[%s6510_s1 + $0xd40] sm:$0xff]  ;;  %v440_v18 = vld [vmem:[%s6510_s1 + $0xcb0] sm:$0xff] }
  0xc2   :  { %3355 = vmatprep.subr.mxu0 %v374_v19  ;;  %3388 = vmatprep.subr.mxu1 %v407_v20  ;;  %v473_v19 = vld [vmem:[%s6510_s1 + $0xdb8] sm:$0xff]  ;;  %v424_v20 = vld [vmem:[%s6510_s1 + $0xc30] sm:$0xff] }
  0xc3   :  { %3356 = vmatpush3.msra.mxu0 %v358_v21  ;;  %3389 = vmatpush3.msra.mxu1 %v391_v23  ;;  %v457_v21 = vld [vmem:[%s6510_s1 + $0xd38] sm:$0xff]  ;;  %v472_v23 = vld [vmem:[%s6510_s1 + $0xdb0] sm:$0xff] }
  0xc4   :  { %3357 = vmatprep.subr.mxu0 %v373_v24  ;;  %3390 = vmatprep.subr.mxu1 %v406_v25  ;;  %v423_v24 = vld [vmem:[%s6510_s1 + $0xc28] sm:$0xff]  ;;  %v456_v25 = vld [vmem:[%s6510_s1 + $0xd30] sm:$0xff] }
  0xc5   :  { %3358 = vmatpush3.msra.mxu0 %v357_v26  ;;  %3391 = vmatpush3.msra.mxu1 %v390_v27  ;;  %v438_v26 = vld [vmem:[%s6510_s1 + $0xca0] sm:$0xff]  ;;  %v471_v27 = vld [vmem:[%s6510_s1 + $0xda8] sm:$0xff] }
  0xc6   :  { %3359 = vmatprep.subr.mxu0 %v372_v28  ;;  %3392 = vmatprep.subr.mxu1 %v405_v30  ;;  %v422_v28 = vld [vmem:[%s6510_s1 + $0xc20] sm:$0xff]  ;;  %v455_v30 = vld [vmem:[%s6510_s1 + $0xd28] sm:$0xff] }
  0xc7   :  { %3360 = vmatpush3.msra.mxu0 %v356_v31  ;;  %3393 = vmatpush3.msra.mxu1 %v389_v33  ;;  %v437_v31 = vld [vmem:[%s6510_s1 + $0xc98] sm:$0xff] }
  0xc8   :  { %3361 = vmatprep.subr.mxu0 %v371_v34  ;;  %3394 = vmatprep.subr.mxu1 %v404_v35 }
  0xc9   :  { %3362 = vmatpush3.msra.mxu0 %v355_v36  ;;  %3395 = vmatpush3.msra.mxu1 %v388_v37 }
  0xca   :  { %3363 = vmatprep.subr.mxu0 %v370_v38  ;;  %3396 = vmatprep.subr.mxu1 %v403_v40 }
  0xcb   :  { %3364 = vmatpush3.msra.mxu0 %v354_v41  ;;  %1862 = vmatprep.mubr.f32.mxu0 %v938_v42 }
  0xcc   :  { %3397 = vmatpush3.msra.mxu1 %v387_v43  ;;  %1863 = vmatmul.mubr.f32.vlgmr.msra.gmra.mxu0 %v930_v32 }
  0xcd   :  { %3398 = vmatprep.subr.mxu1 %v402_v44  ;;  %3403 = vmatprep.subr.mxu0 %v449_v45 }
  0xce   :  { %3399 = vmatpush3.msra.mxu1 %v386_v46  ;;  %1932 = vmatprep.mubr.f32.mxu1 %v939_v47 }
  0xcf   :  { %3404 = vmatpush3.msra.mxu0 %v433_v49  ;;  %1933 = vmatmul.mubr.f32.vlgmr.msra.gmra.mxu1 %v937_v39 }
  0xd0   :  { %3405 = vmatprep.subr.mxu0 %v448_v50  ;;  %3438 = vmatprep.subr.mxu1 %v481_v51 }
  0xd1   :  { %3406 = vmatpush3.msra.mxu0 %v432_v52  ;;  %3439 = vmatpush3.msra.mxu1 %v465_v53 }
  0xd2   :  { %3407 = vmatprep.subr.mxu0 %v447_v54  ;;  %3440 = vmatprep.subr.mxu1 %v480_v55 }
  0xd3   :  { %3408 = vmatpush3.msra.mxu0 %v431_v56  ;;  %3441 = vmatpush3.msra.mxu1 %v464_v57 }
  0xd4   :  { %3409 = vmatprep.subr.mxu0 %v446_v58  ;;  %3442 = vmatprep.subr.mxu1 %v479_v59 }
  0xd5   :  { %3410 = vmatpush3.msra.mxu0 %v430_v60  ;;  %3443 = vmatpush3.msra.mxu1 %v463_v61 }
  0xd6   :  { %3411 = vmatprep.subr.mxu0 %v445_v62  ;;  %3444 = vmatprep.subr.mxu1 %v478_v63 }
  0xd7   :  { %3412 = vmatpush3.msra.mxu0 %v429_v0  ;;  %3445 = vmatpush3.msra.mxu1 %v462_v1 }
  0xd8   :  { %3413 = vmatprep.subr.mxu0 %v444_v2  ;;  %3446 = vmatprep.subr.mxu1 %v477_v3 }
  0xd9   :  { %3414 = vmatpush3.msra.mxu0 %v428_v4  ;;  %3447 = vmatpush3.msra.mxu1 %v461_v5 }
  0xda   :  { %3415 = vmatprep.subr.mxu0 %v443_v6  ;;  %3448 = vmatprep.subr.mxu1 %v476_v7 }
  0xdb   :  { %3416 = vmatpush3.msra.mxu0 %v427_v8  ;;  %3449 = vmatpush3.msra.mxu1 %v460_v9 }
  0xdc   :  { %3417 = vmatprep.subr.mxu0 %v442_v10  ;;  %3450 = vmatprep.subr.mxu1 %v475_v11 }
  0xdd   :  { %3418 = vmatpush3.msra.mxu0 %v426_v12  ;;  %3451 = vmatpush3.msra.mxu1 %v459_v13 }
  0xde   :  { %3419 = vmatprep.subr.mxu0 %v441_v14  ;;  %3452 = vmatprep.subr.mxu1 %v474_v15 }
  0xdf   :  { %3420 = vmatpush3.msra.mxu0 %v425_v16  ;;  %3453 = vmatpush3.msra.mxu1 %v458_v17 }
  0xe0   :  { %3421 = vmatprep.subr.mxu0 %v440_v18  ;;  %3454 = vmatprep.subr.mxu1 %v473_v19 }
  0xe1   :  { %3422 = vmatpush3.msra.mxu0 %v424_v20  ;;  %3455 = vmatpush3.msra.mxu1 %v457_v21 }
  0xe2   :  { %3423 = vmatprep.subr.mxu0 %v439_v22  ;;  %3456 = vmatprep.subr.mxu1 %v472_v23 }
  0xe3   :  { %3424 = vmatpush3.msra.mxu0 %v423_v24 }
  0xe4   :  { %10 = vsyncpa [#allocation3], 0  ;;  %3457 = vmatpush3.msra.mxu1 %v456_v25  ;;  %3425 = vmatprep.subr.mxu0 %v438_v26  ;;  %v470_v32 = vld [vmem:[%s6510_s1 + $0xda0] sm:$0xff]  ;;  %v421_v33 = vld [vmem:[%s6510_s1 + $0xc18] sm:$0xff]  ;;  %v940_v36 = vcombine.high %v27_v29, %v27_v29  ;;  %v947_v39 = vrot.slane %v27_v29, %v4130_v48  ;;  %vm3969_vm0 = vmmov 0   ;;  %vm2848_vm1 = vcmask 1041408  }
  0xe5   :  { %3458 = vmatprep.subr.mxu1 %v471_v27  ;;  %3426 = vmatpush3.msra.mxu0 %v422_v28  ;;  %v454_v34 = vld [vmem:[%s6510_s1 + $0xd20] sm:$0xff]  ;;  %v436_v35 = vld [vmem:[%s6510_s1 + $0xc90] sm:$0xff]  ;;  %v469_v37 = vld [vmem:[%s6510_s1 + $0xd98] sm:$0xff]  ;;  %s3970_s17 = smov [#allocation2]  }
  0xe6   :  { %3459 = vmatpush3.msra.mxu1 %v455_v30  ;;  %3427 = vmatprep.subr.mxu0 %v437_v31  ;;  %v420_v38 = vld [vmem:[%s6510_s1 + $0xc10] sm:$0xff]  ;;  %v453_v40 = vld [vmem:[%s6510_s1 + $0xd18] sm:$0xff]  ;;  %v435_v41 = vld [vmem:[%s6510_s1 + $0xc88] sm:$0xff]  ;;  %v954_v46 = vrot.slane %v940_v36, %v4130_v48  ;;  %v955_v50 = vcombine.high %v947_v39, %v947_v39  ;;  %s2972_s18 = sshll.u32 %s3970_s17, 4  ;;  %s2973_s18 = int_to_ptr.vmem [resolvable:$true] %s2972_s18 }
  0xe7   :  { %3460 = vmatprep.subr.mxu1 %v470_v32  ;;  %3428 = vmatpush3.msra.mxu0 %v421_v33  ;;  %v468_v42 = vld [vmem:[%s6510_s1 + $0xd90] sm:$0xff]  ;;  %v419_v43 = vld [vmem:[%s6510_s1 + $0xc08] sm:$0xff]  ;;  %v434_v45 = vld [vmem:[%s6510_s1 + $0xc80] sm:$0xff]  ;;  %s3945_s19 = scalar_lea.vmem %s2973_s18, 32  ;;  %p3950_p1 = scmp.lt.s32.totalorder %s2973_s18, %s2973_s18 }
  0xe8   :  { %3461 = vmatpush3.msra.mxu1 %v454_v34  ;;  %3429 = vmatprep.subr.mxu0 %v436_v35  ;;  %v452_v44 = vld [vmem:[%s6510_s1 + $0xd10] sm:$0xff]  ;;  %v467_v47 = vld [vmem:[%s6510_s1 + $0xd88] sm:$0xff]  ;;  %v418_v49 = vld [vmem:[%s6510_s1 + $0xc00] sm:$0xff]  ;;  %v956_v55 = vcombine.high %v954_v46, %v954_v46  ;;  %p3946_p0 = scmp.ne.s32.totalorder %s2973_s18, %s3945_s19  ;;  %p3951_p2 = scmp.lt.s32.totalorder %s3945_s19, %s3945_s19 }
  0xe9   :  { %3462 = vmatprep.subr.mxu1 %v469_v37  ;;  %3430 = vmatpush3.msra.mxu0 %v420_v38  ;;  %v451_v51 = vld [vmem:[%s6510_s1 + $0xd08] sm:$0xff]  ;;  %v466_v52 = vld [vmem:[%s6510_s1 + $0xd80] sm:$0xff]  ;;  %v513_v53 = vld [vmem:[%s6510_s1 + $0xef8] sm:$0xff] }
  0xea   :  { %3463 = vmatpush3.msra.mxu1 %v453_v40  ;;  %3431 = vmatprep.subr.mxu0 %v435_v41  ;;  %v450_v54 = vld [vmem:[%s6510_s1 + $0xd00] sm:$0xff]  ;;  %v497_v56 = vld [vmem:[%s6510_s1 + $0xe78] sm:$0xff]  ;;  %v512_v57 = vld [vmem:[%s6510_s1 + $0xef0] sm:$0xff]  ;;  %p3952_p3 = por %p3951_p2, %p3950_p1 }
  0xeb   :  { %3464 = vmatprep.subr.mxu1 %v468_v42  ;;  %3432 = vmatpush3.msra.mxu0 %v419_v43  ;;  %v545_v58 = vld [vmem:[%s6510_s1 + $0xff8] sm:$0xff]  ;;  %v496_v59 = vld [vmem:[%s6510_s1 + $0xe70] sm:$0xff]  ;;  %v511_v61 = vld [vmem:[%s6510_s1 + $0xee8] sm:$0xff] }
  0xec   :  { %3465 = vmatpush3.msra.mxu1 %v452_v44  ;;  %3433 = vmatprep.subr.mxu0 %v434_v45  ;;  %v529_v60 = vld [vmem:[%s6510_s1 + $0xf78] sm:$0xff]  ;;  %v544_v62 = vld [vmem:[%s6510_s1 + $0xff0] sm:$0xff]  ;;  %v495_v63 = vld [vmem:[%s6510_s1 + $0xe68] sm:$0xff]  ;;  %p3953_p4 = pnand %p3952_p3, %p3946_p0 }
  0xed   :  { %3466 = vmatprep.subr.mxu1 %v467_v47  ;;  %3434 = vmatpush3.msra.mxu0 %v418_v49  ;;  %v528_v0 = vld [vmem:[%s6510_s1 + $0xf70] sm:$0xff]  ;;  %v510_v1 = vld [vmem:[%s6510_s1 + $0xee0] sm:$0xff]  ;;  %v543_v2 = vld [vmem:[%s6510_s1 + $0xfe8] sm:$0xff] }
  0xee   :  { %2002 = vmatprep.mubr.f32.mxu0 %v955_v50  ;;  %3467 = vmatpush3.msra.mxu1 %v451_v51  ;;  %v494_v3 = vld [vmem:[%s6510_s1 + $0xe60] sm:$0xff]  ;;  %v527_v4 = vld [vmem:[%s6510_s1 + $0xf68] sm:$0xff]  ;;  %v509_v5 = vld [vmem:[%s6510_s1 + $0xed8] sm:$0xff] }
  0xef   :  { %2003 = vmatmul.mubr.f32.vlgmr.msra.gmra.mxu0 %v947_v39  ;;  %3468 = vmatprep.subr.mxu1 %v466_v52  ;;  %v542_v6 = vld [vmem:[%s6510_s1 + $0xfe0] sm:$0xff]  ;;  %v493_v7 = vld [vmem:[%s6510_s1 + $0xe58] sm:$0xff]  ;;  %v508_v9 = vld [vmem:[%s6510_s1 + $0xed0] sm:$0xff] }
  0xf0   :  { %3473 = vmatprep.subr.mxu0 %v513_v53  ;;  %3469 = vmatpush3.msra.mxu1 %v450_v54  ;;  %v526_v8 = vld [vmem:[%s6510_s1 + $0xf60] sm:$0xff]  ;;  %v541_v10 = vld [vmem:[%s6510_s1 + $0xfd8] sm:$0xff]  ;;  %v492_v11 = vld [vmem:[%s6510_s1 + $0xe50] sm:$0xff] }
  0xf1   :  { %2072 = vmatprep.mubr.f32.mxu1 %v956_v55  ;;  %3474 = vmatpush3.msra.mxu0 %v497_v56  ;;  %v525_v12 = vld [vmem:[%s6510_s1 + $0xf58] sm:$0xff]  ;;  %v507_v13 = vld [vmem:[%s6510_s1 + $0xec8] sm:$0xff]  ;;  %v540_v14 = vld [vmem:[%s6510_s1 + $0xfd0] sm:$0xff] }
  0xf2   :  { %2073 = vmatmul.mubr.f32.vlgmr.msra.gmra.mxu1 %v954_v46  ;;  %3475 = vmatprep.subr.mxu0 %v512_v57  ;;  %v491_v15 = vld [vmem:[%s6510_s1 + $0xe48] sm:$0xff]  ;;  %v524_v16 = vld [vmem:[%s6510_s1 + $0xf50] sm:$0xff]  ;;  %v506_v17 = vld [vmem:[%s6510_s1 + $0xec0] sm:$0xff] }
  0xf3   :  { %3508 = vmatprep.subr.mxu1 %v545_v58  ;;  %3476 = vmatpush3.msra.mxu0 %v496_v59  ;;  %v539_v18 = vld [vmem:[%s6510_s1 + $0xfc8] sm:$0xff]  ;;  %v490_v19 = vld [vmem:[%s6510_s1 + $0xe40] sm:$0xff]  ;;  %v505_v21 = vld [vmem:[%s6510_s1 + $0xeb8] sm:$0xff] }
  0xf4   :  { %3509 = vmatpush3.msra.mxu1 %v529_v60  ;;  %3477 = vmatprep.subr.mxu0 %v511_v61  ;;  %v523_v20 = vld [vmem:[%s6510_s1 + $0xf48] sm:$0xff]  ;;  %v538_v22 = vld [vmem:[%s6510_s1 + $0xfc0] sm:$0xff]  ;;  %v489_v23 = vld [vmem:[%s6510_s1 + $0xe38] sm:$0xff] }
  0xf5   :  { %3510 = vmatprep.subr.mxu1 %v544_v62  ;;  %3478 = vmatpush3.msra.mxu0 %v495_v63  ;;  %v522_v24 = vld [vmem:[%s6510_s1 + $0xf40] sm:$0xff]  ;;  %v504_v25 = vld [vmem:[%s6510_s1 + $0xeb0] sm:$0xff]  ;;  %v537_v26 = vld [vmem:[%s6510_s1 + $0xfb8] sm:$0xff] }
  0xf6   :  { %3511 = vmatpush3.msra.mxu1 %v528_v0  ;;  %3479 = vmatprep.subr.mxu0 %v510_v1  ;;  %v488_v27 = vld [vmem:[%s6510_s1 + $0xe30] sm:$0xff]  ;;  %v521_v28 = vld [vmem:[%s6510_s1 + $0xf38] sm:$0xff]  ;;  %v503_v29 = vld [vmem:[%s6510_s1 + $0xea8] sm:$0xff] }
  0xf7   :  { %3512 = vmatprep.subr.mxu1 %v543_v2  ;;  %3480 = vmatpush3.msra.mxu0 %v494_v3  ;;  %v536_v30 = vld [vmem:[%s6510_s1 + $0xfb0] sm:$0xff]  ;;  %v487_v31 = vld [vmem:[%s6510_s1 + $0xe28] sm:$0xff]  ;;  %v502_v33 = vld [vmem:[%s6510_s1 + $0xea0] sm:$0xff] }
  0xf8   :  { %3513 = vmatpush3.msra.mxu1 %v527_v4  ;;  %3481 = vmatprep.subr.mxu0 %v509_v5  ;;  %v520_v32 = vld [vmem:[%s6510_s1 + $0xf30] sm:$0xff]  ;;  %v535_v34 = vld [vmem:[%s6510_s1 + $0xfa8] sm:$0xff]  ;;  %v486_v35 = vld [vmem:[%s6510_s1 + $0xe20] sm:$0xff] }
  0xf9   :  { %3514 = vmatprep.subr.mxu1 %v542_v6  ;;  %3482 = vmatpush3.msra.mxu0 %v493_v7  ;;  %v28_v36 = vld [vmem:[%s6509_s0 + $0x38] sm:$0xff]  ;;  %v519_v37 = vld [vmem:[%s6510_s1 + $0xf28] sm:$0xff]  ;;  %v534_v39 = vld [vmem:[%s6510_s1 + $0xfa0] sm:$0xff] }
  0xfa   :  { %3515 = vmatpush3.msra.mxu1 %v526_v8  ;;  %3483 = vmatprep.subr.mxu0 %v508_v9  ;;  %v501_v38 = vld [vmem:[%s6510_s1 + $0xe98] sm:$0xff]  ;;  %v518_v41 = vld [vmem:[%s6510_s1 + $0xf20] sm:$0xff]  ;;  %v500_v42 = vld [vmem:[%s6510_s1 + $0xe90] sm:$0xff]  ;;  %v957_v43 = vcombine.high %v28_v36, %v28_v36  ;;  %v964_v46 = vrot.slane %v28_v36, %v4130_v48 }
  0xfb   :  { %3516 = vmatprep.subr.mxu1 %v541_v10  ;;  %3484 = vmatpush3.msra.mxu0 %v492_v11  ;;  %v485_v40 = vld [vmem:[%s6510_s1 + $0xe18] sm:$0xff]  ;;  %v484_v45 = vld [vmem:[%s6510_s1 + $0xe10] sm:$0xff]  ;;  %v499_v49 = vld [vmem:[%s6510_s1 + $0xe88] sm:$0xff] }
  0xfc   :  { %3517 = vmatpush3.msra.mxu1 %v525_v12  ;;  %3485 = vmatprep.subr.mxu0 %v507_v13  ;;  %v533_v44 = vld [vmem:[%s6510_s1 + $0xf98] sm:$0xff]  ;;  %v532_v50 = vld [vmem:[%s6510_s1 + $0xf90] sm:$0xff]  ;;  %v483_v51 = vld [vmem:[%s6510_s1 + $0xe08] sm:$0xff]  ;;  %v971_v54 = vrot.slane %v957_v43, %v4130_v48  ;;  %v972_v57 = vcombine.high %v964_v46, %v964_v46 }
  0xfd   :  { %3518 = vmatprep.subr.mxu1 %v540_v14  ;;  %3486 = vmatpush3.msra.mxu0 %v491_v15  ;;  %v517_v47 = vld [vmem:[%s6510_s1 + $0xf18] sm:$0xff]  ;;  %v516_v52 = vld [vmem:[%s6510_s1 + $0xf10] sm:$0xff]  ;;  %v498_v53 = vld [vmem:[%s6510_s1 + $0xe80] sm:$0xff] }
  0xfe   :  { %3519 = vmatpush3.msra.mxu1 %v524_v16  ;;  %3487 = vmatprep.subr.mxu0 %v506_v17  ;;  %v531_v55 = vld [vmem:[%s6510_s1 + $0xf88] sm:$0xff]  ;;  %v482_v56 = vld [vmem:[%s6510_s1 + $0xe00] sm:$0xff]  ;;  %v577_v60 = vld [vmem:[%s6510_s1 + $0x10f8] sm:$0xff]  ;;  %v973_v62 = vcombine.high %v971_v54, %v971_v54 }
  0xff   :  { %3520 = vmatprep.subr.mxu1 %v539_v18  ;;  %3488 = vmatpush3.msra.mxu0 %v490_v19  ;;  %v515_v58 = vld [vmem:[%s6510_s1 + $0xf08] sm:$0xff]  ;;  %v530_v59 = vld [vmem:[%s6510_s1 + $0xf80] sm:$0xff]  ;;  %v561_v63 = vld [vmem:[%s6510_s1 + $0x1078] sm:$0xff] }
 0x100   :  { %3521 = vmatpush3.msra.mxu1 %v523_v20  ;;  %3489 = vmatprep.subr.mxu0 %v505_v21  ;;  %v514_v61 = vld [vmem:[%s6510_s1 + $0xf00] sm:$0xff]  ;;  %v576_v0 = vld [vmem:[%s6510_s1 + $0x10f0] sm:$0xff]  ;;  %v609_v1 = vld [vmem:[%s6510_s1 + $0x11f8] sm:$0xff] }
 0x101   :  { %3522 = vmatprep.subr.mxu1 %v538_v22  ;;  %3490 = vmatpush3.msra.mxu0 %v489_v23  ;;  %v560_v2 = vld [vmem:[%s6510_s1 + $0x1070] sm:$0xff]  ;;  %v593_v3 = vld [vmem:[%s6510_s1 + $0x1178] sm:$0xff]  ;;  %v575_v4 = vld [vmem:[%s6510_s1 + $0x10e8] sm:$0xff] }
 0x102   :  { %3523 = vmatpush3.msra.mxu1 %v522_v24  ;;  %3491 = vmatprep.subr.mxu0 %v504_v25  ;;  %v608_v5 = vld [vmem:[%s6510_s1 + $0x11f0] sm:$0xff]  ;;  %v559_v6 = vld [vmem:[%s6510_s1 + $0x1068] sm:$0xff]  ;;  %v574_v8 = vld [vmem:[%s6510_s1 + $0x10e0] sm:$0xff] }
 0x103   :  { %3524 = vmatprep.subr.mxu1 %v537_v26  ;;  %3492 = vmatpush3.msra.mxu0 %v488_v27  ;;  %v592_v7 = vld [vmem:[%s6510_s1 + $0x1170] sm:$0xff]  ;;  %v607_v9 = vld [vmem:[%s6510_s1 + $0x11e8] sm:$0xff]  ;;  %v558_v10 = vld [vmem:[%s6510_s1 + $0x1060] sm:$0xff] }
 0x104   :  { %3525 = vmatpush3.msra.mxu1 %v521_v28  ;;  %3493 = vmatprep.subr.mxu0 %v503_v29  ;;  %v591_v11 = vld [vmem:[%s6510_s1 + $0x1168] sm:$0xff]  ;;  %v573_v12 = vld [vmem:[%s6510_s1 + $0x10d8] sm:$0xff]  ;;  %v606_v13 = vld [vmem:[%s6510_s1 + $0x11e0] sm:$0xff] }
 0x105   :  { %3526 = vmatprep.subr.mxu1 %v536_v30  ;;  %3494 = vmatpush3.msra.mxu0 %v487_v31  ;;  %v557_v14 = vld [vmem:[%s6510_s1 + $0x1058] sm:$0xff]  ;;  %v590_v15 = vld [vmem:[%s6510_s1 + $0x1160] sm:$0xff]  ;;  %v572_v16 = vld [vmem:[%s6510_s1 + $0x10d0] sm:$0xff] }
 0x106   :  { %3527 = vmatpush3.msra.mxu1 %v520_v32  ;;  %3495 = vmatprep.subr.mxu0 %v502_v33  ;;  %v605_v17 = vld [vmem:[%s6510_s1 + $0x11d8] sm:$0xff]  ;;  %v556_v18 = vld [vmem:[%s6510_s1 + $0x1050] sm:$0xff]  ;;  %v571_v20 = vld [vmem:[%s6510_s1 + $0x10c8] sm:$0xff] }
 0x107   :  { %3528 = vmatprep.subr.mxu1 %v535_v34  ;;  %3496 = vmatpush3.msra.mxu0 %v486_v35  ;;  %v589_v19 = vld [vmem:[%s6510_s1 + $0x1158] sm:$0xff]  ;;  %v604_v21 = vld [vmem:[%s6510_s1 + $0x11d0] sm:$0xff]  ;;  %v555_v22 = vld [vmem:[%s6510_s1 + $0x1048] sm:$0xff] }
 0x108   :  { %3529 = vmatpush3.msra.mxu1 %v519_v37  ;;  %3497 = vmatprep.subr.mxu0 %v501_v38  ;;  %v588_v23 = vld [vmem:[%s6510_s1 + $0x1150] sm:$0xff]  ;;  %v570_v24 = vld [vmem:[%s6510_s1 + $0x10c0] sm:$0xff]  ;;  %v603_v25 = vld [vmem:[%s6510_s1 + $0x11c8] sm:$0xff] }
 0x109   :  { %3530 = vmatprep.subr.mxu1 %v534_v39  ;;  %3498 = vmatpush3.msra.mxu0 %v485_v40  ;;  %v554_v26 = vld [vmem:[%s6510_s1 + $0x1040] sm:$0xff]  ;;  %v587_v27 = vld [vmem:[%s6510_s1 + $0x1148] sm:$0xff]  ;;  %v569_v28 = vld [vmem:[%s6510_s1 + $0x10b8] sm:$0xff] }
 0x10a   :  { %3531 = vmatpush3.msra.mxu1 %v518_v41  ;;  %3499 = vmatprep.subr.mxu0 %v500_v42  ;;  %v602_v29 = vld [vmem:[%s6510_s1 + $0x11c0] sm:$0xff]  ;;  %v553_v30 = vld [vmem:[%s6510_s1 + $0x1038] sm:$0xff]  ;;  %v568_v32 = vld [vmem:[%s6510_s1 + $0x10b0] sm:$0xff] }
 0x10b   :  { %3532 = vmatprep.subr.mxu1 %v533_v44  ;;  %3500 = vmatpush3.msra.mxu0 %v484_v45  ;;  %v586_v31 = vld [vmem:[%s6510_s1 + $0x1140] sm:$0xff]  ;;  %v601_v33 = vld [vmem:[%s6510_s1 + $0x11b8] sm:$0xff]  ;;  %v552_v34 = vld [vmem:[%s6510_s1 + $0x1030] sm:$0xff] }
 0x10c   :  { %3533 = vmatpush3.msra.mxu1 %v517_v47  ;;  %3501 = vmatprep.subr.mxu0 %v499_v49  ;;  %v585_v35 = vld [vmem:[%s6510_s1 + $0x1138] sm:$0xff]  ;;  %v567_v36 = vld [vmem:[%s6510_s1 + $0x10a8] sm:$0xff]  ;;  %v600_v37 = vld [vmem:[%s6510_s1 + $0x11b0] sm:$0xff] }
 0x10d   :  { %3534 = vmatprep.subr.mxu1 %v532_v50  ;;  %3502 = vmatpush3.msra.mxu0 %v483_v51  ;;  %v551_v38 = vld [vmem:[%s6510_s1 + $0x1028] sm:$0xff]  ;;  %v584_v39 = vld [vmem:[%s6510_s1 + $0x1130] sm:$0xff]  ;;  %v566_v40 = vld [vmem:[%s6510_s1 + $0x10a0] sm:$0xff] }
 0x10e   :  { %3535 = vmatpush3.msra.mxu1 %v516_v52  ;;  %3503 = vmatprep.subr.mxu0 %v498_v53  ;;  %v599_v41 = vld [vmem:[%s6510_s1 + $0x11a8] sm:$0xff]  ;;  %v550_v42 = vld [vmem:[%s6510_s1 + $0x1020] sm:$0xff]  ;;  %v565_v45 = vld [vmem:[%s6510_s1 + $0x1098] sm:$0xff] }
 0x10f   :  { %3536 = vmatprep.subr.mxu1 %v531_v55  ;;  %3504 = vmatpush3.msra.mxu0 %v482_v56  ;;  %v29_v43 = vld [vmem:[%s6509_s0 + $0x40] sm:$0xff]  ;;  %v583_v44 = vld [vmem:[%s6510_s1 + $0x1128] sm:$0xff]  ;;  %v549_v47 = vld [vmem:[%s6510_s1 + $0x1018] sm:$0xff] }
 0x110   :  { %2142 = vmatprep.mubr.f32.mxu0 %v972_v57  ;;  %3537 = vmatpush3.msra.mxu1 %v515_v58  ;;  %v582_v49 = vld [vmem:[%s6510_s1 + $0x1120] sm:$0xff]  ;;  %v564_v50 = vld [vmem:[%s6510_s1 + $0x1090] sm:$0xff]  ;;  %v974_v51 = vcombine.high %v29_v43, %v29_v43  ;;  %v597_v52 = vld [vmem:[%s6510_s1 + $0x1198] sm:$0xff] }
 0x111   :  { %2143 = vmatmul.mubr.f32.vlgmr.msra.gmra.mxu0 %v964_v46  ;;  %3538 = vmatprep.subr.mxu1 %v530_v59  ;;  %v598_v46 = vld [vmem:[%s6510_s1 + $0x11a0] sm:$0xff]  ;;  %v548_v53 = vld [vmem:[%s6510_s1 + $0x1010] sm:$0xff]  ;;  %v581_v55 = vld [vmem:[%s6510_s1 + $0x1118] sm:$0xff] }
 0x112   :  { %3543 = vmatprep.subr.mxu0 %v577_v60  ;;  %3539 = vmatpush3.msra.mxu1 %v514_v61  ;;  %v563_v56 = vld [vmem:[%s6510_s1 + $0x1088] sm:$0xff]  ;;  %v596_v57 = vld [vmem:[%s6510_s1 + $0x1190] sm:$0xff]  ;;  %v562_v60 = vld [vmem:[%s6510_s1 + $0x1080] sm:$0xff]  ;;  %v988_v61 = vrot.slane %v974_v51, %v4130_v48 }
 0x113   :  { %2212 = vmatprep.mubr.f32.mxu1 %v973_v62  ;;  %3544 = vmatpush3.msra.mxu0 %v561_v63  ;;  %v547_v58 = vld [vmem:[%s6510_s1 + $0x1008] sm:$0xff]  ;;  %v580_v59 = vld [vmem:[%s6510_s1 + $0x1110] sm:$0xff]  ;;  %v546_v63 = vld [vmem:[%s6510_s1 + $0x1000] sm:$0xff] }
 0x114   :  { %2213 = vmatmul.mubr.f32.vlgmr.msra.gmra.mxu1 %v971_v54  ;;  %3545 = vmatprep.subr.mxu0 %v576_v0  ;;  %v981_v54 = vrot.slane %v29_v43, %v4130_v48  ;;  %v595_v62 = vld [vmem:[%s6510_s1 + $0x1188] sm:$0xff] }
 0x115   :  { %3578 = vmatprep.subr.mxu1 %v609_v1  ;;  %3546 = vmatpush3.msra.mxu0 %v560_v2  ;;  %v579_v1 = vld [vmem:[%s6510_s1 + $0x1108] sm:$0xff]  ;;  %v594_v2 = vld [vmem:[%s6510_s1 + $0x1180] sm:$0xff] }
 0x116   :  { %3579 = vmatpush3.msra.mxu1 %v593_v3  ;;  %3547 = vmatprep.subr.mxu0 %v575_v4  ;;  %v989_v0 = vcombine.high %v981_v54, %v981_v54  ;;  %v641_v3 = vld [vmem:[%s6510_s1 + $0x12f8] sm:$0xff]  ;;  %v578_v4 = vld [vmem:[%s6510_s1 + $0x1100] sm:$0xff]  ;;  %v631_v43 = vld [vmem:[%s6510_s1 + $0x12a8] sm:$0xff] }
 0x117   :  { %3580 = vmatprep.subr.mxu1 %v608_v5  ;;  %3548 = vmatpush3.msra.mxu0 %v559_v6  ;;  %v990_v5 = vcombine.high %v988_v61, %v988_v61  ;;  %v625_v6 = vld [vmem:[%s6510_s1 + $0x1278] sm:$0xff]  ;;  %v30_v51 = vld [vmem:[%s6509_s0 + $0x48] sm:$0xff] }
 0x118   :  { %3581 = vmatpush3.msra.mxu1 %v592_v7  ;;  %3549 = vmatprep.subr.mxu0 %v574_v8  ;;  %v640_v7 = vld [vmem:[%s6510_s1 + $0x12f0] sm:$0xff]  ;;  %v673_v8 = vld [vmem:[%s6510_s1 + $0x13f8] sm:$0xff] }
 0x119   :  { %3582 = vmatprep.subr.mxu1 %v607_v9  ;;  %3550 = vmatpush3.msra.mxu0 %v558_v10  ;;  %v624_v9 = vld [vmem:[%s6510_s1 + $0x1270] sm:$0xff]  ;;  %v657_v10 = vld [vmem:[%s6510_s1 + $0x1378] sm:$0xff] }
 0x11a   :  { %3583 = vmatpush3.msra.mxu1 %v591_v11  ;;  %3551 = vmatprep.subr.mxu0 %v573_v12  ;;  %v639_v11 = vld [vmem:[%s6510_s1 + $0x12e8] sm:$0xff]  ;;  %v672_v12 = vld [vmem:[%s6510_s1 + $0x13f0] sm:$0xff] }
 0x11b   :  { %3584 = vmatprep.subr.mxu1 %v606_v13  ;;  %3552 = vmatpush3.msra.mxu0 %v557_v14  ;;  %v623_v13 = vld [vmem:[%s6510_s1 + $0x1268] sm:$0xff]  ;;  %v656_v14 = vld [vmem:[%s6510_s1 + $0x1370] sm:$0xff] }
 0x11c   :  { %3585 = vmatpush3.msra.mxu1 %v590_v15  ;;  %3553 = vmatprep.subr.mxu0 %v572_v16  ;;  %v638_v15 = vld [vmem:[%s6510_s1 + $0x12e0] sm:$0xff]  ;;  %v671_v16 = vld [vmem:[%s6510_s1 + $0x13e8] sm:$0xff] }
 0x11d   :  { %3586 = vmatprep.subr.mxu1 %v605_v17  ;;  %3554 = vmatpush3.msra.mxu0 %v556_v18  ;;  %v622_v17 = vld [vmem:[%s6510_s1 + $0x1260] sm:$0xff]  ;;  %v655_v18 = vld [vmem:[%s6510_s1 + $0x1368] sm:$0xff] }
 0x11e   :  { %3587 = vmatpush3.msra.mxu1 %v589_v19  ;;  %3555 = vmatprep.subr.mxu0 %v571_v20  ;;  %v637_v19 = vld [vmem:[%s6510_s1 + $0x12d8] sm:$0xff]  ;;  %v670_v20 = vld [vmem:[%s6510_s1 + $0x13e0] sm:$0xff] }
 0x11f   :  { %3588 = vmatprep.subr.mxu1 %v604_v21  ;;  %3556 = vmatpush3.msra.mxu0 %v555_v22  ;;  %v621_v21 = vld [vmem:[%s6510_s1 + $0x1258] sm:$0xff]  ;;  %v654_v22 = vld [vmem:[%s6510_s1 + $0x1360] sm:$0xff] }
 0x120   :  { %3589 = vmatpush3.msra.mxu1 %v588_v23  ;;  %3557 = vmatprep.subr.mxu0 %v570_v24  ;;  %v636_v23 = vld [vmem:[%s6510_s1 + $0x12d0] sm:$0xff]  ;;  %v669_v24 = vld [vmem:[%s6510_s1 + $0x13d8] sm:$0xff] }
 0x121   :  { %3590 = vmatprep.subr.mxu1 %v603_v25  ;;  %3558 = vmatpush3.msra.mxu0 %v554_v26  ;;  %v620_v25 = vld [vmem:[%s6510_s1 + $0x1250] sm:$0xff]  ;;  %v653_v26 = vld [vmem:[%s6510_s1 + $0x1358] sm:$0xff] }
 0x122   :  { %3591 = vmatpush3.msra.mxu1 %v587_v27  ;;  %3559 = vmatprep.subr.mxu0 %v569_v28  ;;  %v635_v27 = vld [vmem:[%s6510_s1 + $0x12c8] sm:$0xff]  ;;  %v668_v28 = vld [vmem:[%s6510_s1 + $0x13d0] sm:$0xff] }
 0x123   :  { %3592 = vmatprep.subr.mxu1 %v602_v29  ;;  %3560 = vmatpush3.msra.mxu0 %v553_v30  ;;  %v619_v29 = vld [vmem:[%s6510_s1 + $0x1248] sm:$0xff]  ;;  %v652_v30 = vld [vmem:[%s6510_s1 + $0x1350] sm:$0xff] }
 0x124   :  { %3593 = vmatpush3.msra.mxu1 %v586_v31  ;;  %3561 = vmatprep.subr.mxu0 %v568_v32  ;;  %v634_v31 = vld [vmem:[%s6510_s1 + $0x12c0] sm:$0xff]  ;;  %v667_v32 = vld [vmem:[%s6510_s1 + $0x13c8] sm:$0xff] }
 0x125   :  { %3594 = vmatprep.subr.mxu1 %v601_v33  ;;  %3562 = vmatpush3.msra.mxu0 %v552_v34  ;;  %v618_v33 = vld [vmem:[%s6510_s1 + $0x1240] sm:$0xff]  ;;  %v651_v34 = vld [vmem:[%s6510_s1 + $0x1348] sm:$0xff] }
 0x126   :  { %3595 = vmatpush3.msra.mxu1 %v585_v35  ;;  %3563 = vmatprep.subr.mxu0 %v567_v36  ;;  %v633_v35 = vld [vmem:[%s6510_s1 + $0x12b8] sm:$0xff]  ;;  %v666_v36 = vld [vmem:[%s6510_s1 + $0x13c0] sm:$0xff] }
 0x127   :  { %3596 = vmatprep.subr.mxu1 %v600_v37  ;;  %3564 = vmatpush3.msra.mxu0 %v551_v38  ;;  %v617_v37 = vld [vmem:[%s6510_s1 + $0x1238] sm:$0xff]  ;;  %v650_v38 = vld [vmem:[%s6510_s1 + $0x1340] sm:$0xff] }
 0x128   :  { %3597 = vmatpush3.msra.mxu1 %v584_v39  ;;  %3565 = vmatprep.subr.mxu0 %v566_v40  ;;  %v632_v39 = vld [vmem:[%s6510_s1 + $0x12b0] sm:$0xff]  ;;  %v665_v40 = vld [vmem:[%s6510_s1 + $0x13b8] sm:$0xff] }
 0x129   :  { %3598 = vmatprep.subr.mxu1 %v599_v41  ;;  %3566 = vmatpush3.msra.mxu0 %v550_v42  ;;  %v616_v41 = vld [vmem:[%s6510_s1 + $0x1230] sm:$0xff]  ;;  %v649_v42 = vld [vmem:[%s6510_s1 + $0x1338] sm:$0xff] }
 0x12a   :  { %3599 = vmatpush3.msra.mxu1 %v583_v44  ;;  %3567 = vmatprep.subr.mxu0 %v565_v45  ;;  %v664_v44 = vld [vmem:[%s6510_s1 + $0x13b0] sm:$0xff]  ;;  %v615_v45 = vld [vmem:[%s6510_s1 + $0x1228] sm:$0xff] }
 0x12b   :  { %3600 = vmatprep.subr.mxu1 %v598_v46  ;;  %3568 = vmatpush3.msra.mxu0 %v549_v47  ;;  %v648_v46 = vld [vmem:[%s6510_s1 + $0x1330] sm:$0xff]  ;;  %v630_v47 = vld [vmem:[%s6510_s1 + $0x12a0] sm:$0xff] }
 0x12c   :  { %3601 = vmatpush3.msra.mxu1 %v582_v49  ;;  %3569 = vmatprep.subr.mxu0 %v564_v50  ;;  %v663_v49 = vld [vmem:[%s6510_s1 + $0x13a8] sm:$0xff]  ;;  %v614_v50 = vld [vmem:[%s6510_s1 + $0x1220] sm:$0xff] }
 0x12d   :  { %3602 = vmatprep.subr.mxu1 %v597_v52  ;;  %3570 = vmatpush3.msra.mxu0 %v548_v53  ;;  %v647_v52 = vld [vmem:[%s6510_s1 + $0x1328] sm:$0xff]  ;;  %v629_v53 = vld [vmem:[%s6510_s1 + $0x1298] sm:$0xff] }
 0x12e   :  { %3603 = vmatpush3.msra.mxu1 %v581_v55  ;;  %3571 = vmatprep.subr.mxu0 %v563_v56  ;;  %v613_v55 = vld [vmem:[%s6510_s1 + $0x1218] sm:$0xff]  ;;  %v646_v56 = vld [vmem:[%s6510_s1 + $0x1320] sm:$0xff] }
 0x12f   :  { %3604 = vmatprep.subr.mxu1 %v596_v57  ;;  %3572 = vmatpush3.msra.mxu0 %v547_v58  ;;  %v628_v57 = vld [vmem:[%s6510_s1 + $0x1290] sm:$0xff]  ;;  %v991_v58 = vcombine.high %v30_v51, %v30_v51 }
 0x130   :  { %3605 = vmatpush3.msra.mxu1 %v580_v59  ;;  %3573 = vmatprep.subr.mxu0 %v562_v60  ;;  %v661_v59 = vld [vmem:[%s6510_s1 + $0x1398] sm:$0xff]  ;;  %v612_v60 = vld [vmem:[%s6510_s1 + $0x1210] sm:$0xff] }
 0x131   :  { %3606 = vmatprep.subr.mxu1 %v595_v62  ;;  %3574 = vmatpush3.msra.mxu0 %v546_v63  ;;  %v645_v62 = vld [vmem:[%s6510_s1 + $0x1318] sm:$0xff]  ;;  %v627_v63 = vld [vmem:[%s6510_s1 + $0x1288] sm:$0xff] }
 0x132   :  { %2282 = vmatprep.mubr.f32.mxu0 %v989_v0  ;;  %3607 = vmatpush3.msra.mxu1 %v579_v1  ;;  %v660_v0 = vld [vmem:[%s6510_s1 + $0x1390] sm:$0xff]  ;;  %v611_v1 = vld [vmem:[%s6510_s1 + $0x1208] sm:$0xff] }
 0x133   :  { %2283 = vmatmul.mubr.f32.vlgmr.msra.gmra.mxu0 %v981_v54  ;;  %3608 = vmatprep.subr.mxu1 %v594_v2  ;;  %v662_v54 = vld [vmem:[%s6510_s1 + $0x13a0] sm:$0xff]  ;;  %v644_v2 = vld [vmem:[%s6510_s1 + $0x1310] sm:$0xff] }
 0x134   :  { %3613 = vmatprep.subr.mxu0 %v641_v3  ;;  %3609 = vmatpush3.msra.mxu1 %v578_v4  ;;  %v626_v3 = vld [vmem:[%s6510_s1 + $0x1280] sm:$0xff]  ;;  %v1005_v4 = vrot.slane %v991_v58, %v4130_v48  ;;  %v31_v58 = vld [vmem:[%s6509_s0 + $0x50] sm:$0xff] }
 0x135   :  { %2352 = vmatprep.mubr.f32.mxu1 %v990_v5  ;;  %3614 = vmatpush3.msra.mxu0 %v625_v6  ;;  %v659_v5 = vld [vmem:[%s6510_s1 + $0x1388] sm:$0xff]  ;;  %v610_v6 = vld [vmem:[%s6510_s1 + $0x1200] sm:$0xff] }
 0x136   :  { %2353 = vmatmul.mubr.f32.vlgmr.msra.gmra.mxu1 %v988_v61  ;;  %3615 = vmatprep.subr.mxu0 %v640_v7  ;;  %v998_v61 = vrot.slane %v30_v51, %v4130_v48  ;;  %v695_v51 = vld [vmem:[%s6510_s1 + $0x14a8] sm:$0xff] }
 0x137   :  { %3648 = vmatprep.subr.mxu1 %v673_v8  ;;  %3616 = vmatpush3.msra.mxu0 %v624_v9  ;;  %v643_v8 = vld [vmem:[%s6510_s1 + $0x1308] sm:$0xff]  ;;  %v658_v9 = vld [vmem:[%s6510_s1 + $0x1380] sm:$0xff] }
 0x138   :  { %3649 = vmatpush3.msra.mxu1 %v657_v10  ;;  %3617 = vmatprep.subr.mxu0 %v639_v11  ;;  %v1006_v7 = vcombine.high %v998_v61, %v998_v61  ;;  %v705_v10 = vld [vmem:[%s6510_s1 + $0x14f8] sm:$0xff]  ;;  %v642_v11 = vld [vmem:[%s6510_s1 + $0x1300] sm:$0xff] }
 0x139   :  { %3650 = vmatprep.subr.mxu1 %v672_v12  ;;  %3618 = vmatpush3.msra.mxu0 %v623_v13  ;;  %v1007_v12 = vcombine.high %v1005_v4, %v1005_v4  ;;  %v689_v13 = vld [vmem:[%s6510_s1 + $0x1478] sm:$0xff] }
 0x13a   :  { %3651 = vmatpush3.msra.mxu1 %v656_v14  ;;  %3619 = vmatprep.subr.mxu0 %v638_v15  ;;  %v704_v14 = vld [vmem:[%s6510_s1 + $0x14f0] sm:$0xff]  ;;  %v737_v15 = vld [vmem:[%s6510_s1 + $0x15f8] sm:$0xff] }
 0x13b   :  { %3652 = vmatprep.subr.mxu1 %v671_v16  ;;  %3620 = vmatpush3.msra.mxu0 %v622_v17  ;;  %v688_v16 = vld [vmem:[%s6510_s1 + $0x1470] sm:$0xff]  ;;  %v721_v17 = vld [vmem:[%s6510_s1 + $0x1578] sm:$0xff] }
 0x13c   :  { %3653 = vmatpush3.msra.mxu1 %v655_v18  ;;  %3621 = vmatprep.subr.mxu0 %v637_v19  ;;  %v703_v18 = vld [vmem:[%s6510_s1 + $0x14e8] sm:$0xff]  ;;  %v736_v19 = vld [vmem:[%s6510_s1 + $0x15f0] sm:$0xff] }
 0x13d   :  { %3654 = vmatprep.subr.mxu1 %v670_v20  ;;  %3622 = vmatpush3.msra.mxu0 %v621_v21  ;;  %v687_v20 = vld [vmem:[%s6510_s1 + $0x1468] sm:$0xff]  ;;  %v720_v21 = vld [vmem:[%s6510_s1 + $0x1570] sm:$0xff] }
 0x13e   :  { %3655 = vmatpush3.msra.mxu1 %v654_v22  ;;  %3623 = vmatprep.subr.mxu0 %v636_v23  ;;  %v702_v22 = vld [vmem:[%s6510_s1 + $0x14e0] sm:$0xff]  ;;  %v735_v23 = vld [vmem:[%s6510_s1 + $0x15e8] sm:$0xff] }
 0x13f   :  { %3656 = vmatprep.subr.mxu1 %v669_v24  ;;  %3624 = vmatpush3.msra.mxu0 %v620_v25  ;;  %v686_v24 = vld [vmem:[%s6510_s1 + $0x1460] sm:$0xff]  ;;  %v719_v25 = vld [vmem:[%s6510_s1 + $0x1568] sm:$0xff] }
 0x140   :  { %3657 = vmatpush3.msra.mxu1 %v653_v26  ;;  %3625 = vmatprep.subr.mxu0 %v635_v27  ;;  %v701_v26 = vld [vmem:[%s6510_s1 + $0x14d8] sm:$0xff]  ;;  %v734_v27 = vld [vmem:[%s6510_s1 + $0x15e0] sm:$0xff] }
 0x141   :  { %3658 = vmatprep.subr.mxu1 %v668_v28  ;;  %3626 = vmatpush3.msra.mxu0 %v619_v29  ;;  %v685_v28 = vld [vmem:[%s6510_s1 + $0x1458] sm:$0xff]  ;;  %v718_v29 = vld [vmem:[%s6510_s1 + $0x1560] sm:$0xff] }
 0x142   :  { %3659 = vmatpush3.msra.mxu1 %v652_v30  ;;  %3627 = vmatprep.subr.mxu0 %v634_v31  ;;  %v700_v30 = vld [vmem:[%s6510_s1 + $0x14d0] sm:$0xff]  ;;  %v733_v31 = vld [vmem:[%s6510_s1 + $0x15d8] sm:$0xff] }
 0x143   :  { %3660 = vmatprep.subr.mxu1 %v667_v32  ;;  %3628 = vmatpush3.msra.mxu0 %v618_v33  ;;  %v684_v32 = vld [vmem:[%s6510_s1 + $0x1450] sm:$0xff]  ;;  %v717_v33 = vld [vmem:[%s6510_s1 + $0x1558] sm:$0xff] }
 0x144   :  { %3661 = vmatpush3.msra.mxu1 %v651_v34  ;;  %3629 = vmatprep.subr.mxu0 %v633_v35  ;;  %v699_v34 = vld [vmem:[%s6510_s1 + $0x14c8] sm:$0xff]  ;;  %v732_v35 = vld [vmem:[%s6510_s1 + $0x15d0] sm:$0xff] }
 0x145   :  { %3662 = vmatprep.subr.mxu1 %v666_v36  ;;  %3630 = vmatpush3.msra.mxu0 %v617_v37  ;;  %v683_v36 = vld [vmem:[%s6510_s1 + $0x1448] sm:$0xff]  ;;  %v716_v37 = vld [vmem:[%s6510_s1 + $0x1550] sm:$0xff] }
 0x146   :  { %3663 = vmatpush3.msra.mxu1 %v650_v38  ;;  %3631 = vmatprep.subr.mxu0 %v632_v39  ;;  %v698_v38 = vld [vmem:[%s6510_s1 + $0x14c0] sm:$0xff]  ;;  %v731_v39 = vld [vmem:[%s6510_s1 + $0x15c8] sm:$0xff] }
 0x147   :  { %3664 = vmatprep.subr.mxu1 %v665_v40  ;;  %3632 = vmatpush3.msra.mxu0 %v616_v41  ;;  %v682_v40 = vld [vmem:[%s6510_s1 + $0x1440] sm:$0xff]  ;;  %v715_v41 = vld [vmem:[%s6510_s1 + $0x1548] sm:$0xff] }
 0x148   :  { %3665 = vmatpush3.msra.mxu1 %v649_v42  ;;  %3633 = vmatprep.subr.mxu0 %v631_v43  ;;  %v697_v42 = vld [vmem:[%s6510_s1 + $0x14b8] sm:$0xff]  ;;  %v730_v43 = vld [vmem:[%s6510_s1 + $0x15c0] sm:$0xff] }
 0x149   :  { %3666 = vmatprep.subr.mxu1 %v664_v44  ;;  %3634 = vmatpush3.msra.mxu0 %v615_v45  ;;  %v681_v44 = vld [vmem:[%s6510_s1 + $0x1438] sm:$0xff]  ;;  %v714_v45 = vld [vmem:[%s6510_s1 + $0x1540] sm:$0xff] }
 0x14a   :  { %3667 = vmatpush3.msra.mxu1 %v648_v46  ;;  %3635 = vmatprep.subr.mxu0 %v630_v47  ;;  %v696_v46 = vld [vmem:[%s6510_s1 + $0x14b0] sm:$0xff]  ;;  %v729_v47 = vld [vmem:[%s6510_s1 + $0x15b8] sm:$0xff] }
 0x14b   :  { %3668 = vmatprep.subr.mxu1 %v663_v49  ;;  %3636 = vmatpush3.msra.mxu0 %v614_v50  ;;  %v680_v49 = vld [vmem:[%s6510_s1 + $0x1430] sm:$0xff]  ;;  %v713_v50 = vld [vmem:[%s6510_s1 + $0x1538] sm:$0xff] }
 0x14c   :  { %3669 = vmatpush3.msra.mxu1 %v647_v52  ;;  %3637 = vmatprep.subr.mxu0 %v629_v53  ;;  %v728_v52 = vld [vmem:[%s6510_s1 + $0x15b0] sm:$0xff]  ;;  %v679_v53 = vld [vmem:[%s6510_s1 + $0x1428] sm:$0xff] }
 0x14d   :  { %3670 = vmatprep.subr.mxu1 %v662_v54  ;;  %3638 = vmatpush3.msra.mxu0 %v613_v55  ;;  %v712_v54 = vld [vmem:[%s6510_s1 + $0x1530] sm:$0xff]  ;;  %v694_v55 = vld [vmem:[%s6510_s1 + $0x14a0] sm:$0xff] }
 0x14e   :  { %3671 = vmatpush3.msra.mxu1 %v646_v56  ;;  %3639 = vmatprep.subr.mxu0 %v628_v57  ;;  %v727_v56 = vld [vmem:[%s6510_s1 + $0x15a8] sm:$0xff]  ;;  %v678_v57 = vld [vmem:[%s6510_s1 + $0x1420] sm:$0xff] }
 0x14f   :  { %3672 = vmatprep.subr.mxu1 %v661_v59  ;;  %3640 = vmatpush3.msra.mxu0 %v612_v60  ;;  %v711_v59 = vld [vmem:[%s6510_s1 + $0x1528] sm:$0xff]  ;;  %v693_v60 = vld [vmem:[%s6510_s1 + $0x1498] sm:$0xff] }
 0x150   :  { %3673 = vmatpush3.msra.mxu1 %v645_v62  ;;  %3641 = vmatprep.subr.mxu0 %v627_v63  ;;  %v677_v62 = vld [vmem:[%s6510_s1 + $0x1418] sm:$0xff]  ;;  %v710_v63 = vld [vmem:[%s6510_s1 + $0x1520] sm:$0xff] }
 0x151   :  { %3674 = vmatprep.subr.mxu1 %v660_v0  ;;  %3642 = vmatpush3.msra.mxu0 %v611_v1  ;;  %v692_v0 = vld [vmem:[%s6510_s1 + $0x1490] sm:$0xff]  ;;  %v1008_v1 = vcombine.high %v31_v58, %v31_v58 }
 0x152   :  { %3675 = vmatpush3.msra.mxu1 %v644_v2  ;;  %3643 = vmatprep.subr.mxu0 %v626_v3  ;;  %v725_v2 = vld [vmem:[%s6510_s1 + $0x1598] sm:$0xff]  ;;  %v676_v3 = vld [vmem:[%s6510_s1 + $0x1410] sm:$0xff] }
 0x153   :  { %3676 = vmatprep.subr.mxu1 %v659_v5  ;;  %3644 = vmatpush3.msra.mxu0 %v610_v6  ;;  %v709_v5 = vld [vmem:[%s6510_s1 + $0x1518] sm:$0xff]  ;;  %v691_v6 = vld [vmem:[%s6510_s1 + $0x1488] sm:$0xff] }
 0x154   :  { %2422 = vmatprep.mubr.f32.mxu0 %v1006_v7  ;;  %3677 = vmatpush3.msra.mxu1 %v643_v8  ;;  %v724_v7 = vld [vmem:[%s6510_s1 + $0x1590] sm:$0xff]  ;;  %v675_v8 = vld [vmem:[%s6510_s1 + $0x1408] sm:$0xff] }
 0x155   :  { %2423 = vmatmul.mubr.f32.vlgmr.msra.gmra.mxu0 %v998_v61  ;;  %3678 = vmatprep.subr.mxu1 %v658_v9  ;;  %v726_v61 = vld [vmem:[%s6510_s1 + $0x15a0] sm:$0xff]  ;;  %v708_v9 = vld [vmem:[%s6510_s1 + $0x1510] sm:$0xff] }
 0x156   :  { %3683 = vmatprep.subr.mxu0 %v705_v10  ;;  %3679 = vmatpush3.msra.mxu1 %v642_v11  ;;  %v690_v10 = vld [vmem:[%s6510_s1 + $0x1480] sm:$0xff]  ;;  %v1022_v11 = vrot.slane %v1008_v1, %v4130_v48  ;;  %v32_v1 = vld [vmem:[%s6509_s0 + $0x58] sm:$0xff] }
 0x157   :  { %2492 = vmatprep.mubr.f32.mxu1 %v1007_v12  ;;  %3684 = vmatpush3.msra.mxu0 %v689_v13  ;;  %v723_v12 = vld [vmem:[%s6510_s1 + $0x1588] sm:$0xff]  ;;  %v674_v13 = vld [vmem:[%s6510_s1 + $0x1400] sm:$0xff] }
 0x158   :  { %2493 = vmatmul.mubr.f32.vlgmr.msra.gmra.mxu1 %v1005_v4  ;;  %3685 = vmatprep.subr.mxu0 %v704_v14  ;;  %v1015_v4 = vrot.slane %v31_v58, %v4130_v48  ;;  %v759_v58 = vld [vmem:[%s6510_s1 + $0x16a8] sm:$0xff] }
 0x159   :  { %3718 = vmatprep.subr.mxu1 %v737_v15  ;;  %3686 = vmatpush3.msra.mxu0 %v688_v16  ;;  %v707_v15 = vld [vmem:[%s6510_s1 + $0x1508] sm:$0xff]  ;;  %v722_v16 = vld [vmem:[%s6510_s1 + $0x1580] sm:$0xff] }
 0x15a   :  { %3719 = vmatpush3.msra.mxu1 %v721_v17  ;;  %3687 = vmatprep.subr.mxu0 %v703_v18  ;;  %v1023_v14 = vcombine.high %v1015_v4, %v1015_v4  ;;  %v769_v17 = vld [vmem:[%s6510_s1 + $0x16f8] sm:$0xff]  ;;  %v706_v18 = vld [vmem:[%s6510_s1 + $0x1500] sm:$0xff] }
 0x15b   :  { %3720 = vmatprep.subr.mxu1 %v736_v19  ;;  %3688 = vmatpush3.msra.mxu0 %v687_v20  ;;  %v1024_v19 = vcombine.high %v1022_v11, %v1022_v11  ;;  %v753_v20 = vld [vmem:[%s6510_s1 + $0x1678] sm:$0xff] }
 0x15c   :  { %3721 = vmatpush3.msra.mxu1 %v720_v21  ;;  %3689 = vmatprep.subr.mxu0 %v702_v22  ;;  %v768_v21 = vld [vmem:[%s6510_s1 + $0x16f0] sm:$0xff]  ;;  %v801_v22 = vld [vmem:[%s6510_s1 + $0x17f8] sm:$0xff] }
 0x15d   :  { %3722 = vmatprep.subr.mxu1 %v735_v23  ;;  %3690 = vmatpush3.msra.mxu0 %v686_v24  ;;  %v752_v23 = vld [vmem:[%s6510_s1 + $0x1670] sm:$0xff]  ;;  %v785_v24 = vld [vmem:[%s6510_s1 + $0x1778] sm:$0xff] }
 0x15e   :  { %3723 = vmatpush3.msra.mxu1 %v719_v25  ;;  %3691 = vmatprep.subr.mxu0 %v701_v26  ;;  %v767_v25 = vld [vmem:[%s6510_s1 + $0x16e8] sm:$0xff]  ;;  %v800_v26 = vld [vmem:[%s6510_s1 + $0x17f0] sm:$0xff] }
 0x15f   :  { %3724 = vmatprep.subr.mxu1 %v734_v27  ;;  %3692 = vmatpush3.msra.mxu0 %v685_v28  ;;  %v751_v27 = vld [vmem:[%s6510_s1 + $0x1668] sm:$0xff]  ;;  %v784_v28 = vld [vmem:[%s6510_s1 + $0x1770] sm:$0xff] }
 0x160   :  { %3725 = vmatpush3.msra.mxu1 %v718_v29  ;;  %3693 = vmatprep.subr.mxu0 %v700_v30  ;;  %v766_v29 = vld [vmem:[%s6510_s1 + $0x16e0] sm:$0xff]  ;;  %v799_v30 = vld [vmem:[%s6510_s1 + $0x17e8] sm:$0xff] }
 0x161   :  { %3726 = vmatprep.subr.mxu1 %v733_v31  ;;  %3694 = vmatpush3.msra.mxu0 %v684_v32  ;;  %v750_v31 = vld [vmem:[%s6510_s1 + $0x1660] sm:$0xff]  ;;  %v783_v32 = vld [vmem:[%s6510_s1 + $0x1768] sm:$0xff] }
 0x162   :  { %3727 = vmatpush3.msra.mxu1 %v717_v33  ;;  %3695 = vmatprep.subr.mxu0 %v699_v34  ;;  %v765_v33 = vld [vmem:[%s6510_s1 + $0x16d8] sm:$0xff]  ;;  %v798_v34 = vld [vmem:[%s6510_s1 + $0x17e0] sm:$0xff] }
 0x163   :  { %3728 = vmatprep.subr.mxu1 %v732_v35  ;;  %3696 = vmatpush3.msra.mxu0 %v683_v36  ;;  %v749_v35 = vld [vmem:[%s6510_s1 + $0x1658] sm:$0xff]  ;;  %v782_v36 = vld [vmem:[%s6510_s1 + $0x1760] sm:$0xff] }
 0x164   :  { %3729 = vmatpush3.msra.mxu1 %v716_v37  ;;  %3697 = vmatprep.subr.mxu0 %v698_v38  ;;  %v764_v37 = vld [vmem:[%s6510_s1 + $0x16d0] sm:$0xff]  ;;  %v797_v38 = vld [vmem:[%s6510_s1 + $0x17d8] sm:$0xff] }
 0x165   :  { %3730 = vmatprep.subr.mxu1 %v731_v39  ;;  %3698 = vmatpush3.msra.mxu0 %v682_v40  ;;  %v748_v39 = vld [vmem:[%s6510_s1 + $0x1650] sm:$0xff]  ;;  %v781_v40 = vld [vmem:[%s6510_s1 + $0x1758] sm:$0xff] }
 0x166   :  { %3731 = vmatpush3.msra.mxu1 %v715_v41  ;;  %3699 = vmatprep.subr.mxu0 %v697_v42  ;;  %v763_v41 = vld [vmem:[%s6510_s1 + $0x16c8] sm:$0xff]  ;;  %v796_v42 = vld [vmem:[%s6510_s1 + $0x17d0] sm:$0xff] }
 0x167   :  { %3732 = vmatprep.subr.mxu1 %v730_v43  ;;  %3700 = vmatpush3.msra.mxu0 %v681_v44  ;;  %v747_v43 = vld [vmem:[%s6510_s1 + $0x1648] sm:$0xff]  ;;  %v780_v44 = vld [vmem:[%s6510_s1 + $0x1750] sm:$0xff] }
 0x168   :  { %3733 = vmatpush3.msra.mxu1 %v714_v45  ;;  %3701 = vmatprep.subr.mxu0 %v696_v46  ;;  %v762_v45 = vld [vmem:[%s6510_s1 + $0x16c0] sm:$0xff]  ;;  %v795_v46 = vld [vmem:[%s6510_s1 + $0x17c8] sm:$0xff] }
 0x169   :  { %3734 = vmatprep.subr.mxu1 %v729_v47  ;;  %3702 = vmatpush3.msra.mxu0 %v680_v49  ;;  %v746_v47 = vld [vmem:[%s6510_s1 + $0x1640] sm:$0xff]  ;;  %v779_v49 = vld [vmem:[%s6510_s1 + $0x1748] sm:$0xff] }
 0x16a   :  { %3735 = vmatpush3.msra.mxu1 %v713_v50  ;;  %3703 = vmatprep.subr.mxu0 %v695_v51  ;;  %v761_v50 = vld [vmem:[%s6510_s1 + $0x16b8] sm:$0xff]  ;;  %v794_v51 = vld [vmem:[%s6510_s1 + $0x17c0] sm:$0xff] }
 0x16b   :  { %3736 = vmatprep.subr.mxu1 %v728_v52  ;;  %3704 = vmatpush3.msra.mxu0 %v679_v53  ;;  %v745_v52 = vld [vmem:[%s6510_s1 + $0x1638] sm:$0xff]  ;;  %v778_v53 = vld [vmem:[%s6510_s1 + $0x1740] sm:$0xff] }
 0x16c   :  { %3737 = vmatpush3.msra.mxu1 %v712_v54  ;;  %3705 = vmatprep.subr.mxu0 %v694_v55  ;;  %v760_v54 = vld [vmem:[%s6510_s1 + $0x16b0] sm:$0xff]  ;;  %v793_v55 = vld [vmem:[%s6510_s1 + $0x17b8] sm:$0xff] }
 0x16d   :  { %3738 = vmatprep.subr.mxu1 %v727_v56  ;;  %3706 = vmatpush3.msra.mxu0 %v678_v57  ;;  %v744_v56 = vld [vmem:[%s6510_s1 + $0x1630] sm:$0xff]  ;;  %v777_v57 = vld [vmem:[%s6510_s1 + $0x1738] sm:$0xff] }
 0x16e   :  { %3739 = vmatpush3.msra.mxu1 %v711_v59  ;;  %3707 = vmatprep.subr.mxu0 %v693_v60  ;;  %v792_v59 = vld [vmem:[%s6510_s1 + $0x17b0] sm:$0xff]  ;;  %v743_v60 = vld [vmem:[%s6510_s1 + $0x1628] sm:$0xff] }
 0x16f   :  { %3740 = vmatprep.subr.mxu1 %v726_v61  ;;  %3708 = vmatpush3.msra.mxu0 %v677_v62  ;;  %v776_v61 = vld [vmem:[%s6510_s1 + $0x1730] sm:$0xff]  ;;  %v758_v62 = vld [vmem:[%s6510_s1 + $0x16a0] sm:$0xff] }
 0x170   :  { %3741 = vmatpush3.msra.mxu1 %v710_v63  ;;  %3709 = vmatprep.subr.mxu0 %v692_v0  ;;  %v791_v63 = vld [vmem:[%s6510_s1 + $0x17a8] sm:$0xff]  ;;  %v742_v0 = vld [vmem:[%s6510_s1 + $0x1620] sm:$0xff] }
 0x171   :  { %3742 = vmatprep.subr.mxu1 %v725_v2  ;;  %3710 = vmatpush3.msra.mxu0 %v676_v3  ;;  %v775_v2 = vld [vmem:[%s6510_s1 + $0x1728] sm:$0xff]  ;;  %v757_v3 = vld [vmem:[%s6510_s1 + $0x1698] sm:$0xff] }
 0x172   :  { %3743 = vmatpush3.msra.mxu1 %v709_v5  ;;  %3711 = vmatprep.subr.mxu0 %v691_v6  ;;  %v741_v5 = vld [vmem:[%s6510_s1 + $0x1618] sm:$0xff]  ;;  %v774_v6 = vld [vmem:[%s6510_s1 + $0x1720] sm:$0xff] }
 0x173   :  { %3744 = vmatprep.subr.mxu1 %v724_v7  ;;  %3712 = vmatpush3.msra.mxu0 %v675_v8  ;;  %v756_v7 = vld [vmem:[%s6510_s1 + $0x1690] sm:$0xff]  ;;  %v1025_v8 = vcombine.high %v32_v1, %v32_v1 }
 0x174   :  { %3745 = vmatpush3.msra.mxu1 %v708_v9  ;;  %3713 = vmatprep.subr.mxu0 %v690_v10  ;;  %v789_v9 = vld [vmem:[%s6510_s1 + $0x1798] sm:$0xff]  ;;  %v740_v10 = vld [vmem:[%s6510_s1 + $0x1610] sm:$0xff] }
 0x175   :  { %3746 = vmatprep.subr.mxu1 %v723_v12  ;;  %3714 = vmatpush3.msra.mxu0 %v674_v13  ;;  %v773_v12 = vld [vmem:[%s6510_s1 + $0x1718] sm:$0xff]  ;;  %v755_v13 = vld [vmem:[%s6510_s1 + $0x1688] sm:$0xff] }
 0x176   :  { %2562 = vmatprep.mubr.f32.mxu0 %v1023_v14  ;;  %3747 = vmatpush3.msra.mxu1 %v707_v15  ;;  %v788_v14 = vld [vmem:[%s6510_s1 + $0x1790] sm:$0xff]  ;;  %v739_v15 = vld [vmem:[%s6510_s1 + $0x1608] sm:$0xff] }
 0x177   :  { %2563 = vmatmul.mubr.f32.vlgmr.msra.gmra.mxu0 %v1015_v4  ;;  %3748 = vmatprep.subr.mxu1 %v722_v16  ;;  %v790_v4 = vld [vmem:[%s6510_s1 + $0x17a0] sm:$0xff]  ;;  %v772_v16 = vld [vmem:[%s6510_s1 + $0x1710] sm:$0xff] }
 0x178   :  { %3753 = vmatprep.subr.mxu0 %v769_v17  ;;  %3749 = vmatpush3.msra.mxu1 %v706_v18  ;;  %v754_v17 = vld [vmem:[%s6510_s1 + $0x1680] sm:$0xff]  ;;  %v1039_v18 = vrot.slane %v1025_v8, %v4130_v48 }
 0x179   :  { %2632 = vmatprep.mubr.f32.mxu1 %v1024_v19  ;;  %3754 = vmatpush3.msra.mxu0 %v753_v20  ;;  %v787_v19 = vld [vmem:[%s6510_s1 + $0x1788] sm:$0xff]  ;;  %v738_v20 = vld [vmem:[%s6510_s1 + $0x1600] sm:$0xff] }
 0x17a   :  { %2633 = vmatmul.mubr.f32.vlgmr.msra.gmra.mxu1 %v1022_v11  ;;  %3755 = vmatprep.subr.mxu0 %v768_v21  ;;  %v1032_v11 = vrot.slane %v32_v1, %v4130_v48  ;;  %v786_v48 = vld [vmem:[%s6510_s1 + $0x1780] sm:$0xff] }
 0x17b   :  { %3788 = vmatprep.subr.mxu1 %v801_v22  ;;  %3756 = vmatpush3.msra.mxu0 %v752_v23  ;;  %v771_v22 = vld [vmem:[%s6510_s1 + $0x1708] sm:$0xff]  ;;  %v770_v23 = vld [vmem:[%s6510_s1 + $0x1700] sm:$0xff] }
 0x17c   :  { %3789 = vmatpush3.msra.mxu1 %v785_v24  ;;  %3757 = vmatprep.subr.mxu0 %v767_v25  ;;  %v1040_v21 = vcombine.high %v1032_v11, %v1032_v11  ;;  %v1041_v24 = vcombine.high %v1039_v18, %v1039_v18  ;;  %v817_v25 = vld [vmem:[%s6510_s1 + $0x1878] sm:$0xff] }
 0x17d   :  { %3790 = vmatprep.subr.mxu1 %v800_v26  ;;  %3758 = vmatpush3.msra.mxu0 %v751_v27  ;;  %v3968_v26 = vmov 0.0   ;;  %v816_v27 = vld [vmem:[%s6510_s1 + $0x1870] sm:$0xff] }
 0x17e   :  { %3791 = vmatpush3.msra.mxu1 %v784_v28  ;;  %3759 = vmatprep.subr.mxu0 %v766_v29  ;;  %v815_v28 = vld [vmem:[%s6510_s1 + $0x1868] sm:$0xff]  ;;  %v814_v29 = vld [vmem:[%s6510_s1 + $0x1860] sm:$0xff] }
 0x17f   :  { %3792 = vmatprep.subr.mxu1 %v799_v30  ;;  %3760 = vmatpush3.msra.mxu0 %v750_v31  ;;  %v813_v30 = vld [vmem:[%s6510_s1 + $0x1858] sm:$0xff]  ;;  %v812_v31 = vld [vmem:[%s6510_s1 + $0x1850] sm:$0xff] }
 0x180   :  { %3793 = vmatpush3.msra.mxu1 %v783_v32  ;;  %3761 = vmatprep.subr.mxu0 %v765_v33  ;;  %v811_v32 = vld [vmem:[%s6510_s1 + $0x1848] sm:$0xff]  ;;  %v810_v33 = vld [vmem:[%s6510_s1 + $0x1840] sm:$0xff] }
 0x181   :  { %3794 = vmatprep.subr.mxu1 %v798_v34  ;;  %3762 = vmatpush3.msra.mxu0 %v749_v35  ;;  %v809_v34 = vld [vmem:[%s6510_s1 + $0x1838] sm:$0xff]  ;;  %v808_v35 = vld [vmem:[%s6510_s1 + $0x1830] sm:$0xff] }
 0x182   :  { %3795 = vmatpush3.msra.mxu1 %v782_v36  ;;  %3763 = vmatprep.subr.mxu0 %v764_v37  ;;  %v807_v36 = vld [vmem:[%s6510_s1 + $0x1828] sm:$0xff]  ;;  %v806_v37 = vld [vmem:[%s6510_s1 + $0x1820] sm:$0xff] }
 0x183   :  { %3796 = vmatprep.subr.mxu1 %v797_v38  ;;  %3764 = vmatpush3.msra.mxu0 %v748_v39  ;;  %v805_v38 = vld [vmem:[%s6510_s1 + $0x1818] sm:$0xff]  ;;  %v804_v39 = vld [vmem:[%s6510_s1 + $0x1810] sm:$0xff] }
 0x184   :  { %3797 = vmatpush3.msra.mxu1 %v781_v40  ;;  %3765 = vmatprep.subr.mxu0 %v763_v41  ;;  %v803_v40 = vld [vmem:[%s6510_s1 + $0x1808] sm:$0xff]  ;;  %v802_v41 = vld [vmem:[%s6510_s1 + $0x1800] sm:$0xff] }
 0x185   :  { %3798 = vmatprep.subr.mxu1 %v796_v42  ;;  %3766 = vmatpush3.msra.mxu0 %v747_v43  ;;  %v2981_v42 = vld.sshfl [vmem:[%s6509_s0 + $0x60] sm:$0x3 pattern:$0x76325410]  ;;  %v2887_v43 = vld [vmem:[%s6512_s3 + $0x78] sm:$0xff] }
 0x186   :  { %3799 = vmatpush3.msra.mxu1 %v780_v44  ;;  %3767 = vmatprep.subr.mxu0 %v762_v45  ;;  %v2886_v44 = vld [vmem:[%s6512_s3 + $0x70] sm:$0xff]  ;;  %v2885_v45 = vld [vmem:[%s6512_s3 + $0x68] sm:$0xff] }
 0x187   :  { %3800 = vmatprep.subr.mxu1 %v795_v46  ;;  %3768 = vmatpush3.msra.mxu0 %v746_v47  ;;  %v2884_v46 = vld [vmem:[%s6512_s3 + $0x60] sm:$0xff]  ;;  %v2883_v47 = vld [vmem:[%s6512_s3 + $0x58] sm:$0xff] }
 0x188   :  { %3801 = vmatpush3.msra.mxu1 %v779_v49  ;;  %3769 = vmatprep.subr.mxu0 %v761_v50  ;;  %v2882_v49 = vld [vmem:[%s6512_s3 + $0x50] sm:$0xff]  ;;  %v2881_v50 = vld [vmem:[%s6512_s3 + $0x48] sm:$0xff] }
 0x189   :  { %3802 = vmatprep.subr.mxu1 %v794_v51  ;;  %3770 = vmatpush3.msra.mxu0 %v745_v52  ;;  %v2880_v51 = vld [vmem:[%s6512_s3 + $0x40] sm:$0xff]  ;;  %v2879_v52 = vld [vmem:[%s6512_s3 + $0x38] sm:$0xff] }
 0x18a   :  { %3803 = vmatpush3.msra.mxu1 %v778_v53  ;;  %3771 = vmatprep.subr.mxu0 %v760_v54  ;;  %v2878_v53 = vld [vmem:[%s6512_s3 + $0x30] sm:$0xff]  ;;  %v2877_v54 = vld [vmem:[%s6512_s3 + $0x28] sm:$0xff] }
 0x18b   :  { %3804 = vmatprep.subr.mxu1 %v793_v55  ;;  %3772 = vmatpush3.msra.mxu0 %v744_v56  ;;  %v3015_v55 = vpop.f32.mrf.mxu0  ;;  %v2876_v56 = vld [vmem:[%s6512_s3 + $0x20] sm:$0xff] }
 0x18c   :  { %3805 = vmatpush3.msra.mxu1 %v777_v57  ;;  %3773 = vmatprep.subr.mxu0 %v759_v58  ;;  %v2875_v57 = vld [vmem:[%s6512_s3 + $0x18] sm:$0xff] }
 0x18d   :  { %3806 = vmatprep.subr.mxu1 %v792_v59  ;;  %3774 = vmatpush3.msra.mxu0 %v743_v60  ;;  %v3016_v58 = vpop.f32.mrf.mxu0  ;;  %v3050_v59 = vpop.f32.mrf.mxu1  ;;  %v2874_v60 = vld [vmem:[%s6512_s3 + $0x10] sm:$0xff] }
 0x18e   :  { %3807 = vmatpush3.msra.mxu1 %v776_v61  ;;  %3775 = vmatprep.subr.mxu0 %v758_v62  ;;  %v3017_v62 = vadd.f32 %v3016_v58, %v3015_v55 }
 0x18f   :  { %3808 = vmatprep.subr.mxu1 %v791_v63  ;;  %3776 = vmatpush3.msra.mxu0 %v742_v0  ;;  %v3085_v61 = vpop.f32.mrf.mxu0  ;;  %v2873_v63 = vld [vmem:[%s6512_s3 + $0x8] sm:$0xff]  ;;  %v2980_v0 = vld [vmem:[%s6511_s2] ss:$0 sm:$0xff]  ;;  %v3051_v1 = vpop.f32.mrf.mxu1 }
 0x190   :  { %3809 = vmatpush3.msra.mxu1 %v775_v2  ;;  %3777 = vmatprep.subr.mxu0 %v757_v3  ;;  %v2872_v2 = vld [vmem:[%s6512_s3] sm:$0xff] }
 0x191   :  { %3810 = vmatprep.subr.mxu1 %v790_v4  ;;  %3778 = vmatpush3.msra.mxu0 %v741_v5  ;;  %v3086_v3 = vpop.f32.mrf.mxu0  ;;  %v3120_v4 = vpop.f32.mrf.mxu1  ;;  %v1165_v5 = vadd.f32 %v3017_v62, %v2980_v0 }
 0x192   :  { %3811 = vmatpush3.msra.mxu1 %v774_v6  ;;  %3779 = vmatprep.subr.mxu0 %v756_v7  ;;  %v3052_v6 = vadd.f32 %v3051_v1, %v3050_v59  ;;  %v3087_v8 = vadd.f32 %v3086_v3, %v3085_v61 }
 0x193   :  { %3812 = vmatprep.subr.mxu1 %v789_v9  ;;  %3780 = vmatpush3.msra.mxu0 %v740_v10  ;;  %v3155_v7 = vpop.f32.mrf.mxu0  ;;  %v3121_v9 = vpop.f32.mrf.mxu1 }
 0x194   :  { %3813 = vmatpush3.msra.mxu1 %v773_v12  ;;  %3781 = vmatprep.subr.mxu0 %v755_v13  ;;  %v1235_v10 = vadd.f32 %v3052_v6, %v1165_v5 }
 0x195   :  { %3814 = vmatprep.subr.mxu1 %v788_v14  ;;  %3782 = vmatpush3.msra.mxu0 %v739_v15  ;;  %v3190_v12 = vpop.f32.mrf.mxu1  ;;  %v3122_v14 = vadd.f32 %v3121_v9, %v3120_v4 }
 0x196   :  { %3815 = vmatpush3.msra.mxu1 %v772_v16  ;;  %3783 = vmatprep.subr.mxu0 %v754_v17  ;;  %v1305_v13 = vadd.f32 %v3087_v8, %v1235_v10 }
 0x197   :  { %3816 = vmatprep.subr.mxu1 %v787_v19  ;;  %3784 = vmatpush3.msra.mxu0 %v738_v20  ;;  %v3191_v17 = vpop.f32.mrf.mxu1 }
 0x198   :  { %2702 = vmatprep.mubr.f32.mxu0 %v1040_v21  ;;  %3817 = vmatpush3.msra.mxu1 %v771_v22  ;;  %v3192_v22 = vadd.f32 %v3191_v17, %v3190_v12 }
 0x199   :  { %2703 = vmatmul.mubr.f32.vlgmr.msra.gmra.mxu0 %v1032_v11  ;;  %3818 = vmatprep.subr.mxu1 %v786_v48  ;;  %v3156_v11 = vpop.f32.mrf.mxu0  ;;  %v3260_v20 = vpop.f32.mrf.mxu1 }
 0x19a   :  { %3857 = vmatprep.subr.mxu0 %v3968_v26  ;;  %3819 = vmatpush3.msra.mxu1 %v770_v23  ;;  %v3157_v16 = vadd.f32 %v3156_v11, %v3155_v7 }
 0x19b   :  { %2772 = vmatprep.mubr.f32.mxu1 %v1041_v24  ;;  %3858 = vmatpush3.msra.mxu0 %v817_v25  ;;  %v3225_v15 = vpop.f32.mrf.mxu0  ;;  %v3261_v24 = vpop.f32.mrf.mxu1 }
 0x19c   :  { %2773 = vmatmul.mubr.f32.vlgmr.msra.gmra.mxu1 %v1039_v18  ;;  %3859 = vmatprep.subr.mxu0 %v3968_v26  ;;  %v1375_v18 = vadd.f32 %v3122_v14, %v1305_v13 }
 0x19d   :  { %3860 = vmatpush3.msra.mxu0 %v816_v27  ;;  %3889 = vmatprep.mubr.msk.f32.mxu0 %vm3969_vm0, %v3968_v26  ;;  %v3226_v19 = vpop.f32.mrf.mxu0  ;;  %v3330_v27 = vpop.f32.mrf.mxu1 }
 0x19e   :  { %3861 = vmatprep.subr.mxu0 %v3968_v26  ;;  %3892 = vmatprep.subr.mxu1 %v3968_v26  ;;  %v1445_v21 = vadd.f32 %v3157_v16, %v1375_v18  ;;  %v3227_v23 = vadd.f32 %v3226_v19, %v3225_v15 }
 0x19f   :  { %3862 = vmatpush3.msra.mxu0 %v815_v28  ;;  %3924 = vmatprep.mubr.msk.f32.mxu1 %vm3969_vm0, %v3968_v26  ;;  %v3295_v48 = vpop.f32.mrf.mxu0 }
 0x1a0   :  { %3863 = vmatprep.subr.mxu0 %v3968_v26  ;;  %3893 = vmatpush3.msra.mxu1 %v2887_v43  ;;  %v1515_v25 = vadd.f32 %v3192_v22, %v1445_v21 }
 0x1a1   :  { %3864 = vmatpush3.msra.mxu0 %v814_v29  ;;  %3894 = vmatprep.subr.mxu1 %v3968_v26  ;;  %v3262_v29 = vadd.f32 %v3261_v24, %v3260_v20 }
 0x1a2   :  { %3865 = vmatprep.subr.mxu0 %v3968_v26  ;;  %3895 = vmatpush3.msra.mxu1 %v2886_v44  ;;  %v1585_v28 = vadd.f32 %v3227_v23, %v1515_v25 }
 0x1a3   :  { %3866 = vmatpush3.msra.mxu0 %v813_v30  ;;  %3896 = vmatprep.subr.mxu1 %v3968_v26 }
 0x1a4   :  { %3867 = vmatprep.subr.mxu0 %v3968_v26  ;;  %3897 = vmatpush3.msra.mxu1 %v2885_v45 }
 0x1a5   :  { %3868 = vmatpush3.msra.mxu0 %v812_v31  ;;  %3898 = vmatprep.subr.mxu1 %v3968_v26 }
 0x1a6   :  { %3869 = vmatprep.subr.mxu0 %v3968_v26  ;;  %3899 = vmatpush3.msra.mxu1 %v2884_v46 }
 0x1a7   :  { %3870 = vmatpush3.msra.mxu0 %v811_v32  ;;  %3900 = vmatprep.subr.mxu1 %v3968_v26  ;;  %v3331_v32 = vpop.f32.mrf.mxu1 }
 0x1a8   :  { %3871 = vmatprep.subr.mxu0 %v3968_v26  ;;  %3901 = vmatpush3.msra.mxu1 %v2883_v47 }
 0x1a9   :  { %3872 = vmatpush3.msra.mxu0 %v810_v33  ;;  %3902 = vmatprep.subr.mxu1 %v3968_v26  ;;  %v1655_v33 = vadd.f32 %v3262_v29, %v1585_v28 }
 0x1aa   :  { %3873 = vmatprep.subr.mxu0 %v3968_v26  ;;  %3903 = vmatpush3.msra.mxu1 %v2882_v49 }
 0x1ab   :  { %3874 = vmatpush3.msra.mxu0 %v809_v34  ;;  %3904 = vmatprep.subr.mxu1 %v3968_v26 }
 0x1ac   :  { %3875 = vmatprep.subr.mxu0 %v3968_v26  ;;  %3905 = vmatpush3.msra.mxu1 %v2881_v50 }
 0x1ad   :  { %3876 = vmatpush3.msra.mxu0 %v808_v35  ;;  %3906 = vmatprep.subr.mxu1 %v3968_v26  ;;  %v3400_v35 = vpop.f32.mrf.mxu1 }
 0x1ae   :  { %3877 = vmatprep.subr.mxu0 %v3968_v26  ;;  %3907 = vmatpush3.msra.mxu1 %v2880_v51 }
 0x1af   :  { %3878 = vmatpush3.msra.mxu0 %v807_v36  ;;  %3908 = vmatprep.subr.mxu1 %v3968_v26 }
 0x1b0   :  { %3879 = vmatprep.subr.mxu0 %v3968_v26  ;;  %3909 = vmatpush3.msra.mxu1 %v2879_v52 }
 0x1b1   :  { %3880 = vmatpush3.msra.mxu0 %v806_v37  ;;  %3910 = vmatprep.subr.mxu1 %v3968_v26  ;;  %v3332_v37 = vadd.f32 %v3331_v32, %v3330_v27 }
 0x1b2   :  { %3881 = vmatprep.subr.mxu0 %v3968_v26  ;;  %3911 = vmatpush3.msra.mxu1 %v2878_v53 }
 0x1b3   :  { %3882 = vmatpush3.msra.mxu0 %v805_v38  ;;  %3912 = vmatprep.subr.mxu1 %v3968_v26 }
 0x1b4   :  { %3883 = vmatprep.subr.mxu0 %v3968_v26  ;;  %3913 = vmatpush3.msra.mxu1 %v2877_v54 }
 0x1b5   :  { %3884 = vmatpush3.msra.mxu0 %v804_v39  ;;  %3914 = vmatprep.subr.mxu1 %v3968_v26 }
 0x1b6   :  { %3885 = vmatprep.subr.mxu0 %v3968_v26  ;;  %3915 = vmatpush3.msra.mxu1 %v2876_v56 }
 0x1b7   :  { %3886 = vmatpush3.msra.mxu0 %v803_v40  ;;  %3916 = vmatprep.subr.mxu1 %v3968_v26  ;;  %v3401_v40 = vpop.f32.mrf.mxu1 }
 0x1b8   :  { %3887 = vmatprep.subr.mxu0 %v3968_v26  ;;  %3917 = vmatpush3.msra.mxu1 %v2875_v57  ;;  %v3402_v45 = vadd.f32 %v3401_v40, %v3400_v35 }
 0x1b9   :  { %3888 = vmatpush3.msra.mxu0 %v802_v41  ;;  %3918 = vmatprep.subr.mxu1 %v3968_v26  ;;  %v3470_v43 = vpop.f32.mrf.mxu1 }
 0x1ba   :  { %3890 = vmatmul.mubr.f32.vlgmr.msra.gmra.mxu0 %v2981_v42  ;;  %3919 = vmatpush3.msra.mxu1 %v2874_v60 }
 0x1bb   :  { %3920 = vmatprep.subr.mxu1 %v3968_v26  ;;  %v3471_v49 = vpop.f32.mrf.mxu1 }
 0x1bc   :  { %3921 = vmatpush3.msra.mxu1 %v2873_v63  ;;  %v3472_v54 = vadd.f32 %v3471_v49, %v3470_v43 }
 0x1bd   :  { %3922 = vmatprep.subr.mxu1 %v3968_v26  ;;  %v3296_v26 = vpop.f32.mrf.mxu0 }
 0x1be   :  { %3923 = vmatpush3.msra.mxu1 %v2872_v2  ;;  %v3297_v31 = vadd.f32 %v3296_v26, %v3295_v48 }
 0x1bf   :  { %v3365_v30 = vpop.f32.mrf.mxu0 }
 0x1c0   :  { %v1725_v36 = vadd.f32 %v3297_v31, %v1655_v33 }
 0x1c1   :  { %v3366_v34 = vpop.f32.mrf.mxu0 }
 0x1c2   :  { %v3367_v39 = vadd.f32 %v3366_v34, %v3365_v30  ;;  %v1795_v41 = vadd.f32 %v3332_v37, %v1725_v36 }
 0x1c3   :  { %v3435_v38 = vpop.f32.mrf.mxu0 }
 0x1c4   :  { %v1865_v44 = vadd.f32 %v3367_v39, %v1795_v41 }
 0x1c5   :  { %v3436_v42 = vpop.f32.mrf.mxu0 }
 0x1c6   :  { %v3437_v47 = vadd.f32 %v3436_v42, %v3435_v38  ;;  %v1935_v50 = vadd.f32 %v3402_v45, %v1865_v44 }
 0x1c8   :  { %v2005_v53 = vadd.f32 %v3437_v47, %v1935_v50 }
 0x1ca   :  { %v2075_v58 = vadd.f32 %v3472_v54, %v2005_v53  ;;  %v2982_v54 = vld [vmem:[%s6513_s4] ss:$0 sm:$0xff] }
 0x1d1   :  { %v3505_v46 = vpop.f32.mrf.mxu0 }
 0x1d3   :  { %v3506_v51 = vpop.f32.mrf.mxu0 }
 0x1d4   :  { %v3540_v52 = vpop.f32.mrf.mxu1  ;;  %v3507_v56 = vadd.f32 %v3506_v51, %v3505_v46 }
 0x1d6   :  { %v3541_v57 = vpop.f32.mrf.mxu1  ;;  %v2145_v61 = vadd.f32 %v3507_v56, %v2075_v58 }
 0x1d7   :  { %v3542_v62 = vadd.f32 %v3541_v57, %v3540_v52 }
 0x1d9   :  { %v2215_v2 = vadd.f32 %v3542_v62, %v2145_v61 }
 0x1f3   :  { %v3575_v55 = vpop.f32.mrf.mxu0 }
 0x1f5   :  { %v3576_v59 = vpop.f32.mrf.mxu0 }
 0x1f6   :  { %v3610_v60 = vpop.f32.mrf.mxu1  ;;  %v3577_v0 = vadd.f32 %v3576_v59, %v3575_v55 }
 0x1f8   :  { %v3611_v1 = vpop.f32.mrf.mxu1  ;;  %v2285_v5 = vadd.f32 %v3577_v0, %v2215_v2 }
 0x1f9   :  { %v3612_v6 = vadd.f32 %v3611_v1, %v3610_v60 }
 0x1fb   :  { %v2355_v10 = vadd.f32 %v3612_v6, %v2285_v5 }
 0x215   :  { %v3645_v63 = vpop.f32.mrf.mxu0 }
 0x217   :  { %v3646_v3 = vpop.f32.mrf.mxu0 }
 0x218   :  { %v3680_v4 = vpop.f32.mrf.mxu1  ;;  %v3647_v8 = vadd.f32 %v3646_v3, %v3645_v63 }
 0x21a   :  { %v3681_v9 = vpop.f32.mrf.mxu1  ;;  %v2425_v13 = vadd.f32 %v3647_v8, %v2355_v10 }
 0x21b   :  { %v3682_v14 = vadd.f32 %v3681_v9, %v3680_v4 }
 0x21d   :  { %v2495_v18 = vadd.f32 %v3682_v14, %v2425_v13 }
 0x237   :  { %v3715_v7 = vpop.f32.mrf.mxu0 }
 0x239   :  { %v3716_v11 = vpop.f32.mrf.mxu0 }
 0x23a   :  { %v3750_v12 = vpop.f32.mrf.mxu1  ;;  %v3717_v16 = vadd.f32 %v3716_v11, %v3715_v7 }
 0x23c   :  { %v3751_v17 = vpop.f32.mrf.mxu1  ;;  %v2565_v21 = vadd.f32 %v3717_v16, %v2495_v18 }
 0x23d   :  { %v3752_v22 = vadd.f32 %v3751_v17, %v3750_v12 }
 0x23f   :  { %v2635_v24 = vadd.f32 %v3752_v22, %v2565_v21 }
 0x259   :  { %v3785_v15 = vpop.f32.mrf.mxu0 }
 0x25b   :  { %v3786_v19 = vpop.f32.mrf.mxu0 }
 0x25c   :  { %v3820_v20 = vpop.f32.mrf.mxu1  ;;  %v3787_v48 = vadd.f32 %v3786_v19, %v3785_v15 }
 0x25e   :  { %v3821_v23 = vpop.f32.mrf.mxu1  ;;  %v2705_v25 = vadd.f32 %v3787_v48, %v2635_v24 }
 0x25f   :  { %v3822_v26 = vadd.f32 %v3821_v23, %v3820_v20 }
 0x261   :  { %v2775_v27 = vadd.f32 %v3822_v26, %v2705_v25 }
 0x27a   :  { %v2844_v28 = vpop.f32.mrf.mxu0 }
 0x27b   :  { %v2845_v29 = vadd.f32 %v2844_v28, %v2775_v27 }
 0x27c   :  { %v3891_v30 = vpop.f32.mrf.mxu0 }
 0x27d   :  { %v2849_v31 = vsel %vm2848_vm1, %v2845_v29, 0.0 }
 0x27e   :  { %v2850_v32 = vrot.slane %v2849_v31, 4 }
 0x280   :  { %v2851_v33 = vadd.f32 %v2850_v32, %v2849_v31 }
 0x282   :  { %v2852_v34 = vrot.slane %v2851_v33, 2 }
 0x284   :  { %v2853_v35 = vadd.f32 %v2852_v34, %v2851_v33 }
 0x286   :  { %v2854_v36 = vrot.slane %v2853_v35, 1 }
 0x288   :  { %v2855_v37 = vadd.f32 %v2854_v36, %v2853_v35 }
 0x28a   :  { %v2857_v38 = vmul.f32 0.5, %v2855_v37 }
 0x28c   :  { %v2858_v39 = vsub.f32 %v2845_v29, %v2857_v38 }
 0x28e   :  { %v2859_v40 = vmul.f32 %v2858_v39, %v2858_v39 }
 0x290   :  { %v2860_v41 = vsel %vm2848_vm1, %v2859_v40, 0.0 }
 0x291   :  { %v2861_v42 = vrot.slane %v2860_v41, 4 }
 0x293   :  { %v2862_v43 = vadd.f32 %v2861_v42, %v2860_v41 }
 0x295   :  { %v2863_v44 = vrot.slane %v2862_v43, 2 }
 0x297   :  { %v2864_v45 = vadd.f32 %v2863_v44, %v2862_v43 }
 0x299   :  { %v2865_v46 = vrot.slane %v2864_v45, 1 }
 0x29b   :  { %v2866_v47 = vadd.f32 %v2865_v46, %v2864_v45 }
 0x29d   :  { %v2867_v49 = vmul.f32 0.5, %v2866_v47 }
 0x29f   :  { %v2868_v50 = vadd.f32 1e-05, %v2867_v49 }
 0x2a1   :  { %3943 = vrsqrt.f32 %v2868_v50 }
 0x2ae   :  { %v3944_v51 = vpop.eup %3943 }
 0x2af   :  { %v2870_v52 = vmul.f32 %v3944_v51, %v2858_v39 }
 0x2b1   :  { %v2871_v53 = vmax.f32 %v2870_v52, 0.0 }
 0x2b3   :  { %3925 = vmatmul.mubr.f32.vlgmr.msra.gmra.mxu1 %v2871_v53 }
 0x373   :  { %v2961_v55 = vpop.f32.mrf.mxu1 }
 0x374   :  { %v2962_v56 = vadd.f32 %v2982_v54, %v2961_v55 }
 0x375   :  { %v3926_v57 = vpop.f32.mrf.mxu1 }
 0x376   :  { %2965 = vst [vmem:[#allocation2] sm:$0x3] %v2962_v56 }
 0x377   :  { %3956 = shalt.err (!%p3953_p4)
}
 0x378   :  { %2975 = dma.vmem_to_hbm [thread:$0]  %s2973_s18, 32, %s6514_s5, [#allocation3]  }
 0x379   :  { %3965 = dma.done.wait [#allocation3], 32  }
 0x37a   :  { %3966 = vsyncadd [#allocation3], 4294967264 }
 0x37b   :  { %2979 = vsyncpa [#allocation3], 1 }

// kernel: net_forward.2
= control target key start
LH: loop header
LB: loop body
LE: loop exit
PB: predicated region body
PF: predicated region fallthrough
CT: control target
= control target key end

     0   :  { %s7550_s18 = smov 0   ;;  %s9949_s0 = inlined_call_operand.vmem [shape: f32[2,956,81], index: 0, kind: input, shape index: {}]   ;;  %s9950_s1 = inlined_call_operand.vmem [shape: f32[81,96], index: 1, kind: input, shape index: {}]   ;;  %s9951_s2 = inlined_call_operand.vmem [shape: f32[1,96], index: 2, kind: input, shape index: {}]   ;;  %s9952_s3 = inlined_call_operand.vmem [shape: f32[3,96,32], index: 3, kind: input, shape index: {}]   ;;  %s9953_s4 = inlined_call_operand.vmem [shape: f32[1,32], index: 4, kind: input, shape index: {}]   ;;  %s9954_s5 = inlined_call_operand.vmem [shape: f32[2,196,32], index: 5, kind: output, shape index: {}]  }
   0x1 LB: > { %s5616_s19 = sadd.s32 4294967295, %s7518_s18   ;;  %p5620_p0 = scmp.ge.s32.totalorder %s7518_s18, 1  ;;  %s7518_s18 = sphi %s7550_s18, %s15_s18  }
   0x2   : > { %p187_p1 = scmp.lt.s32.totalorder %s7518_s18, 3 }
   0x4   : > { %p188_p2 = pnand %p5620_p0, %p187_p1 }
   0x6   : > { %191 = sbr.rel (%p188_p2) target bundleno = 923 (0x39b), region = 40 }
   0xb   : > { %v355_v0 = vld [vmem:[%s9950_s1 + $0x50] sm:$0x1]  ;;  %vm724_vm0 = vcmask 1040384   ;;  %v354_v1 = vld [vmem:[%s9950_s1 + $0x48] sm:$0xff]  ;;  %p215_p3 = scmp.lt.s32.totalorder %s5616_s19, 1  ;;  %v353_v2 = vld [vmem:[%s9950_s1 + $0x40] sm:$0xff] }
   0xc   : > { %6611 = vmatprep.subr.msk.mxu0 %vm724_vm0, %v355_v0  ;;  %v352_v3 = vld [vmem:[%s9950_s1 + $0x38] sm:$0xff]  ;;  %vm363_vm1 = vcmask 662528   ;;  %v351_v4 = vld [vmem:[%s9950_s1 + $0x30] sm:$0xff]  ;;  %v350_v6 = vld [vmem:[%s9950_s1 + $0x28] sm:$0xff]  ;;  %vm1513_vm2 = vcmask 785408   ;;  %vm1633_vm3 = vcmask 781312  }
   0xd   : > { %6612 = vmatpush3.msk.msra.mxu0 %vm724_vm0, %v355_v0  ;;  %s10218_s19 = smov (!%p215_p3, %s5616_s19), 1  ;;  %v349_v7 = vld [vmem:[%s9950_s1 + $0x20] sm:$0xff]  ;;  %v348_v8 = vld [vmem:[%s9950_s1 + $0x18] sm:$0xff]  ;;  %v347_v9 = vld [vmem:[%s9950_s1 + $0x10] sm:$0xff]  ;;  %vm4807_vm4 = vcmask 261120   ;;  %vm5481_vm5 = vcmask 259072  }
   0xe   : > { %6613 = vmatprep.subr.mxu0 %v354_v1  ;;  %s7413_s28 = smul.u32 960, %s10218_s19  ;;  %v346_v10 = vld [vmem:[%s9950_s1 + $0x8] sm:$0xff]  ;;  %v345_v11 = vld [vmem:[%s9950_s1] sm:$0xff]  ;;  %v5756_v45 = vld [vmem:[%s9952_s3 + $0xb8] sm:$0xff]  ;;  %vm4919_vm6 = vcmask 257024   ;;  %vm5475_vm7 = vcmask 256000  }
   0xf   : > { %6614 = vmatpush3.msra.mxu0 %v354_v1  ;;  %6813 = vmatprep.subr.mxu1 %v5756_v45  ;;  %v5755_v48 = vld [vmem:[%s9952_s3 + $0xb0] sm:$0xff]  ;;  %v5754_v50 = vld [vmem:[%s9952_s3 + $0xa8] sm:$0xff]  ;;  %v5753_v52 = vld [vmem:[%s9952_s3 + $0xa0] sm:$0xff]  ;;  %s7414_s11 = smul.u32 200, %s10218_s19 }
  0x10   : > { %6615 = vmatprep.subr.mxu0 %v353_v2  ;;  %s7579_s8 = scalar_lea.vmem %s9949_s0, %s7413_s28  ;;  %6814 = vmatpush3.msra.mxu1 %v5756_v45  ;;  %v5752_v54 = vld [vmem:[%s9952_s3 + $0x98] sm:$0xff]  ;;  %v5751_v56 = vld [vmem:[%s9952_s3 + $0x90] sm:$0xff]  ;;  %v5750_v58 = vld [vmem:[%s9952_s3 + $0x88] sm:$0xff] }
  0x11   : > { %6616 = vmatpush3.msra.mxu0 %v353_v2  ;;  %v225_v5 = vld [vmem:[%s7579_s8] sm:$0xff]  ;;  %v226_v12 = vld [vmem:[%s7579_s8 + $0x8] sm:$0xff]  ;;  %v227_v13 = vld [vmem:[%s7579_s8 + $0x10] sm:$0xff]  ;;  %6815 = vmatprep.subr.mxu1 %v5755_v48  ;;  %s9231_s13 = scalar_lea.vmem %s9954_s5, %s7414_s11 }
  0x12   : > { %6617 = vmatprep.subr.mxu0 %v352_v3  ;;  %6633 = vmatprep.mubr.msk.f32.mxu0 %vm363_vm1, %v225_v5  ;;  %v228_v14 = vld [vmem:[%s7579_s8 + $0x18] sm:$0xff]  ;;  %v229_v15 = vld [vmem:[%s7579_s8 + $0x20] sm:$0xff]  ;;  %v230_v16 = vld [vmem:[%s7579_s8 + $0x28] sm:$0xff] }
  0x13   : > { %6618 = vmatpush3.msra.mxu0 %v352_v3  ;;  %v231_v17 = vld [vmem:[%s7579_s8 + $0x30] sm:$0xff]  ;;  %v232_v18 = vld [vmem:[%s7579_s8 + $0x38] sm:$0xff]  ;;  %v233_v19 = vld [vmem:[%s7579_s8 + $0x40] sm:$0xff]  ;;  %6816 = vmatpush3.msra.mxu1 %v5755_v48 }
  0x14   : > { %6619 = vmatprep.subr.mxu0 %v351_v4  ;;  %v234_v20 = vld [vmem:[%s7579_s8 + $0x48] sm:$0xff]  ;;  %v235_v21 = vld [vmem:[%s7579_s8 + $0x50] sm:$0xff]  ;;  %v236_v22 = vld [vmem:[%s7579_s8 + $0x58] sm:$0xff]  ;;  %6817 = vmatprep.subr.mxu1 %v5754_v50 }
  0x15   : > { %6620 = vmatpush3.msra.mxu0 %v351_v4  ;;  %v237_v23 = vld [vmem:[%s7579_s8 + $0x60] sm:$0xff]  ;;  %v238_v24 = vld [vmem:[%s7579_s8 + $0x68] sm:$0xff]  ;;  %v239_v25 = vld [vmem:[%s7579_s8 + $0x70] sm:$0xff]  ;;  %6818 = vmatpush3.msra.mxu1 %v5754_v50 }
  0x16   : > { %6621 = vmatprep.subr.mxu0 %v350_v6  ;;  %v240_v26 = vld [vmem:[%s7579_s8 + $0x78] sm:$0xff]  ;;  %v241_v27 = vld [vmem:[%s7579_s8 + $0x80] sm:$0xff]  ;;  %v242_v28 = vld [vmem:[%s7579_s8 + $0x88] sm:$0xff]  ;;  %6819 = vmatprep.subr.mxu1 %v5753_v52 }
  0x17   : > { %6622 = vmatpush3.msra.mxu0 %v350_v6  ;;  %v243_v29 = vld [vmem:[%s7579_s8 + $0x90] sm:$0xff]  ;;  %v244_v30 = vld [vmem:[%s7579_s8 + $0x98] sm:$0xff]  ;;  %v245_v31 = vld [vmem:[%s7579_s8 + $0xa0] sm:$0xff]  ;;  %6820 = vmatpush3.msra.mxu1 %v5753_v52 }
  0x18   : > { %6623 = vmatprep.subr.mxu0 %v349_v7  ;;  %v246_v32 = vld [vmem:[%s7579_s8 + $0xa8] sm:$0xff]  ;;  %v247_v33 = vld [vmem:[%s7579_s8 + $0xb0] sm:$0xff]  ;;  %v248_v34 = vld [vmem:[%s7579_s8 + $0xb8] sm:$0xff]  ;;  %6821 = vmatprep.subr.mxu1 %v5752_v54 }
  0x19   : > { %6624 = vmatpush3.msra.mxu0 %v349_v7  ;;  %v249_v35 = vld [vmem:[%s7579_s8 + $0xc0] sm:$0xff]  ;;  %v250_v36 = vld [vmem:[%s7579_s8 + $0xc8] sm:$0xff]  ;;  %v251_v37 = vld [vmem:[%s7579_s8 + $0xd0] sm:$0xff]  ;;  %6822 = vmatpush3.msra.mxu1 %v5752_v54 }
  0x1a   : > { %6625 = vmatprep.subr.mxu0 %v348_v8  ;;  %v252_v38 = vld [vmem:[%s7579_s8 + $0xd8] sm:$0xff]  ;;  %v253_v39 = vld [vmem:[%s7579_s8 + $0xe0] sm:$0xff]  ;;  %v254_v40 = vld [vmem:[%s7579_s8 + $0xe8] sm:$0xff]  ;;  %6823 = vmatprep.subr.mxu1 %v5751_v56 }
  0x1b   : > { %6626 = vmatpush3.msra.mxu0 %v348_v8  ;;  %v255_v41 = vld [vmem:[%s7579_s8 + $0xf0] sm:$0xff]  ;;  %v256_v42 = vld [vmem:[%s7579_s8 + $0xf8] sm:$0xff]  ;;  %v257_v43 = vld [vmem:[%s7579_s8 + $0x100] sm:$0xff]  ;;  %6824 = vmatpush3.msra.mxu1 %v5751_v56 }
  0x1c   : > { %6627 = vmatprep.subr.mxu0 %v347_v9  ;;  %v258_v44 = vld [vmem:[%s7579_s8 + $0x108] sm:$0xff]  ;;  %v259_v46 = vld [vmem:[%s7579_s8 + $0x110] sm:$0xff]  ;;  %v260_v47 = vld [vmem:[%s7579_s8 + $0x118] sm:$0xff]  ;;  %6825 = vmatprep.subr.mxu1 %v5750_v58 }
  0x1d   : > { %6628 = vmatpush3.msra.mxu0 %v347_v9  ;;  %v261_v49 = vld [vmem:[%s7579_s8 + $0x120] sm:$0xff]  ;;  %v262_v51 = vld [vmem:[%s7579_s8 + $0x128] sm:$0xff]  ;;  %v263_v53 = vld [vmem:[%s7579_s8 + $0x130] sm:$0xff]  ;;  %6826 = vmatpush3.msra.mxu1 %v5750_v58 }
  0x1e   : > { %6629 = vmatprep.subr.mxu0 %v346_v10  ;;  %v264_v55 = vld [vmem:[%s7579_s8 + $0x138] sm:$0xff]  ;;  %v265_v57 = vld [vmem:[%s7579_s8 + $0x140] sm:$0xff]  ;;  %v266_v59 = vld [vmem:[%s7579_s8 + $0x148] sm:$0xff] }
  0x1f   : > { %6630 = vmatpush3.msra.mxu0 %v346_v10  ;;  %v5749_v60 = vld [vmem:[%s9952_s3 + $0x80] sm:$0xff]  ;;  %v267_v61 = vld [vmem:[%s7579_s8 + $0x150] sm:$0xff]  ;;  %v5748_v62 = vld [vmem:[%s9952_s3 + $0x78] sm:$0xff] }
  0x20   : > { %6631 = vmatprep.subr.mxu0 %v345_v11  ;;  %6827 = vmatprep.subr.mxu1 %v5749_v60  ;;  %v268_v63 = vld [vmem:[%s7579_s8 + $0x158] sm:$0xff]  ;;  %v5747_v0 = vld [vmem:[%s9952_s3 + $0x70] sm:$0xff]  ;;  %v269_v1 = vld [vmem:[%s7579_s8 + $0x160] sm:$0xff] }
  0x21   : > { %6632 = vmatpush3.msra.mxu0 %v345_v11  ;;  %6828 = vmatpush3.msra.mxu1 %v5749_v60  ;;  %v5992_v2 = vld [vmem:[%s9952_s3 + $0x118] sm:$0xff]  ;;  %v5746_v3 = vld [vmem:[%s9952_s3 + $0x68] sm:$0xff]  ;;  %v5745_v5 = vld [vmem:[%s9952_s3 + $0x60] sm:$0xff] }
  0x22   : > { %6634 = vmatmul.mubr.msk.f32.vlgmr.msra.gmra.mxu0 %vm363_vm1, %v226_v12  ;;  %6829 = vmatprep.subr.mxu1 %v5748_v62  ;;  %v270_v4 = vld [vmem:[%s7579_s8 + $0x168] sm:$0xff]  ;;  %v271_v6 = vld [vmem:[%s7579_s8 + $0x170] sm:$0xff]  ;;  %v272_v7 = vld [vmem:[%s7579_s8 + $0x178] sm:$0xff] }
  0x23   : > { %6636 = vmatprep.mubr.msk.f32.mxu0 %vm363_vm1, %v227_v13  ;;  %6830 = vmatpush3.msra.mxu1 %v5748_v62  ;;  %v5991_v8 = vld [vmem:[%s9952_s3 + $0x110] sm:$0xff]  ;;  %v273_v9 = vld [vmem:[%s7579_s8 + $0x180] sm:$0xff]  ;;  %v7740_v10 = vld [vmem:[%s9952_s3 + $0x58] sm:$0xff] }
  0x24   : > { %6831 = vmatprep.subr.mxu1 %v5747_v0  ;;  %7197 = vmatprep.subr.mxu0 %v5992_v2  ;;  %v5990_v11 = vld [vmem:[%s9952_s3 + $0x108] sm:$0xff]  ;;  %v5989_v13 = vld [vmem:[%s9952_s3 + $0x100] sm:$0xff]  ;;  %v303_v50 = vld [vmem:[%s7579_s8 + $0x270] sm:$0xff] }
  0x25   : > { %6832 = vmatpush3.msra.mxu1 %v5747_v0  ;;  %7198 = vmatpush3.msra.mxu0 %v5992_v2  ;;  %v274_v12 = vld [vmem:[%s7579_s8 + $0x188] sm:$0xff]  ;;  %v301_v48 = vld [vmem:[%s7579_s8 + $0x260] sm:$0xff]  ;;  %v307_v54 = vld [vmem:[%s7579_s8 + $0x290] sm:$0xff] }
  0x26   : > { %6637 = vmatmul.mubr.msk.f32.gmra.mxu0 %vm363_vm1, %v228_v14  ;;  %6833 = vmatprep.subr.mxu1 %v5746_v3  ;;  %v275_v14 = vld [vmem:[%s7579_s8 + $0x190] sm:$0xff]  ;;  %v298_v45 = vld [vmem:[%s7579_s8 + $0x248] sm:$0xff]  ;;  %v305_v52 = vld [vmem:[%s7579_s8 + $0x280] sm:$0xff] }
  0x27   : > { %6639 = vmatprep.mubr.msk.f32.mxu0 %vm363_vm1, %v229_v15  ;;  %6834 = vmatpush3.msra.mxu1 %v5746_v3  ;;  %v5988_v15 = vld [vmem:[%s9952_s3 + $0xf8] sm:$0xff]  ;;  %v309_v56 = vld [vmem:[%s7579_s8 + $0x2a0] sm:$0xff]  ;;  %v311_v58 = vld [vmem:[%s7579_s8 + $0x2b0] sm:$0xff] }
  0x28   : > { %6835 = vmatprep.subr.mxu1 %v5745_v5  ;;  %7199 = vmatprep.subr.mxu0 %v5991_v8  ;;  %v313_v60 = vld [vmem:[%s7579_s8 + $0x2c0] sm:$0xff]  ;;  %v315_v62 = vld [vmem:[%s7579_s8 + $0x2d0] sm:$0xff]  ;;  %v320_v3 = vld [vmem:[%s7579_s8 + $0x2f8] sm:$0xff] }
  0x29   : > { %6836 = vmatpush3.msra.mxu1 %v5745_v5  ;;  %7200 = vmatpush3.msra.mxu0 %v5991_v8  ;;  %v317_v0 = vld [vmem:[%s7579_s8 + $0x2e0] sm:$0xff]  ;;  %v319_v2 = vld [vmem:[%s7579_s8 + $0x2f0] sm:$0xff]  ;;  %v322_v5 = vld [vmem:[%s7579_s8 + $0x308] sm:$0xff] }
  0x2a   : > { %6640 = vmatmul.mubr.msk.f32.gmra.mxu0 %vm363_vm1, %v230_v16  ;;  %7005 = vmatprep.subr.mxu1 %v7740_v10  ;;  %v276_v16 = vld [vmem:[%s7579_s8 + $0x198] sm:$0xff] }
  0x2b   : > { %6642 = vmatprep.mubr.msk.f32.mxu0 %vm363_vm1, %v231_v17  ;;  %7201 = vmatprep.subr.mxu0 %v5990_v11  ;;  %v5987_v17 = vld [vmem:[%s9952_s3 + $0xf0] sm:$0xff] }
  0x2c   : > { %7202 = vmatpush3.msra.mxu0 %v5990_v11  ;;  %v324_v11 = vld [vmem:[%s7579_s8 + $0x318] sm:$0xff] }
  0x2d   : > { %7203 = vmatprep.subr.mxu0 %v5989_v13 }
  0x2e   : > { %6643 = vmatmul.mubr.msk.f32.gmra.mxu0 %vm363_vm1, %v232_v18  ;;  %v277_v18 = vld [vmem:[%s7579_s8 + $0x1a0] sm:$0xff] }
  0x2f   : > { %6645 = vmatprep.mubr.msk.f32.mxu0 %vm363_vm1, %v233_v19  ;;  %7204 = vmatpush3.msra.mxu0 %v5989_v13  ;;  %v5986_v19 = vld [vmem:[%s9952_s3 + $0xe8] sm:$0xff]  ;;  %v325_v13 = vld [vmem:[%s7579_s8 + $0x320] sm:$0xff] }
  0x30   : > { %7205 = vmatprep.subr.mxu0 %v5988_v15 }
  0x31   : > { %7206 = vmatpush3.msra.mxu0 %v5988_v15 }
  0x32   : > { %6646 = vmatmul.mubr.msk.f32.gmra.mxu0 %vm363_vm1, %v234_v20  ;;  %7207 = vmatprep.subr.mxu0 %v5987_v17  ;;  %v278_v20 = vld [vmem:[%s7579_s8 + $0x1a8] sm:$0xff] }
  0x33   : > { %6648 = vmatprep.mubr.msk.f32.mxu0 %vm363_vm1, %v235_v21  ;;  %7208 = vmatpush3.msra.mxu0 %v5987_v17  ;;  %v5985_v21 = vld [vmem:[%s9952_s3 + $0xe0] sm:$0xff] }
  0x34   : > { %7209 = vmatprep.subr.mxu0 %v5986_v19 }
  0x35   : > { %7210 = vmatpush3.msra.mxu0 %v5986_v19  ;;  %v326_v19 = vld [vmem:[%s7579_s8 + $0x328] sm:$0xff] }
  0x36   : > { %6649 = vmatmul.mubr.msk.f32.gmra.mxu0 %vm363_vm1, %v236_v22  ;;  %v279_v22 = vld [vmem:[%s7579_s8 + $0x1b0] sm:$0xff]  ;;  %7211 = vmatprep.subr.mxu0 %v5985_v21 }
  0x37   : > { %6651 = vmatprep.mubr.msk.f32.mxu0 %vm363_vm1, %v237_v23  ;;  %v5984_v23 = vld [vmem:[%s9952_s3 + $0xd8] sm:$0xff]  ;;  %7212 = vmatpush3.msra.mxu0 %v5985_v21  ;;  %v327_v21 = vld [vmem:[%s7579_s8 + $0x330] sm:$0xff] }
  0x38   : > { %7213 = vmatprep.subr.mxu0 %v5984_v23 }
  0x39   : > { %7214 = vmatpush3.msra.mxu0 %v5984_v23 }
  0x3a   : > { %6652 = vmatmul.mubr.msk.f32.gmra.mxu0 %vm363_vm1, %v238_v24  ;;  %v280_v24 = vld [vmem:[%s7579_s8 + $0x1b8] sm:$0xff] }
  0x3b   : > { %6654 = vmatprep.mubr.msk.f32.mxu0 %vm363_vm1, %v239_v25  ;;  %v5983_v25 = vld [vmem:[%s9952_s3 + $0xd0] sm:$0xff] }
  0x3c   : > { %7215 = vmatprep.subr.mxu0 %v5983_v25 }
  0x3d   : > { %7216 = vmatpush3.msra.mxu0 %v5983_v25 }
  0x3e   : > { %6655 = vmatmul.mubr.msk.f32.gmra.mxu0 %vm363_vm1, %v240_v26  ;;  %v281_v26 = vld [vmem:[%s7579_s8 + $0x1c0] sm:$0xff] }
  0x3f   : > { %6657 = vmatprep.mubr.msk.f32.mxu0 %vm363_vm1, %v241_v27  ;;  %v5982_v27 = vld [vmem:[%s9952_s3 + $0xc8] sm:$0xff] }
  0x40   : > { %7217 = vmatprep.subr.mxu0 %v5982_v27 }
  0x41   : > { %7218 = vmatpush3.msra.mxu0 %v5982_v27  ;;  %v328_v27 = vld [vmem:[%s7579_s8 + $0x338] sm:$0xff] }
  0x42   : > { %6658 = vmatmul.mubr.msk.f32.gmra.mxu0 %vm363_vm1, %v242_v28  ;;  %v282_v28 = vld [vmem:[%s7579_s8 + $0x1c8] sm:$0xff] }
  0x43   : > { %6660 = vmatprep.mubr.msk.f32.mxu0 %vm363_vm1, %v243_v29  ;;  %v5981_v29 = vld [vmem:[%s9952_s3 + $0xc0] sm:$0xff] }
  0x44   : > { %7219 = vmatprep.subr.mxu0 %v5981_v29 }
  0x45   : > { %7220 = vmatpush3.msra.mxu0 %v5981_v29  ;;  %v329_v29 = vld [vmem:[%s7579_s8 + $0x340] sm:$0xff] }
  0x46   : > { %6661 = vmatmul.mubr.msk.f32.gmra.mxu0 %vm363_vm1, %v244_v30  ;;  %v283_v30 = vld [vmem:[%s7579_s8 + $0x1d0] sm:$0xff] }
  0x47   : > { %6663 = vmatprep.mubr.msk.f32.mxu0 %vm363_vm1, %v245_v31  ;;  %v284_v31 = vld [vmem:[%s7579_s8 + $0x1d8] sm:$0xff] }
  0x4a   : > { %6664 = vmatmul.mubr.msk.f32.gmra.mxu0 %vm363_vm1, %v246_v32  ;;  %v285_v32 = vld [vmem:[%s7579_s8 + $0x1e0] sm:$0xff] }
  0x4b   : > { %6666 = vmatprep.mubr.msk.f32.mxu0 %vm363_vm1, %v247_v33  ;;  %v286_v33 = vld [vmem:[%s7579_s8 + $0x1e8] sm:$0xff] }
  0x4e   : > { %6667 = vmatmul.mubr.msk.f32.gmra.mxu0 %vm363_vm1, %v248_v34  ;;  %v287_v34 = vld [vmem:[%s7579_s8 + $0x1f0] sm:$0xff] }
  0x4f   : > { %6669 = vmatprep.mubr.msk.f32.mxu0 %vm363_vm1, %v249_v35  ;;  %v288_v35 = vld [vmem:[%s7579_s8 + $0x1f8] sm:$0xff] }
  0x52   : > { %6670 = vmatmul.mubr.msk.f32.gmra.mxu0 %vm363_vm1, %v250_v36  ;;  %v289_v36 = vld [vmem:[%s7579_s8 + $0x200] sm:$0xff] }
  0x53   : > { %6672 = vmatprep.mubr.msk.f32.mxu0 %vm363_vm1, %v251_v37  ;;  %v290_v37 = vld [vmem:[%s7579_s8 + $0x208] sm:$0xff] }
  0x56   : > { %6673 = vmatmul.mubr.msk.f32.gmra.mxu0 %vm363_vm1, %v252_v38  ;;  %v291_v38 = vld [vmem:[%s7579_s8 + $0x210] sm:$0xff] }
  0x57   : > { %6675 = vmatprep.mubr.msk.f32.mxu0 %vm363_vm1, %v253_v39  ;;  %v292_v39 = vld [vmem:[%s7579_s8 + $0x218] sm:$0xff] }
  0x5a   : > { %6676 = vmatmul.mubr.msk.f32.gmra.mxu0 %vm363_vm1, %v254_v40  ;;  %v293_v40 = vld [vmem:[%s7579_s8 + $0x220] sm:$0xff] }
  0x5b   : > { %6678 = vmatprep.mubr.msk.f32.mxu0 %vm363_vm1, %v255_v41  ;;  %v294_v41 = vld [vmem:[%s7579_s8 + $0x228] sm:$0xff] }
  0x5e   : > { %6679 = vmatmul.mubr.msk.f32.gmra.mxu0 %vm363_vm1, %v256_v42  ;;  %v295_v42 = vld [vmem:[%s7579_s8 + $0x230] sm:$0xff] }
  0x5f   : > { %6681 = vmatprep.mubr.msk.f32.mxu0 %vm363_vm1, %v257_v43  ;;  %v296_v43 = vld [vmem:[%s7579_s8 + $0x238] sm:$0xff] }
  0x62   : > { %6682 = vmatmul.mubr.msk.f32.gmra.mxu0 %vm363_vm1, %v258_v44  ;;  %v297_v44 = vld [vmem:[%s7579_s8 + $0x240] sm:$0xff] }
  0x63   : > { %6684 = vmatprep.mubr.msk.f32.mxu0 %vm363_vm1, %v259_v46  ;;  %v299_v46 = vld [vmem:[%s7579_s8 + $0x250] sm:$0xff] }
  0x66   : > { %6685 = vmatmul.mubr.msk.f32.gmra.mxu0 %vm363_vm1, %v260_v47  ;;  %v300_v47 = vld [vmem:[%s7579_s8 + $0x258] sm:$0xff] }
  0x67   : > { %6687 = vmatprep.mubr.msk.f32.mxu0 %vm363_vm1, %v261_v49  ;;  %v302_v49 = vld [vmem:[%s7579_s8 + $0x268] sm:$0xff] }
  0x6a   : > { %6688 = vmatmul.mubr.msk.f32.gmra.mxu0 %vm363_vm1, %v262_v51  ;;  %v304_v51 = vld [vmem:[%s7579_s8 + $0x278] sm:$0xff] }
  0x6b   : > { %6690 = vmatprep.mubr.msk.f32.mxu0 %vm363_vm1, %v263_v53  ;;  %v306_v53 = vld [vmem:[%s7579_s8 + $0x288] sm:$0xff] }
  0x6e   : > { %6691 = vmatmul.mubr.msk.f32.gmra.mxu0 %vm363_vm1, %v264_v55  ;;  %v308_v55 = vld [vmem:[%s7579_s8 + $0x298] sm:$0xff] }
  0x6f   : > { %6693 = vmatprep.mubr.msk.f32.mxu0 %vm363_vm1, %v265_v57  ;;  %v310_v57 = vld [vmem:[%s7579_s8 + $0x2a8] sm:$0xff] }
  0x72   : > { %6694 = vmatmul.mubr.msk.f32.gmra.mxu0 %vm363_vm1, %v266_v59  ;;  %v312_v59 = vld [vmem:[%s7579_s8 + $0x2b8] sm:$0xff] }
  0x73   : > { %6696 = vmatprep.mubr.msk.f32.mxu0 %vm363_vm1, %v267_v61  ;;  %v314_v61 = vld [vmem:[%s7579_s8 + $0x2c8] sm:$0xff] }
  0x76   : > { %6697 = vmatmul.mubr.msk.f32.gmra.mxu0 %vm363_vm1, %v268_v63  ;;  %v316_v63 = vld [vmem:[%s7579_s8 + $0x2d8] sm:$0xff] }
  0x77   : > { %6699 = vmatprep.mubr.msk.f32.mxu0 %vm363_vm1, %v269_v1  ;;  %v318_v1 = vld [vmem:[%s7579_s8 + $0x2e8] sm:$0xff] }
  0x7a   : > { %6700 = vmatmul.mubr.msk.f32.gmra.mxu0 %vm363_vm1, %v270_v4  ;;  %v321_v4 = vld [vmem:[%s7579_s8 + $0x300] sm:$0xff] }
  0x7b   : > { %6702 = vmatprep.mubr.msk.f32.mxu0 %vm363_vm1, %v271_v6  ;;  %v7875_v6 = vld [vmem:[%s9951_s2] ss:$0 sm:$0xff] }
  0x7e   : > { %6703 = vmatmul.mubr.msk.f32.gmra.mxu0 %vm363_vm1, %v272_v7  ;;  %v323_v7 = vld [vmem:[%s7579_s8 + $0x310] sm:$0xff] }
  0x7f   : > { %6705 = vmatprep.mubr.msk.f32.mxu0 %vm363_vm1, %v273_v9 }
  0x82   : > { %6706 = vmatmul.mubr.msk.f32.gmra.mxu0 %vm363_vm1, %v274_v12 }
  0x83   : > { %6708 = vmatprep.mubr.msk.f32.mxu0 %vm363_vm1, %v275_v14 }
  0x86   : > { %6709 = vmatmul.mubr.msk.f32.gmra.mxu0 %vm363_vm1, %v276_v16 }
  0x87   : > { %6711 = vmatprep.mubr.msk.f32.mxu0 %vm363_vm1, %v277_v18 }
  0x8a   : > { %6712 = vmatmul.mubr.msk.f32.gmra.mxu0 %vm363_vm1, %v278_v20 }
  0x8b   : > { %6714 = vmatprep.mubr.msk.f32.mxu0 %vm363_vm1, %v279_v22 }
  0x8e   : > { %6715 = vmatmul.mubr.msk.f32.gmra.mxu0 %vm363_vm1, %v280_v24 }
  0x8f   : > { %6717 = vmatprep.mubr.msk.f32.mxu0 %vm363_vm1, %v281_v26 }
  0x92   : > { %6718 = vmatmul.mubr.msk.f32.gmra.mxu0 %vm363_vm1, %v282_v28 }
  0x93   : > { %6720 = vmatprep.mubr.msk.f32.mxu0 %vm363_vm1, %v283_v30 }
  0x96   : > { %6721 = vmatmul.mubr.msk.f32.gmra.mxu0 %vm363_vm1, %v284_v31 }
  0x97   : > { %6723 = vmatprep.mubr.msk.f32.mxu0 %vm363_vm1, %v285_v32 }
  0x9a   : > { %6724 = vmatmul.mubr.msk.f32.gmra.mxu0 %vm363_vm1, %v286_v33 }
  0x9b   : > { %6726 = vmatprep.mubr.msk.f32.mxu0 %vm363_vm1, %v287_v34 }
  0x9e   : > { %6727 = vmatmul.mubr.msk.f32.gmra.mxu0 %vm363_vm1, %v288_v35  ;;  %v330_v35 = vld [vmem:[%s7579_s8 + $0x348] sm:$0xff] }
  0x9f   : > { %6729 = vmatprep.mubr.msk.f32.mxu0 %vm363_vm1, %v289_v36 }
  0xa2   : > { %6730 = vmatmul.mubr.msk.f32.gmra.mxu0 %vm363_vm1, %v290_v37  ;;  %v331_v37 = vld [vmem:[%s7579_s8 + $0x350] sm:$0xff] }
  0xa3   : > { %6732 = vmatprep.mubr.msk.f32.mxu0 %vm363_vm1, %v291_v38 }
  0xa6   : > { %6733 = vmatmul.mubr.msk.f32.gmra.mxu0 %vm363_vm1, %v292_v39 }
  0xa7   : > { %6735 = vmatprep.mubr.msk.f32.mxu0 %vm363_vm1, %v293_v40 }
  0xaa   : > { %6736 = vmatmul.mubr.msk.f32.gmra.mxu0 %vm363_vm1, %v294_v41 }
  0xab   : > { %6738 = vmatprep.mubr.msk.f32.mxu0 %vm363_vm1, %v295_v42 }
  0xae   : > { %6739 = vmatmul.mubr.msk.f32.gmra.mxu0 %vm363_vm1, %v296_v43  ;;  %v332_v43 = vld [vmem:[%s7579_s8 + $0x358] sm:$0xff] }
  0xaf   : > { %6741 = vmatprep.mubr.msk.f32.mxu0 %vm363_vm1, %v297_v44 }
  0xb2   : > { %6742 = vmatmul.mubr.msk.f32.gmra.mxu0 %vm363_vm1, %v298_v45  ;;  %v333_v45 = vld [vmem:[%s7579_s8 + $0x360] sm:$0xff] }
  0xb3   : > { %6744 = vmatprep.mubr.msk.f32.mxu0 %vm363_vm1, %v299_v46 }
  0xb6   : > { %6745 = vmatmul.mubr.msk.f32.gmra.mxu0 %vm363_vm1, %v300_v47 }
  0xb7   : > { %6747 = vmatprep.mubr.msk.f32.mxu0 %vm363_vm1, %v301_v48 }
  0xba   : > { %6748 = vmatmul.mubr.msk.f32.gmra.mxu0 %vm363_vm1, %v302_v49 }
  0xbb   : > { %6750 = vmatprep.mubr.msk.f32.mxu0 %vm363_vm1, %v303_v50 }
  0xbe   : > { %6751 = vmatmul.mubr.msk.f32.gmra.mxu0 %vm363_vm1, %v304_v51  ;;  %v334_v51 = vld [vmem:[%s7579_s8 + $0x368] sm:$0xff] }
  0xbf   : > { %6753 = vmatprep.mubr.msk.f32.mxu0 %vm363_vm1, %v305_v52 }
  0xc2   : > { %6754 = vmatmul.mubr.msk.f32.gmra.mxu0 %vm363_vm1, %v306_v53 }
  0xc3   : > { %6756 = vmatprep.mubr.msk.f32.mxu0 %vm363_vm1, %v307_v54  ;;  %v335_v54 = vld [vmem:[%s7579_s8 + $0x370] sm:$0xff] }
  0xc6   : > { %6757 = vmatmul.mubr.msk.f32.gmra.mxu0 %vm363_vm1, %v308_v55 }
  0xc7   : > { %6759 = vmatprep.mubr.msk.f32.mxu0 %vm363_vm1, %v309_v56 }
  0xca   : > { %6760 = vmatmul.mubr.msk.f32.gmra.mxu0 %vm363_vm1, %v310_v57 }
  0xcb   : > { %6762 = vmatprep.mubr.msk.f32.mxu0 %vm363_vm1, %v311_v58  ;;  %v1757_v58 = vld [vmem:[%s9952_s3 + $0x50] sm:$0xff] }
  0xce   : > { %6763 = vmatmul.mubr.msk.f32.gmra.mxu0 %vm363_vm1, %v312_v59 }
  0xcf   : > { %6765 = vmatprep.mubr.msk.f32.mxu0 %vm363_vm1, %v313_v60 }
  0xd2   : > { %6766 = vmatmul.mubr.msk.f32.gmra.mxu0 %vm363_vm1, %v314_v61 }
  0xd3   : > { %6768 = vmatprep.mubr.msk.f32.mxu0 %vm363_vm1, %v315_v62  ;;  %v336_v62 = vld [vmem:[%s7579_s8 + $0x378] sm:$0xff] }
  0xd6   : > { %6769 = vmatmul.mubr.msk.f32.gmra.mxu0 %vm363_vm1, %v316_v63 }
  0xd7   : > { %6771 = vmatprep.mubr.msk.f32.mxu0 %vm363_vm1, %v317_v0 }
  0xda   : > { %6772 = vmatmul.mubr.msk.f32.gmra.mxu0 %vm363_vm1, %v318_v1  ;;  %v337_v1 = vld [vmem:[%s7579_s8 + $0x380] sm:$0xff] }
  0xdb   : > { %6774 = vmatprep.mubr.msk.f32.mxu0 %vm363_vm1, %v319_v2  ;;  %v1756_v2 = vld [vmem:[%s9952_s3 + $0x48] sm:$0xff] }
  0xde   : > { %6775 = vmatmul.mubr.msk.f32.gmra.mxu0 %vm363_vm1, %v320_v3 }
  0xdf   : > { %6777 = vmatprep.mubr.msk.f32.mxu0 %vm363_vm1, %v321_v4 }
  0xe2   : > { %v6635_v8 = vpop.f32.mrf.mxu0  ;;  %6778 = vmatmul.mubr.msk.f32.gmra.mxu0 %vm363_vm1, %v322_v5 }
  0xe3   : > { %v800_v9 = vadd.f32 %v6635_v8, %v7875_v6  ;;  %6780 = vmatprep.mubr.msk.f32.mxu0 %vm363_vm1, %v323_v7  ;;  %v1755_v7 = vld [vmem:[%s9952_s3 + $0x40] sm:$0xff] }
  0xe4   : > { %v794_v12 = vpop.f32.mrf.mxu0 }
  0xe5   : > { %v1394_v14 = vmax.f32 %v800_v9, 0.0  ;;  %v795_v15 = vadd.f32 %v7875_v6, %v794_v12 }
  0xe6   : > { %v6638_v16 = vpop.f32.mrf.mxu0  ;;  %6781 = vmatmul.mubr.msk.f32.gmra.mxu0 %vm363_vm1, %v324_v11  ;;  %v338_v11 = vld [vmem:[%s7579_s8 + $0x388] sm:$0xff] }
  0xe7   : > { %1515 = vst.msk [vmem:[#allocation2 + $0x8] sm:$0xff] %vm1513_vm2, %v1394_v14  ;;  %v1393_v17 = vmax.f32 %v795_v15, 0.0  ;;  %v810_v18 = vadd.f32 %v6638_v16, %v7875_v6  ;;  %6783 = vmatprep.mubr.msk.f32.mxu0 %vm363_vm1, %v325_v13  ;;  %v339_v14 = vld [vmem:[%s7579_s8 + $0x390] sm:$0xff] }
  0xe8   : > { %v804_v20 = vpop.f32.mrf.mxu0 }
  0xe9   : > { %1514 = vst.msk [vmem:[#allocation2] sm:$0xff] %vm1513_vm2, %v1393_v17  ;;  %v1396_v22 = vmax.f32 %v810_v18, 0.0  ;;  %v805_v23 = vadd.f32 %v7875_v6, %v804_v20  ;;  %v1754_v18 = vld [vmem:[%s9952_s3 + $0x38] sm:$0xff] }
  0xea   : > { %v6641_v24 = vpop.f32.mrf.mxu0  ;;  %6784 = vmatmul.mubr.msk.f32.gmra.mxu0 %vm363_vm1, %v326_v19 }
  0xeb   : > { %1517 = vst.msk [vmem:[#allocation2 + $0x18] sm:$0xff] %vm1513_vm2, %v1396_v22  ;;  %v1395_v25 = vmax.f32 %v805_v23, 0.0  ;;  %v820_v26 = vadd.f32 %v6641_v24, %v7875_v6  ;;  %6786 = vmatprep.mubr.msk.f32.mxu0 %vm363_vm1, %v327_v21  ;;  %v340_v22 = vld [vmem:[%s7579_s8 + $0x398] sm:$0xff] }
  0xec   : > { %v814_v28 = vpop.f32.mrf.mxu0 }
  0xed   : > { %1516 = vst.msk [vmem:[#allocation2 + $0x10] sm:$0xff] %vm1513_vm2, %v1395_v25  ;;  %v1398_v30 = vmax.f32 %v820_v26, 0.0  ;;  %v815_v31 = vadd.f32 %v7875_v6, %v814_v28  ;;  %v341_v25 = vld [vmem:[%s7579_s8 + $0x3a0] sm:$0xff]  ;;  %v1753_v26 = vld [vmem:[%s9952_s3 + $0x30] sm:$0xff] }
  0xee   : > { %v6644_v32 = vpop.f32.mrf.mxu0  ;;  %6787 = vmatmul.mubr.msk.f32.gmra.mxu0 %vm363_vm1, %v328_v27 }
  0xef   : > { %1519 = vst.msk [vmem:[#allocation2 + $0x28] sm:$0xff] %vm1513_vm2, %v1398_v30  ;;  %v1397_v33 = vmax.f32 %v815_v31, 0.0  ;;  %v830_v34 = vadd.f32 %v6644_v32, %v7875_v6  ;;  %6789 = vmatprep.mubr.msk.f32.mxu0 %vm363_vm1, %v329_v29  ;;  %v1752_v31 = vld [vmem:[%s9952_s3 + $0x28] sm:$0xff] }
  0xf0   : > { %v824_v36 = vpop.f32.mrf.mxu0 }
  0xf1   : > { %1518 = vst.msk [vmem:[#allocation2 + $0x20] sm:$0xff] %vm1513_vm2, %v1397_v33  ;;  %v1400_v38 = vmax.f32 %v830_v34, 0.0  ;;  %v825_v39 = vadd.f32 %v7875_v6, %v824_v36  ;;  %v342_v34 = vld [vmem:[%s7579_s8 + $0x3a8] sm:$0xff] }
  0xf2   : > { %v6647_v40 = vpop.f32.mrf.mxu0  ;;  %6790 = vmatmul.mubr.msk.f32.gmra.mxu0 %vm363_vm1, %v330_v35 }
  0xf3   : > { %1521 = vst.msk [vmem:[#allocation2 + $0x38] sm:$0xff] %vm1513_vm2, %v1400_v38  ;;  %v1399_v41 = vmax.f32 %v825_v39, 0.0  ;;  %v840_v42 = vadd.f32 %v6647_v40, %v7875_v6  ;;  %6792 = vmatprep.mubr.msk.f32.mxu0 %vm363_vm1, %v331_v37  ;;  %v343_v37 = vld [vmem:[%s7579_s8 + $0x3b0] sm:$0xff] }
  0xf4   : > { %v834_v44 = vpop.f32.mrf.mxu0 }
  0xf5   : > { %1520 = vst.msk [vmem:[#allocation2 + $0x30] sm:$0xff] %vm1513_vm2, %v1399_v41  ;;  %v1402_v46 = vmax.f32 %v840_v42, 0.0  ;;  %v835_v47 = vadd.f32 %v7875_v6, %v834_v44  ;;  %v1751_v41 = vld [vmem:[%s9952_s3 + $0x20] sm:$0xff] }
  0xf6   : > { %v6650_v48 = vpop.f32.mrf.mxu0  ;;  %6793 = vmatmul.mubr.msk.f32.gmra.mxu0 %vm363_vm1, %v332_v43  ;;  %v1640_v57 = vld [vmem:[#allocation2 + $0x28] sm:$0xff] }
  0xf7   : > { %1523 = vst.msk [vmem:[#allocation2 + $0x48] sm:$0xff] %vm1513_vm2, %v1402_v46  ;;  %v1401_v49 = vmax.f32 %v835_v47, 0.0  ;;  %v850_v50 = vadd.f32 %v6650_v48, %v7875_v6  ;;  %6795 = vmatprep.mubr.msk.f32.mxu0 %vm363_vm1, %v333_v45  ;;  %v344_v45 = vld [vmem:[%s7579_s8 + $0x3b8] sm:$0xf] }
  0xf8   : > { %v844_v52 = vpop.f32.mrf.mxu0  ;;  %v1639_v53 = vld [vmem:[#allocation2 + $0x20] sm:$0xff] }
  0xf9   : > { %1522 = vst.msk [vmem:[#allocation2 + $0x40] sm:$0xff] %vm1513_vm2, %v1401_v49  ;;  %v1404_v55 = vmax.f32 %v850_v50, 0.0  ;;  %v845_v56 = vadd.f32 %v7875_v6, %v844_v52  ;;  %6837 = vmatprep.mubr.msk.f32.mxu1 %vm1513_vm2, %v1639_v53 }
  0xfa   : > { %v6653_v59 = vpop.f32.mrf.mxu0  ;;  %6796 = vmatmul.mubr.msk.f32.gmra.mxu0 %vm363_vm1, %v334_v51  ;;  %6838 = vmatmul.mubr.msk.f32.vlgmr.msra.gmra.mxu1 %vm1513_vm2, %v1640_v57 }
  0xfb   : > { %1525 = vst.msk [vmem:[#allocation2 + $0x58] sm:$0xff] %vm1513_vm2, %v1404_v55  ;;  %v1403_v60 = vmax.f32 %v845_v56, 0.0  ;;  %v860_v61 = vadd.f32 %v6653_v59, %v7875_v6  ;;  %7006 = vmatpush3.msra.mxu1 %v7740_v10  ;;  %6798 = vmatprep.mubr.msk.f32.mxu0 %vm363_vm1, %v335_v54  ;;  %v1642_v10 = vld [vmem:[#allocation2 + $0x38] sm:$0xff] }
  0xfc   : > { %v854_v63 = vpop.f32.mrf.mxu0  ;;  %v1641_v0 = vld [vmem:[#allocation2 + $0x30] sm:$0xff]  ;;  %7007 = vmatprep.subr.mxu1 %v1757_v58 }
  0xfd   : > { %1524 = vst.msk [vmem:[#allocation2 + $0x50] sm:$0xff] %vm1513_vm2, %v1403_v60  ;;  %v1406_v3 = vmax.f32 %v860_v61, 0.0  ;;  %v855_v4 = vadd.f32 %v7875_v6, %v854_v63  ;;  %6840 = vmatprep.mubr.msk.f32.mxu1 %vm1513_vm2, %v1641_v0  ;;  %7008 = vmatpush3.msra.mxu1 %v1757_v58 }
  0xfe   : > { %v6656_v5 = vpop.f32.mrf.mxu0  ;;  %6799 = vmatmul.mubr.msk.f32.gmra.mxu0 %vm363_vm1, %v336_v62  ;;  %6841 = vmatmul.mubr.msk.f32.gmra.mxu1 %vm1513_vm2, %v1642_v10  ;;  %v7958_v17 = vld [vmem:[#allocation2 + $0x48] sm:$0xff]  ;;  %v1750_v62 = vld [vmem:[%s9952_s3 + $0x18] sm:$0xff] }
  0xff   : > { %1527 = vst.msk [vmem:[#allocation2 + $0x68] sm:$0xff] %vm1513_vm2, %v1406_v3  ;;  %v1405_v8 = vmax.f32 %v855_v4, 0.0  ;;  %v870_v9 = vadd.f32 %v6656_v5, %v7875_v6  ;;  %6801 = vmatprep.mubr.msk.f32.mxu0 %vm363_vm1, %v337_v1  ;;  %7009 = vmatprep.subr.mxu1 %v1756_v2 }
 0x100   : > { %v864_v12 = vpop.f32.mrf.mxu0  ;;  %v7951_v13 = vld [vmem:[#allocation2 + $0x40] sm:$0xff]  ;;  %7010 = vmatpush3.msra.mxu1 %v1756_v2 }
 0x101   : > { %1526 = vst.msk [vmem:[#allocation2 + $0x60] sm:$0xff] %vm1513_vm2, %v1405_v8  ;;  %v1408_v15 = vmax.f32 %v870_v9, 0.0  ;;  %v865_v16 = vadd.f32 %v7875_v6, %v864_v12  ;;  %6843 = vmatprep.mubr.msk.f32.mxu1 %vm1513_vm2, %v7951_v13  ;;  %7011 = vmatprep.subr.mxu1 %v1755_v7 }
 0x102   : > { %v6659_v19 = vpop.f32.mrf.mxu0  ;;  %6802 = vmatmul.mubr.msk.f32.gmra.mxu0 %vm363_vm1, %v338_v11  ;;  %6844 = vmatmul.mubr.msk.f32.gmra.mxu1 %vm1513_vm2, %v7958_v17  ;;  %v7980_v29 = vld [vmem:[#allocation2 + $0x58] sm:$0xff] }
 0x103   : > { %1529 = vst.msk [vmem:[#allocation2 + $0x78] sm:$0xff] %vm1513_vm2, %v1408_v15  ;;  %v1407_v20 = vmax.f32 %v865_v16, 0.0  ;;  %v880_v21 = vadd.f32 %v6659_v19, %v7875_v6  ;;  %6804 = vmatprep.mubr.msk.f32.mxu0 %vm363_vm1, %v339_v14  ;;  %7012 = vmatpush3.msra.mxu1 %v1755_v7 }
 0x104   : > { %v874_v23 = vpop.f32.mrf.mxu0  ;;  %v7970_v24 = vld [vmem:[#allocation2 + $0x50] sm:$0xff]  ;;  %7013 = vmatprep.subr.mxu1 %v1754_v18 }
 0x105   : > { %1528 = vst.msk [vmem:[#allocation2 + $0x70] sm:$0xff] %vm1513_vm2, %v1407_v20  ;;  %v1410_v27 = vmax.f32 %v880_v21, 0.0  ;;  %v875_v28 = vadd.f32 %v7875_v6, %v874_v23  ;;  %6846 = vmatprep.mubr.msk.f32.mxu1 %vm1513_vm2, %v7970_v24  ;;  %7014 = vmatpush3.msra.mxu1 %v1754_v18 }
 0x106   : > { %v6662_v30 = vpop.f32.mrf.mxu0  ;;  %6805 = vmatmul.mubr.msk.f32.gmra.mxu0 %vm363_vm1, %v340_v22  ;;  %6847 = vmatmul.mubr.msk.f32.gmra.mxu1 %vm1513_vm2, %v7980_v29  ;;  %v7999_v40 = vld [vmem:[#allocation2 + $0x68] sm:$0xff] }
 0x107   : > { %1531 = vst.msk [vmem:[#allocation2 + $0x88] sm:$0xff] %vm1513_vm2, %v1410_v27  ;;  %v1409_v32 = vmax.f32 %v875_v28, 0.0  ;;  %v890_v33 = vadd.f32 %v6662_v30, %v7875_v6  ;;  %6807 = vmatprep.mubr.msk.f32.mxu0 %vm363_vm1, %v341_v25  ;;  %7015 = vmatprep.subr.mxu1 %v1753_v26 }
 0x108   : > { %v884_v35 = vpop.f32.mrf.mxu0  ;;  %v7992_v36 = vld [vmem:[#allocation2 + $0x60] sm:$0xff]  ;;  %7016 = vmatpush3.msra.mxu1 %v1753_v26 }
 0x109   : > { %1530 = vst.msk [vmem:[#allocation2 + $0x80] sm:$0xff] %vm1513_vm2, %v1409_v32  ;;  %v1412_v38 = vmax.f32 %v890_v33, 0.0  ;;  %v885_v39 = vadd.f32 %v7875_v6, %v884_v35  ;;  %6849 = vmatprep.mubr.msk.f32.mxu1 %vm1513_vm2, %v7992_v36  ;;  %7017 = vmatprep.subr.mxu1 %v1752_v31 }
 0x10a   : > { %v6665_v42 = vpop.f32.mrf.mxu0  ;;  %6808 = vmatmul.mubr.msk.f32.gmra.mxu0 %vm363_vm1, %v342_v34  ;;  %6850 = vmatmul.mubr.msk.f32.gmra.mxu1 %vm1513_vm2, %v7999_v40  ;;  %v8014_v50 = vld [vmem:[#allocation2 + $0x78] sm:$0xff] }
 0x10b   : > { %1533 = vst.msk [vmem:[#allocation2 + $0x98] sm:$0xff] %vm1513_vm2, %v1412_v38  ;;  %v1411_v43 = vmax.f32 %v885_v39, 0.0  ;;  %v900_v44 = vadd.f32 %v6665_v42, %v7875_v6  ;;  %6810 = vmatprep.mubr.msk.f32.mxu0 %vm363_vm1, %v343_v37  ;;  %7018 = vmatpush3.msra.mxu1 %v1752_v31  ;;  %v1749_v37 = vld [vmem:[%s9952_s3 + $0x10] sm:$0xff] }
 0x10c   : > { %v894_v46 = vpop.f32.mrf.mxu0  ;;  %v1649_v47 = vld [vmem:[#allocation2 + $0x70] sm:$0xff]  ;;  %7019 = vmatprep.subr.mxu1 %v1751_v41 }
 0x10d   : > { %1532 = vst.msk [vmem:[#allocation2 + $0x90] sm:$0xff] %vm1513_vm2, %v1411_v43  ;;  %v1414_v48 = vmax.f32 %v900_v44, 0.0  ;;  %v895_v49 = vadd.f32 %v7875_v6, %v894_v46  ;;  %6852 = vmatprep.mubr.msk.f32.mxu1 %vm1513_vm2, %v1649_v47  ;;  %7020 = vmatpush3.msra.mxu1 %v1751_v41 }
 0x10e   : > { %v6668_v51 = vpop.f32.mrf.mxu0  ;;  %6811 = vmatmul.mubr.msk.f32.gmra.mxu0 %vm363_vm1, %v344_v45  ;;  %6853 = vmatmul.mubr.msk.f32.gmra.mxu1 %vm1513_vm2, %v8014_v50  ;;  %v1652_v58 = vld [vmem:[#allocation2 + $0x88] sm:$0xff] }
 0x10f   : > { %1535 = vst.msk [vmem:[#allocation2 + $0xa8] sm:$0xff] %vm1513_vm2, %v1414_v48  ;;  %v1413_v52 = vmax.f32 %v895_v49, 0.0  ;;  %v910_v53 = vadd.f32 %v6668_v51, %v7875_v6  ;;  %7221 = vmatprep.mubr.msk.f32.mxu0 %vm1513_vm2, %v7951_v13  ;;  %7021 = vmatprep.subr.mxu1 %v1750_v62 }
 0x110   : > { %v904_v54 = vpop.f32.mrf.mxu0  ;;  %v1651_v55 = vld [vmem:[#allocation2 + $0x80] sm:$0xff]  ;;  %7022 = vmatpush3.msra.mxu1 %v1750_v62 }
 0x111   : > { %1534 = vst.msk [vmem:[#allocation2 + $0xa0] sm:$0xff] %vm1513_vm2, %v1413_v52  ;;  %v1416_v56 = vmax.f32 %v910_v53, 0.0  ;;  %v905_v57 = vadd.f32 %v7875_v6, %v904_v54  ;;  %6855 = vmatprep.mubr.msk.f32.mxu1 %vm1513_vm2, %v1651_v55  ;;  %7023 = vmatprep.subr.mxu1 %v1749_v37 }
 0x112   : > { %v6671_v59 = vpop.f32.mrf.mxu0  ;;  %6856 = vmatmul.mubr.msk.f32.gmra.mxu1 %vm1513_vm2, %v1652_v58  ;;  %7222 = vmatmul.mubr.msk.f32.vlgmr.msra.gmra.mxu0 %vm1513_vm2, %v7958_v17  ;;  %v1654_v3 = vld [vmem:[#allocation2 + $0x98] sm:$0xff] }
 0x113   : > { %1537 = vst.msk [vmem:[#allocation2 + $0xb8] sm:$0xff] %vm1513_vm2, %v1416_v56  ;;  %v1415_v60 = vmax.f32 %v905_v57, 0.0  ;;  %v920_v61 = vadd.f32 %v6671_v59, %v7875_v6  ;;  %7224 = vmatprep.mubr.msk.f32.mxu0 %vm1513_vm2, %v7970_v24  ;;  %7024 = vmatpush3.msra.mxu1 %v1749_v37 }
 0x114   : > { %v914_v63 = vpop.f32.mrf.mxu0  ;;  %v1653_v0 = vld [vmem:[#allocation2 + $0x90] sm:$0xff] }
 0x115   : > { %1536 = vst.msk [vmem:[#allocation2 + $0xb0] sm:$0xff] %vm1513_vm2, %v1415_v60  ;;  %v1418_v1 = vmax.f32 %v920_v61, 0.0  ;;  %v915_v2 = vadd.f32 %v7875_v6, %v914_v63  ;;  %6858 = vmatprep.mubr.msk.f32.mxu1 %vm1513_vm2, %v1653_v0 }
 0x116   : > { %v6674_v4 = vpop.f32.mrf.mxu0  ;;  %6859 = vmatmul.mubr.msk.f32.gmra.mxu1 %vm1513_vm2, %v1654_v3  ;;  %7225 = vmatmul.mubr.msk.f32.gmra.mxu0 %vm1513_vm2, %v7980_v29  ;;  %v1656_v12 = vld [vmem:[#allocation2 + $0xa8] sm:$0xff] }
 0x117   : > { %1539 = vst.msk [vmem:[#allocation2 + $0xc8] sm:$0xff] %vm1513_vm2, %v1418_v1  ;;  %v1417_v10 = vmax.f32 %v915_v2, 0.0  ;;  %v930_v5 = vadd.f32 %v6674_v4, %v7875_v6  ;;  %7227 = vmatprep.mubr.msk.f32.mxu0 %vm1513_vm2, %v7992_v36 }
 0x118   : > { %v924_v7 = vpop.f32.mrf.mxu0  ;;  %v1655_v8 = vld [vmem:[#allocation2 + $0xa0] sm:$0xff] }
 0x119   : > { %1538 = vst.msk [vmem:[#allocation2 + $0xc0] sm:$0xff] %vm1513_vm2, %v1417_v10  ;;  %v1420_v9 = vmax.f32 %v930_v5, 0.0  ;;  %v925_v11 = vadd.f32 %v7875_v6, %v924_v7  ;;  %6861 = vmatprep.mubr.msk.f32.mxu1 %vm1513_vm2, %v1655_v8 }
 0x11a   : > { %v6677_v13 = vpop.f32.mrf.mxu0  ;;  %6862 = vmatmul.mubr.msk.f32.gmra.mxu1 %vm1513_vm2, %v1656_v12  ;;  %7228 = vmatmul.mubr.msk.f32.gmra.mxu0 %vm1513_vm2, %v7999_v40  ;;  %v1658_v20 = vld [vmem:[#allocation2 + $0xb8] sm:$0xff] }
 0x11b   : > { %1541 = vst.msk [vmem:[#allocation2 + $0xd8] sm:$0xff] %vm1513_vm2, %v1420_v9  ;;  %v1419_v14 = vmax.f32 %v925_v11, 0.0  ;;  %v940_v15 = vadd.f32 %v6677_v13, %v7875_v6  ;;  %7230 = vmatprep.mubr.msk.f32.mxu0 %vm1513_vm2, %v1649_v47 }
 0x11c   : > { %v934_v16 = vpop.f32.mrf.mxu0  ;;  %v1657_v17 = vld [vmem:[#allocation2 + $0xb0] sm:$0xff] }
 0x11d   : > { %1540 = vst.msk [vmem:[#allocation2 + $0xd0] sm:$0xff] %vm1513_vm2, %v1419_v14  ;;  %v1422_v18 = vmax.f32 %v940_v15, 0.0  ;;  %v935_v19 = vadd.f32 %v7875_v6, %v934_v16  ;;  %6864 = vmatprep.mubr.msk.f32.mxu1 %vm1513_vm2, %v1657_v17  ;;  %v1748_v15 = vld [vmem:[%s9952_s3 + $0x8] sm:$0xff] }
 0x11e   : > { %v6680_v21 = vpop.f32.mrf.mxu0  ;;  %6865 = vmatmul.mubr.msk.f32.gmra.mxu1 %vm1513_vm2, %v1658_v20  ;;  %7231 = vmatmul.mubr.msk.f32.gmra.mxu0 %vm1513_vm2, %v8014_v50  ;;  %v1660_v28 = vld [vmem:[#allocation2 + $0xc8] sm:$0xff] }
 0x11f   : > { %1543 = vst.msk [vmem:[#allocation2 + $0xe8] sm:$0xff] %vm1513_vm2, %v1422_v18  ;;  %v1421_v22 = vmax.f32 %v935_v19, 0.0  ;;  %v950_v23 = vadd.f32 %v6680_v21, %v7875_v6  ;;  %7233 = vmatprep.mubr.msk.f32.mxu0 %vm1513_vm2, %v1651_v55  ;;  %7025 = vmatprep.subr.mxu1 %v1748_v15 }
 0x120   : > { %v944_v24 = vpop.f32.mrf.mxu0  ;;  %v1659_v25 = vld [vmem:[#allocation2 + $0xc0] sm:$0xff]  ;;  %7026 = vmatpush3.msra.mxu1 %v1748_v15 }
 0x121   : > { %1542 = vst.msk [vmem:[#allocation2 + $0xe0] sm:$0xff] %vm1513_vm2, %v1421_v22  ;;  %v1424_v26 = vmax.f32 %v950_v23, 0.0  ;;  %v945_v27 = vadd.f32 %v7875_v6, %v944_v24  ;;  %6867 = vmatprep.mubr.msk.f32.mxu1 %vm1513_vm2, %v1659_v25 }
 0x122   : > { %v6683_v29 = vpop.f32.mrf.mxu0  ;;  %6868 = vmatmul.mubr.msk.f32.gmra.mxu1 %vm1513_vm2, %v1660_v28  ;;  %7234 = vmatmul.mubr.msk.f32.gmra.mxu0 %vm1513_vm2, %v1652_v58  ;;  %v1662_v36 = vld [vmem:[#allocation2 + $0xd8] sm:$0xff] }
 0x123   : > { %1545 = vst.msk [vmem:[#allocation2 + $0xf8] sm:$0xff] %vm1513_vm2, %v1424_v26  ;;  %v1423_v30 = vmax.f32 %v945_v27, 0.0  ;;  %v960_v31 = vadd.f32 %v6683_v29, %v7875_v6  ;;  %7236 = vmatprep.mubr.msk.f32.mxu0 %vm1513_vm2, %v1653_v0 }
 0x124   : > { %v954_v32 = vpop.f32.mrf.mxu0  ;;  %v1661_v33 = vld [vmem:[#allocation2 + $0xd0] sm:$0xff] }
 0x125   : > { %1544 = vst.msk [vmem:[#allocation2 + $0xf0] sm:$0xff] %vm1513_vm2, %v1423_v30  ;;  %v1426_v34 = vmax.f32 %v960_v31, 0.0  ;;  %v955_v35 = vadd.f32 %v7875_v6, %v954_v32  ;;  %6870 = vmatprep.mubr.msk.f32.mxu1 %vm1513_vm2, %v1661_v33 }
 0x126   : > { %v6686_v38 = vpop.f32.mrf.mxu0  ;;  %6871 = vmatmul.mubr.msk.f32.gmra.mxu1 %vm1513_vm2, %v1662_v36  ;;  %7237 = vmatmul.mubr.msk.f32.gmra.mxu0 %vm1513_vm2, %v1654_v3  ;;  %v1664_v45 = vld [vmem:[#allocation2 + $0xe8] sm:$0xff] }
 0x127   : > { %1547 = vst.msk [vmem:[#allocation2 + $0x108] sm:$0xff] %vm1513_vm2, %v1426_v34  ;;  %v1425_v39 = vmax.f32 %v955_v35, 0.0  ;;  %v970_v40 = vadd.f32 %v6686_v38, %v7875_v6  ;;  %7239 = vmatprep.mubr.msk.f32.mxu0 %vm1513_vm2, %v1655_v8 }
 0x128   : > { %v964_v41 = vpop.f32.mrf.mxu0  ;;  %v1663_v42 = vld [vmem:[#allocation2 + $0xe0] sm:$0xff] }
 0x129   : > { %1546 = vst.msk [vmem:[#allocation2 + $0x100] sm:$0xff] %vm1513_vm2, %v1425_v39  ;;  %v1428_v43 = vmax.f32 %v970_v40, 0.0  ;;  %v965_v44 = vadd.f32 %v7875_v6, %v964_v41  ;;  %6873 = vmatprep.mubr.msk.f32.mxu1 %vm1513_vm2, %v1663_v42 }
 0x12a   : > { %v6689_v46 = vpop.f32.mrf.mxu0  ;;  %6874 = vmatmul.mubr.msk.f32.gmra.mxu1 %vm1513_vm2, %v1664_v45  ;;  %7240 = vmatmul.mubr.msk.f32.gmra.mxu0 %vm1513_vm2, %v1656_v12  ;;  %v1666_v53 = vld [vmem:[#allocation2 + $0xf8] sm:$0xff] }
 0x12b   : > { %1549 = vst.msk [vmem:[#allocation2 + $0x118] sm:$0xff] %vm1513_vm2, %v1428_v43  ;;  %v1427_v47 = vmax.f32 %v965_v44, 0.0  ;;  %v980_v48 = vadd.f32 %v6689_v46, %v7875_v6  ;;  %7242 = vmatprep.mubr.msk.f32.mxu0 %vm1513_vm2, %v1657_v17 }
 0x12c   : > { %v974_v49 = vpop.f32.mrf.mxu0  ;;  %v1665_v50 = vld [vmem:[#allocation2 + $0xf0] sm:$0xff] }
 0x12d   : > { %1548 = vst.msk [vmem:[#allocation2 + $0x110] sm:$0xff] %vm1513_vm2, %v1427_v47  ;;  %v1430_v51 = vmax.f32 %v980_v48, 0.0  ;;  %v975_v52 = vadd.f32 %v7875_v6, %v974_v49  ;;  %6876 = vmatprep.mubr.msk.f32.mxu1 %vm1513_vm2, %v1665_v50 }
 0x12e   : > { %v6692_v54 = vpop.f32.mrf.mxu0  ;;  %6877 = vmatmul.mubr.msk.f32.gmra.mxu1 %vm1513_vm2, %v1666_v53  ;;  %7243 = vmatmul.mubr.msk.f32.gmra.mxu0 %vm1513_vm2, %v1658_v20  ;;  %v1668_v61 = vld [vmem:[#allocation2 + $0x108] sm:$0xff] }
 0x12f   : > { %1551 = vst.msk [vmem:[#allocation2 + $0x128] sm:$0xff] %vm1513_vm2, %v1430_v51  ;;  %v1429_v55 = vmax.f32 %v975_v52, 0.0  ;;  %v990_v56 = vadd.f32 %v6692_v54, %v7875_v6  ;;  %7245 = vmatprep.mubr.msk.f32.mxu0 %vm1513_vm2, %v1659_v25  ;;  %v1747_v51 = vld [vmem:[%s9952_s3] sm:$0xff] }
 0x130   : > { %v984_v57 = vpop.f32.mrf.mxu0  ;;  %v1667_v58 = vld [vmem:[#allocation2 + $0x100] sm:$0xff]  ;;  %7027 = vmatprep.subr.mxu1 %v1747_v51 }
 0x131   : > { %1550 = vst.msk [vmem:[#allocation2 + $0x120] sm:$0xff] %vm1513_vm2, %v1429_v55  ;;  %v1432_v59 = vmax.f32 %v990_v56, 0.0  ;;  %v985_v60 = vadd.f32 %v7875_v6, %v984_v57  ;;  %6879 = vmatprep.mubr.msk.f32.mxu1 %vm1513_vm2, %v1667_v58  ;;  %7028 = vmatpush3.msra.mxu1 %v1747_v51 }
 0x132   : > { %v6695_v62 = vpop.f32.mrf.mxu0  ;;  %6880 = vmatmul.mubr.msk.f32.gmra.mxu1 %vm1513_vm2, %v1668_v61  ;;  %7246 = vmatmul.mubr.msk.f32.gmra.mxu0 %vm1513_vm2, %v1660_v28  ;;  %v1670_v10 = vld [vmem:[#allocation2 + $0x118] sm:$0xff] }
 0x133   : > { %1553 = vst.msk [vmem:[#allocation2 + $0x138] sm:$0xff] %vm1513_vm2, %v1432_v59  ;;  %v1431_v63 = vmax.f32 %v985_v60, 0.0  ;;  %v1000_v0 = vadd.f32 %v6695_v62, %v7875_v6  ;;  %7248 = vmatprep.mubr.msk.f32.mxu0 %vm1513_vm2, %v1661_v33  ;;  %v8181_v60 = vld [vmem:[%s9952_s3 + $0x118] sm:$0xff] }
 0x134   : > { %v994_v1 = vpop.f32.mrf.mxu0  ;;  %v1669_v2 = vld [vmem:[#allocation2 + $0x110] sm:$0xff]  ;;  %7389 = vmatprep.subr.mxu1 %v8181_v60 }
 0x135   : > { %1552 = vst.msk [vmem:[#allocation2 + $0x130] sm:$0xff] %vm1513_vm2, %v1431_v63  ;;  %v1434_v3 = vmax.f32 %v1000_v0, 0.0  ;;  %v995_v4 = vadd.f32 %v7875_v6, %v994_v1  ;;  %6882 = vmatprep.mubr.msk.f32.mxu1 %vm1513_vm2, %v1669_v2 }
 0x136   : > { %v6698_v5 = vpop.f32.mrf.mxu0  ;;  %6883 = vmatmul.mubr.msk.f32.gmra.mxu1 %vm1513_vm2, %v1670_v10  ;;  %7249 = vmatmul.mubr.msk.f32.gmra.mxu0 %vm1513_vm2, %v1662_v36  ;;  %v1672_v14 = vld [vmem:[#allocation2 + $0x128] sm:$0xff] }
 0x137   : > { %1555 = vst.msk [vmem:[#allocation2 + $0x148] sm:$0xff] %vm1513_vm2, %v1434_v3  ;;  %v1433_v7 = vmax.f32 %v995_v4, 0.0  ;;  %v1010_v8 = vadd.f32 %v6698_v5, %v7875_v6  ;;  %7251 = vmatprep.mubr.msk.f32.mxu0 %vm1513_vm2, %v1663_v42 }
 0x138   : > { %v1004_v9 = vpop.f32.mrf.mxu0  ;;  %v1671_v11 = vld [vmem:[#allocation2 + $0x120] sm:$0xff] }
 0x139   : > { %1554 = vst.msk [vmem:[#allocation2 + $0x140] sm:$0xff] %vm1513_vm2, %v1433_v7  ;;  %v1436_v12 = vmax.f32 %v1010_v8, 0.0  ;;  %v1005_v13 = vadd.f32 %v7875_v6, %v1004_v9  ;;  %6885 = vmatprep.mubr.msk.f32.mxu1 %vm1513_vm2, %v1671_v11 }
 0x13a   : > { %v6701_v16 = vpop.f32.mrf.mxu0  ;;  %6886 = vmatmul.mubr.msk.f32.gmra.mxu1 %vm1513_vm2, %v1672_v14  ;;  %7252 = vmatmul.mubr.msk.f32.gmra.mxu0 %vm1513_vm2, %v1664_v45  ;;  %v1674_v23 = vld [vmem:[#allocation2 + $0x138] sm:$0xff] }
 0x13b   : > { %1557 = vst.msk [vmem:[#allocation2 + $0x158] sm:$0xff] %vm1513_vm2, %v1436_v12  ;;  %v1435_v17 = vmax.f32 %v1005_v13, 0.0  ;;  %v1020_v18 = vadd.f32 %v6701_v16, %v7875_v6  ;;  %7254 = vmatprep.mubr.msk.f32.mxu0 %vm1513_vm2, %v1665_v50 }
 0x13c   : > { %v1014_v19 = vpop.f32.mrf.mxu0  ;;  %v1673_v20 = vld [vmem:[#allocation2 + $0x130] sm:$0xff] }
 0x13d   : > { %1556 = vst.msk [vmem:[#allocation2 + $0x150] sm:$0xff] %vm1513_vm2, %v1435_v17  ;;  %v1438_v21 = vmax.f32 %v1020_v18, 0.0  ;;  %v1015_v22 = vadd.f32 %v7875_v6, %v1014_v19  ;;  %6888 = vmatprep.mubr.msk.f32.mxu1 %vm1513_vm2, %v1673_v20 }
 0x13e   : > { %v6704_v24 = vpop.f32.mrf.mxu0  ;;  %6889 = vmatmul.mubr.msk.f32.gmra.mxu1 %vm1513_vm2, %v1674_v23  ;;  %7255 = vmatmul.mubr.msk.f32.gmra.mxu0 %vm1513_vm2, %v1666_v53  ;;  %v8137_v31 = vld [vmem:[#allocation2 + $0x148] sm:$0xff] }
 0x13f   : > { %1559 = vst.msk [vmem:[#allocation2 + $0x168] sm:$0xff] %vm1513_vm2, %v1438_v21  ;;  %v1437_v25 = vmax.f32 %v1015_v22, 0.0  ;;  %v1030_v26 = vadd.f32 %v6704_v24, %v7875_v6  ;;  %7257 = vmatprep.mubr.msk.f32.mxu0 %vm1513_vm2, %v1667_v58 }
 0x140   : > { %v1024_v27 = vpop.f32.mrf.mxu0  ;;  %v1675_v28 = vld [vmem:[#allocation2 + $0x140] sm:$0xff] }
 0x141   : > { %1558 = vst.msk [vmem:[#allocation2 + $0x160] sm:$0xff] %vm1513_vm2, %v1437_v25  ;;  %v1440_v29 = vmax.f32 %v1030_v26, 0.0  ;;  %v1025_v30 = vadd.f32 %v7875_v6, %v1024_v27  ;;  %6891 = vmatprep.mubr.msk.f32.mxu1 %vm1513_vm2, %v1675_v28 }
 0x142   : > { %v6707_v32 = vpop.f32.mrf.mxu0  ;;  %6892 = vmatmul.mubr.msk.f32.gmra.mxu1 %vm1513_vm2, %v8137_v31  ;;  %7258 = vmatmul.mubr.msk.f32.gmra.mxu0 %vm1513_vm2, %v1668_v61  ;;  %v8148_v39 = vld [vmem:[#allocation2 + $0x158] sm:$0xff] }
 0x143   : > { %1561 = vst.msk [vmem:[#allocation2 + $0x178] sm:$0xff] %vm1513_vm2, %v1440_v29  ;;  %v1439_v33 = vmax.f32 %v1025_v30, 0.0  ;;  %v1040_v34 = vadd.f32 %v6707_v32, %v7875_v6  ;;  %7260 = vmatprep.mubr.msk.f32.mxu0 %vm1513_vm2, %v1669_v2 }
 0x144   : > { %v1034_v35 = vpop.f32.mrf.mxu0  ;;  %v1677_v36 = vld [vmem:[#allocation2 + $0x150] sm:$0xff] }
 0x145   : > { %1560 = vst.msk [vmem:[#allocation2 + $0x170] sm:$0xff] %vm1513_vm2, %v1439_v33  ;;  %v1442_v37 = vmax.f32 %v1040_v34, 0.0  ;;  %v1035_v38 = vadd.f32 %v7875_v6, %v1034_v35  ;;  %6894 = vmatprep.mubr.msk.f32.mxu1 %vm1513_vm2, %v1677_v36 }
 0x146   : > { %v6710_v40 = vpop.f32.mrf.mxu0  ;;  %6895 = vmatmul.mubr.msk.f32.gmra.mxu1 %vm1513_vm2, %v8148_v39  ;;  %7261 = vmatmul.mubr.msk.f32.gmra.mxu0 %vm1513_vm2, %v1670_v10  ;;  %v8159_v47 = vld [vmem:[#allocation2 + $0x168] sm:$0xff] }
 0x147   : > { %1563 = vst.msk [vmem:[#allocation2 + $0x188] sm:$0xff] %vm1513_vm2, %v1442_v37  ;;  %v1441_v41 = vmax.f32 %v1035_v38, 0.0  ;;  %v1050_v42 = vadd.f32 %v6710_v40, %v7875_v6  ;;  %7263 = vmatprep.mubr.msk.f32.mxu0 %vm1513_vm2, %v1671_v11 }
 0x148   : > { %v1044_v43 = vpop.f32.mrf.mxu0  ;;  %v1679_v44 = vld [vmem:[#allocation2 + $0x160] sm:$0xff] }
 0x149   : > { %1562 = vst.msk [vmem:[#allocation2 + $0x180] sm:$0xff] %vm1513_vm2, %v1441_v41  ;;  %v1444_v45 = vmax.f32 %v1050_v42, 0.0  ;;  %v1045_v46 = vadd.f32 %v7875_v6, %v1044_v43  ;;  %6897 = vmatprep.mubr.msk.f32.mxu1 %vm1513_vm2, %v1679_v44 }
 0x14a   : > { %v6713_v48 = vpop.f32.mrf.mxu0  ;;  %6898 = vmatmul.mubr.msk.f32.gmra.mxu1 %vm1513_vm2, %v8159_v47  ;;  %7264 = vmatmul.mubr.msk.f32.gmra.mxu0 %vm1513_vm2, %v1672_v14  ;;  %v1682_v56 = vld [vmem:[#allocation2 + $0x178] sm:$0xff] }
 0x14b   : > { %1565 = vst.msk [vmem:[#allocation2 + $0x198] sm:$0xff] %vm1513_vm2, %v1444_v45  ;;  %v1443_v49 = vmax.f32 %v1045_v46, 0.0  ;;  %v1060_v50 = vadd.f32 %v6713_v48, %v7875_v6  ;;  %7266 = vmatprep.mubr.msk.f32.mxu0 %vm1513_vm2, %v1673_v20 }
 0x14c   : > { %v1054_v52 = vpop.f32.mrf.mxu0  ;;  %v1681_v53 = vld [vmem:[#allocation2 + $0x170] sm:$0xff] }
 0x14d   : > { %1564 = vst.msk [vmem:[#allocation2 + $0x190] sm:$0xff] %vm1513_vm2, %v1443_v49  ;;  %v1446_v54 = vmax.f32 %v1060_v50, 0.0  ;;  %v1055_v55 = vadd.f32 %v7875_v6, %v1054_v52  ;;  %6900 = vmatprep.mubr.msk.f32.mxu1 %vm1513_vm2, %v1681_v53 }
 0x14e   : > { %v6716_v57 = vpop.f32.mrf.mxu0  ;;  %6901 = vmatmul.mubr.msk.f32.gmra.mxu1 %vm1513_vm2, %v1682_v56  ;;  %7267 = vmatmul.mubr.msk.f32.gmra.mxu0 %vm1513_vm2, %v1674_v23  ;;  %v1684_v1 = vld [vmem:[#allocation2 + $0x188] sm:$0xff] }
 0x14f   : > { %1567 = vst.msk [vmem:[#allocation2 + $0x1a8] sm:$0xff] %vm1513_vm2, %v1446_v54  ;;  %v1445_v58 = vmax.f32 %v1055_v55, 0.0  ;;  %v1070_v59 = vadd.f32 %v6716_v57, %v7875_v6  ;;  %7269 = vmatprep.mubr.msk.f32.mxu0 %vm1513_vm2, %v1675_v28 }
 0x150   : > { %v1064_v61 = vpop.f32.mrf.mxu0  ;;  %v1683_v62 = vld [vmem:[#allocation2 + $0x180] sm:$0xff] }
 0x151   : > { %1566 = vst.msk [vmem:[#allocation2 + $0x1a0] sm:$0xff] %vm1513_vm2, %v1445_v58  ;;  %v1448_v63 = vmax.f32 %v1070_v59, 0.0  ;;  %v1065_v0 = vadd.f32 %v7875_v6, %v1064_v61  ;;  %6903 = vmatprep.mubr.msk.f32.mxu1 %vm1513_vm2, %v1683_v62 }
 0x152   : > { %v6719_v2 = vpop.f32.mrf.mxu0  ;;  %6904 = vmatmul.mubr.msk.f32.gmra.mxu1 %vm1513_vm2, %v1684_v1  ;;  %7270 = vmatmul.mubr.msk.f32.gmra.mxu0 %vm1513_vm2, %v8137_v31  ;;  %v1686_v9 = vld [vmem:[#allocation2 + $0x198] sm:$0xff] }
 0x153   : > { %1569 = vst.msk [vmem:[#allocation2 + $0x1b8] sm:$0xff] %vm1513_vm2, %v1448_v63  ;;  %v1447_v3 = vmax.f32 %v1065_v0, 0.0  ;;  %v1080_v4 = vadd.f32 %v6719_v2, %v7875_v6  ;;  %7272 = vmatprep.mubr.msk.f32.mxu0 %vm1513_vm2, %v1677_v36 }
 0x154   : > { %v1074_v10 = vpop.f32.mrf.mxu0  ;;  %v1685_v5 = vld [vmem:[#allocation2 + $0x190] sm:$0xff] }
 0x155   : > { %1568 = vst.msk [vmem:[#allocation2 + $0x1b0] sm:$0xff] %vm1513_vm2, %v1447_v3  ;;  %v1450_v7 = vmax.f32 %v1080_v4, 0.0  ;;  %v1075_v8 = vadd.f32 %v7875_v6, %v1074_v10  ;;  %6906 = vmatprep.mubr.msk.f32.mxu1 %vm1513_vm2, %v1685_v5 }
 0x156   : > { %v6722_v11 = vpop.f32.mrf.mxu0  ;;  %6907 = vmatmul.mubr.msk.f32.gmra.mxu1 %vm1513_vm2, %v1686_v9  ;;  %7273 = vmatmul.mubr.msk.f32.gmra.mxu0 %vm1513_vm2, %v8148_v39  ;;  %v1688_v18 = vld [vmem:[#allocation2 + $0x1a8] sm:$0xff] }
 0x157   : > { %1571 = vst.msk [vmem:[#allocation2 + $0x1c8] sm:$0xff] %vm1513_vm2, %v1450_v7  ;;  %v1449_v12 = vmax.f32 %v1075_v8, 0.0  ;;  %v1090_v13 = vadd.f32 %v6722_v11, %v7875_v6  ;;  %7275 = vmatprep.mubr.msk.f32.mxu0 %vm1513_vm2, %v1679_v44 }
 0x158   : > { %v1084_v14 = vpop.f32.mrf.mxu0  ;;  %v1687_v15 = vld [vmem:[#allocation2 + $0x1a0] sm:$0xff] }
 0x159   : > { %1570 = vst.msk [vmem:[#allocation2 + $0x1c0] sm:$0xff] %vm1513_vm2, %v1449_v12  ;;  %v1452_v16 = vmax.f32 %v1090_v13, 0.0  ;;  %v1085_v17 = vadd.f32 %v7875_v6, %v1084_v14  ;;  %6909 = vmatprep.mubr.msk.f32.mxu1 %vm1513_vm2, %v1687_v15 }
 0x15a   : > { %v6725_v19 = vpop.f32.mrf.mxu0  ;;  %6910 = vmatmul.mubr.msk.f32.gmra.mxu1 %vm1513_vm2, %v1688_v18  ;;  %7276 = vmatmul.mubr.msk.f32.gmra.mxu0 %vm1513_vm2, %v8159_v47  ;;  %v1690_v26 = vld [vmem:[#allocation2 + $0x1b8] sm:$0xff] }
 0x15b   : > { %1573 = vst.msk [vmem:[#allocation2 + $0x1d8] sm:$0xff] %vm1513_vm2, %v1452_v16  ;;  %v1451_v20 = vmax.f32 %v1085_v17, 0.0  ;;  %v1100_v21 = vadd.f32 %v6725_v19, %v7875_v6  ;;  %7278 = vmatprep.mubr.msk.f32.mxu0 %vm1513_vm2, %v1681_v53  ;;  %v8244_v53 = vld [vmem:[%s9951_s2] ss:$0 sm:$0xff] }
 0x15c   : > { %v1094_v22 = vpop.f32.mrf.mxu0  ;;  %v1689_v23 = vld [vmem:[#allocation2 + $0x1b0] sm:$0xff] }
 0x15d   : > { %1572 = vst.msk [vmem:[#allocation2 + $0x1d0] sm:$0xff] %vm1513_vm2, %v1451_v20  ;;  %v1454_v24 = vmax.f32 %v1100_v21, 0.0  ;;  %v1095_v25 = vadd.f32 %v7875_v6, %v1094_v22  ;;  %6912 = vmatprep.mubr.msk.f32.mxu1 %vm1513_vm2, %v1689_v23 }
 0x15e   : > { %v6728_v27 = vpop.f32.mrf.mxu0  ;;  %6913 = vmatmul.mubr.msk.f32.gmra.mxu1 %vm1513_vm2, %v1690_v26  ;;  %7279 = vmatmul.mubr.msk.f32.gmra.mxu0 %vm1513_vm2, %v1682_v56  ;;  %v1692_v34 = vld [vmem:[#allocation2 + $0x1c8] sm:$0xff] }
 0x15f   : > { %1575 = vst.msk [vmem:[#allocation2 + $0x1e8] sm:$0xff] %vm1513_vm2, %v1454_v24  ;;  %v1453_v28 = vmax.f32 %v1095_v25, 0.0  ;;  %v1110_v29 = vadd.f32 %v6728_v27, %v7875_v6  ;;  %7281 = vmatprep.mubr.msk.f32.mxu0 %vm1513_vm2, %v1683_v62 }
 0x160   : > { %v1104_v30 = vpop.f32.mrf.mxu0  ;;  %v1691_v31 = vld [vmem:[#allocation2 + $0x1c0] sm:$0xff] }
 0x161   : > { %1574 = vst.msk [vmem:[#allocation2 + $0x1e0] sm:$0xff] %vm1513_vm2, %v1453_v28  ;;  %v1456_v32 = vmax.f32 %v1110_v29, 0.0  ;;  %v1105_v33 = vadd.f32 %v7875_v6, %v1104_v30  ;;  %6915 = vmatprep.mubr.msk.f32.mxu1 %vm1513_vm2, %v1691_v31 }
 0x162   : > { %v6731_v35 = vpop.f32.mrf.mxu0  ;;  %6916 = vmatmul.mubr.msk.f32.gmra.mxu1 %vm1513_vm2, %v1692_v34  ;;  %7282 = vmatmul.mubr.msk.f32.gmra.mxu0 %vm1513_vm2, %v1684_v1  ;;  %v1694_v42 = vld [vmem:[#allocation2 + $0x1d8] sm:$0xff] }
 0x163   : > { %1577 = vst.msk [vmem:[#allocation2 + $0x1f8] sm:$0xff] %vm1513_vm2, %v1456_v32  ;;  %v1455_v36 = vmax.f32 %v1105_v33, 0.0  ;;  %v1120_v37 = vadd.f32 %v6731_v35, %v7875_v6  ;;  %7284 = vmatprep.mubr.msk.f32.mxu0 %vm1513_vm2, %v1685_v5 }
 0x164   : > { %v1114_v38 = vpop.f32.mrf.mxu0  ;;  %v1693_v39 = vld [vmem:[#allocation2 + $0x1d0] sm:$0xff] }
 0x165   : > { %1576 = vst.msk [vmem:[#allocation2 + $0x1f0] sm:$0xff] %vm1513_vm2, %v1455_v36  ;;  %v1458_v40 = vmax.f32 %v1120_v37, 0.0  ;;  %v1115_v41 = vadd.f32 %v7875_v6, %v1114_v38  ;;  %6918 = vmatprep.mubr.msk.f32.mxu1 %vm1513_vm2, %v1693_v39 }
 0x166   : > { %v6734_v43 = vpop.f32.mrf.mxu0  ;;  %6919 = vmatmul.mubr.msk.f32.gmra.mxu1 %vm1513_vm2, %v1694_v42  ;;  %7285 = vmatmul.mubr.msk.f32.gmra.mxu0 %vm1513_vm2, %v1686_v9  ;;  %v1696_v50 = vld [vmem:[#allocation2 + $0x1e8] sm:$0xff] }
 0x167   : > { %1579 = vst.msk [vmem:[#allocation2 + $0x208] sm:$0xff] %vm1513_vm2, %v1458_v40  ;;  %v1457_v44 = vmax.f32 %v1115_v41, 0.0  ;;  %v1130_v45 = vadd.f32 %v6734_v43, %v7875_v6  ;;  %7287 = vmatprep.mubr.msk.f32.mxu0 %vm1513_vm2, %v1687_v15 }
 0x168   : > { %v1124_v46 = vpop.f32.mrf.mxu0  ;;  %v1695_v47 = vld [vmem:[#allocation2 + $0x1e0] sm:$0xff] }
 0x169   : > { %1578 = vst.msk [vmem:[#allocation2 + $0x200] sm:$0xff] %vm1513_vm2, %v1457_v44  ;;  %v1460_v48 = vmax.f32 %v1130_v45, 0.0  ;;  %v1125_v49 = vadd.f32 %v7875_v6, %v1124_v46  ;;  %6921 = vmatprep.mubr.msk.f32.mxu1 %vm1513_vm2, %v1695_v47 }
 0x16a   : > { %v6737_v51 = vpop.f32.mrf.mxu0  ;;  %6922 = vmatmul.mubr.msk.f32.gmra.mxu1 %vm1513_vm2, %v1696_v50  ;;  %7288 = vmatmul.mubr.msk.f32.gmra.mxu0 %vm1513_vm2, %v1688_v18  ;;  %v1698_v58 = vld [vmem:[#allocation2 + $0x1f8] sm:$0xff] }
 0x16b   : > { %1581 = vst.msk [vmem:[#allocation2 + $0x218] sm:$0xff] %vm1513_vm2, %v1460_v48  ;;  %v1459_v52 = vmax.f32 %v1125_v49, 0.0  ;;  %v1140_v54 = vadd.f32 %v8244_v53, %v6737_v51  ;;  %7290 = vmatprep.mubr.msk.f32.mxu0 %vm1513_vm2, %v1689_v23 }
 0x16c   : > { %v1134_v6 = vpop.f32.mrf.mxu0  ;;  %v1697_v55 = vld [vmem:[#allocation2 + $0x1f0] sm:$0xff] }
 0x16d   : > { %1580 = vst.msk [vmem:[#allocation2 + $0x210] sm:$0xff] %vm1513_vm2, %v1459_v52  ;;  %v1462_v56 = vmax.f32 %v1140_v54, 0.0  ;;  %v1135_v57 = vadd.f32 %v8244_v53, %v1134_v6  ;;  %6924 = vmatprep.mubr.msk.f32.mxu1 %vm1513_vm2, %v1697_v55 }
 0x16e   : > { %v6740_v59 = vpop.f32.mrf.mxu0  ;;  %6925 = vmatmul.mubr.msk.f32.gmra.mxu1 %vm1513_vm2, %v1698_v58  ;;  %7291 = vmatmul.mubr.msk.f32.gmra.mxu0 %vm1513_vm2, %v1690_v26  ;;  %v1700_v3 = vld [vmem:[#allocation2 + $0x208] sm:$0xff] }
 0x16f   : > { %1583 = vst.msk [vmem:[#allocation2 + $0x228] sm:$0xff] %vm1513_vm2, %v1462_v56  ;;  %v1461_v61 = vmax.f32 %v1135_v57, 0.0  ;;  %v1150_v62 = vadd.f32 %v8244_v53, %v6740_v59  ;;  %7293 = vmatprep.mubr.msk.f32.mxu0 %vm1513_vm2, %v1691_v31 }
 0x170   : > { %v1144_v63 = vpop.f32.mrf.mxu0  ;;  %v1699_v0 = vld [vmem:[#allocation2 + $0x200] sm:$0xff] }
 0x171   : > { %1582 = vst.msk [vmem:[#allocation2 + $0x220] sm:$0xff] %vm1513_vm2, %v1461_v61  ;;  %v1464_v1 = vmax.f32 %v1150_v62, 0.0  ;;  %v1145_v2 = vadd.f32 %v8244_v53, %v1144_v63  ;;  %6927 = vmatprep.mubr.msk.f32.mxu1 %vm1513_vm2, %v1699_v0 }
 0x172   : > { %v6743_v4 = vpop.f32.mrf.mxu0  ;;  %6928 = vmatmul.mubr.msk.f32.gmra.mxu1 %vm1513_vm2, %v1700_v3  ;;  %7294 = vmatmul.mubr.msk.f32.gmra.mxu0 %vm1513_vm2, %v1692_v34  ;;  %v1702_v12 = vld [vmem:[#allocation2 + $0x218] sm:$0xff] }
 0x173   : > { %1585 = vst.msk [vmem:[#allocation2 + $0x238] sm:$0xff] %vm1513_vm2, %v1464_v1  ;;  %v1463_v10 = vmax.f32 %v1145_v2, 0.0  ;;  %v1160_v5 = vadd.f32 %v8244_v53, %v6743_v4  ;;  %7296 = vmatprep.mubr.msk.f32.mxu0 %vm1513_vm2, %v1693_v39 }
 0x174   : > { %v1154_v7 = vpop.f32.mrf.mxu0  ;;  %v1701_v8 = vld [vmem:[#allocation2 + $0x210] sm:$0xff] }
 0x175   : > { %1584 = vst.msk [vmem:[#allocation2 + $0x230] sm:$0xff] %vm1513_vm2, %v1463_v10  ;;  %v1466_v9 = vmax.f32 %v1160_v5, 0.0  ;;  %v1155_v11 = vadd.f32 %v8244_v53, %v1154_v7  ;;  %6930 = vmatprep.mubr.msk.f32.mxu1 %vm1513_vm2, %v1701_v8 }
 0x176   : > { %v6746_v13 = vpop.f32.mrf.mxu0  ;;  %6931 = vmatmul.mubr.msk.f32.gmra.mxu1 %vm1513_vm2, %v1702_v12  ;;  %7297 = vmatmul.mubr.msk.f32.gmra.mxu0 %vm1513_vm2, %v1694_v42  ;;  %v1704_v20 = vld [vmem:[#allocation2 + $0x228] sm:$0xff] }
 0x177   : > { %1587 = vst.msk [vmem:[#allocation2 + $0x248] sm:$0xff] %vm1513_vm2, %v1466_v9  ;;  %v1465_v14 = vmax.f32 %v1155_v11, 0.0  ;;  %v1170_v15 = vadd.f32 %v8244_v53, %v6746_v13  ;;  %7299 = vmatprep.mubr.msk.f32.mxu0 %vm1513_vm2, %v1695_v47 }
 0x178   : > { %v1164_v16 = vpop.f32.mrf.mxu0  ;;  %v1703_v17 = vld [vmem:[#allocation2 + $0x220] sm:$0xff] }
 0x179   : > { %1586 = vst.msk [vmem:[#allocation2 + $0x240] sm:$0xff] %vm1513_vm2, %v1465_v14  ;;  %v1468_v18 = vmax.f32 %v1170_v15, 0.0  ;;  %v1165_v19 = vadd.f32 %v8244_v53, %v1164_v16  ;;  %6933 = vmatprep.mubr.msk.f32.mxu1 %vm1513_vm2, %v1703_v17 }
 0x17a   : > { %v6749_v21 = vpop.f32.mrf.mxu0  ;;  %6934 = vmatmul.mubr.msk.f32.gmra.mxu1 %vm1513_vm2, %v1704_v20  ;;  %7300 = vmatmul.mubr.msk.f32.gmra.mxu0 %vm1513_vm2, %v1696_v50  ;;  %v1706_v28 = vld [vmem:[#allocation2 + $0x238] sm:$0xff] }
 0x17b   : > { %1589 = vst.msk [vmem:[#allocation2 + $0x258] sm:$0xff] %vm1513_vm2, %v1468_v18  ;;  %v1467_v22 = vmax.f32 %v1165_v19, 0.0  ;;  %v1180_v23 = vadd.f32 %v8244_v53, %v6749_v21  ;;  %7302 = vmatprep.mubr.msk.f32.mxu0 %vm1513_vm2, %v1697_v55 }
 0x17c   : > { %v1174_v24 = vpop.f32.mrf.mxu0  ;;  %v1705_v25 = vld [vmem:[#allocation2 + $0x230] sm:$0xff] }
 0x17d   : > { %1588 = vst.msk [vmem:[#allocation2 + $0x250] sm:$0xff] %vm1513_vm2, %v1467_v22  ;;  %v1470_v26 = vmax.f32 %v1180_v23, 0.0  ;;  %v1175_v27 = vadd.f32 %v8244_v53, %v1174_v24  ;;  %6936 = vmatprep.mubr.msk.f32.mxu1 %vm1513_vm2, %v1705_v25 }
 0x17e   : > { %v6752_v29 = vpop.f32.mrf.mxu0  ;;  %6937 = vmatmul.mubr.msk.f32.gmra.mxu1 %vm1513_vm2, %v1706_v28  ;;  %7303 = vmatmul.mubr.msk.f32.gmra.mxu0 %vm1513_vm2, %v1698_v58  ;;  %v1708_v36 = vld [vmem:[#allocation2 + $0x248] sm:$0xff] }
 0x17f   : > { %1591 = vst.msk [vmem:[#allocation2 + $0x268] sm:$0xff] %vm1513_vm2, %v1470_v26  ;;  %v1469_v30 = vmax.f32 %v1175_v27, 0.0  ;;  %v1190_v31 = vadd.f32 %v8244_v53, %v6752_v29  ;;  %7305 = vmatprep.mubr.msk.f32.mxu0 %vm1513_vm2, %v1699_v0 }
 0x180   : > { %v1184_v32 = vpop.f32.mrf.mxu0  ;;  %v1707_v33 = vld [vmem:[#allocation2 + $0x240] sm:$0xff] }
 0x181   : > { %1590 = vst.msk [vmem:[#allocation2 + $0x260] sm:$0xff] %vm1513_vm2, %v1469_v30  ;;  %v1472_v34 = vmax.f32 %v1190_v31, 0.0  ;;  %v1185_v35 = vadd.f32 %v8244_v53, %v1184_v32  ;;  %6939 = vmatprep.mubr.msk.f32.mxu1 %vm1513_vm2, %v1707_v33 }
 0x182   : > { %v6755_v37 = vpop.f32.mrf.mxu0  ;;  %6940 = vmatmul.mubr.msk.f32.gmra.mxu1 %vm1513_vm2, %v1708_v36  ;;  %7306 = vmatmul.mubr.msk.f32.gmra.mxu0 %vm1513_vm2, %v1700_v3  ;;  %v1710_v44 = vld [vmem:[#allocation2 + $0x258] sm:$0xff] }
 0x183   : > { %1593 = vst.msk [vmem:[#allocation2 + $0x278] sm:$0xff] %vm1513_vm2, %v1472_v34  ;;  %v1471_v38 = vmax.f32 %v1185_v35, 0.0  ;;  %v1200_v39 = vadd.f32 %v8244_v53, %v6755_v37  ;;  %7308 = vmatprep.mubr.msk.f32.mxu0 %vm1513_vm2, %v1701_v8 }
 0x184   : > { %v1194_v40 = vpop.f32.mrf.mxu0  ;;  %v1709_v41 = vld [vmem:[#allocation2 + $0x250] sm:$0xff] }
 0x185   : > { %1592 = vst.msk [vmem:[#allocation2 + $0x270] sm:$0xff] %vm1513_vm2, %v1471_v38  ;;  %v1474_v42 = vmax.f32 %v1200_v39, 0.0  ;;  %v1195_v43 = vadd.f32 %v8244_v53, %v1194_v40  ;;  %6942 = vmatprep.mubr.msk.f32.mxu1 %vm1513_vm2, %v1709_v41 }
 0x186   : > { %v6758_v45 = vpop.f32.mrf.mxu0  ;;  %6943 = vmatmul.mubr.msk.f32.gmra.mxu1 %vm1513_vm2, %v1710_v44  ;;  %7309 = vmatmul.mubr.msk.f32.gmra.mxu0 %vm1513_vm2, %v1702_v12  ;;  %v1712_v52 = vld [vmem:[#allocation2 + $0x268] sm:$0xff] }
 0x187   : > { %1595 = vst.msk [vmem:[#allocation2 + $0x288] sm:$0xff] %vm1513_vm2, %v1474_v42  ;;  %v1473_v46 = vmax.f32 %v1195_v43, 0.0  ;;  %v1210_v47 = vadd.f32 %v8244_v53, %v6758_v45  ;;  %7311 = vmatprep.mubr.msk.f32.mxu0 %vm1513_vm2, %v1703_v17 }
 0x188   : > { %v1204_v48 = vpop.f32.mrf.mxu0  ;;  %v1711_v49 = vld [vmem:[#allocation2 + $0x260] sm:$0xff] }
 0x189   : > { %1594 = vst.msk [vmem:[#allocation2 + $0x280] sm:$0xff] %vm1513_vm2, %v1473_v46  ;;  %v1476_v50 = vmax.f32 %v1210_v47, 0.0  ;;  %v1205_v51 = vadd.f32 %v8244_v53, %v1204_v48  ;;  %6945 = vmatprep.mubr.msk.f32.mxu1 %vm1513_vm2, %v1711_v49 }
 0x18a   : > { %v6761_v54 = vpop.f32.mrf.mxu0  ;;  %6946 = vmatmul.mubr.msk.f32.gmra.mxu1 %vm1513_vm2, %v1712_v52  ;;  %7312 = vmatmul.mubr.msk.f32.gmra.mxu0 %vm1513_vm2, %v1704_v20  ;;  %v8318_v61 = vld [vmem:[#allocation2 + $0x278] sm:$0xff] }
 0x18b   : > { %1597 = vst.msk [vmem:[#allocation2 + $0x298] sm:$0xff] %vm1513_vm2, %v1476_v50  ;;  %v1475_v6 = vmax.f32 %v1205_v51, 0.0  ;;  %v1220_v55 = vadd.f32 %v8244_v53, %v6761_v54  ;;  %7314 = vmatprep.mubr.msk.f32.mxu0 %vm1513_vm2, %v1705_v25 }
 0x18c   : > { %v1214_v56 = vpop.f32.mrf.mxu0  ;;  %v8312_v57 = vld [vmem:[#allocation2 + $0x270] sm:$0xff] }
 0x18d   : > { %1596 = vst.msk [vmem:[#allocation2 + $0x290] sm:$0xff] %vm1513_vm2, %v1475_v6  ;;  %v1478_v58 = vmax.f32 %v1220_v55, 0.0  ;;  %v1215_v59 = vadd.f32 %v8244_v53, %v1214_v56  ;;  %6948 = vmatprep.mubr.msk.f32.mxu1 %vm1513_vm2, %v8312_v57 }
 0x18e   : > { %v6764_v62 = vpop.f32.mrf.mxu0  ;;  %6949 = vmatmul.mubr.msk.f32.gmra.mxu1 %vm1513_vm2, %v8318_v61  ;;  %7315 = vmatmul.mubr.msk.f32.gmra.mxu0 %vm1513_vm2, %v1706_v28  ;;  %v8332_v10 = vld [vmem:[#allocation2 + $0x288] sm:$0xff] }
 0x18f   : > { %1599 = vst.msk [vmem:[#allocation2 + $0x2a8] sm:$0xff] %vm1513_vm2, %v1478_v58  ;;  %v1477_v63 = vmax.f32 %v1215_v59, 0.0  ;;  %v1230_v0 = vadd.f32 %v8244_v53, %v6764_v62  ;;  %7317 = vmatprep.mubr.msk.f32.mxu0 %vm1513_vm2, %v1707_v33 }
 0x190   : > { %v1224_v1 = vpop.f32.mrf.mxu0  ;;  %v8326_v2 = vld [vmem:[#allocation2 + $0x280] sm:$0xff] }
 0x191   : > { %1598 = vst.msk [vmem:[#allocation2 + $0x2a0] sm:$0xff] %vm1513_vm2, %v1477_v63  ;;  %v1480_v3 = vmax.f32 %v1230_v0, 0.0  ;;  %v1225_v4 = vadd.f32 %v8244_v53, %v1224_v1  ;;  %6951 = vmatprep.mubr.msk.f32.mxu1 %vm1513_vm2, %v8326_v2 }
 0x192   : > { %v6767_v5 = vpop.f32.mrf.mxu0  ;;  %6952 = vmatmul.mubr.msk.f32.gmra.mxu1 %vm1513_vm2, %v8332_v10  ;;  %7318 = vmatmul.mubr.msk.f32.gmra.mxu0 %vm1513_vm2, %v1708_v36  ;;  %v8346_v14 = vld [vmem:[#allocation2 + $0x298] sm:$0xff] }
 0x193   : > { %1601 = vst.msk [vmem:[#allocation2 + $0x2b8] sm:$0xff] %vm1513_vm2, %v1480_v3  ;;  %v1479_v7 = vmax.f32 %v1225_v4, 0.0  ;;  %v1240_v8 = vadd.f32 %v8244_v53, %v6767_v5  ;;  %7320 = vmatprep.mubr.msk.f32.mxu0 %vm1513_vm2, %v1709_v41 }
 0x194   : > { %v1234_v9 = vpop.f32.mrf.mxu0  ;;  %v8340_v11 = vld [vmem:[#allocation2 + $0x290] sm:$0xff] }
 0x195   : > { %1600 = vst.msk [vmem:[#allocation2 + $0x2b0] sm:$0xff] %vm1513_vm2, %v1479_v7  ;;  %v1482_v12 = vmax.f32 %v1240_v8, 0.0  ;;  %v1235_v13 = vadd.f32 %v8244_v53, %v1234_v9  ;;  %6954 = vmatprep.mubr.msk.f32.mxu1 %vm1513_vm2, %v8340_v11 }
 0x196   : > { %v6770_v15 = vpop.f32.mrf.mxu0  ;;  %6955 = vmatmul.mubr.msk.f32.gmra.mxu1 %vm1513_vm2, %v8346_v14  ;;  %7321 = vmatmul.mubr.msk.f32.gmra.mxu0 %vm1513_vm2, %v1710_v44  ;;  %v8360_v22 = vld [vmem:[#allocation2 + $0x2a8] sm:$0xff] }
 0x197   : > { %1603 = vst.msk [vmem:[#allocation2 + $0x2c8] sm:$0xff] %vm1513_vm2, %v1482_v12  ;;  %v1481_v16 = vmax.f32 %v1235_v13, 0.0  ;;  %v1250_v17 = vadd.f32 %v8244_v53, %v6770_v15  ;;  %7323 = vmatprep.mubr.msk.f32.mxu0 %vm1513_vm2, %v1711_v49 }
 0x198   : > { %v1244_v18 = vpop.f32.mrf.mxu0  ;;  %v8354_v19 = vld [vmem:[#allocation2 + $0x2a0] sm:$0xff] }
 0x199   : > { %1602 = vst.msk [vmem:[#allocation2 + $0x2c0] sm:$0xff] %vm1513_vm2, %v1481_v16  ;;  %v1484_v20 = vmax.f32 %v1250_v17, 0.0  ;;  %v1245_v21 = vadd.f32 %v8244_v53, %v1244_v18  ;;  %6957 = vmatprep.mubr.msk.f32.mxu1 %vm1513_vm2, %v8354_v19 }
 0x19a   : > { %v6773_v23 = vpop.f32.mrf.mxu0  ;;  %6958 = vmatmul.mubr.msk.f32.gmra.mxu1 %vm1513_vm2, %v8360_v22  ;;  %7324 = vmatmul.mubr.msk.f32.gmra.mxu0 %vm1513_vm2, %v1712_v52  ;;  %v8375_v30 = vld [vmem:[#allocation2 + $0x2b8] sm:$0xff] }
 0x19b   : > { %1605 = vst.msk [vmem:[#allocation2 + $0x2d8] sm:$0xff] %vm1513_vm2, %v1484_v20  ;;  %v1483_v24 = vmax.f32 %v1245_v21, 0.0  ;;  %v1260_v25 = vadd.f32 %v8244_v53, %v6773_v23  ;;  %7326 = vmatprep.mubr.msk.f32.mxu0 %vm1513_vm2, %v8312_v57 }
 0x19c   : > { %v1254_v26 = vpop.f32.mrf.mxu0  ;;  %v8369_v27 = vld [vmem:[#allocation2 + $0x2b0] sm:$0xff] }
 0x19d   : > { %1604 = vst.msk [vmem:[#allocation2 + $0x2d0] sm:$0xff] %vm1513_vm2, %v1483_v24  ;;  %v1486_v28 = vmax.f32 %v1260_v25, 0.0  ;;  %v1255_v29 = vadd.f32 %v8244_v53, %v1254_v26  ;;  %6960 = vmatprep.mubr.msk.f32.mxu1 %vm1513_vm2, %v8369_v27 }
 0x19e   : > { %v6776_v31 = vpop.f32.mrf.mxu0  ;;  %6961 = vmatmul.mubr.msk.f32.gmra.mxu1 %vm1513_vm2, %v8375_v30  ;;  %7327 = vmatmul.mubr.msk.f32.gmra.mxu0 %vm1513_vm2, %v8318_v61  ;;  %v8391_v38 = vld [vmem:[#allocation2 + $0x2c8] sm:$0xff] }
 0x19f   : > { %1607 = vst.msk [vmem:[#allocation2 + $0x2e8] sm:$0xff] %vm1513_vm2, %v1486_v28  ;;  %v1485_v32 = vmax.f32 %v1255_v29, 0.0  ;;  %v1270_v33 = vadd.f32 %v8244_v53, %v6776_v31  ;;  %7329 = vmatprep.mubr.msk.f32.mxu0 %vm1513_vm2, %v8326_v2 }
 0x1a0   : > { %v1264_v34 = vpop.f32.mrf.mxu0  ;;  %v8385_v35 = vld [vmem:[#allocation2 + $0x2c0] sm:$0xff] }
 0x1a1   : > { %1606 = vst.msk [vmem:[#allocation2 + $0x2e0] sm:$0xff] %vm1513_vm2, %v1485_v32  ;;  %v1488_v36 = vmax.f32 %v1270_v33, 0.0  ;;  %v1265_v37 = vadd.f32 %v8244_v53, %v1264_v34  ;;  %6963 = vmatprep.mubr.msk.f32.mxu1 %vm1513_vm2, %v8385_v35 }
 0x1a2   : > { %v6779_v39 = vpop.f32.mrf.mxu0  ;;  %6964 = vmatmul.mubr.msk.f32.gmra.mxu1 %vm1513_vm2, %v8391_v38  ;;  %7330 = vmatmul.mubr.msk.f32.gmra.mxu0 %vm1513_vm2, %v8332_v10  ;;  %v8407_v46 = vld [vmem:[#allocation2 + $0x2d8] sm:$0xff] }
 0x1a3   : > { %1609 = vst.msk [vmem:[#allocation2 + $0x2f8] sm:$0xff] %vm1513_vm2, %v1488_v36  ;;  %v1487_v40 = vmax.f32 %v1265_v37, 0.0  ;;  %v1280_v41 = vadd.f32 %v8244_v53, %v6779_v39  ;;  %7332 = vmatprep.mubr.msk.f32.mxu0 %vm1513_vm2, %v8340_v11 }
 0x1a4   : > { %v1274_v42 = vpop.f32.mrf.mxu0  ;;  %v8401_v43 = vld [vmem:[#allocation2 + $0x2d0] sm:$0xff] }
 0x1a5   : > { %1608 = vst.msk [vmem:[#allocation2 + $0x2f0] sm:$0xff] %vm1513_vm2, %v1487_v40  ;;  %v1490_v44 = vmax.f32 %v1280_v41, 0.0  ;;  %v1275_v45 = vadd.f32 %v8244_v53, %v1274_v42  ;;  %6966 = vmatprep.mubr.msk.f32.mxu1 %vm1513_vm2, %v8401_v43 }
 0x1a6   : > { %v6782_v47 = vpop.f32.mrf.mxu0  ;;  %6967 = vmatmul.mubr.msk.f32.gmra.mxu1 %vm1513_vm2, %v8407_v46  ;;  %7333 = vmatmul.mubr.msk.f32.gmra.mxu0 %vm1513_vm2, %v8346_v14  ;;  %v8423_v6 = vld [vmem:[#allocation2 + $0x2e8] sm:$0xff] }
 0x1a7   : > { %1611 = vst.msk [vmem:[#allocation2 + $0x308] sm:$0xff] %vm1513_vm2, %v1490_v44  ;;  %v1489_v48 = vmax.f32 %v1275_v45, 0.0  ;;  %v1290_v49 = vadd.f32 %v8244_v53, %v6782_v47  ;;  %7335 = vmatprep.mubr.msk.f32.mxu0 %vm1513_vm2, %v8354_v19 }
 0x1a8   : > { %v1284_v50 = vpop.f32.mrf.mxu0  ;;  %v8417_v51 = vld [vmem:[#allocation2 + $0x2e0] sm:$0xff] }
 0x1a9   : > { %1610 = vst.msk [vmem:[#allocation2 + $0x300] sm:$0xff] %vm1513_vm2, %v1489_v48  ;;  %v1492_v52 = vmax.f32 %v1290_v49, 0.0  ;;  %v1285_v54 = vadd.f32 %v8244_v53, %v1284_v50  ;;  %6969 = vmatprep.mubr.msk.f32.mxu1 %vm1513_vm2, %v8417_v51 }
 0x1aa   : > { %v6785_v55 = vpop.f32.mrf.mxu0  ;;  %6970 = vmatmul.mubr.msk.f32.gmra.mxu1 %vm1513_vm2, %v8423_v6  ;;  %7336 = vmatmul.mubr.msk.f32.gmra.mxu0 %vm1513_vm2, %v8360_v22  ;;  %v8439_v1 = vld [vmem:[#allocation2 + $0x2f8] sm:$0xff] }
 0x1ab   : > { %1613 = vst.msk [vmem:[#allocation2 + $0x318] sm:$0xff] %vm1513_vm2, %v1492_v52  ;;  %v1491_v56 = vmax.f32 %v1285_v54, 0.0  ;;  %v1300_v58 = vadd.f32 %v8244_v53, %v6785_v55  ;;  %7338 = vmatprep.mubr.msk.f32.mxu0 %vm1513_vm2, %v8369_v27 }
 0x1ac   : > { %v1294_v59 = vpop.f32.mrf.mxu0  ;;  %v8433_v62 = vld [vmem:[#allocation2 + $0x2f0] sm:$0xff] }
 0x1ad   : > { %1612 = vst.msk [vmem:[#allocation2 + $0x310] sm:$0xff] %vm1513_vm2, %v1491_v56  ;;  %v1494_v63 = vmax.f32 %v1300_v58, 0.0  ;;  %v1295_v0 = vadd.f32 %v8244_v53, %v1294_v59  ;;  %6972 = vmatprep.mubr.msk.f32.mxu1 %vm1513_vm2, %v8433_v62 }
 0x1ae   : > { %v6788_v3 = vpop.f32.mrf.mxu0  ;;  %6973 = vmatmul.mubr.msk.f32.gmra.mxu1 %vm1513_vm2, %v8439_v1  ;;  %7339 = vmatmul.mubr.msk.f32.gmra.mxu0 %vm1513_vm2, %v8375_v30  ;;  %v8455_v13 = vld [vmem:[#allocation2 + $0x308] sm:$0xff] }
 0x1af   : > { %1615 = vst.msk [vmem:[#allocation2 + $0x328] sm:$0xff] %vm1513_vm2, %v1494_v63  ;;  %v1493_v4 = vmax.f32 %v1295_v0, 0.0  ;;  %v1310_v5 = vadd.f32 %v8244_v53, %v6788_v3  ;;  %7341 = vmatprep.mubr.msk.f32.mxu0 %vm1513_vm2, %v8385_v35 }
 0x1b0   : > { %v1304_v7 = vpop.f32.mrf.mxu0  ;;  %v8449_v8 = vld [vmem:[#allocation2 + $0x300] sm:$0xff] }
 0x1b1   : > { %1614 = vst.msk [vmem:[#allocation2 + $0x320] sm:$0xff] %vm1513_vm2, %v1493_v4  ;;  %v1496_v9 = vmax.f32 %v1310_v5, 0.0  ;;  %v1305_v12 = vadd.f32 %v8244_v53, %v1304_v7  ;;  %6975 = vmatprep.mubr.msk.f32.mxu1 %vm1513_vm2, %v8449_v8 }
 0x1b2   : > { %v6791_v15 = vpop.f32.mrf.mxu0  ;;  %6976 = vmatmul.mubr.msk.f32.gmra.mxu1 %vm1513_vm2, %v8455_v13  ;;  %7342 = vmatmul.mubr.msk.f32.gmra.mxu0 %vm1513_vm2, %v8391_v38  ;;  %v8471_v24 = vld [vmem:[#allocation2 + $0x318] sm:$0xff] }
 0x1b3   : > { %1617 = vst.msk [vmem:[#allocation2 + $0x338] sm:$0xff] %vm1513_vm2, %v1496_v9  ;;  %v1495_v16 = vmax.f32 %v1305_v12, 0.0  ;;  %v1320_v17 = vadd.f32 %v8244_v53, %v6791_v15  ;;  %7344 = vmatprep.mubr.msk.f32.mxu0 %vm1513_vm2, %v8401_v43 }
 0x1b4   : > { %v1314_v18 = vpop.f32.mrf.mxu0  ;;  %v8465_v20 = vld [vmem:[#allocation2 + $0x310] sm:$0xff] }
 0x1b5   : > { %1616 = vst.msk [vmem:[#allocation2 + $0x330] sm:$0xff] %vm1513_vm2, %v1495_v16  ;;  %v1498_v21 = vmax.f32 %v1320_v17, 0.0  ;;  %v1315_v23 = vadd.f32 %v8244_v53, %v1314_v18  ;;  %6978 = vmatprep.mubr.msk.f32.mxu1 %vm1513_vm2, %v8465_v20 }
 0x1b6   : > { %v6794_v25 = vpop.f32.mrf.mxu0  ;;  %6979 = vmatmul.mubr.msk.f32.gmra.mxu1 %vm1513_vm2, %v8471_v24  ;;  %7345 = vmatmul.mubr.msk.f32.gmra.mxu0 %vm1513_vm2, %v8407_v46  ;;  %v8487_v34 = vld [vmem:[#allocation2 + $0x328] sm:$0xff] }
 0x1b7   : > { %1619 = vst.msk [vmem:[#allocation2 + $0x348] sm:$0xff] %vm1513_vm2, %v1498_v21  ;;  %v1497_v26 = vmax.f32 %v1315_v23, 0.0  ;;  %v1330_v28 = vadd.f32 %v8244_v53, %v6794_v25  ;;  %7347 = vmatprep.mubr.msk.f32.mxu0 %vm1513_vm2, %v8417_v51 }
 0x1b8   : > { %v1324_v29 = vpop.f32.mrf.mxu0  ;;  %v8481_v31 = vld [vmem:[#allocation2 + $0x320] sm:$0xff] }
 0x1b9   : > { %1618 = vst.msk [vmem:[#allocation2 + $0x340] sm:$0xff] %vm1513_vm2, %v1497_v26  ;;  %v1500_v32 = vmax.f32 %v1330_v28, 0.0  ;;  %v1325_v33 = vadd.f32 %v8244_v53, %v1324_v29  ;;  %6981 = vmatprep.mubr.msk.f32.mxu1 %vm1513_vm2, %v8481_v31 }
 0x1ba   : > { %v6797_v36 = vpop.f32.mrf.mxu0  ;;  %v8489_v37 = vpop.f32.mrf.mxu1  ;;  %6982 = vmatmul.mubr.msk.f32.gmra.mxu1 %vm1513_vm2, %v8487_v34  ;;  %7348 = vmatmul.mubr.msk.f32.gmra.mxu0 %vm1513_vm2, %v8423_v6  ;;  %v8507_v48 = vld [vmem:[#allocation2 + $0x338] sm:$0xff] }
 0x1bb   : > { %1621 = vst.msk [vmem:[#allocation2 + $0x358] sm:$0xff] %vm1513_vm2, %v1500_v32  ;;  %v1499_v39 = vmax.f32 %v1325_v33, 0.0  ;;  %v1340_v40 = vadd.f32 %v8244_v53, %v6797_v36  ;;  %7350 = vmatprep.mubr.msk.f32.mxu0 %vm1513_vm2, %v8433_v62 }
 0x1bc   : > { %v1334_v41 = vpop.f32.mrf.mxu0  ;;  %v8499_v42 = vpop.f32.mrf.mxu1  ;;  %v8501_v44 = vld [vmem:[#allocation2 + $0x330] sm:$0xff] }
 0x1bd   : > { %1620 = vst.msk [vmem:[#allocation2 + $0x350] sm:$0xff] %vm1513_vm2, %v1499_v39  ;;  %v1502_v45 = vmax.f32 %v1340_v40, 0.0  ;;  %v1335_v47 = vadd.f32 %v8244_v53, %v1334_v41  ;;  %6984 = vmatprep.mubr.msk.f32.mxu1 %vm1513_vm2, %v8501_v44 }
 0x1be   : > { %v6800_v49 = vpop.f32.mrf.mxu0  ;;  %v8509_v50 = vpop.f32.mrf.mxu1  ;;  %6985 = vmatmul.mubr.msk.f32.gmra.mxu1 %vm1513_vm2, %v8507_v48  ;;  %7351 = vmatmul.mubr.msk.f32.gmra.mxu0 %vm1513_vm2, %v8439_v1  ;;  %v8527_v0 = vld [vmem:[#allocation2 + $0x348] sm:$0xff] }
 0x1bf   : > { %1623 = vst.msk [vmem:[#allocation2 + $0x368] sm:$0xff] %vm1513_vm2, %v1502_v45  ;;  %v1501_v52 = vmax.f32 %v1335_v47, 0.0  ;;  %v1350_v54 = vadd.f32 %v8244_v53, %v6800_v49  ;;  %7353 = vmatprep.mubr.msk.f32.mxu0 %vm1513_vm2, %v8449_v8 }
 0x1c0   : > { %v1344_v55 = vpop.f32.mrf.mxu0  ;;  %v8519_v56 = vpop.f32.mrf.mxu1  ;;  %v8521_v58 = vld [vmem:[#allocation2 + $0x340] sm:$0xff] }
 0x1c1   : > { %1622 = vst.msk [vmem:[#allocation2 + $0x360] sm:$0xff] %vm1513_vm2, %v1501_v52  ;;  %v1504_v59 = vmax.f32 %v1350_v54, 0.0  ;;  %v1345_v63 = vadd.f32 %v8244_v53, %v1344_v55  ;;  %6987 = vmatprep.mubr.msk.f32.mxu1 %vm1513_vm2, %v8521_v58 }
 0x1c2   : > { %v6803_v3 = vpop.f32.mrf.mxu0  ;;  %v8529_v4 = vpop.f32.mrf.mxu1  ;;  %6988 = vmatmul.mubr.msk.f32.gmra.mxu1 %vm1513_vm2, %v8527_v0  ;;  %7354 = vmatmul.mubr.msk.f32.gmra.mxu0 %vm1513_vm2, %v8455_v13  ;;  %v8547_v18 = vld [vmem:[#allocation2 + $0x358] sm:$0xff] }
 0x1c3   : > { %1625 = vst.msk [vmem:[#allocation2 + $0x378] sm:$0xff] %vm1513_vm2, %v1504_v59  ;;  %v1503_v5 = vmax.f32 %v1345_v63, 0.0  ;;  %v1360_v7 = vadd.f32 %v8244_v53, %v6803_v3  ;;  %7356 = vmatprep.mubr.msk.f32.mxu0 %vm1513_vm2, %v8465_v20 }
 0x1c4   : > { %v1354_v9 = vpop.f32.mrf.mxu0  ;;  %v8539_v12 = vpop.f32.mrf.mxu1  ;;  %v8541_v15 = vld [vmem:[#allocation2 + $0x350] sm:$0xff] }
 0x1c5   : > { %1624 = vst.msk [vmem:[#allocation2 + $0x370] sm:$0xff] %vm1513_vm2, %v1503_v5  ;;  %v1506_v16 = vmax.f32 %v1360_v7, 0.0  ;;  %v1355_v17 = vadd.f32 %v8244_v53, %v1354_v9  ;;  %6990 = vmatprep.mubr.msk.f32.mxu1 %vm1513_vm2, %v8541_v15 }
 0x1c6   : > { %v6806_v21 = vpop.f32.mrf.mxu0  ;;  %v8549_v23 = vpop.f32.mrf.mxu1  ;;  %6991 = vmatmul.mubr.msk.f32.gmra.mxu1 %vm1513_vm2, %v8547_v18  ;;  %7357 = vmatmul.mubr.msk.f32.gmra.mxu0 %vm1513_vm2, %v8471_v24  ;;  %v8567_v39 = vld [vmem:[#allocation2 + $0x368] sm:$0xff] }
 0x1c7   : > { %1627 = vst.msk [vmem:[#allocation2 + $0x388] sm:$0xff] %vm1513_vm2, %v1506_v16  ;;  %v1505_v25 = vmax.f32 %v1355_v17, 0.0  ;;  %v1370_v26 = vadd.f32 %v8244_v53, %v6806_v21  ;;  %7359 = vmatprep.mubr.msk.f32.mxu0 %vm1513_vm2, %v8481_v31  ;;  %9957 = vst [vmem:[#allocation5_spill] sm:$0xff] %v8567_v39 }
 0x1c8   : > { %v1364_v28 = vpop.f32.mrf.mxu0  ;;  %v8559_v29 = vpop.f32.mrf.mxu1  ;;  %v8561_v32 = vld [vmem:[#allocation2 + $0x360] sm:$0xff] }
 0x1c9   : > { %1626 = vst.msk [vmem:[#allocation2 + $0x380] sm:$0xff] %vm1513_vm2, %v1505_v25  ;;  %v1508_v33 = vmax.f32 %v1370_v26, 0.0  ;;  %v1365_v36 = vadd.f32 %v8244_v53, %v1364_v28  ;;  %6993 = vmatprep.mubr.msk.f32.mxu1 %vm1513_vm2, %v8561_v32 }
 0x1ca   : > { %v6809_v40 = vpop.f32.mrf.mxu0  ;;  %v8569_v41 = vpop.f32.mrf.mxu1  ;;  %6994 = vmatmul.mubr.msk.f32.gmra.mxu1 %vm1513_vm2, %v8567_v39  ;;  %7360 = vmatmul.mubr.msk.f32.gmra.mxu0 %vm1513_vm2, %v8487_v34  ;;  %v1759_v63 = vld [vmem:[#allocation2 + $0x378] sm:$0xff] }
 0x1cb   : > { %1629 = vst.msk [vmem:[#allocation2 + $0x398] sm:$0xff] %vm1513_vm2, %v1508_v33  ;;  %v1507_v45 = vmax.f32 %v1365_v36, 0.0  ;;  %v1380_v47 = vadd.f32 %v8244_v53, %v6809_v40  ;;  %7362 = vmatprep.mubr.msk.f32.mxu0 %vm1513_vm2, %v8501_v44 }
 0x1cc   : > { %v1374_v49 = vpop.f32.mrf.mxu0  ;;  %v8579_v52 = vpop.f32.mrf.mxu1  ;;  %v8581_v54 = vld [vmem:[#allocation2 + $0x370] sm:$0xff] }
 0x1cd   : > { %9958 = vst [vmem:[#allocation6_spill] sm:$0xff] %v8581_v54  ;;  %1628 = vst.msk [vmem:[#allocation2 + $0x390] sm:$0xff] %vm1513_vm2, %v1507_v45  ;;  %v1510_v55 = vmax.f32 %v1380_v47, 0.0  ;;  %v1375_v59 = vadd.f32 %v8244_v53, %v1374_v49  ;;  %6996 = vmatprep.mubr.msk.f32.mxu1 %vm1513_vm2, %v8581_v54 }
 0x1ce   : > { %v6812_v3 = vpop.f32.mrf.mxu0  ;;  %v8587_v5 = vpop.f32.mrf.mxu1  ;;  %6997 = vmatmul.mubr.msk.f32.gmra.mxu1 %vm1513_vm2, %v1759_v63  ;;  %7363 = vmatmul.mubr.msk.f32.gmra.mxu0 %vm1513_vm2, %v8507_v48  ;;  %v1761_v28 = vld [vmem:[#allocation2 + $0x388] sm:$0xff] }
 0x1cf   : > { %1631 = vst.msk [vmem:[#allocation2 + $0x3a8] sm:$0xff] %vm1513_vm2, %v1510_v55  ;;  %v1509_v7 = vmax.f32 %v1375_v59, 0.0  ;;  %v1390_v9 = vadd.f32 %v8244_v53, %v6812_v3  ;;  %7365 = vmatprep.mubr.msk.f32.mxu0 %vm1513_vm2, %v8521_v58  ;;  %v1635_v3 = vld [vmem:[#allocation2] sm:$0xff] }
 0x1d0   : > { %v1384_v16 = vpop.f32.mrf.mxu0  ;;  %v8596_v17 = vpop.f32.mrf.mxu1  ;;  %v1760_v21 = vld [vmem:[#allocation2 + $0x380] sm:$0xff] }
 0x1d1   : > { %1630 = vst.msk [vmem:[#allocation2 + $0x3a0] sm:$0xff] %vm1513_vm2, %v1509_v7  ;;  %v1512_v25 = vmax.f32 %v1390_v9, 0.0  ;;  %v1385_v26 = vadd.f32 %v8244_v53, %v1384_v16  ;;  %6999 = vmatprep.mubr.msk.f32.mxu1 %vm1513_vm2, %v1760_v21  ;;  %v1636_v16 = vld [vmem:[#allocation2 + $0x8] sm:$0xff] }
 0x1d2   : > { %v8601_v33 = vpop.f32.mrf.mxu1  ;;  %7000 = vmatmul.mubr.msk.f32.gmra.mxu1 %vm1513_vm2, %v1761_v28  ;;  %v8604_v36 = vpop.f32.mrf.mxu0  ;;  %7366 = vmatmul.mubr.msk.f32.gmra.mxu0 %vm1513_vm2, %v8527_v0  ;;  %v1763_v49 = vld [vmem:[#allocation2 + $0x398] sm:$0xf] }
 0x1d3   : > { %9959 = vst [vmem:[#allocation7_spill] sm:$0xff] %v8601_v33  ;;  %1634 = vst.msk [vmem:[#allocation2 + $0x3b8] sm:$0xf] %vm1633_vm3, %v1512_v25  ;;  %v1511_v40 = vmax.f32 %v1385_v26, 0.0  ;;  %7368 = vmatprep.mubr.msk.f32.mxu0 %vm1513_vm2, %v8541_v15 }
 0x1d4   : > { %v8610_v45 = vpop.f32.mrf.mxu1  ;;  %v8612_v53 = vpop.f32.mrf.mxu0  ;;  %v1762_v47 = vld [vmem:[#allocation2 + $0x390] sm:$0xff] }
 0x1d5   : > { %9960 = vst [vmem:[#allocation8_spill] sm:$0xff] %v8610_v45  ;;  %1632 = vst.msk [vmem:[#allocation2 + $0x3b0] sm:$0xff] %vm1513_vm2, %v1511_v40  ;;  %7002 = vmatprep.mubr.msk.f32.mxu1 %vm1513_vm2, %v1762_v47  ;;  %v1637_v40 = vld [vmem:[#allocation2 + $0x10] sm:$0xff] }
 0x1d6   : > { %v8616_v55 = vpop.f32.mrf.mxu1  ;;  %7003 = vmatmul.mubr.msk.f32.gmra.mxu1 %vm1513_vm2, %v1763_v49  ;;  %v8619_v59 = vpop.f32.mrf.mxu0  ;;  %7369 = vmatmul.mubr.msk.f32.gmra.mxu0 %vm1513_vm2, %v8547_v18 }
 0x1d7   : > { %9961 = vst [vmem:[#allocation9_spill] sm:$0xff] %v8616_v55  ;;  %7029 = vmatprep.mubr.msk.f32.mxu1 %vm1513_vm2, %v1635_v3  ;;  %7371 = vmatprep.mubr.msk.f32.mxu0 %vm1513_vm2, %v8561_v32 }
 0x1d8   : > { %v8626_v7 = vpop.f32.mrf.mxu1  ;;  %v8628_v9 = vpop.f32.mrf.mxu0 }
 0x1d9   : > { %9962 = vst [vmem:[#allocation10_spill] sm:$0xff] %v8626_v7 }
 0x1da   : > { %v8630_v25 = vpop.f32.mrf.mxu1  ;;  %7030 = vmatmul.mubr.msk.f32.vlgmr.msra.gmra.mxu1 %vm1513_vm2, %v1636_v16  ;;  %v8633_v26 = vpop.f32.mrf.mxu0  ;;  %7372 = vmatmul.mubr.msk.f32.gmra.mxu0 %vm1513_vm2, %v8567_v39  ;;  %v7425_v16 = vld [vmem:[%s9952_s3 + $0x110] sm:$0xff] }
 0x1db   : > { %9963 = vst [vmem:[#allocation11_spill] sm:$0xff] %v8630_v25  ;;  %7401 = vmatpush3.msra.mxu1 %v8181_v60  ;;  %7032 = vmatprep.mubr.msk.f32.mxu1 %vm1513_vm2, %v1637_v40  ;;  %v1638_v25 = vld [vmem:[#allocation2 + $0x18] sm:$0xff]  ;;  %v7426_v40 = vld [vmem:[#allocation2 + $0x20] sm:$0xff] }
 0x1dc   : > { %7374 = vmatprep.mubr.msk.f32.mxu0 %vm1513_vm2, %v8581_v54  ;;  %v8641_v49 = vpop.f32.mrf.mxu1  ;;  %v8643_v3 = vpop.f32.mrf.mxu0  ;;  %7390 = vmatprep.subr.mxu1 %v7425_v16 }
 0x1dd   : > { %9964 = vst [vmem:[#allocation12_spill] sm:$0xff] %v8641_v49  ;;  %7402 = vmatpush3.msra.mxu1 %v7425_v16  ;;  %v7427_v16 = vld [vmem:[%s9952_s3 + $0x108] sm:$0xff] }
 0x1de   : > { %v8648_v7 = vpop.f32.mrf.mxu1  ;;  %7033 = vmatmul.mubr.msk.f32.gmra.mxu1 %vm1513_vm2, %v1638_v25  ;;  %v8651_v60 = vpop.f32.mrf.mxu0  ;;  %7375 = vmatmul.mubr.msk.f32.gmra.mxu0 %vm1513_vm2, %v1759_v63  ;;  %v7429_v63 = vld [vmem:[#allocation2 + $0x30] sm:$0xff] }
 0x1df   : > { %9965 = vst [vmem:[#allocation13_spill] sm:$0xff] %v8648_v7  ;;  %7035 = vmatprep.mubr.msk.f32.mxu1 %vm1513_vm2, %v7426_v40  ;;  %7377 = vmatprep.mubr.msk.f32.mxu0 %vm1513_vm2, %v1760_v21  ;;  %v7428_v7 = vld [vmem:[#allocation2 + $0x28] sm:$0xff] }
 0x1e0   : > { %v8656_v49 = vpop.f32.mrf.mxu1  ;;  %v8658_v55 = vpop.f32.mrf.mxu0  ;;  %7391 = vmatprep.subr.mxu1 %v7427_v16 }
 0x1e1   : > { %9966 = vst [vmem:[#allocation14_spill] sm:$0xff] %v8656_v49  ;;  %7403 = vmatpush3.msra.mxu1 %v7427_v16  ;;  %v7430_v16 = vld [vmem:[%s9952_s3 + $0x100] sm:$0xff] }
 0x1e2   : > { %v8663_v25 = vpop.f32.mrf.mxu1  ;;  %7036 = vmatmul.mubr.msk.f32.gmra.mxu1 %vm1513_vm2, %v7428_v7  ;;  %7378 = vmatmul.mubr.msk.f32.gmra.mxu0 %vm1513_vm2, %v1761_v28  ;;  %v8669_v21 = vpop.f32.mrf.mxu0  ;;  %v7431_v7 = vld [vmem:[#allocation2 + $0x38] sm:$0xff]  ;;  %v7432_v28 = vld [vmem:[#allocation2 + $0x40] sm:$0xff] }
 0x1e3   : > { %9967 = vst [vmem:[#allocation15_spill] sm:$0xff] %v8663_v25  ;;  %7038 = vmatprep.mubr.msk.f32.mxu1 %vm1513_vm2, %v7429_v63  ;;  %7380 = vmatprep.mubr.msk.f32.mxu0 %vm1513_vm2, %v1762_v47  ;;  %v3485_v25 = vld [vmem:[#allocation2 + $0x398] sm:$0xff] }
 0x1e4   : > { %v8671_v40 = vpop.f32.mrf.mxu1  ;;  %7392 = vmatprep.subr.mxu1 %v7430_v16  ;;  %v7433_v47 = vld [vmem:[%s9952_s3 + $0xf8] sm:$0xff]  ;;  %v8684_v63 = vpop.f32.mrf.mxu0 }
 0x1e5   : > { %9968 = vst [vmem:[#allocation16_spill] sm:$0xff] %v8671_v40  ;;  %7404 = vmatpush3.msra.mxu1 %v7430_v16  ;;  %v7434_v16 = vld [vmem:[%s9952_s3 + $0xf0] sm:$0xff] }
 0x1e6   : > { %v8676_v49 = vpop.f32.mrf.mxu1  ;;  %7039 = vmatmul.mubr.msk.f32.gmra.mxu1 %vm1513_vm2, %v7431_v7  ;;  %7381 = vmatmul.mubr.msk.f32.gmra.mxu0 %vm1513_vm2, %v3485_v25  ;;  %v7435_v25 = vld [vmem:[#allocation2 + $0x48] sm:$0xff] }
 0x1e7   : > { %9969 = vst [vmem:[#allocation17_spill] sm:$0xff] %v8676_v49  ;;  %7041 = vmatprep.mubr.msk.f32.mxu1 %vm1513_vm2, %v7432_v28  ;;  %7393 = vmatprep.subr.mxu1 %v7433_v47  ;;  %v7436_v28 = vld [vmem:[#allocation2 + $0x50] sm:$0xff]  ;;  %v8695_v49 = vpop.f32.mrf.mxu0 }
 0x1e8   : > { %v8686_v40 = vpop.f32.mrf.mxu1  ;;  %7405 = vmatpush3.msra.mxu1 %v7433_v47  ;;  %v7437_v47 = vld [vmem:[%s9952_s3 + $0xe8] sm:$0xff] }
 0x1e9   : > { %9970 = vst [vmem:[#allocation18_spill] sm:$0xff] %v8686_v40  ;;  %7394 = vmatprep.subr.mxu1 %v7434_v16 }
 0x1ea   : > { %v8691_v7 = vpop.f32.mrf.mxu1  ;;  %7042 = vmatmul.mubr.msk.f32.gmra.mxu1 %vm1513_vm2, %v7435_v25  ;;  %v7439_v25 = vld [vmem:[%s9952_s3 + $0xe0] sm:$0xff] }
 0x1eb   : > { %9971 = vst [vmem:[#allocation19_spill] sm:$0xff] %v8691_v7  ;;  %7044 = vmatprep.mubr.msk.f32.mxu1 %vm1513_vm2, %v7436_v28  ;;  %7406 = vmatpush3.msra.mxu1 %v7434_v16  ;;  %v7438_v7 = vld [vmem:[#allocation2 + $0x58] sm:$0xff]  ;;  %v7440_v16 = vld [vmem:[#allocation2 + $0x60] sm:$0xff]  ;;  %v8709_v28 = vpop.f32.mrf.mxu0 }
 0x1ec   : > { %v8697_v45 = vpop.f32.mrf.mxu1  ;;  %7395 = vmatprep.subr.mxu1 %v7437_v47  ;;  %9974 = vst [vmem:[#allocation22_spill] sm:$0xff] %v8709_v28 }
 0x1ed   : > { %9972 = vst [vmem:[#allocation20_spill] sm:$0xff] %v8697_v45  ;;  %7407 = vmatpush3.msra.mxu1 %v7437_v47  ;;  %v7441_v47 = vld [vmem:[%s9952_s3 + $0xd8] sm:$0xff] }
 0x1ee   : > { %v8702_v40 = vpop.f32.mrf.mxu1  ;;  %7045 = vmatmul.mubr.msk.f32.gmra.mxu1 %vm1513_vm2, %v7438_v7  ;;  %7396 = vmatprep.subr.mxu1 %v7439_v25 }
 0x1ef   : > { %9973 = vst [vmem:[#allocation21_spill] sm:$0xff] %v8702_v40  ;;  %7047 = vmatprep.mubr.msk.f32.mxu1 %vm1513_vm2, %v7440_v16  ;;  %7408 = vmatpush3.msra.mxu1 %v7439_v25  ;;  %v7442_v40 = vld [vmem:[#allocation2 + $0x68] sm:$0xff]  ;;  %v7443_v16 = vld [vmem:[%s9952_s3 + $0xd0] sm:$0xff] }
 0x1f0   : > { %v8711_v45 = vpop.f32.mrf.mxu1  ;;  %7397 = vmatprep.subr.mxu1 %v7441_v47  ;;  %v7444_v25 = vld [vmem:[#allocation2 + $0x70] sm:$0xff] }
 0x1f1   : > { %9975 = vst [vmem:[#allocation23_spill] sm:$0xff] %v8711_v45  ;;  %7409 = vmatpush3.msra.mxu1 %v7441_v47  ;;  %v8723_v45 = vpop.f32.mrf.mxu0  ;;  %v7445_v47 = vld [vmem:[%s9952_s3 + $0xc8] sm:$0xff] }
 0x1f2   : > { %v8716_v7 = vpop.f32.mrf.mxu1  ;;  %7048 = vmatmul.mubr.msk.f32.gmra.mxu1 %vm1513_vm2, %v7442_v40  ;;  %7398 = vmatprep.subr.mxu1 %v7443_v16  ;;  %9977 = vst [vmem:[#allocation25_spill] sm:$0xff] %v8723_v45 }
 0x1f3   : > { %9976 = vst [vmem:[#allocation24_spill] sm:$0xff] %v8716_v7  ;;  %7050 = vmatprep.mubr.msk.f32.mxu1 %vm1513_vm2, %v7444_v25  ;;  %7410 = vmatpush3.msra.mxu1 %v7443_v16  ;;  %v7446_v7 = vld [vmem:[#allocation2 + $0x78] sm:$0xff]  ;;  %v7447_v25 = vld [vmem:[%s9952_s3 + $0xc0] sm:$0xff] }
 0x1f4   : > { %v8725_v28 = vpop.f32.mrf.mxu1  ;;  %7399 = vmatprep.subr.mxu1 %v7445_v47  ;;  %v7448_v16 = vld [vmem:[#allocation2 + $0x80] sm:$0xff] }
 0x1f5   : > { %9978 = vst [vmem:[#allocation26_spill] sm:$0xff] %v8725_v28  ;;  %7411 = vmatpush3.msra.mxu1 %v7445_v47  ;;  %v8737_v28 = vpop.f32.mrf.mxu0  ;;  %v7449_v47 = vld [vmem:[#allocation2 + $0x88] sm:$0xff] }
 0x1f6   : > { %v8730_v40 = vpop.f32.mrf.mxu1  ;;  %7051 = vmatmul.mubr.msk.f32.gmra.mxu1 %vm1513_vm2, %v7446_v7  ;;  %7400 = vmatprep.subr.mxu1 %v7447_v25  ;;  %9980 = vst [vmem:[#allocation28_spill] sm:$0xff] %v8737_v28  ;;  %v7453_v28 = vld [vmem:[#allocation2 + $0xa8] sm:$0xff] }
 0x1f7   : > { %9979 = vst [vmem:[#allocation27_spill] sm:$0xff] %v8730_v40  ;;  %7053 = vmatprep.mubr.msk.f32.mxu1 %vm1513_vm2, %v7448_v16  ;;  %7412 = vmatpush3.msra.mxu1 %v7447_v25  ;;  %v7450_v40 = vld [vmem:[#allocation2 + $0x90] sm:$0xff]  ;;  %v8745_v7 = vpop.f32.mrf.mxu0  ;;  %v7451_v16 = vld [vmem:[#allocation2 + $0x98] sm:$0xff]  ;;  %v7452_v25 = vld [vmem:[#allocation2 + $0xa0] sm:$0xff] }
 0x1f8   : > { %v8739_v45 = vpop.f32.mrf.mxu1  ;;  %9983 = vst [vmem:[#allocation31_spill] sm:$0xff] %v8745_v7  ;;  %v7455_v7 = vld [vmem:[#allocation2 + $0xb8] sm:$0xff] }
 0x1f9   : > { %9981 = vst [vmem:[#allocation29_spill] sm:$0xff] %v8739_v45  ;;  %v8753_v45 = vpop.f32.mrf.mxu0 }
 0x1fa   : > { %v8741_v54 = vpop.f32.mrf.mxu1  ;;  %7054 = vmatmul.mubr.msk.f32.gmra.mxu1 %vm1513_vm2, %v7449_v47  ;;  %9986 = vst [vmem:[#allocation34_spill] sm:$0xff] %v8753_v45  ;;  %v7457_v45 = vld [vmem:[#allocation2 + $0xc8] sm:$0xff] }
 0x1fb   : > { %9982 = vst [vmem:[#allocation30_spill] sm:$0xff] %v8741_v54  ;;  %7056 = vmatprep.mubr.msk.f32.mxu1 %vm1513_vm2, %v7450_v40  ;;  %v7454_v40 = vld [vmem:[#allocation2 + $0xb0] sm:$0xff] }
 0x1fc   : > { %v8747_v33 = vpop.f32.mrf.mxu1 }
 0x1fd   : > { %9984 = vst [vmem:[#allocation32_spill] sm:$0xff] %v8747_v33  ;;  %v8761_v33 = vpop.f32.mrf.mxu0 }
 0x1fe   : > { %v8749_v39 = vpop.f32.mrf.mxu1  ;;  %7057 = vmatmul.mubr.msk.f32.gmra.mxu1 %vm1513_vm2, %v7451_v16  ;;  %9989 = vst [vmem:[#allocation37_spill] sm:$0xff] %v8761_v33  ;;  %v7459_v33 = vld [vmem:[#allocation2 + $0xd8] sm:$0xff] }
 0x1ff   : > { %9985 = vst [vmem:[#allocation33_spill] sm:$0xff] %v8749_v39  ;;  %7059 = vmatprep.mubr.msk.f32.mxu1 %vm1513_vm2, %v7452_v25  ;;  %v7456_v25 = vld [vmem:[#allocation2 + $0xc0] sm:$0xff] }
 0x200   : > { %v8755_v54 = vpop.f32.mrf.mxu1 }
 0x201   : > { %9987 = vst [vmem:[#allocation35_spill] sm:$0xff] %v8755_v54  ;;  %v8769_v54 = vpop.f32.mrf.mxu0 }
 0x202   : > { %v8757_v47 = vpop.f32.mrf.mxu1  ;;  %7060 = vmatmul.mubr.msk.f32.gmra.mxu1 %vm1513_vm2, %v7453_v28  ;;  %9992 = vst [vmem:[#allocation40_spill] sm:$0xff] %v8769_v54  ;;  %v7461_v54 = vld [vmem:[#allocation2 + $0xe8] sm:$0xff] }
 0x203   : > { %9988 = vst [vmem:[#allocation36_spill] sm:$0xff] %v8757_v47  ;;  %7062 = vmatprep.mubr.msk.f32.mxu1 %vm1513_vm2, %v7454_v40  ;;  %v7458_v40 = vld [vmem:[#allocation2 + $0xd0] sm:$0xff] }
 0x204   : > { %v8763_v39 = vpop.f32.mrf.mxu1 }
 0x205   : > { %9990 = vst [vmem:[#allocation38_spill] sm:$0xff] %v8763_v39  ;;  %v8777_v39 = vpop.f32.mrf.mxu0 }
 0x206   : > { %v8765_v16 = vpop.f32.mrf.mxu1  ;;  %7063 = vmatmul.mubr.msk.f32.gmra.mxu1 %vm1513_vm2, %v7455_v7  ;;  %9995 = vst [vmem:[#allocation43_spill] sm:$0xff] %v8777_v39  ;;  %v7463_v39 = vld [vmem:[#allocation2 + $0xf8] sm:$0xff] }
 0x207   : > { %9991 = vst [vmem:[#allocation39_spill] sm:$0xff] %v8765_v16  ;;  %7065 = vmatprep.mubr.msk.f32.mxu1 %vm1513_vm2, %v7456_v25  ;;  %v7460_v25 = vld [vmem:[#allocation2 + $0xe0] sm:$0xff] }
 0x208   : > { %v8771_v47 = vpop.f32.mrf.mxu1 }
 0x209   : > { %9993 = vst [vmem:[#allocation41_spill] sm:$0xff] %v8771_v47  ;;  %v8785_v47 = vpop.f32.mrf.mxu0 }
 0x20a   : > { %v8773_v28 = vpop.f32.mrf.mxu1  ;;  %7066 = vmatmul.mubr.msk.f32.gmra.mxu1 %vm1513_vm2, %v7457_v45  ;;  %9998 = vst [vmem:[#allocation46_spill] sm:$0xff] %v8785_v47  ;;  %v7465_v47 = vld [vmem:[#allocation2 + $0x108] sm:$0xff] }
 0x20b   : > { %9994 = vst [vmem:[#allocation42_spill] sm:$0xff] %v8773_v28  ;;  %7068 = vmatprep.mubr.msk.f32.mxu1 %vm1513_vm2, %v7458_v40  ;;  %v7462_v40 = vld [vmem:[#allocation2 + $0xf0] sm:$0xff] }
 0x20c   : > { %v8779_v16 = vpop.f32.mrf.mxu1 }
 0x20d   : > { %9996 = vst [vmem:[#allocation44_spill] sm:$0xff] %v8779_v16  ;;  %v8793_v16 = vpop.f32.mrf.mxu0 }
 0x20e   : > { %v8781_v7 = vpop.f32.mrf.mxu1  ;;  %7069 = vmatmul.mubr.msk.f32.gmra.mxu1 %vm1513_vm2, %v7459_v33  ;;  %10001 = vst [vmem:[#allocation49_spill] sm:$0xff] %v8793_v16  ;;  %v7467_v16 = vld [vmem:[#allocation2 + $0x118] sm:$0xff] }
 0x20f   : > { %9997 = vst [vmem:[#allocation45_spill] sm:$0xff] %v8781_v7  ;;  %7071 = vmatprep.mubr.msk.f32.mxu1 %vm1513_vm2, %v7460_v25  ;;  %v7464_v25 = vld [vmem:[#allocation2 + $0x100] sm:$0xff] }
 0x210   : > { %v8787_v28 = vpop.f32.mrf.mxu1 }
 0x211   : > { %9999 = vst [vmem:[#allocation47_spill] sm:$0xff] %v8787_v28  ;;  %v8801_v28 = vpop.f32.mrf.mxu0 }
 0x212   : > { %v8789_v45 = vpop.f32.mrf.mxu1  ;;  %7072 = vmatmul.mubr.msk.f32.gmra.mxu1 %vm1513_vm2, %v7461_v54  ;;  %10004 = vst [vmem:[#allocation52_spill] sm:$0xff] %v8801_v28  ;;  %v7469_v28 = vld [vmem:[#allocation2 + $0x128] sm:$0xff] }
 0x213   : > { %10000 = vst [vmem:[#allocation48_spill] sm:$0xff] %v8789_v45  ;;  %7074 = vmatprep.mubr.msk.f32.mxu1 %vm1513_vm2, %v7462_v40  ;;  %v7466_v40 = vld [vmem:[#allocation2 + $0x110] sm:$0xff] }
 0x214   : > { %v8795_v7 = vpop.f32.mrf.mxu1 }
 0x215   : > { %10002 = vst [vmem:[#allocation50_spill] sm:$0xff] %v8795_v7  ;;  %v8809_v7 = vpop.f32.mrf.mxu0 }
 0x216   : > { %v8797_v33 = vpop.f32.mrf.mxu1  ;;  %7075 = vmatmul.mubr.msk.f32.gmra.mxu1 %vm1513_vm2, %v7463_v39  ;;  %10007 = vst [vmem:[#allocation55_spill] sm:$0xff] %v8809_v7 }
 0x217   : > { %10003 = vst [vmem:[#allocation51_spill] sm:$0xff] %v8797_v33  ;;  %7077 = vmatprep.mubr.msk.f32.mxu1 %vm1513_vm2, %v7464_v25  ;;  %v7468_v25 = vld [vmem:[#allocation2 + $0x120] sm:$0xff] }
 0x218   : > { %v8803_v45 = vpop.f32.mrf.mxu1 }
 0x219   : > { %10005 = vst [vmem:[#allocation53_spill] sm:$0xff] %v8803_v45  ;;  %v8817_v45 = vpop.f32.mrf.mxu0 }
 0x21a   : > { %v8805_v54 = vpop.f32.mrf.mxu1  ;;  %7078 = vmatmul.mubr.msk.f32.gmra.mxu1 %vm1513_vm2, %v7465_v47  ;;  %10010 = vst [vmem:[#allocation58_spill] sm:$0xff] %v8817_v45  ;;  %v7471_v45 = vld [vmem:[#allocation2 + $0x138] sm:$0xff] }
 0x21b   : > { %10006 = vst [vmem:[#allocation54_spill] sm:$0xff] %v8805_v54  ;;  %7080 = vmatprep.mubr.msk.f32.mxu1 %vm1513_vm2, %v7466_v40  ;;  %v7470_v40 = vld [vmem:[#allocation2 + $0x130] sm:$0xff] }
 0x21c   : > { %v8811_v33 = vpop.f32.mrf.mxu1 }
 0x21d   : > { %10008 = vst [vmem:[#allocation56_spill] sm:$0xff] %v8811_v33  ;;  %v8825_v33 = vpop.f32.mrf.mxu0 }
 0x21e   : > { %v8813_v39 = vpop.f32.mrf.mxu1  ;;  %7081 = vmatmul.mubr.msk.f32.gmra.mxu1 %vm1513_vm2, %v7467_v16  ;;  %10013 = vst [vmem:[#allocation61_spill] sm:$0xff] %v8825_v33  ;;  %v3486_v16 = vld [vmem:[#allocation2 + $0x3a0] sm:$0xff]  ;;  %v7475_v33 = vld [vmem:[#allocation2 + $0x158] sm:$0xff] }
 0x21f   : > { %10009 = vst [vmem:[#allocation57_spill] sm:$0xff] %v8813_v39  ;;  %7083 = vmatprep.mubr.msk.f32.mxu1 %vm1513_vm2, %v7468_v25  ;;  %7383 = vmatprep.mubr.msk.f32.mxu0 %vm1513_vm2, %v3486_v16  ;;  %v3487_v25 = vld [vmem:[#allocation2 + $0x3a8] sm:$0xff]  ;;  %v7474_v16 = vld [vmem:[#allocation2 + $0x150] sm:$0xff] }
 0x220   : > { %v8819_v54 = vpop.f32.mrf.mxu1  ;;  %7384 = vmatmul.mubr.msk.f32.gmra.mxu0 %vm1513_vm2, %v3487_v25 }
 0x221   : > { %10011 = vst [vmem:[#allocation59_spill] sm:$0xff] %v8819_v54 }
 0x222   : > { %v8821_v47 = vpop.f32.mrf.mxu1  ;;  %7084 = vmatmul.mubr.msk.f32.gmra.mxu1 %vm1513_vm2, %v7469_v28  ;;  %v8835_v28 = vpop.f32.mrf.mxu0 }
 0x223   : > { %10012 = vst [vmem:[#allocation60_spill] sm:$0xff] %v8821_v47  ;;  %7086 = vmatprep.mubr.msk.f32.mxu1 %vm1513_vm2, %v7470_v40  ;;  %v7472_v47 = vld [vmem:[#allocation2 + $0x140] sm:$0xff]  ;;  %10016 = vst [vmem:[#allocation64_spill] sm:$0xff] %v8835_v28  ;;  %v7477_v28 = vld [vmem:[#allocation2 + $0x168] sm:$0xff] }
 0x224   : > { %v8827_v39 = vpop.f32.mrf.mxu1 }
 0x225   : > { %10014 = vst [vmem:[#allocation62_spill] sm:$0xff] %v8827_v39  ;;  %v7473_v39 = vld [vmem:[#allocation2 + $0x148] sm:$0xff] }
 0x226   : > { %v8830_v7 = vpop.f32.mrf.mxu1  ;;  %7087 = vmatmul.mubr.msk.f32.gmra.mxu1 %vm1513_vm2, %v7471_v45 }
 0x227   : > { %10015 = vst [vmem:[#allocation63_spill] sm:$0xff] %v8830_v7  ;;  %7089 = vmatprep.mubr.msk.f32.mxu1 %vm1513_vm2, %v7472_v47  ;;  %v8843_v7 = vpop.f32.mrf.mxu0  ;;  %v7476_v47 = vld [vmem:[#allocation2 + $0x160] sm:$0xff] }
 0x228   : > { %v8837_v40 = vpop.f32.mrf.mxu1  ;;  %10019 = vst [vmem:[#allocation67_spill] sm:$0xff] %v8843_v7  ;;  %v7479_v7 = vld [vmem:[#allocation2 + $0x178] sm:$0xff] }
 0x229   : > { %10017 = vst [vmem:[#allocation65_spill] sm:$0xff] %v8837_v40  ;;  %v8851_v40 = vpop.f32.mrf.mxu0 }
 0x22a   : > { %v8839_v54 = vpop.f32.mrf.mxu1  ;;  %7090 = vmatmul.mubr.msk.f32.gmra.mxu1 %vm1513_vm2, %v7473_v39  ;;  %10022 = vst [vmem:[#allocation70_spill] sm:$0xff] %v8851_v40  ;;  %v7481_v40 = vld [vmem:[#allocation2 + $0x188] sm:$0xff] }
 0x22b   : > { %10018 = vst [vmem:[#allocation66_spill] sm:$0xff] %v8839_v54  ;;  %7092 = vmatprep.mubr.msk.f32.mxu1 %vm1513_vm2, %v7474_v16  ;;  %v7478_v16 = vld [vmem:[#allocation2 + $0x170] sm:$0xff] }
 0x22c   : > { %v8845_v45 = vpop.f32.mrf.mxu1 }
 0x22d   : > { %10020 = vst [vmem:[#allocation68_spill] sm:$0xff] %v8845_v45  ;;  %v8859_v45 = vpop.f32.mrf.mxu0 }
 0x22e   : > { %v8847_v25 = vpop.f32.mrf.mxu1  ;;  %7093 = vmatmul.mubr.msk.f32.gmra.mxu1 %vm1513_vm2, %v7475_v33  ;;  %10025 = vst [vmem:[#allocation73_spill] sm:$0xff] %v8859_v45  ;;  %v7483_v45 = vld [vmem:[#allocation2 + $0x198] sm:$0xff] }
 0x22f   : > { %10021 = vst [vmem:[#allocation69_spill] sm:$0xff] %v8847_v25  ;;  %7095 = vmatprep.mubr.msk.f32.mxu1 %vm1513_vm2, %v7476_v47  ;;  %v7480_v47 = vld [vmem:[#allocation2 + $0x180] sm:$0xff] }
 0x230   : > { %v8853_v54 = vpop.f32.mrf.mxu1 }
 0x231   : > { %10023 = vst [vmem:[#allocation71_spill] sm:$0xff] %v8853_v54  ;;  %v8867_v54 = vpop.f32.mrf.mxu0 }
 0x232   : > { %v8855_v39 = vpop.f32.mrf.mxu1  ;;  %7096 = vmatmul.mubr.msk.f32.gmra.mxu1 %vm1513_vm2, %v7477_v28  ;;  %10028 = vst [vmem:[#allocation76_spill] sm:$0xff] %v8867_v54  ;;  %v7485_v54 = vld [vmem:[#allocation2 + $0x1a8] sm:$0xff] }
 0x233   : > { %10024 = vst [vmem:[#allocation72_spill] sm:$0xff] %v8855_v39  ;;  %7098 = vmatprep.mubr.msk.f32.mxu1 %vm1513_vm2, %v7478_v16  ;;  %v7482_v16 = vld [vmem:[#allocation2 + $0x190] sm:$0xff] }
 0x234   : > { %v8861_v25 = vpop.f32.mrf.mxu1 }
 0x235   : > { %10026 = vst [vmem:[#allocation74_spill] sm:$0xff] %v8861_v25  ;;  %v8875_v25 = vpop.f32.mrf.mxu0 }
 0x236   : > { %v8863_v33 = vpop.f32.mrf.mxu1  ;;  %7099 = vmatmul.mubr.msk.f32.gmra.mxu1 %vm1513_vm2, %v7479_v7  ;;  %10031 = vst [vmem:[#allocation79_spill] sm:$0xff] %v8875_v25  ;;  %v7487_v25 = vld [vmem:[#allocation2 + $0x1b8] sm:$0xff] }
 0x237   : > { %10027 = vst [vmem:[#allocation75_spill] sm:$0xff] %v8863_v33  ;;  %7101 = vmatprep.mubr.msk.f32.mxu1 %vm1513_vm2, %v7480_v47  ;;  %v7484_v47 = vld [vmem:[#allocation2 + $0x1a0] sm:$0xff] }
 0x238   : > { %v8869_v39 = vpop.f32.mrf.mxu1 }
 0x239   : > { %10029 = vst [vmem:[#allocation77_spill] sm:$0xff] %v8869_v39  ;;  %v8883_v39 = vpop.f32.mrf.mxu0 }
 0x23a   : > { %v8871_v28 = vpop.f32.mrf.mxu1  ;;  %7102 = vmatmul.mubr.msk.f32.gmra.mxu1 %vm1513_vm2, %v7481_v40  ;;  %10034 = vst [vmem:[#allocation82_spill] sm:$0xff] %v8883_v39  ;;  %v7489_v39 = vld [vmem:[#allocation2 + $0x1c8] sm:$0xff] }
 0x23b   : > { %10030 = vst [vmem:[#allocation78_spill] sm:$0xff] %v8871_v28  ;;  %7104 = vmatprep.mubr.msk.f32.mxu1 %vm1513_vm2, %v7482_v16  ;;  %v7486_v16 = vld [vmem:[#allocation2 + $0x1b0] sm:$0xff] }
 0x23c   : > { %v8877_v33 = vpop.f32.mrf.mxu1 }
 0x23d   : > { %10032 = vst [vmem:[#allocation80_spill] sm:$0xff] %v8877_v33  ;;  %v8891_v33 = vpop.f32.mrf.mxu0 }
 0x23e   : > { %v8879_v7 = vpop.f32.mrf.mxu1  ;;  %7105 = vmatmul.mubr.msk.f32.gmra.mxu1 %vm1513_vm2, %v7483_v45  ;;  %10037 = vst [vmem:[#allocation85_spill] sm:$0xff] %v8891_v33  ;;  %v7491_v33 = vld [vmem:[#allocation2 + $0x1d8] sm:$0xff] }
 0x23f   : > { %10033 = vst [vmem:[#allocation81_spill] sm:$0xff] %v8879_v7  ;;  %7107 = vmatprep.mubr.msk.f32.mxu1 %vm1513_vm2, %v7484_v47  ;;  %v7488_v47 = vld [vmem:[#allocation2 + $0x1c0] sm:$0xff] }
 0x240   : > { %v8885_v28 = vpop.f32.mrf.mxu1 }
 0x241   : > { %10035 = vst [vmem:[#allocation83_spill] sm:$0xff] %v8885_v28  ;;  %v8899_v28 = vpop.f32.mrf.mxu0 }
 0x242   : > { %v8887_v40 = vpop.f32.mrf.mxu1  ;;  %7108 = vmatmul.mubr.msk.f32.gmra.mxu1 %vm1513_vm2, %v7485_v54  ;;  %10040 = vst [vmem:[#allocation88_spill] sm:$0xff] %v8899_v28  ;;  %v7493_v28 = vld [vmem:[#allocation2 + $0x1e8] sm:$0xff] }
 0x243   : > { %10036 = vst [vmem:[#allocation84_spill] sm:$0xff] %v8887_v40  ;;  %7110 = vmatprep.mubr.msk.f32.mxu1 %vm1513_vm2, %v7486_v16  ;;  %v7490_v16 = vld [vmem:[#allocation2 + $0x1d0] sm:$0xff] }
 0x244   : > { %v8893_v7 = vpop.f32.mrf.mxu1 }
 0x245   : > { %10038 = vst [vmem:[#allocation86_spill] sm:$0xff] %v8893_v7  ;;  %v8907_v7 = vpop.f32.mrf.mxu0 }
 0x246   : > { %v8895_v45 = vpop.f32.mrf.mxu1  ;;  %7111 = vmatmul.mubr.msk.f32.gmra.mxu1 %vm1513_vm2, %v7487_v25  ;;  %10043 = vst [vmem:[#allocation91_spill] sm:$0xff] %v8907_v7  ;;  %v7495_v7 = vld [vmem:[#allocation2 + $0x1f8] sm:$0xff] }
 0x247   : > { %10039 = vst [vmem:[#allocation87_spill] sm:$0xff] %v8895_v45  ;;  %7113 = vmatprep.mubr.msk.f32.mxu1 %vm1513_vm2, %v7488_v47  ;;  %v7492_v47 = vld [vmem:[#allocation2 + $0x1e0] sm:$0xff] }
 0x248   : > { %v8901_v40 = vpop.f32.mrf.mxu1 }
 0x249   : > { %10041 = vst [vmem:[#allocation89_spill] sm:$0xff] %v8901_v40  ;;  %v8915_v40 = vpop.f32.mrf.mxu0 }
 0x24a   : > { %v8903_v54 = vpop.f32.mrf.mxu1  ;;  %7114 = vmatmul.mubr.msk.f32.gmra.mxu1 %vm1513_vm2, %v7489_v39  ;;  %10046 = vst [vmem:[#allocation94_spill] sm:$0xff] %v8915_v40  ;;  %v7497_v40 = vld [vmem:[#allocation2 + $0x208] sm:$0xff] }
 0x24b   : > { %10042 = vst [vmem:[#allocation90_spill] sm:$0xff] %v8903_v54  ;;  %7116 = vmatprep.mubr.msk.f32.mxu1 %vm1513_vm2, %v7490_v16  ;;  %v7494_v16 = vld [vmem:[#allocation2 + $0x1f0] sm:$0xff] }
 0x24c   : > { %v8909_v45 = vpop.f32.mrf.mxu1 }
 0x24d   : > { %10044 = vst [vmem:[#allocation92_spill] sm:$0xff] %v8909_v45  ;;  %v8923_v45 = vpop.f32.mrf.mxu0 }
 0x24e   : > { %v8911_v25 = vpop.f32.mrf.mxu1  ;;  %7117 = vmatmul.mubr.msk.f32.gmra.mxu1 %vm1513_vm2, %v7491_v33  ;;  %10049 = vst [vmem:[#allocation97_spill] sm:$0xff] %v8923_v45  ;;  %v7499_v45 = vld [vmem:[#allocation2 + $0x218] sm:$0xff] }
 0x24f   : > { %10045 = vst [vmem:[#allocation93_spill] sm:$0xff] %v8911_v25  ;;  %7119 = vmatprep.mubr.msk.f32.mxu1 %vm1513_vm2, %v7492_v47  ;;  %v7496_v47 = vld [vmem:[#allocation2 + $0x200] sm:$0xff] }
 0x250   : > { %v8917_v54 = vpop.f32.mrf.mxu1 }
 0x251   : > { %10047 = vst [vmem:[#allocation95_spill] sm:$0xff] %v8917_v54  ;;  %v8931_v54 = vpop.f32.mrf.mxu0 }
 0x252   : > { %v8919_v39 = vpop.f32.mrf.mxu1  ;;  %7120 = vmatmul.mubr.msk.f32.gmra.mxu1 %vm1513_vm2, %v7493_v28  ;;  %10052 = vst [vmem:[#allocation100_spill] sm:$0xff] %v8931_v54  ;;  %v7501_v54 = vld [vmem:[#allocation2 + $0x228] sm:$0xff] }
 0x253   : > { %10048 = vst [vmem:[#allocation96_spill] sm:$0xff] %v8919_v39  ;;  %7122 = vmatprep.mubr.msk.f32.mxu1 %vm1513_vm2, %v7494_v16  ;;  %v7498_v16 = vld [vmem:[#allocation2 + $0x210] sm:$0xff] }
 0x254   : > { %v8925_v25 = vpop.f32.mrf.mxu1 }
 0x255   : > { %10050 = vst [vmem:[#allocation98_spill] sm:$0xff] %v8925_v25  ;;  %v8939_v25 = vpop.f32.mrf.mxu0 }
 0x256   : > { %v8927_v33 = vpop.f32.mrf.mxu1  ;;  %7123 = vmatmul.mubr.msk.f32.gmra.mxu1 %vm1513_vm2, %v7495_v7  ;;  %10055 = vst [vmem:[#allocation103_spill] sm:$0xff] %v8939_v25  ;;  %v7503_v25 = vld [vmem:[#allocation2 + $0x238] sm:$0xff] }
 0x257   : > { %10051 = vst [vmem:[#allocation99_spill] sm:$0xff] %v8927_v33  ;;  %7125 = vmatprep.mubr.msk.f32.mxu1 %vm1513_vm2, %v7496_v47  ;;  %v7500_v47 = vld [vmem:[#allocation2 + $0x220] sm:$0xff] }
 0x258   : > { %v8933_v39 = vpop.f32.mrf.mxu1 }
 0x259   : > { %10053 = vst [vmem:[#allocation101_spill] sm:$0xff] %v8933_v39  ;;  %v8947_v39 = vpop.f32.mrf.mxu0 }
 0x25a   : > { %v8935_v28 = vpop.f32.mrf.mxu1  ;;  %7126 = vmatmul.mubr.msk.f32.gmra.mxu1 %vm1513_vm2, %v7497_v40  ;;  %10058 = vst [vmem:[#allocation106_spill] sm:$0xff] %v8947_v39  ;;  %v7505_v39 = vld [vmem:[#allocation2 + $0x248] sm:$0xff] }
 0x25b   : > { %10054 = vst [vmem:[#allocation102_spill] sm:$0xff] %v8935_v28  ;;  %7128 = vmatprep.mubr.msk.f32.mxu1 %vm1513_vm2, %v7498_v16  ;;  %v7502_v16 = vld [vmem:[#allocation2 + $0x230] sm:$0xff] }
 0x25c   : > { %v8941_v33 = vpop.f32.mrf.mxu1 }
 0x25d   : > { %10056 = vst [vmem:[#allocation104_spill] sm:$0xff] %v8941_v33  ;;  %v8955_v33 = vpop.f32.mrf.mxu0 }
 0x25e   : > { %v8943_v7 = vpop.f32.mrf.mxu1  ;;  %7129 = vmatmul.mubr.msk.f32.gmra.mxu1 %vm1513_vm2, %v7499_v45  ;;  %10061 = vst [vmem:[#allocation109_spill] sm:$0xff] %v8955_v33  ;;  %v7507_v33 = vld [vmem:[#allocation2 + $0x258] sm:$0xff] }
 0x25f   : > { %10057 = vst [vmem:[#allocation105_spill] sm:$0xff] %v8943_v7  ;;  %7131 = vmatprep.mubr.msk.f32.mxu1 %vm1513_vm2, %v7500_v47  ;;  %v7504_v47 = vld [vmem:[#allocation2 + $0x240] sm:$0xff] }
 0x260   : > { %v8949_v28 = vpop.f32.mrf.mxu1 }
 0x261   : > { %10059 = vst [vmem:[#allocation107_spill] sm:$0xff] %v8949_v28  ;;  %v8963_v28 = vpop.f32.mrf.mxu0 }
 0x262   : > { %v8951_v40 = vpop.f32.mrf.mxu1  ;;  %7132 = vmatmul.mubr.msk.f32.gmra.mxu1 %vm1513_vm2, %v7501_v54  ;;  %10064 = vst [vmem:[#allocation112_spill] sm:$0xff] %v8963_v28  ;;  %v7509_v28 = vld [vmem:[#allocation2 + $0x268] sm:$0xff] }
 0x263   : > { %10060 = vst [vmem:[#allocation108_spill] sm:$0xff] %v8951_v40  ;;  %7134 = vmatprep.mubr.msk.f32.mxu1 %vm1513_vm2, %v7502_v16  ;;  %v7506_v16 = vld [vmem:[#allocation2 + $0x250] sm:$0xff] }
 0x264   : > { %v8957_v7 = vpop.f32.mrf.mxu1 }
 0x265   : > { %10062 = vst [vmem:[#allocation110_spill] sm:$0xff] %v8957_v7  ;;  %v8971_v7 = vpop.f32.mrf.mxu0 }
 0x266   : > { %v8959_v45 = vpop.f32.mrf.mxu1  ;;  %7135 = vmatmul.mubr.msk.f32.gmra.mxu1 %vm1513_vm2, %v7503_v25 }
 0x267   : > { %10063 = vst [vmem:[#allocation111_spill] sm:$0xff] %v8959_v45  ;;  %7137 = vmatprep.mubr.msk.f32.mxu1 %vm1513_vm2, %v7504_v47  ;;  %v7508_v47 = vld [vmem:[#allocation2 + $0x260] sm:$0xff] }
 0x268   : > { %v8965_v40 = vpop.f32.mrf.mxu1 }
 0x269   : > { %10065 = vst [vmem:[#allocation113_spill] sm:$0xff] %v8965_v40  ;;  %v8979_v40 = vpop.f32.mrf.mxu0 }
 0x26a   : > { %v8967_v54 = vpop.f32.mrf.mxu1  ;;  %7138 = vmatmul.mubr.msk.f32.gmra.mxu1 %vm1513_vm2, %v7505_v39 }
 0x26b   : > { %10066 = vst [vmem:[#allocation114_spill] sm:$0xff] %v8967_v54  ;;  %7140 = vmatprep.mubr.msk.f32.mxu1 %vm1513_vm2, %v7506_v16  ;;  %v8988_v16 = vpop.f32.mrf.mxu0 }
 0x26c   : > { %v8973_v45 = vpop.f32.mrf.mxu1 }
 0x26e   : > { %v8975_v25 = vpop.f32.mrf.mxu1  ;;  %7141 = vmatmul.mubr.msk.f32.gmra.mxu1 %vm1513_vm2, %v7507_v33 }
 0x26f   : > { %10067 = vst [vmem:[#allocation115_spill] sm:$0xff] %v8975_v25  ;;  %7143 = vmatprep.mubr.msk.f32.mxu1 %vm1513_vm2, %v7508_v47  ;;  %v8998_v47 = vpop.f32.mrf.mxu0 }
 0x270   : > { %v8981_v54 = vpop.f32.mrf.mxu1 }
 0x272   : > { %v8983_v39 = vpop.f32.mrf.mxu1  ;;  %7144 = vmatmul.mubr.msk.f32.gmra.mxu1 %vm1513_vm2, %v7509_v28 }
 0x273   : > { %10068 = vst [vmem:[#allocation116_spill] sm:$0xff] %v8983_v39  ;;  %7146 = vmatprep.mubr.msk.f32.mxu1 %vm1513_vm2, %v8312_v57  ;;  %v9008_v57 = vpop.f32.mrf.mxu0 }
 0x274   : > { %v8990_v25 = vpop.f32.mrf.mxu1 }
 0x276   : > { %v8992_v33 = vpop.f32.mrf.mxu1  ;;  %7147 = vmatmul.mubr.msk.f32.gmra.mxu1 %vm1513_vm2, %v8318_v61 }
 0x277   : > { %10069 = vst [vmem:[#allocation117_spill] sm:$0xff] %v8992_v33  ;;  %7149 = vmatprep.mubr.msk.f32.mxu1 %vm1513_vm2, %v8326_v2  ;;  %v9018_v2 = vpop.f32.mrf.mxu0 }
 0x278   : > { %v9000_v39 = vpop.f32.mrf.mxu1 }
 0x279   : > { %10070 = vst [vmem:[#allocation118_spill] sm:$0xff] %v9000_v39 }
 0x27a   : > { %v9002_v28 = vpop.f32.mrf.mxu1  ;;  %7150 = vmatmul.mubr.msk.f32.gmra.mxu1 %vm1513_vm2, %v8332_v10 }
 0x27b   : > { %10071 = vst [vmem:[#allocation119_spill] sm:$0xff] %v9002_v28  ;;  %7152 = vmatprep.mubr.msk.f32.mxu1 %vm1513_vm2, %v8340_v11  ;;  %v9028_v11 = vpop.f32.mrf.mxu0 }
 0x27c   : > { %v9010_v33 = vpop.f32.mrf.mxu1 }
 0x27d   : > { %10072 = vst [vmem:[#allocation120_spill] sm:$0xff] %v9010_v33 }
 0x27e   : > { %v9012_v61 = vpop.f32.mrf.mxu1  ;;  %7153 = vmatmul.mubr.msk.f32.gmra.mxu1 %vm1513_vm2, %v8346_v14 }
 0x27f   : > { %10073 = vst [vmem:[#allocation121_spill] sm:$0xff] %v9012_v61  ;;  %7155 = vmatprep.mubr.msk.f32.mxu1 %vm1513_vm2, %v8354_v19  ;;  %v9038_v19 = vpop.f32.mrf.mxu0 }
 0x280   : > { %v9020_v28 = vpop.f32.mrf.mxu1 }
 0x281   : > { %10074 = vst [vmem:[#allocation122_spill] sm:$0xff] %v9020_v28 }
 0x282   : > { %v9022_v10 = vpop.f32.mrf.mxu1  ;;  %7156 = vmatmul.mubr.msk.f32.gmra.mxu1 %vm1513_vm2, %v8360_v22 }
 0x283   : > { %10075 = vst [vmem:[#allocation123_spill] sm:$0xff] %v9022_v10  ;;  %7158 = vmatprep.mubr.msk.f32.mxu1 %vm1513_vm2, %v8369_v27  ;;  %v9048_v27 = vpop.f32.mrf.mxu0 }
 0x284   : > { %v9030_v61 = vpop.f32.mrf.mxu1 }
 0x285   : > { %10076 = vst [vmem:[#allocation124_spill] sm:$0xff] %v9030_v61 }
 0x286   : > { %v9032_v14 = vpop.f32.mrf.mxu1  ;;  %7159 = vmatmul.mubr.msk.f32.gmra.mxu1 %vm1513_vm2, %v8375_v30 }
 0x287   : > { %10077 = vst [vmem:[#allocation125_spill] sm:$0xff] %v9032_v14  ;;  %7161 = vmatprep.mubr.msk.f32.mxu1 %vm1513_vm2, %v8385_v35  ;;  %v9058_v35 = vpop.f32.mrf.mxu0 }
 0x288   : > { %v9040_v10 = vpop.f32.mrf.mxu1 }
 0x289   : > { %10078 = vst [vmem:[#allocation126_spill] sm:$0xff] %v9040_v10 }
 0x28a   : > { %v9042_v22 = vpop.f32.mrf.mxu1  ;;  %7162 = vmatmul.mubr.msk.f32.gmra.mxu1 %vm1513_vm2, %v8391_v38 }
 0x28b   : > { %10079 = vst [vmem:[#allocation127_spill] sm:$0xff] %v9042_v22  ;;  %7164 = vmatprep.mubr.msk.f32.mxu1 %vm1513_vm2, %v8401_v43  ;;  %v9068_v43 = vpop.f32.mrf.mxu0 }
 0x28c   : > { %v9050_v14 = vpop.f32.mrf.mxu1 }
 0x28d   : > { %10080 = vst [vmem:[#allocation128_spill] sm:$0xff] %v9050_v14 }
 0x28e   : > { %v9052_v30 = vpop.f32.mrf.mxu1  ;;  %7165 = vmatmul.mubr.msk.f32.gmra.mxu1 %vm1513_vm2, %v8407_v46 }
 0x28f   : > { %10081 = vst [vmem:[#allocation129_spill] sm:$0xff] %v9052_v30  ;;  %7167 = vmatprep.mubr.msk.f32.mxu1 %vm1513_vm2, %v8417_v51  ;;  %v9078_v51 = vpop.f32.mrf.mxu0 }
 0x290   : > { %v9060_v22 = vpop.f32.mrf.mxu1 }
 0x291   : > { %10082 = vst [vmem:[#allocation130_spill] sm:$0xff] %v9060_v22 }
 0x292   : > { %v9062_v38 = vpop.f32.mrf.mxu1  ;;  %7168 = vmatmul.mubr.msk.f32.gmra.mxu1 %vm1513_vm2, %v8423_v6 }
 0x293   : > { %10083 = vst [vmem:[#allocation131_spill] sm:$0xff] %v9062_v38  ;;  %7170 = vmatprep.mubr.msk.f32.mxu1 %vm1513_vm2, %v8433_v62 }
 0x294   : > { %v9070_v30 = vpop.f32.mrf.mxu1 }
 0x295   : > { %10084 = vst [vmem:[#allocation132_spill] sm:$0xff] %v9070_v30 }
 0x296   : > { %v9072_v46 = vpop.f32.mrf.mxu1  ;;  %7171 = vmatmul.mubr.msk.f32.gmra.mxu1 %vm1513_vm2, %v8439_v1  ;;  %v9092_v1 = vld [vmem:[%s9953_s4] ss:$0 sm:$0xff] }
 0x297   : > { %10085 = vst [vmem:[#allocation133_spill] sm:$0xff] %v9072_v46  ;;  %7173 = vmatprep.mubr.msk.f32.mxu1 %vm1513_vm2, %v8449_v8  ;;  %v9087_v46 = vpop.f32.mrf.mxu0 }
 0x298   : > { %v9080_v38 = vpop.f32.mrf.mxu1 }
 0x299   : > { %10086 = vst [vmem:[#allocation134_spill] sm:$0xff] %v9080_v38 }
 0x29a   : > { %v7031_v6 = vpop.f32.mrf.mxu1  ;;  %7174 = vmatmul.mubr.msk.f32.gmra.mxu1 %vm1513_vm2, %v8455_v13 }
 0x29b   : > { %v2825_v62 = vadd.f32 %v7031_v6, %v8489_v37  ;;  %7176 = vmatprep.mubr.msk.f32.mxu1 %vm1513_vm2, %v8465_v20  ;;  %v9103_v6 = vpop.f32.mrf.mxu0 }
 0x29c   : > { %v2819_v8 = vpop.f32.mrf.mxu1 }
 0x29d   : > { %v4465_v30 = vadd.f32 %v8604_v36, %v2825_v62  ;;  %v2820_v38 = vadd.f32 %v2819_v8, %v8499_v42 }
 0x29e   : > { %v7034_v22 = vpop.f32.mrf.mxu1  ;;  %7177 = vmatmul.mubr.msk.f32.gmra.mxu1 %vm1513_vm2, %v8471_v24 }
 0x29f   : > { %v4584_v13 = vadd.f32 %v9092_v1, %v4465_v30  ;;  %v4464_v20 = vadd.f32 %v8612_v53, %v2820_v38  ;;  %v2835_v37 = vadd.f32 %v7034_v22, %v8509_v50  ;;  %7179 = vmatprep.mubr.msk.f32.mxu1 %vm1513_vm2, %v8481_v31  ;;  %v9116_v30 = vpop.f32.mrf.mxu0 }
 0x2a0   : > { %v2829_v14 = vpop.f32.mrf.mxu1 }
 0x2a1   : > { %v4696_v36 = vmax.f32 %v4584_v13, 0.0  ;;  %v4583_v42 = vadd.f32 %v9092_v1, %v4464_v20  ;;  %v4467_v62 = vadd.f32 %v8619_v59, %v2835_v37  ;;  %v2830_v24 = vadd.f32 %v2829_v14, %v8519_v56  ;;  %v9130_v37 = vpop.f32.mrf.mxu0 }
 0x2a2   : > { %v7037_v8 = vpop.f32.mrf.mxu1  ;;  %7180 = vmatmul.mubr.msk.f32.gmra.mxu1 %vm1513_vm2, %v8487_v34 }
 0x2a3   : > { %4809 = vst.msk [vmem:[#allocation3 + $0x8] sm:$0xff] %vm4807_vm4, %v4696_v36  ;;  %v4695_v50 = vmax.f32 %v4583_v42, 0.0  ;;  %v4586_v31 = vadd.f32 %v9092_v1, %v4467_v62  ;;  %v4466_v53 = vadd.f32 %v8628_v9, %v2830_v24  ;;  %v2845_v22 = vadd.f32 %v7037_v8, %v8529_v4  ;;  %7182 = vmatprep.mubr.msk.f32.mxu1 %vm1513_vm2, %v8501_v44  ;;  %v9144_v8 = vpop.f32.mrf.mxu0 }
 0x2a4   : > { %v2839_v59 = vpop.f32.mrf.mxu1 }
 0x2a5   : > { %4808 = vst.msk [vmem:[#allocation3] sm:$0xff] %vm4807_vm4, %v4695_v50  ;;  %v4698_v56 = vmax.f32 %v4586_v31, 0.0  ;;  %v4585_v34 = vadd.f32 %v9092_v1, %v4466_v53  ;;  %v4469_v14 = vadd.f32 %v8633_v26, %v2845_v22  ;;  %v2840_v38 = vadd.f32 %v2839_v59, %v8539_v12  ;;  %v9157_v22 = vpop.f32.mrf.mxu0 }
 0x2a6   : > { %v7040_v13 = vpop.f32.mrf.mxu1  ;;  %7183 = vmatmul.mubr.msk.f32.gmra.mxu1 %vm1513_vm2, %v8507_v48 }
 0x2a7   : > { %4811 = vst.msk [vmem:[#allocation3 + $0x18] sm:$0xff] %vm4807_vm4, %v4698_v56  ;;  %v4697_v4 = vmax.f32 %v4585_v34, 0.0  ;;  %v4588_v44 = vadd.f32 %v9092_v1, %v4469_v14  ;;  %v4468_v9 = vadd.f32 %v8643_v3, %v2840_v38  ;;  %v2855_v20 = vadd.f32 %v7040_v13, %v8549_v23  ;;  %7185 = vmatprep.mubr.msk.f32.mxu1 %vm1513_vm2, %v8521_v58  ;;  %v10087_v13 = vld [vmem:[#allocation5_spill] sm:$0xff] }
 0x2a8   : > { %v2849_v26 = vpop.f32.mrf.mxu1 }
 0x2a9   : > { %4810 = vst.msk [vmem:[#allocation3 + $0x10] sm:$0xff] %vm4807_vm4, %v4697_v4  ;;  %v4700_v12 = vmax.f32 %v4588_v44, 0.0  ;;  %v4587_v48 = vadd.f32 %v9092_v1, %v4468_v9  ;;  %v4471_v36 = vadd.f32 %v8651_v60, %v2855_v20  ;;  %v2850_v42 = vadd.f32 %v2849_v26, %v8559_v29  ;;  %v10089_v44 = vld [vmem:[#allocation6_spill] sm:$0xff] }
 0x2aa   : > { %v7043_v62 = vpop.f32.mrf.mxu1  ;;  %7186 = vmatmul.mubr.msk.f32.gmra.mxu1 %vm1513_vm2, %v8527_v0 }
 0x2ab   : > { %4813 = vst.msk [vmem:[#allocation3 + $0x28] sm:$0xff] %vm4807_vm4, %v4700_v12  ;;  %v4699_v23 = vmax.f32 %v4587_v48, 0.0  ;;  %v4590_v58 = vadd.f32 %v9092_v1, %v4471_v36  ;;  %v4470_v3 = vadd.f32 %v8658_v55, %v2850_v42  ;;  %v2865_v24 = vadd.f32 %v7043_v62, %v8569_v41  ;;  %7188 = vmatprep.mubr.msk.f32.mxu1 %vm1513_vm2, %v8541_v15  ;;  %v10090_v12 = vld [vmem:[#allocation22_spill] sm:$0xff]  ;;  %v1746_v36 = vld [vmem:[#allocation2 + $0x378] sm:$0xf] }
 0x2ac   : > { %v2859_v60 = vpop.f32.mrf.mxu1  ;;  %v4921_v56 = vld [vmem:[#allocation3] sm:$0xff] }
 0x2ad   : > { %4812 = vst.msk [vmem:[#allocation3 + $0x20] sm:$0xff] %vm4807_vm4, %v4699_v23  ;;  %v4702_v29 = vmax.f32 %v4590_v58, 0.0  ;;  %v4589_v0 = vadd.f32 %v9092_v1, %v4470_v3  ;;  %v4473_v50 = vadd.f32 %v8669_v21, %v2865_v24  ;;  %v2860_v31 = vadd.f32 %v2859_v60, %v8579_v52  ;;  %v5029_v34 = vld [vmem:[#allocation3 + $0x1] sm:$0xff] }
 0x2ae   : > { %v7046_v53 = vpop.f32.mrf.mxu1  ;;  %7189 = vmatmul.mubr.msk.f32.gmra.mxu1 %vm1513_vm2, %v8547_v18  ;;  %v5137_v42 = vmax.f32 %v4921_v56, %v5029_v34  ;;  %v10091_v60 = vld [vmem:[#allocation25_spill] sm:$0xff] }
 0x2af   : > { %4815 = vst.msk [vmem:[#allocation3 + $0x38] sm:$0xff] %vm4807_vm4, %v4702_v29  ;;  %v4701_v41 = vmax.f32 %v4589_v0, 0.0  ;;  %v4592_v15 = vadd.f32 %v9092_v1, %v4473_v50  ;;  %v2875_v55 = vadd.f32 %v7046_v53, %v8587_v5  ;;  %7191 = vmatprep.mubr.msk.f32.mxu1 %vm1513_vm2, %v8561_v32  ;;  %v4472_v21 = vadd.f32 %v8684_v63, %v2860_v31  ;;  %v10088_v63 = vld [vmem:[#allocation7_spill] sm:$0xff]  ;;  %v10092_v50 = vld [vmem:[#allocation8_spill] sm:$0xff] }
 0x2b0   : > { %v2869_v59 = vpop.f32.mrf.mxu1  ;;  %v4923_v62 = vld [vmem:[#allocation3 + $0x10] sm:$0xff] }
 0x2b1   : > { %4814 = vst.msk [vmem:[#allocation3 + $0x30] sm:$0xff] %vm4807_vm4, %v4701_v41  ;;  %v4704_v52 = vmax.f32 %v4592_v15, 0.0  ;;  %v4475_v18 = vadd.f32 %v8695_v49, %v2875_v55  ;;  %v4591_v14 = vadd.f32 %v9092_v1, %v4472_v21  ;;  %v2870_v38 = vadd.f32 %v2869_v59, %v8596_v17  ;;  %v9171_v49 = vpop.f32.mrf.mxu0  ;;  %v5030_v23 = vld [vmem:[#allocation3 + $0x9] sm:$0xff]  ;;  %v5031_v58 = vld [vmem:[#allocation3 + $0x11] sm:$0xff] }
 0x2b2   : > { %v7049_v5 = vpop.f32.mrf.mxu1  ;;  %7192 = vmatmul.mubr.msk.f32.gmra.mxu1 %vm1513_vm2, %v10087_v13  ;;  %v3488_v41 = vld [vmem:[#allocation2 + $0x3b0] sm:$0xff]  ;;  %v4922_v15 = vld [vmem:[#allocation3 + $0x8] sm:$0xff] }
 0x2b3   : > { %4817 = vst.msk [vmem:[#allocation3 + $0x48] sm:$0xff] %vm4807_vm4, %v4704_v52  ;;  %v4594_v32 = vadd.f32 %v9092_v1, %v4475_v18  ;;  %v2885_v4 = vadd.f32 %v7049_v5, %v10088_v63  ;;  %7194 = vmatprep.mubr.msk.f32.mxu1 %vm1513_vm2, %v10089_v44  ;;  %v4703_v26 = vmax.f32 %v4591_v14, 0.0  ;;  %v4474_v17 = vadd.f32 %v10090_v12, %v2870_v38  ;;  %v4926_v55 = vld [vmem:[#allocation3 + $0x28] sm:$0xff]  ;;  %v10093_v52 = vld [vmem:[#allocation9_spill] sm:$0xff]  ;;  %v9183_v56 = vpop.f32.mrf.mxu0  ;;  %v10094_v63 = vld [vmem:[#allocation28_spill] sm:$0xff] }
 0x2b4   : > { %v4925_v9 = vld [vmem:[#allocation3 + $0x20] sm:$0xff]  ;;  %v2879_v48 = vpop.f32.mrf.mxu1  ;;  %v5138_v34 = vmax.f32 %v4922_v15, %v5030_v23  ;;  %v5139_v14 = vmax.f32 %v4923_v62, %v5031_v58  ;;  %v10095_v12 = vld [vmem:[#allocation31_spill] sm:$0xff]  ;;  %v10098_v15 = vld [vmem:[#allocation34_spill] sm:$0xff] }
 0x2b5   : > { %v5033_v20 = vld [vmem:[#allocation3 + $0x21] sm:$0xff]  ;;  %v4706_v24 = vmax.f32 %v4594_v32, 0.0  ;;  %v4477_v29 = vadd.f32 %v10091_v60, %v2885_v4  ;;  %4816 = vst.msk [vmem:[#allocation3 + $0x40] sm:$0xff] %vm4807_vm4, %v4703_v26  ;;  %v4593_v0 = vadd.f32 %v9092_v1, %v4474_v17  ;;  %v2880_v31 = vadd.f32 %v2879_v48, %v10092_v50  ;;  %v3489_v48 = vld [vmem:[#allocation2 + $0x3b8] sm:$0xf]  ;;  %v9195_v50 = vpop.f32.mrf.mxu0 }
 0x2b6   : > { %v5141_v3 = vmax.f32 %v4925_v9, %v5033_v20  ;;  %v7052_v53 = vpop.f32.mrf.mxu1  ;;  %7195 = vmatmul.mubr.msk.f32.gmra.mxu1 %vm1513_vm2, %v1746_v36  ;;  %v5032_v58 = vld [vmem:[#allocation3 + $0x19] sm:$0xff] }
 0x2b7   : > { %4819 = vst.msk [vmem:[#allocation3 + $0x58] sm:$0xff] %vm4807_vm4, %v4706_v24  ;;  %v4596_v59 = vadd.f32 %v9092_v1, %v4477_v29  ;;  %v2895_v18 = vadd.f32 %v7052_v53, %v10093_v52  ;;  %7386 = vmatprep.mubr.msk.f32.mxu1 %vm1513_vm2, %v3488_v41  ;;  %v4705_v32 = vmax.f32 %v4593_v0, 0.0  ;;  %v4476_v4 = vadd.f32 %v10094_v63, %v2880_v31  ;;  %v10097_v29 = vld [vmem:[#allocation11_spill] sm:$0xff]  ;;  %v4924_v31 = vld [vmem:[#allocation3 + $0x18] sm:$0xff] }
 0x2b8   : > { %v5260_v21 = vmax.f32 %v5137_v42, %v5141_v3  ;;  %v4927_v38 = vld [vmem:[#allocation3 + $0x30] sm:$0xff]  ;;  %v2889_v44 = vpop.f32.mrf.mxu1  ;;  %v10096_v42 = vld [vmem:[#allocation10_spill] sm:$0xff]  ;;  %v4928_v53 = vld [vmem:[#allocation3 + $0x38] sm:$0xff] }
 0x2b9   : > { %v5034_v5 = vld [vmem:[#allocation3 + $0x29] sm:$0xff]  ;;  %v5035_v13 = vld [vmem:[#allocation3 + $0x31] sm:$0xff]  ;;  %v4708_v26 = vmax.f32 %v4596_v59, 0.0  ;;  %v4479_v17 = vadd.f32 %v10095_v12, %v2895_v18  ;;  %4818 = vst.msk [vmem:[#allocation3 + $0x50] sm:$0xff] %vm4807_vm4, %v4705_v32  ;;  %v4595_v36 = vadd.f32 %v9092_v1, %v4476_v4  ;;  %v2890_v62 = vadd.f32 %v2889_v44, %v10096_v42 }
 0x2ba   : > { %5368 = vst.msk [vmem:[#allocation4] sm:$0xff] %vm4807_vm4, %v5260_v21  ;;  %v5142_v9 = vmax.f32 %v4926_v55, %v5034_v5  ;;  %v5143_v20 = vmax.f32 %v4927_v38, %v5035_v13  ;;  %v7055_v23 = vpop.f32.mrf.mxu1  ;;  %7387 = vmatmul.mubr.msk.f32.vlgmr.msra.gmra.mxu1 %vm1513_vm2, %v3489_v48  ;;  %v10100_v5 = vld [vmem:[#allocation12_spill] sm:$0xff]  ;;  %v5140_v32 = vmax.f32 %v4924_v31, %v5032_v58  ;;  %v9217_v42 = vld [vmem:[#allocation3 + $0x48] sm:$0xff]  ;;  %v10103_v31 = vld [vmem:[#allocation43_spill] sm:$0xff] }
 0x2bb   : > { %4821 = vst.msk [vmem:[#allocation3 + $0x68] sm:$0xff] %vm4807_vm4, %v4708_v26  ;;  %v4598_v60 = vadd.f32 %v9092_v1, %v4479_v17  ;;  %v2905_v0 = vadd.f32 %v7055_v23, %v10097_v29  ;;  %v4707_v41 = vmax.f32 %v4595_v36, 0.0  ;;  %v4478_v55 = vadd.f32 %v10098_v15, %v2890_v62  ;;  %v10101_v26 = vld [vmem:[#allocation40_spill] sm:$0xff]  ;;  %v10102_v17 = vld [vmem:[#allocation13_spill] sm:$0xff]  ;;  %v9215_v36 = vpop.f32.mrf.mxu0 }
 0x2bc   : > { %v5261_v3 = vmax.f32 %v5138_v34, %v5142_v9  ;;  %v5262_v24 = vmax.f32 %v5139_v14, %v5143_v20  ;;  %v2899_v21 = vpop.f32.mrf.mxu1  ;;  %v9200_v59 = vld [vmem:[#allocation3 + $0x40] sm:$0xff] }
 0x2bd   : > { %v5036_v52 = vld [vmem:[#allocation3 + $0x39] sm:$0xff]  ;;  %v9202_v18 = vld [vmem:[#allocation3 + $0x41] sm:$0xff]  ;;  %v4710_v34 = vmax.f32 %v4598_v60, 0.0  ;;  %v2900_v13 = vadd.f32 %v2899_v21, %v10100_v5  ;;  %4820 = vst.msk [vmem:[#allocation3 + $0x60] sm:$0xff] %vm4807_vm4, %v4707_v41  ;;  %v4597_v44 = vadd.f32 %v9092_v1, %v4478_v55 }
 0x2be   : > { %5369 = vst.msk [vmem:[#allocation4 + $0x8] sm:$0xff] %vm4807_vm4, %v5261_v3  ;;  %5370 = vst.msk [vmem:[#allocation4 + $0x10] sm:$0xff] %vm4807_vm4, %v5262_v24  ;;  %v10099_v14 = vld [vmem:[#allocation37_spill] sm:$0xff]  ;;  %v5144_v63 = vmax.f32 %v4928_v53, %v5036_v52  ;;  %v5145_v4 = vmax.f32 %v9200_v59, %v9202_v18  ;;  %v7058_v9 = vpop.f32.mrf.mxu1  ;;  %v10104_v41 = vld [vmem:[#allocation14_spill] sm:$0xff] }
 0x2bf   : > { %v4481_v38 = vadd.f32 %v10099_v14, %v2905_v0  ;;  %4823 = vst.msk [vmem:[#allocation3 + $0x78] sm:$0xff] %vm4807_vm4, %v4710_v34  ;;  %v4480_v12 = vadd.f32 %v10101_v26, %v2900_v13  ;;  %v2915_v48 = vadd.f32 %v7058_v9, %v10102_v17  ;;  %v4709_v23 = vmax.f32 %v4597_v44, 0.0  ;;  %v10105_v34 = vld [vmem:[#allocation46_spill] sm:$0xff]  ;;  %v9243_v13 = vpop.f32.mrf.mxu0 }
 0x2c0   : > { %v5263_v62 = vmax.f32 %v5140_v32, %v5144_v63  ;;  %v2909_v58 = vpop.f32.mrf.mxu1  ;;  %v9219_v3 = vld [vmem:[#allocation3 + $0x50] sm:$0xff]  ;;  %v9245_v63 = vld [vmem:[#allocation3 + $0x58] sm:$0xff] }
 0x2c1   : > { %v4600_v20 = vadd.f32 %v9092_v1, %v4481_v38  ;;  %v9221_v24 = vld [vmem:[#allocation3 + $0x49] sm:$0xff]  ;;  %v9223_v60 = vld [vmem:[#allocation3 + $0x51] sm:$0xff]  ;;  %v4599_v0 = vadd.f32 %v9092_v1, %v4480_v12  ;;  %v4483_v53 = vadd.f32 %v10103_v31, %v2915_v48  ;;  %v2910_v15 = vadd.f32 %v2909_v58, %v10104_v41  ;;  %4822 = vst.msk [vmem:[#allocation3 + $0x70] sm:$0xff] %vm4807_vm4, %v4709_v23  ;;  %v10107_v48 = vld [vmem:[#allocation49_spill] sm:$0xff] }
 0x2c2   : > { %5371 = vst.msk [vmem:[#allocation4 + $0x18] sm:$0xff] %vm4807_vm4, %v5263_v62  ;;  %v5146_v55 = vmax.f32 %v9217_v42, %v9221_v24  ;;  %v5147_v21 = vmax.f32 %v9219_v3, %v9223_v60  ;;  %v7061_v59 = vpop.f32.mrf.mxu1  ;;  %v10106_v38 = vld [vmem:[#allocation15_spill] sm:$0xff]  ;;  %v10108_v62 = vld [vmem:[#allocation16_spill] sm:$0xff] }
 0x2c3   : > { %v4712_v29 = vmax.f32 %v4600_v20, 0.0  ;;  %v4711_v52 = vmax.f32 %v4599_v0, 0.0  ;;  %v4602_v18 = vadd.f32 %v9092_v1, %v4483_v53  ;;  %v4482_v14 = vadd.f32 %v10105_v34, %v2910_v15  ;;  %v10109_v0 = vld [vmem:[#allocation52_spill] sm:$0xff]  ;;  %v10110_v53 = vld [vmem:[#allocation17_spill] sm:$0xff]  ;;  %v9258_v15 = vpop.f32.mrf.mxu0 }
 0x2c4   : > { %v2925_v5 = vadd.f32 %v7061_v59, %v10106_v38  ;;  %v2919_v44 = vpop.f32.mrf.mxu1  ;;  %v4933_v9 = vld [vmem:[#allocation3 + $0x60] sm:$0xff]  ;;  %v4934_v59 = vld [vmem:[#allocation3 + $0x68] sm:$0xff] }
 0x2c5   : > { %4825 = vst.msk [vmem:[#allocation3 + $0x88] sm:$0xff] %vm4807_vm4, %v4712_v29  ;;  %v5477_v32 = vld [vmem:[#allocation4] ss:$2 sm:$0xff]  ;;  %4824 = vst.msk [vmem:[#allocation3 + $0x80] sm:$0xff] %vm4807_vm4, %v4711_v52  ;;  %v4714_v12 = vmax.f32 %v4602_v18, 0.0  ;;  %v4601_v17 = vadd.f32 %v9092_v1, %v4482_v14  ;;  %v2920_v23 = vadd.f32 %v2919_v44, %v10108_v62 }
 0x2c6   : > { %5480 = vst.msk [vmem:[%s9231_s13] sm:$0xff] %vm4807_vm4, %v5477_v32  ;;  %v5040_v20 = vld [vmem:[#allocation3 + $0x59] sm:$0xff]  ;;  %v5041_v26 = vld [vmem:[#allocation3 + $0x61] sm:$0xff]  ;;  %v4485_v42 = vadd.f32 %v10107_v48, %v2925_v5  ;;  %v7064_v24 = vpop.f32.mrf.mxu1 }
 0x2c7   : > { %v5148_v58 = vmax.f32 %v9245_v63, %v5040_v20  ;;  %v5149_v3 = vmax.f32 %v4933_v9, %v5041_v26  ;;  %4827 = vst.msk [vmem:[#allocation3 + $0x98] sm:$0xff] %vm4807_vm4, %v4714_v12  ;;  %v4713_v60 = vmax.f32 %v4601_v17, 0.0  ;;  %v4484_v31 = vadd.f32 %v10109_v0, %v2920_v23  ;;  %v10111_v63 = vld [vmem:[#allocation55_spill] sm:$0xff]  ;;  %v10112_v9 = vld [vmem:[#allocation18_spill] sm:$0xff]  ;;  %v4936_v17 = vld [vmem:[#allocation3 + $0x78] sm:$0xff] }
 0x2c8   : > { %v4604_v29 = vadd.f32 %v9092_v1, %v4485_v42  ;;  %v2935_v41 = vadd.f32 %v7064_v24, %v10110_v53  ;;  %v2929_v18 = vpop.f32.mrf.mxu1  ;;  %v4935_v14 = vld [vmem:[#allocation3 + $0x70] sm:$0xff]  ;;  %v10113_v23 = vld [vmem:[#allocation58_spill] sm:$0xff]  ;;  %v9270_v24 = vpop.f32.mrf.mxu0 }
 0x2c9   : > { %v5268_v52 = vmax.f32 %v5145_v4, %v5149_v3  ;;  %v5479_v34 = vld [vmem:[#allocation4 + $0x10] ss:$2 sm:$0x3f]  ;;  %4826 = vst.msk [vmem:[#allocation3 + $0x90] sm:$0xff] %vm4807_vm4, %v4713_v60  ;;  %v4603_v32 = vadd.f32 %v9092_v1, %v4484_v31  ;;  %v2930_v20 = vadd.f32 %v2929_v18, %v10112_v9 }
 0x2ca   : > { %v5042_v38 = vld [vmem:[#allocation3 + $0x69] sm:$0xff]  ;;  %v4716_v5 = vmax.f32 %v4604_v29, 0.0  ;;  %v4487_v44 = vadd.f32 %v10111_v63, %v2935_v41  ;;  %5482 = vst.msk [vmem:[%s9231_s13 + $0x8] sm:$0x3f] %vm5481_vm5, %v5479_v34  ;;  %v5043_v26 = vld [vmem:[#allocation3 + $0x71] sm:$0xff]  ;;  %v7067_v4 = vpop.f32.mrf.mxu1 }
 0x2cb   : > { %5376 = vst.msk [vmem:[#allocation4 + $0x40] sm:$0xff] %vm4807_vm4, %v5268_v52  ;;  %v5150_v12 = vmax.f32 %v4934_v59, %v5042_v38  ;;  %v5151_v48 = vmax.f32 %v4935_v14, %v5043_v26  ;;  %v4715_v42 = vmax.f32 %v4603_v32, 0.0  ;;  %v4486_v3 = vadd.f32 %v10113_v23, %v2930_v20  ;;  %v10114_v53 = vld [vmem:[#allocation19_spill] sm:$0xff]  ;;  %v10116_v63 = vld [vmem:[#allocation20_spill] sm:$0xff] }
 0x2cc   : > { %4829 = vst.msk [vmem:[#allocation3 + $0xa8] sm:$0xff] %vm4807_vm4, %v4716_v5  ;;  %v4606_v62 = vadd.f32 %v9092_v1, %v4487_v44  ;;  %v4937_v29 = vld [vmem:[#allocation3 + $0x80] sm:$0xff]  ;;  %v2945_v41 = vadd.f32 %v7067_v4, %v10114_v53  ;;  %v2939_v52 = vpop.f32.mrf.mxu1  ;;  %v9279_v9 = vld [vmem:[#allocation3 + $0x88] sm:$0xff]  ;;  %v10118_v23 = vld [vmem:[#allocation64_spill] sm:$0xff] }
 0x2cd   : > { %v5269_v60 = vmax.f32 %v5146_v55, %v5150_v12  ;;  %v5044_v0 = vld [vmem:[#allocation3 + $0x79] sm:$0xff]  ;;  %v5045_v31 = vld [vmem:[#allocation3 + $0x81] sm:$0xff]  ;;  %v5270_v59 = vmax.f32 %v5147_v21, %v5151_v48  ;;  %4828 = vst.msk [vmem:[#allocation3 + $0xa0] sm:$0xff] %vm4807_vm4, %v4715_v42  ;;  %v4605_v38 = vadd.f32 %v9092_v1, %v4486_v3  ;;  %v2940_v55 = vadd.f32 %v2939_v52, %v10116_v63  ;;  %v9283_v12 = vpop.f32.mrf.mxu0  ;;  %v10120_v53 = vld [vmem:[#allocation23_spill] sm:$0xff] }
 0x2ce   : > { %v5152_v18 = vmax.f32 %v4936_v17, %v5044_v0  ;;  %v5153_v34 = vmax.f32 %v4937_v29, %v5045_v31  ;;  %v4718_v14 = vmax.f32 %v4606_v62, 0.0  ;;  %v10115_v5 = vld [vmem:[#allocation61_spill] sm:$0xff]  ;;  %v7070_v44 = vpop.f32.mrf.mxu1  ;;  %v10119_v0 = vld [vmem:[#allocation67_spill] sm:$0xff] }
 0x2cf   : > { %5377 = vst.msk [vmem:[#allocation4 + $0x48] sm:$0xff] %vm4807_vm4, %v5269_v60  ;;  %v4489_v32 = vadd.f32 %v10115_v5, %v2945_v41  ;;  %5378 = vst.msk [vmem:[#allocation4 + $0x50] sm:$0xff] %vm4807_vm4, %v5270_v59  ;;  %v10117_v21 = vld [vmem:[#allocation21_spill] sm:$0xff]  ;;  %v4717_v42 = vmax.f32 %v4605_v38, 0.0  ;;  %v4488_v3 = vadd.f32 %v10118_v23, %v2940_v55  ;;  %v10121_v5 = vld [vmem:[#allocation70_spill] sm:$0xff]  ;;  %v9306_v63 = vpop.f32.mrf.mxu0 }
 0x2d0   : > { %v5271_v20 = vmax.f32 %v5148_v58, %v5152_v18  ;;  %4831 = vst.msk [vmem:[#allocation3 + $0xb8] sm:$0xff] %vm4807_vm4, %v4718_v14  ;;  %v2955_v26 = vadd.f32 %v7070_v44, %v10117_v21  ;;  %v9285_v4 = vld [vmem:[#allocation3 + $0x90] sm:$0xff]  ;;  %v2949_v60 = vpop.f32.mrf.mxu1  ;;  %v9302_v14 = vld [vmem:[#allocation3 + $0x98] sm:$0xff] }
 0x2d1   : > { %v9287_v17 = vld [vmem:[#allocation3 + $0x89] sm:$0xff]  ;;  %v9289_v48 = vld [vmem:[#allocation3 + $0x91] sm:$0xff]  ;;  %v4608_v62 = vadd.f32 %v9092_v1, %v4489_v32  ;;  %v2950_v41 = vadd.f32 %v2949_v60, %v10120_v53  ;;  %4830 = vst.msk [vmem:[#allocation3 + $0xb0] sm:$0xff] %vm4807_vm4, %v4717_v42  ;;  %v4607_v59 = vadd.f32 %v9092_v1, %v4488_v3  ;;  %v10123_v3 = vld [vmem:[#allocation73_spill] sm:$0xff] }
 0x2d2   : > { %5379 = vst.msk [vmem:[#allocation4 + $0x58] sm:$0xff] %vm4807_vm4, %v5271_v20  ;;  %v5154_v58 = vmax.f32 %v9279_v9, %v9287_v17  ;;  %v5155_v29 = vmax.f32 %v9285_v4, %v9289_v48  ;;  %v4491_v31 = vadd.f32 %v10119_v0, %v2955_v26  ;;  %v7073_v18 = vpop.f32.mrf.mxu1  ;;  %v10122_v21 = vld [vmem:[#allocation24_spill] sm:$0xff]  ;;  %v10124_v0 = vld [vmem:[#allocation26_spill] sm:$0xff] }
 0x2d3   : > { %v4720_v52 = vmax.f32 %v4608_v62, 0.0  ;;  %v4490_v32 = vadd.f32 %v10121_v5, %v2950_v41  ;;  %v4719_v20 = vmax.f32 %v4607_v59, 0.0  ;;  %v2965_v26 = vadd.f32 %v7073_v18, %v10122_v21  ;;  %v10125_v59 = vld [vmem:[#allocation27_spill] sm:$0xff]  ;;  %v4942_v5 = vld [vmem:[#allocation3 + $0xa8] sm:$0xff] }
 0x2d4   : > { %v4610_v38 = vadd.f32 %v9092_v1, %v4491_v31  ;;  %v4941_v55 = vld [vmem:[#allocation3 + $0xa0] sm:$0xff]  ;;  %v2959_v4 = vpop.f32.mrf.mxu1 }
 0x2d5   : > { %v9308_v44 = vld [vmem:[#allocation3 + $0x99] sm:$0xff]  ;;  %v5049_v9 = vld [vmem:[#allocation3 + $0xa1] sm:$0xff]  ;;  %4833 = vst.msk [vmem:[#allocation3 + $0xc8] sm:$0xff] %vm4807_vm4, %v4720_v52  ;;  %v4609_v23 = vadd.f32 %v9092_v1, %v4490_v32  ;;  %4832 = vst.msk [vmem:[#allocation3 + $0xc0] sm:$0xff] %vm4807_vm4, %v4719_v20  ;;  %v4493_v60 = vadd.f32 %v10123_v3, %v2965_v26  ;;  %v2960_v31 = vadd.f32 %v2959_v4, %v10124_v0 }
 0x2d6   : > { %v5484_v17 = vld [vmem:[#allocation4 + $0x40] ss:$2 sm:$0xff]  ;;  %v5156_v48 = vmax.f32 %v9302_v14, %v9308_v44  ;;  %v5157_v42 = vmax.f32 %v4941_v55, %v5049_v9  ;;  %v4722_v62 = vmax.f32 %v4610_v38, 0.0  ;;  %v7076_v53 = vpop.f32.mrf.mxu1  ;;  %v9322_v14 = vpop.f32.mrf.mxu0  ;;  %v10126_v55 = vld [vmem:[#allocation76_spill] sm:$0xff]  ;;  %v10127_v26 = vld [vmem:[#allocation79_spill] sm:$0xff] }
 0x2d7   : > { %5487 = vst.msk [vmem:[%s9231_s13 + $0xe] sm:$0xff] %vm4807_vm4, %v5484_v17  ;;  %v4721_v52 = vmax.f32 %v4609_v23, 0.0  ;;  %v2975_v18 = vadd.f32 %v7076_v53, %v10125_v59  ;;  %v4612_v32 = vadd.f32 %v9092_v1, %v4493_v60  ;;  %v4492_v44 = vadd.f32 %v10126_v55, %v2960_v31  ;;  %v10128_v17 = vld [vmem:[#allocation29_spill] sm:$0xff]  ;;  %v10129_v53 = vld [vmem:[#allocation82_spill] sm:$0xff]  ;;  %v4944_v10 = vld [vmem:[#allocation3 + $0xb8] sm:$0xff] }
 0x2d8   : > { %v5276_v41 = vmax.f32 %v5153_v34, %v5157_v42  ;;  %4835 = vst.msk [vmem:[#allocation3 + $0xd8] sm:$0xff] %vm4807_vm4, %v4722_v62  ;;  %v2969_v9 = vpop.f32.mrf.mxu1  ;;  %v4943_v20 = vld [vmem:[#allocation3 + $0xb0] sm:$0xff]  ;;  %v9336_v55 = vpop.f32.mrf.mxu0 }
 0x2d9   : > { %v5486_v38 = vld [vmem:[#allocation4 + $0x50] ss:$2 sm:$0x3f]  ;;  %4834 = vst.msk [vmem:[#allocation3 + $0xd0] sm:$0xff] %vm4807_vm4, %v4721_v52  ;;  %v4495_v4 = vadd.f32 %v10127_v26, %v2975_v18  ;;  %v2970_v42 = vadd.f32 %v2969_v9, %v10128_v17  ;;  %v4724_v3 = vmax.f32 %v4612_v32, 0.0  ;;  %v4611_v60 = vadd.f32 %v9092_v1, %v4492_v44 }
 0x2da   : > { %5488 = vst.msk [vmem:[%s9231_s13 + $0x16] sm:$0x3f] %vm5481_vm5, %v5486_v38  ;;  %v5050_v34 = vld [vmem:[#allocation3 + $0xa9] sm:$0xff]  ;;  %v5051_v21 = vld [vmem:[#allocation3 + $0xb1] sm:$0xff]  ;;  %v7079_v0 = vpop.f32.mrf.mxu1 }
 0x2db   : > { %5384 = vst.msk [vmem:[#allocation4 + $0x80] sm:$0xff] %vm4807_vm4, %v5276_v41  ;;  %v5158_v62 = vmax.f32 %v4942_v5, %v5050_v34  ;;  %v5159_v23 = vmax.f32 %v4943_v20, %v5051_v21  ;;  %v4614_v31 = vadd.f32 %v9092_v1, %v4495_v4  ;;  %v4494_v59 = vadd.f32 %v10129_v53, %v2970_v42  ;;  %v10130_v41 = vld [vmem:[#allocation30_spill] sm:$0xff]  ;;  %v10131_v21 = vld [vmem:[#allocation85_spill] sm:$0xff]  ;;  %v10132_v4 = vld [vmem:[#allocation32_spill] sm:$0xff] }
 0x2dc   : > { %v2985_v38 = vadd.f32 %v7079_v0, %v10130_v41  ;;  %4837 = vst.msk [vmem:[#allocation3 + $0xe8] sm:$0xff] %vm4807_vm4, %v4724_v3  ;;  %v4723_v18 = vmax.f32 %v4611_v60, 0.0  ;;  %v2979_v5 = vpop.f32.mrf.mxu1  ;;  %v9339_v9 = vld [vmem:[#allocation3 + $0xc0] sm:$0xff]  ;;  %v10133_v60 = vld [vmem:[#allocation88_spill] sm:$0xff] }
 0x2dd   : > { %v5277_v52 = vmax.f32 %v5154_v58, %v5158_v62  ;;  %v5278_v61 = vmax.f32 %v5155_v29, %v5159_v23  ;;  %v5052_v32 = vld [vmem:[#allocation3 + $0xb9] sm:$0xff]  ;;  %v9341_v44 = vld [vmem:[#allocation3 + $0xc1] sm:$0xff]  ;;  %v4726_v20 = vmax.f32 %v4614_v31, 0.0  ;;  %v4613_v34 = vadd.f32 %v9092_v1, %v4494_v59  ;;  %v9357_v59 = vpop.f32.mrf.mxu0 }
 0x2de   : > { %v4497_v26 = vadd.f32 %v10131_v21, %v2985_v38  ;;  %v2980_v17 = vadd.f32 %v2979_v5, %v10132_v4  ;;  %v5160_v58 = vmax.f32 %v4944_v10, %v5052_v32  ;;  %v5161_v29 = vmax.f32 %v9339_v9, %v9341_v44  ;;  %4836 = vst.msk [vmem:[#allocation3 + $0xe0] sm:$0xff] %vm4807_vm4, %v4723_v18  ;;  %v7082_v42 = vpop.f32.mrf.mxu1  ;;  %v9351_v62 = vld [vmem:[#allocation3 + $0xc8] sm:$0xff]  ;;  %v10134_v31 = vld [vmem:[#allocation33_spill] sm:$0xff]  ;;  %v10135_v44 = vld [vmem:[#allocation91_spill] sm:$0xff] }
 0x2df   : > { %5385 = vst.msk [vmem:[#allocation4 + $0x88] sm:$0xff] %vm4807_vm4, %v5277_v52  ;;  %5386 = vst.msk [vmem:[#allocation4 + $0x90] sm:$0xff] %vm4807_vm4, %v5278_v61  ;;  %v4725_v23 = vmax.f32 %v4613_v34, 0.0  ;;  %v2995_v53 = vadd.f32 %v7082_v42, %v10134_v31  ;;  %v10136_v34 = vld [vmem:[#allocation35_spill] sm:$0xff]  ;;  %v10137_v4 = vld [vmem:[#allocation36_spill] sm:$0xff] }
 0x2e0   : > { %4839 = vst.msk [vmem:[#allocation3 + $0xf8] sm:$0xff] %vm4807_vm4, %v4726_v20  ;;  %v4616_v3 = vadd.f32 %v9092_v1, %v4497_v26  ;;  %v4496_v0 = vadd.f32 %v10133_v60, %v2980_v17  ;;  %v5279_v61 = vmax.f32 %v5156_v48, %v5160_v58  ;;  %v4947_v10 = vld [vmem:[#allocation3 + $0xd0] sm:$0xff]  ;;  %v2989_v52 = vpop.f32.mrf.mxu1  ;;  %v9367_v58 = vpop.f32.mrf.mxu0  ;;  %v9369_v42 = vld [vmem:[#allocation3 + $0xd8] sm:$0xff] }
 0x2e1   : > { %v5054_v41 = vld [vmem:[#allocation3 + $0xc9] sm:$0xff]  ;;  %v5055_v38 = vld [vmem:[#allocation3 + $0xd1] sm:$0xff]  ;;  %4838 = vst.msk [vmem:[#allocation3 + $0xf0] sm:$0xff] %vm4807_vm4, %v4725_v23  ;;  %v4499_v20 = vadd.f32 %v10135_v44, %v2995_v53  ;;  %v2990_v21 = vadd.f32 %v2989_v52, %v10136_v34 }
 0x2e2   : > { %v5162_v18 = vmax.f32 %v9351_v62, %v5054_v41  ;;  %v5163_v5 = vmax.f32 %v4947_v10, %v5055_v38  ;;  %v4728_v9 = vmax.f32 %v4616_v3, 0.0  ;;  %v4615_v32 = vadd.f32 %v9092_v1, %v4496_v0  ;;  %5387 = vst.msk [vmem:[#allocation4 + $0x98] sm:$0xff] %vm4807_vm4, %v5279_v61  ;;  %v7085_v48 = vpop.f32.mrf.mxu1  ;;  %v10138_v23 = vld [vmem:[#allocation94_spill] sm:$0xff]  ;;  %v10139_v61 = vld [vmem:[#allocation97_spill] sm:$0xff] }
 0x2e3   : > { %v3005_v17 = vadd.f32 %v7085_v48, %v10137_v4  ;;  %v4618_v62 = vadd.f32 %v9092_v1, %v4499_v20  ;;  %v4498_v3 = vadd.f32 %v10138_v23, %v2990_v21  ;;  %v10140_v41 = vld [vmem:[#allocation38_spill] sm:$0xff]  ;;  %v10141_v4 = vld [vmem:[#allocation100_spill] sm:$0xff]  ;;  %v10142_v23 = vld [vmem:[#allocation39_spill] sm:$0xff] }
 0x2e4   : > { %4841 = vst.msk [vmem:[#allocation3 + $0x108] sm:$0xff] %vm4807_vm4, %v4728_v9  ;;  %v4727_v26 = vmax.f32 %v4615_v32, 0.0  ;;  %v2999_v60 = vpop.f32.mrf.mxu1  ;;  %v4950_v34 = vld [vmem:[#allocation3 + $0xe8] sm:$0xff] }
 0x2e5   : > { %v4949_v31 = vld [vmem:[#allocation3 + $0xe0] sm:$0xff]  ;;  %v4501_v10 = vadd.f32 %v10139_v61, %v3005_v17  ;;  %v3000_v38 = vadd.f32 %v2999_v60, %v10140_v41  ;;  %v4730_v32 = vmax.f32 %v4618_v62, 0.0  ;;  %v4617_v44 = vadd.f32 %v9092_v1, %v4498_v3  ;;  %v9383_v61 = vpop.f32.mrf.mxu0 }
 0x2e6   : > { %v5490_v0 = vld [vmem:[#allocation4 + $0x80] ss:$2 sm:$0xff]  ;;  %4840 = vst.msk [vmem:[#allocation3 + $0x100] sm:$0xff] %vm4807_vm4, %v4727_v26  ;;  %v7088_v20 = vpop.f32.mrf.mxu1 }
 0x2e7   : > { %v5056_v53 = vld [vmem:[#allocation3 + $0xd9] sm:$0xff]  ;;  %5493 = vst.msk [vmem:[%s9231_s13 + $0x1c] sm:$0xff] %vm4807_vm4, %v5490_v0  ;;  %v5057_v52 = vld [vmem:[#allocation3 + $0xe1] sm:$0xff]  ;;  %v4620_v48 = vadd.f32 %v9092_v1, %v4501_v10  ;;  %v4500_v26 = vadd.f32 %v10141_v4, %v3000_v38  ;;  %v3015_v17 = vadd.f32 %v7088_v20, %v10142_v23  ;;  %4843 = vst.msk [vmem:[#allocation3 + $0x118] sm:$0xff] %vm4807_vm4, %v4730_v32 }
 0x2e8   : > { %v5164_v9 = vmax.f32 %v9369_v42, %v5056_v53  ;;  %v5165_v21 = vmax.f32 %v4949_v31, %v5057_v52  ;;  %v4951_v60 = vld [vmem:[#allocation3 + $0xf0] sm:$0xff]  ;;  %v4729_v42 = vmax.f32 %v4617_v44, 0.0  ;;  %v3009_v62 = vpop.f32.mrf.mxu1  ;;  %v10144_v4 = vld [vmem:[#allocation41_spill] sm:$0xff]  ;;  %v4952_v32 = vld [vmem:[#allocation3 + $0xf8] sm:$0xff] }
 0x2e9   : > { %v5058_v0 = vld [vmem:[#allocation3 + $0xe9] sm:$0xff]  ;;  %v5059_v41 = vld [vmem:[#allocation3 + $0xf1] sm:$0xff]  ;;  %v4732_v52 = vmax.f32 %v4620_v48, 0.0  ;;  %v4619_v10 = vadd.f32 %v9092_v1, %v4500_v26  ;;  %v3010_v23 = vadd.f32 %v3009_v62, %v10144_v4 }
 0x2ea   : > { %v5492_v3 = vld [vmem:[#allocation4 + $0x90] ss:$2 sm:$0x3f]  ;;  %v5284_v53 = vmax.f32 %v5161_v29, %v5165_v21  ;;  %v5166_v28 = vmax.f32 %v4950_v34, %v5058_v0  ;;  %v5167_v31 = vmax.f32 %v4951_v60, %v5059_v41  ;;  %4842 = vst.msk [vmem:[#allocation3 + $0x110] sm:$0xff] %vm4807_vm4, %v4729_v42  ;;  %v7091_v33 = vpop.f32.mrf.mxu1  ;;  %v10145_v29 = vld [vmem:[#allocation42_spill] sm:$0xff]  ;;  %v9395_v21 = vpop.f32.mrf.mxu0 }
 0x2eb   : > { %5494 = vst.msk [vmem:[%s9231_s13 + $0x24] sm:$0x3f] %vm5481_vm5, %v5492_v3  ;;  %v10143_v38 = vld [vmem:[#allocation103_spill] sm:$0xff]  ;;  %v3025_v34 = vadd.f32 %v7091_v33, %v10145_v29  ;;  %v10146_v41 = vld [vmem:[#allocation106_spill] sm:$0xff]  ;;  %v10148_v3 = vld [vmem:[#allocation44_spill] sm:$0xff] }
 0x2ec   : > { %v4503_v20 = vadd.f32 %v10143_v38, %v3015_v17  ;;  %5392 = vst.msk [vmem:[#allocation4 + $0xc0] sm:$0xff] %vm4807_vm4, %v5284_v53  ;;  %v5285_v44 = vmax.f32 %v5162_v18, %v5166_v28  ;;  %v5286_v39 = vmax.f32 %v5163_v5, %v5167_v31  ;;  %4845 = vst.msk [vmem:[#allocation3 + $0x128] sm:$0xff] %vm4807_vm4, %v4732_v52  ;;  %v4731_v17 = vmax.f32 %v4619_v10, 0.0  ;;  %v3019_v62 = vpop.f32.mrf.mxu1  ;;  %v10147_v18 = vld [vmem:[#allocation109_spill] sm:$0xff]  ;;  %v10149_v4 = vld [vmem:[#allocation112_spill] sm:$0xff] }
 0x2ed   : > { %v9397_v48 = vld [vmem:[#allocation3 + $0x100] sm:$0xff]  ;;  %v4502_v42 = vadd.f32 %v10146_v41, %v3010_v23  ;;  %v4505_v5 = vadd.f32 %v10147_v18, %v3025_v34  ;;  %v3020_v53 = vadd.f32 %v3019_v62, %v10148_v3  ;;  %v10151_v41 = vld [vmem:[#allocation47_spill] sm:$0xff] }
 0x2ee   : > { %v5060_v60 = vld [vmem:[#allocation3 + $0xf9] sm:$0xff]  ;;  %v9399_v26 = vld [vmem:[#allocation3 + $0x101] sm:$0xff]  ;;  %v4622_v0 = vadd.f32 %v9092_v1, %v4503_v20  ;;  %5393 = vst.msk [vmem:[#allocation4 + $0xc8] sm:$0xff] %vm4807_vm4, %v5285_v44  ;;  %5394 = vst.msk [vmem:[#allocation4 + $0xd0] sm:$0xff] %vm4807_vm4, %v5286_v39  ;;  %v7094_v10 = vpop.f32.mrf.mxu1  ;;  %v9413_v39 = vpop.f32.mrf.mxu0 }
 0x2ef   : > { %v5168_v28 = vmax.f32 %v4952_v32, %v5060_v60  ;;  %v5169_v33 = vmax.f32 %v9397_v48, %v9399_v26  ;;  %4844 = vst.msk [vmem:[#allocation3 + $0x120] sm:$0xff] %vm4807_vm4, %v4731_v17  ;;  %v4621_v52 = vadd.f32 %v9092_v1, %v4502_v42  ;;  %v4624_v20 = vadd.f32 %v9092_v1, %v4505_v5  ;;  %v9415_v32 = vld [vmem:[#allocation3 + $0x108] sm:$0xff]  ;;  %v10150_v29 = vld [vmem:[#allocation45_spill] sm:$0xff] }
 0x2f0   : > { %v4734_v31 = vmax.f32 %v4622_v0, 0.0  ;;  %v4504_v23 = vadd.f32 %v10149_v4, %v3020_v53  ;;  %v3035_v34 = vadd.f32 %v7094_v10, %v10150_v29  ;;  %v3029_v48 = vpop.f32.mrf.mxu1  ;;  %v9437_v10 = vpop.f32.mrf.mxu0 }
 0x2f1   : > { %v5287_v38 = vmax.f32 %v5164_v9, %v5168_v28  ;;  %v4733_v44 = vmax.f32 %v4621_v52, 0.0  ;;  %v9420_v60 = vld [vmem:[#allocation3 + $0x110] sm:$0xff]  ;;  %v4736_v17 = vmax.f32 %v4624_v20, 0.0  ;;  %v3030_v42 = vadd.f32 %v3029_v48, %v10151_v41  ;;  %v9439_v20 = vld [vmem:[#allocation3 + $0x118] sm:$0xff] }
 0x2f2   : > { %4847 = vst.msk [vmem:[#allocation3 + $0x138] sm:$0xff] %vm4807_vm4, %v4734_v31  ;;  %v9422_v26 = vld [vmem:[#allocation3 + $0x109] sm:$0xff]  ;;  %v9424_v9 = vld [vmem:[#allocation3 + $0x111] sm:$0xff]  ;;  %v4623_v0 = vadd.f32 %v9092_v1, %v4504_v23  ;;  %v4507_v18 = vadd.f32 %v8971_v7, %v3035_v34  ;;  %v7097_v5 = vpop.f32.mrf.mxu1 }
 0x2f3   : > { %5395 = vst.msk [vmem:[#allocation4 + $0xd8] sm:$0xff] %vm4807_vm4, %v5287_v38  ;;  %v5170_v62 = vmax.f32 %v9415_v32, %v9422_v26  ;;  %v5171_v28 = vmax.f32 %v9420_v60, %v9424_v9  ;;  %4846 = vst.msk [vmem:[#allocation3 + $0x130] sm:$0xff] %vm4807_vm4, %v4733_v44  ;;  %v4506_v53 = vadd.f32 %v8979_v40, %v3030_v42  ;;  %v10152_v31 = vld [vmem:[#allocation48_spill] sm:$0xff]  ;;  %v10153_v34 = vld [vmem:[#allocation50_spill] sm:$0xff] }
 0x2f4   : > { %4849 = vst.msk [vmem:[#allocation3 + $0x148] sm:$0xff] %vm4807_vm4, %v4736_v17  ;;  %v4735_v3 = vmax.f32 %v4623_v0, 0.0  ;;  %v3045_v52 = vadd.f32 %v7097_v5, %v10152_v31  ;;  %v4626_v4 = vadd.f32 %v9092_v1, %v4507_v18  ;;  %v3039_v23 = vpop.f32.mrf.mxu1  ;;  %v10154_v18 = vld [vmem:[#allocation51_spill] sm:$0xff]  ;;  %v4958_v31 = vld [vmem:[#allocation3 + $0x128] sm:$0xff] }
 0x2f5   : > { %v5496_v38 = vld [vmem:[#allocation4 + $0xc0] ss:$2 sm:$0xff]  ;;  %v4625_v29 = vadd.f32 %v9092_v1, %v4506_v53  ;;  %v3040_v48 = vadd.f32 %v3039_v23, %v10153_v34 }
 0x2f6   : > { %5499 = vst.msk [vmem:[%s9231_s13 + $0x2a] sm:$0xff] %vm4807_vm4, %v5496_v38  ;;  %v4957_v32 = vld [vmem:[#allocation3 + $0x120] sm:$0xff]  ;;  %4848 = vst.msk [vmem:[#allocation3 + $0x140] sm:$0xff] %vm4807_vm4, %v4735_v3  ;;  %v4509_v40 = vadd.f32 %v8988_v16, %v3045_v52  ;;  %v4738_v9 = vmax.f32 %v4626_v4, 0.0  ;;  %v7100_v17 = vpop.f32.mrf.mxu1  ;;  %v9452_v3 = vpop.f32.mrf.mxu0 }
 0x2f7   : > { %v5064_v7 = vld [vmem:[#allocation3 + $0x119] sm:$0xff]  ;;  %v5065_v44 = vld [vmem:[#allocation3 + $0x121] sm:$0xff]  ;;  %v4737_v0 = vmax.f32 %v4625_v29, 0.0  ;;  %v4508_v42 = vadd.f32 %v8998_v47, %v3040_v48  ;;  %v3055_v5 = vadd.f32 %v7100_v17, %v10154_v18 }
 0x2f8   : > { %v5172_v60 = vmax.f32 %v9439_v20, %v5064_v7  ;;  %v5173_v26 = vmax.f32 %v4957_v32, %v5065_v44  ;;  %v4628_v41 = vadd.f32 %v9092_v1, %v4509_v40  ;;  %4851 = vst.msk [vmem:[#allocation3 + $0x158] sm:$0xff] %vm4807_vm4, %v4738_v9  ;;  %v3049_v52 = vpop.f32.mrf.mxu1  ;;  %v9461_v47 = vld [vmem:[%s9953_s4] ss:$0 sm:$0xff]  ;;  %v10156_v17 = vld [vmem:[#allocation54_spill] sm:$0xff] }
 0x2f9   : > { %4850 = vst.msk [vmem:[#allocation3 + $0x150] sm:$0xff] %vm4807_vm4, %v4737_v0  ;;  %v4627_v23 = vadd.f32 %v9461_v47, %v4508_v42  ;;  %v10155_v32 = vld [vmem:[#allocation53_spill] sm:$0xff]  ;;  %v4960_v34 = vld [vmem:[#allocation3 + $0x138] sm:$0xff] }
 0x2fa   : > { %v5498_v53 = vld [vmem:[#allocation4 + $0xd0] ss:$2 sm:$0x3f]  ;;  %v5292_v16 = vmax.f32 %v5169_v33, %v5173_v26  ;;  %v4740_v1 = vmax.f32 %v4628_v41, 0.0  ;;  %v4511_v33 = vadd.f32 %v9008_v57, %v3055_v5  ;;  %v3050_v7 = vadd.f32 %v3049_v52, %v10155_v32  ;;  %v7103_v40 = vpop.f32.mrf.mxu1  ;;  %v9471_v41 = vpop.f32.mrf.mxu0  ;;  %v10158_v32 = vld [vmem:[#allocation57_spill] sm:$0xff] }
 0x2fb   : > { %5500 = vst.msk [vmem:[%s9231_s13 + $0x32] sm:$0x3f] %vm5481_vm5, %v5498_v53  ;;  %v4959_v38 = vld [vmem:[#allocation3 + $0x130] sm:$0xff]  ;;  %v4739_v48 = vmax.f32 %v4627_v23, 0.0  ;;  %v3065_v0 = vadd.f32 %v7103_v40, %v10156_v17 }
 0x2fc   : > { %v5066_v20 = vld [vmem:[#allocation3 + $0x129] sm:$0xff]  ;;  %v5067_v4 = vld [vmem:[#allocation3 + $0x131] sm:$0xff]  ;;  %5400 = vst.msk [vmem:[#allocation4 + $0x100] sm:$0xff] %vm4807_vm4, %v5292_v16  ;;  %4853 = vst.msk [vmem:[#allocation3 + $0x168] sm:$0xff] %vm4807_vm4, %v4740_v1  ;;  %v4630_v26 = vadd.f32 %v9461_v47, %v4511_v33  ;;  %v4510_v9 = vadd.f32 %v9018_v2, %v3050_v7 }
 0x2fd   : > { %v5174_v44 = vmax.f32 %v4958_v31, %v5066_v20  ;;  %v5175_v29 = vmax.f32 %v4959_v38, %v5067_v4  ;;  %v4961_v18 = vld [vmem:[#allocation3 + $0x140] sm:$0xff]  ;;  %v3059_v31 = vpop.f32.mrf.mxu1  ;;  %4852 = vst.msk [vmem:[#allocation3 + $0x160] sm:$0xff] %vm4807_vm4, %v4739_v48  ;;  %v4513_v2 = vadd.f32 %v9028_v11, %v3065_v0  ;;  %v10157_v4 = vld [vmem:[#allocation56_spill] sm:$0xff]  ;;  %v9479_v1 = vld [vmem:[#allocation3 + $0x148] sm:$0xff] }
 0x2fe   : > { %v5068_v5 = vld [vmem:[#allocation3 + $0x139] sm:$0xff]  ;;  %v5069_v53 = vld [vmem:[#allocation3 + $0x141] sm:$0xff]  ;;  %v4742_v38 = vmax.f32 %v4630_v26, 0.0  ;;  %v4629_v20 = vadd.f32 %v9461_v47, %v4510_v9  ;;  %v10159_v0 = vld [vmem:[#allocation59_spill] sm:$0xff] }
 0x2ff   : > { %v5293_v57 = vmax.f32 %v5170_v62, %v5174_v44  ;;  %v5294_v42 = vmax.f32 %v5171_v28, %v5175_v29  ;;  %v5176_v16 = vmax.f32 %v4960_v34, %v5068_v5  ;;  %v5177_v52 = vmax.f32 %v4961_v18, %v5069_v53  ;;  %v7106_v28 = vpop.f32.mrf.mxu1  ;;  %v9483_v44 = vpop.f32.mrf.mxu0  ;;  %v9499_v53 = vld [vmem:[#allocation3 + $0x158] sm:$0xff] }
 0x300   : > { %v3060_v62 = vadd.f32 %v3059_v31, %v10157_v4  ;;  %4855 = vst.msk [vmem:[#allocation3 + $0x178] sm:$0xff] %vm4807_vm4, %v4742_v38  ;;  %v4741_v33 = vmax.f32 %v4629_v20, 0.0  ;;  %v3075_v7 = vadd.f32 %v7106_v28, %v10158_v32  ;;  %v9485_v29 = vld [vmem:[#allocation3 + $0x150] sm:$0xff]  ;;  %v4632_v11 = vadd.f32 %v9461_v47, %v4513_v2  ;;  %v10160_v4 = vld [vmem:[#allocation60_spill] sm:$0xff] }
 0x301   : > { %5401 = vst.msk [vmem:[#allocation4 + $0x108] sm:$0xff] %vm4807_vm4, %v5293_v57  ;;  %5402 = vst.msk [vmem:[#allocation4 + $0x110] sm:$0xff] %vm4807_vm4, %v5294_v42  ;;  %v5295_v23 = vmax.f32 %v5172_v60, %v5176_v16  ;;  %v5070_v40 = vld [vmem:[#allocation3 + $0x149] sm:$0xff]  ;;  %v9487_v34 = vld [vmem:[#allocation3 + $0x151] sm:$0xff]  ;;  %v3069_v26 = vpop.f32.mrf.mxu1  ;;  %v9503_v16 = vpop.f32.mrf.mxu0 }
 0x302   : > { %v4512_v48 = vadd.f32 %v9038_v19, %v3060_v62  ;;  %v5178_v60 = vmax.f32 %v9479_v1, %v5070_v40  ;;  %v5179_v9 = vmax.f32 %v9485_v29, %v9487_v34  ;;  %4854 = vst.msk [vmem:[#allocation3 + $0x170] sm:$0xff] %vm4807_vm4, %v4741_v33  ;;  %v4515_v17 = vadd.f32 %v9048_v27, %v3075_v7  ;;  %v10161_v29 = vld [vmem:[#allocation62_spill] sm:$0xff] }
 0x303   : > { %5403 = vst.msk [vmem:[#allocation4 + $0x118] sm:$0xff] %vm4807_vm4, %v5295_v23  ;;  %v3070_v57 = vadd.f32 %v3069_v26, %v10159_v0  ;;  %v4744_v42 = vmax.f32 %v4632_v11, 0.0  ;;  %v7109_v5 = vpop.f32.mrf.mxu1  ;;  %v4966_v11 = vld [vmem:[#allocation3 + $0x168] sm:$0xff] }
 0x304   : > { %v4631_v18 = vadd.f32 %v9461_v47, %v4512_v48  ;;  %v4634_v19 = vadd.f32 %v9461_v47, %v4515_v17  ;;  %v4965_v38 = vld [vmem:[#allocation3 + $0x160] sm:$0xff]  ;;  %v3085_v62 = vadd.f32 %v7109_v5, %v10160_v4  ;;  %v10162_v17 = vld [vmem:[#allocation63_spill] sm:$0xff] }
 0x305   : > { %v4514_v31 = vadd.f32 %v9058_v35, %v3070_v57  ;;  %v9505_v20 = vld [vmem:[#allocation3 + $0x159] sm:$0xff]  ;;  %v5073_v2 = vld [vmem:[#allocation3 + $0x161] sm:$0xff]  ;;  %4857 = vst.msk [vmem:[#allocation3 + $0x188] sm:$0xff] %vm4807_vm4, %v4744_v42  ;;  %v3079_v28 = vpop.f32.mrf.mxu1  ;;  %v9519_v57 = vpop.f32.mrf.mxu0 }
 0x306   : > { %v4743_v27 = vmax.f32 %v4631_v18, 0.0  ;;  %v5180_v23 = vmax.f32 %v9499_v53, %v9505_v20  ;;  %v5181_v33 = vmax.f32 %v4965_v38, %v5073_v2  ;;  %v4746_v32 = vmax.f32 %v4634_v19, 0.0  ;;  %v10163_v20 = vld [vmem:[#allocation65_spill] sm:$0xff] }
 0x307   : > { %v4633_v35 = vadd.f32 %v9461_v47, %v4514_v31  ;;  %v4517_v7 = vadd.f32 %v9068_v43, %v3085_v62  ;;  %v3080_v40 = vadd.f32 %v3079_v28, %v10161_v29  ;;  %v7112_v34 = vpop.f32.mrf.mxu1  ;;  %v4968_v29 = vld [vmem:[#allocation3 + $0x178] sm:$0xff] }
 0x308   : > { %v5502_v1 = vld [vmem:[#allocation4 + $0x100] ss:$2 sm:$0xff]  ;;  %4856 = vst.msk [vmem:[#allocation3 + $0x180] sm:$0xff] %vm4807_vm4, %v4743_v27  ;;  %v5300_v48 = vmax.f32 %v5177_v52, %v5181_v33  ;;  %4859 = vst.msk [vmem:[#allocation3 + $0x198] sm:$0xff] %vm4807_vm4, %v4746_v32  ;;  %v3095_v0 = vadd.f32 %v7112_v34, %v10162_v17 }
 0x309   : > { %5505 = vst.msk [vmem:[%s9231_s13 + $0x38] sm:$0xff] %vm4807_vm4, %v5502_v1  ;;  %v4745_v26 = vmax.f32 %v4633_v35, 0.0  ;;  %v4967_v18 = vld [vmem:[#allocation3 + $0x170] sm:$0xff]  ;;  %v4636_v53 = vadd.f32 %v9461_v47, %v4517_v7  ;;  %v4516_v19 = vadd.f32 %v9078_v51, %v3080_v40  ;;  %v3089_v43 = vpop.f32.mrf.mxu1  ;;  %v10164_v32 = vld [vmem:[#allocation66_spill] sm:$0xff]  ;;  %v9533_v7 = vpop.f32.mrf.mxu0 }
 0x30a   : > { %v5504_v42 = vld [vmem:[#allocation4 + $0x110] ss:$2 sm:$0x3f]  ;;  %5408 = vst.msk [vmem:[#allocation4 + $0x140] sm:$0xff] %vm4807_vm4, %v5300_v48  ;;  %v4519_v38 = vadd.f32 %v9087_v46, %v3095_v0  ;;  %v3090_v2 = vadd.f32 %v3089_v43, %v10163_v20 }
 0x30b   : > { %v5074_v5 = vld [vmem:[#allocation3 + $0x169] sm:$0xff]  ;;  %5506 = vst.msk [vmem:[%s9231_s13 + $0x40] sm:$0x3f] %vm5481_vm5, %v5504_v42  ;;  %v5075_v52 = vld [vmem:[#allocation3 + $0x171] sm:$0xff]  ;;  %v4748_v4 = vmax.f32 %v4636_v53, 0.0  ;;  %v4635_v62 = vadd.f32 %v9461_v47, %v4516_v19  ;;  %v7115_v28 = vpop.f32.mrf.mxu1 }
 0x30c   : > { %v5182_v31 = vmax.f32 %v4966_v11, %v5074_v5  ;;  %4858 = vst.msk [vmem:[#allocation3 + $0x190] sm:$0xff] %vm4807_vm4, %v4745_v26  ;;  %v5183_v27 = vmax.f32 %v4967_v18, %v5075_v52  ;;  %v4638_v51 = vadd.f32 %v9461_v47, %v4519_v38  ;;  %v4518_v33 = vadd.f32 %v9103_v6, %v3090_v2  ;;  %v10165_v0 = vld [vmem:[#allocation68_spill] sm:$0xff]  ;;  %v9542_v53 = vld [vmem:[#allocation3 + $0x188] sm:$0xff]  ;;  %v9548_v38 = vpop.f32.mrf.mxu0 }
 0x30d   : > { %v3105_v35 = vadd.f32 %v7115_v28, %v10164_v32  ;;  %4861 = vst.msk [vmem:[#allocation3 + $0x1a8] sm:$0xff] %vm4807_vm4, %v4748_v4  ;;  %v4747_v46 = vmax.f32 %v4635_v62, 0.0  ;;  %v3099_v34 = vpop.f32.mrf.mxu1  ;;  %v10167_v32 = vld [vmem:[#allocation71_spill] sm:$0xff] }
 0x30e   : > { %v5301_v1 = vmax.f32 %v5178_v60, %v5182_v31  ;;  %v5302_v40 = vmax.f32 %v5179_v9, %v5183_v27  ;;  %v4750_v60 = vmax.f32 %v4638_v51, 0.0  ;;  %v4637_v17 = vadd.f32 %v9461_v47, %v4518_v33  ;;  %v10166_v31 = vld [vmem:[#allocation69_spill] sm:$0xff] }
 0x30f   : > { %v4969_v11 = vld [vmem:[#allocation3 + $0x180] sm:$0xff]  ;;  %v4521_v6 = vadd.f32 %v9116_v30, %v3105_v35  ;;  %v3100_v42 = vadd.f32 %v3099_v34, %v10165_v0  ;;  %4860 = vst.msk [vmem:[#allocation3 + $0x1a0] sm:$0xff] %vm4807_vm4, %v4747_v46  ;;  %v7118_v5 = vpop.f32.mrf.mxu1  ;;  %v9558_v34 = vpop.f32.mrf.mxu0 }
 0x310   : > { %5409 = vst.msk [vmem:[#allocation4 + $0x148] sm:$0xff] %vm4807_vm4, %v5301_v1  ;;  %v5076_v48 = vld [vmem:[#allocation3 + $0x179] sm:$0xff]  ;;  %v5077_v26 = vld [vmem:[#allocation3 + $0x181] sm:$0xff]  ;;  %5410 = vst.msk [vmem:[#allocation4 + $0x150] sm:$0xff] %vm4807_vm4, %v5302_v40  ;;  %v4749_v19 = vmax.f32 %v4637_v17, 0.0  ;;  %v3115_v30 = vadd.f32 %v7118_v5, %v10166_v31 }
 0x311   : > { %v5184_v18 = vmax.f32 %v4968_v29, %v5076_v48  ;;  %v5185_v9 = vmax.f32 %v4969_v11, %v5077_v26  ;;  %4863 = vst.msk [vmem:[#allocation3 + $0x1b8] sm:$0xff] %vm4807_vm4, %v4750_v60  ;;  %v4640_v43 = vadd.f32 %v9461_v47, %v4521_v6  ;;  %v4520_v52 = vadd.f32 %v9130_v37, %v3100_v42  ;;  %v3109_v62 = vpop.f32.mrf.mxu1  ;;  %v10168_v40 = vld [vmem:[#allocation72_spill] sm:$0xff] }
 0x312   : > { %4862 = vst.msk [vmem:[#allocation3 + $0x1b0] sm:$0xff] %vm4807_vm4, %v4749_v19  ;;  %v4523_v37 = vadd.f32 %v9144_v8, %v3115_v30  ;;  %v3110_v35 = vadd.f32 %v3109_v62, %v10167_v32  ;;  %v9560_v48 = vld [vmem:[#allocation3 + $0x198] sm:$0xff] }
 0x313   : > { %v5303_v20 = vmax.f32 %v5180_v23, %v5184_v18  ;;  %v4971_v2 = vld [vmem:[#allocation3 + $0x190] sm:$0xff]  ;;  %v4752_v51 = vmax.f32 %v4640_v43, 0.0  ;;  %v4639_v33 = vadd.f32 %v9461_v47, %v4520_v52  ;;  %v7121_v23 = vpop.f32.mrf.mxu1  ;;  %v10169_v18 = vld [vmem:[#allocation74_spill] sm:$0xff] }
 0x314   : > { %v5078_v27 = vld [vmem:[#allocation3 + $0x189] sm:$0xff]  ;;  %v5079_v4 = vld [vmem:[#allocation3 + $0x191] sm:$0xff]  ;;  %v3125_v46 = vadd.f32 %v7121_v23, %v10168_v40  ;;  %v4642_v26 = vadd.f32 %v9461_v47, %v4523_v37  ;;  %v4522_v60 = vadd.f32 %v9157_v22, %v3110_v35 }
 0x315   : > { %v5186_v28 = vmax.f32 %v9542_v53, %v5078_v27  ;;  %v5187_v1 = vmax.f32 %v4971_v2, %v5079_v4  ;;  %5411 = vst.msk [vmem:[#allocation4 + $0x158] sm:$0xff] %vm4807_vm4, %v5303_v20  ;;  %4865 = vst.msk [vmem:[#allocation3 + $0x1c8] sm:$0xff] %vm4807_vm4, %v4752_v51  ;;  %v4751_v29 = vmax.f32 %v4639_v33, 0.0  ;;  %v3119_v17 = vpop.f32.mrf.mxu1  ;;  %v4974_v22 = vld [vmem:[#allocation3 + $0x1a8] sm:$0xff]  ;;  %v10170_v2 = vld [vmem:[#allocation75_spill] sm:$0xff]  ;;  %v9574_v4 = vpop.f32.mrf.mxu0 }
 0x316   : > { %v4973_v8 = vld [vmem:[#allocation3 + $0x1a0] sm:$0xff]  ;;  %v4525_v42 = vadd.f32 %v9171_v49, %v3125_v46  ;;  %v3120_v5 = vadd.f32 %v3119_v17, %v10169_v18  ;;  %v4754_v43 = vmax.f32 %v4642_v26, 0.0  ;;  %v4641_v52 = vadd.f32 %v9461_v47, %v4522_v60 }
 0x317   : > { %v5508_v11 = vld [vmem:[#allocation4 + $0x140] ss:$2 sm:$0xff]  ;;  %4864 = vst.msk [vmem:[#allocation3 + $0x1c0] sm:$0xff] %vm4807_vm4, %v4751_v29  ;;  %v7124_v31 = vpop.f32.mrf.mxu1 }
 0x318   : > { %5511 = vst.msk [vmem:[%s9231_s13 + $0x46] sm:$0xff] %vm4807_vm4, %v5508_v11  ;;  %v5080_v6 = vld [vmem:[#allocation3 + $0x199] sm:$0xff]  ;;  %v5081_v0 = vld [vmem:[#allocation3 + $0x1a1] sm:$0xff]  ;;  %v4644_v30 = vadd.f32 %v9461_v47, %v4525_v42  ;;  %v4524_v20 = vadd.f32 %v9183_v56, %v3120_v5  ;;  %v3135_v27 = vadd.f32 %v7124_v31, %v10170_v2  ;;  %4867 = vst.msk [vmem:[#allocation3 + $0x1d8] sm:$0xff] %vm4807_vm4, %v4754_v43  ;;  %v4753_v37 = vmax.f32 %v4641_v52, 0.0  ;;  %v9586_v42 = vpop.f32.mrf.mxu0 }
 0x319   : > { %v5188_v53 = vmax.f32 %v9560_v48, %v5080_v6  ;;  %v5189_v19 = vmax.f32 %v4973_v8, %v5081_v0  ;;  %v4975_v62 = vld [vmem:[#allocation3 + $0x1b0] sm:$0xff]  ;;  %v3129_v32 = vpop.f32.mrf.mxu1  ;;  %v4976_v26 = vld [vmem:[#allocation3 + $0x1b8] sm:$0xff]  ;;  %v10172_v6 = vld [vmem:[#allocation78_spill] sm:$0xff] }
 0x31a   : > { %v5082_v51 = vld [vmem:[#allocation3 + $0x1a9] sm:$0xff]  ;;  %v5083_v33 = vld [vmem:[#allocation3 + $0x1b1] sm:$0xff]  ;;  %v4756_v40 = vmax.f32 %v4644_v30, 0.0  ;;  %v4643_v46 = vadd.f32 %v9461_v47, %v4524_v20  ;;  %4866 = vst.msk [vmem:[#allocation3 + $0x1d0] sm:$0xff] %vm4807_vm4, %v4753_v37  ;;  %v4527_v56 = vadd.f32 %v9195_v50, %v3135_v27 }
 0x31b   : > { %v5308_v49 = vmax.f32 %v5185_v9, %v5189_v19  ;;  %v5190_v23 = vmax.f32 %v4974_v22, %v5082_v51  ;;  %v5191_v29 = vmax.f32 %v4975_v62, %v5083_v33  ;;  %v10171_v9 = vld [vmem:[#allocation77_spill] sm:$0xff]  ;;  %v7127_v48 = vpop.f32.mrf.mxu1  ;;  %v10173_v22 = vld [vmem:[#allocation80_spill] sm:$0xff]  ;;  %v9604_v51 = vpop.f32.mrf.mxu0 }
 0x31c   : > { %v5510_v35 = vld [vmem:[#allocation4 + $0x150] ss:$2 sm:$0x3f]  ;;  %v3130_v11 = vadd.f32 %v3129_v32, %v10171_v9  ;;  %4869 = vst.msk [vmem:[#allocation3 + $0x1e8] sm:$0xff] %vm4807_vm4, %v4756_v40  ;;  %v4755_v8 = vmax.f32 %v4643_v46, 0.0  ;;  %v3145_v0 = vadd.f32 %v7127_v48, %v10172_v6  ;;  %v4646_v50 = vadd.f32 %v9461_v47, %v4527_v56  ;;  %v9606_v33 = vld [vmem:[#allocation3 + $0x1c8] sm:$0xff] }
 0x31d   : > { %5512 = vst.msk [vmem:[%s9231_s13 + $0x4e] sm:$0x3f] %vm5481_vm5, %v5510_v35  ;;  %v5309_v60 = vmax.f32 %v5186_v28, %v5190_v23  ;;  %v5310_v17 = vmax.f32 %v5187_v1, %v5191_v29  ;;  %v3139_v52 = vpop.f32.mrf.mxu1  ;;  %v10174_v32 = vld [vmem:[#allocation81_spill] sm:$0xff]  ;;  %v10176_v6 = vld [vmem:[#allocation84_spill] sm:$0xff] }
 0x31e   : > { %5416 = vst.msk [vmem:[#allocation4 + $0x180] sm:$0xff] %vm4807_vm4, %v5308_v49  ;;  %v9588_v18 = vld [vmem:[#allocation3 + $0x1c0] sm:$0xff]  ;;  %v4526_v43 = vadd.f32 %v9215_v36, %v3130_v11  ;;  %4868 = vst.msk [vmem:[#allocation3 + $0x1e0] sm:$0xff] %vm4807_vm4, %v4755_v8  ;;  %v4529_v31 = vadd.f32 %v9243_v13, %v3145_v0  ;;  %v3140_v30 = vadd.f32 %v3139_v52, %v10173_v22  ;;  %v4758_v20 = vmax.f32 %v4646_v50, 0.0  ;;  %v10177_v22 = vld [vmem:[#allocation86_spill] sm:$0xff] }
 0x31f   : > { %v5084_v5 = vld [vmem:[#allocation3 + $0x1b9] sm:$0xff]  ;;  %v9590_v19 = vld [vmem:[#allocation3 + $0x1c1] sm:$0xff]  ;;  %5417 = vst.msk [vmem:[#allocation4 + $0x188] sm:$0xff] %vm4807_vm4, %v5309_v60  ;;  %5418 = vst.msk [vmem:[#allocation4 + $0x190] sm:$0xff] %vm4807_vm4, %v5310_v17  ;;  %v7130_v27 = vpop.f32.mrf.mxu1 }
 0x320   : > { %v5192_v28 = vmax.f32 %v4976_v26, %v5084_v5  ;;  %v5193_v1 = vmax.f32 %v9588_v18, %v9590_v19  ;;  %v4645_v2 = vadd.f32 %v9461_v47, %v4526_v43  ;;  %v4648_v49 = vadd.f32 %v9461_v47, %v4529_v31  ;;  %4871 = vst.msk [vmem:[#allocation3 + $0x1f8] sm:$0xff] %vm4807_vm4, %v4758_v20  ;;  %v9619_v60 = vld [vmem:[#allocation3 + $0x1d8] sm:$0xff]  ;;  %v9624_v18 = vpop.f32.mrf.mxu0 }
 0x321   : > { %v4528_v62 = vadd.f32 %v9258_v15, %v3140_v30  ;;  %v3155_v13 = vadd.f32 %v7130_v27, %v10174_v32  ;;  %v3149_v35 = vpop.f32.mrf.mxu1  ;;  %v9611_v23 = vld [vmem:[#allocation3 + $0x1d0] sm:$0xff] }
 0x322   : > { %v5311_v36 = vmax.f32 %v5188_v53, %v5192_v28  ;;  %v4757_v37 = vmax.f32 %v4645_v2, 0.0  ;;  %v5086_v29 = vld [vmem:[#allocation3 + $0x1c9] sm:$0xff]  ;;  %v5087_v53 = vld [vmem:[#allocation3 + $0x1d1] sm:$0xff]  ;;  %v4760_v40 = vmax.f32 %v4648_v49, 0.0 }
 0x323   : > { %v4647_v46 = vadd.f32 %v9461_v47, %v4528_v62  ;;  %v10175_v15 = vld [vmem:[#allocation83_spill] sm:$0xff]  ;;  %v5194_v9 = vmax.f32 %v9606_v33, %v5086_v29  ;;  %v5195_v11 = vmax.f32 %v9611_v23, %v5087_v53  ;;  %v4531_v48 = vadd.f32 %v9270_v24, %v3155_v13  ;;  %v7133_v26 = vpop.f32.mrf.mxu1  ;;  %v9636_v33 = vpop.f32.mrf.mxu0  ;;  %v4982_v32 = vld [vmem:[#allocation3 + $0x1e8] sm:$0xff] }
 0x324   : > { %5419 = vst.msk [vmem:[#allocation4 + $0x198] sm:$0xff] %vm4807_vm4, %v5311_v36  ;;  %v3150_v56 = vadd.f32 %v3149_v35, %v10175_v15  ;;  %4870 = vst.msk [vmem:[#allocation3 + $0x1f0] sm:$0xff] %vm4807_vm4, %v4757_v37  ;;  %v3165_v0 = vadd.f32 %v7133_v26, %v10176_v6  ;;  %v10178_v35 = vld [vmem:[#allocation87_spill] sm:$0xff]  ;;  %v10179_v15 = vld [vmem:[#allocation89_spill] sm:$0xff] }
 0x325   : > { %4873 = vst.msk [vmem:[#allocation3 + $0x208] sm:$0xff] %vm4807_vm4, %v4760_v40  ;;  %v4759_v17 = vmax.f32 %v4647_v46, 0.0  ;;  %v4981_v19 = vld [vmem:[#allocation3 + $0x1e0] sm:$0xff]  ;;  %v4650_v43 = vadd.f32 %v9461_v47, %v4531_v48  ;;  %v3159_v52 = vpop.f32.mrf.mxu1 }
 0x326   : > { %v4530_v8 = vadd.f32 %v9283_v12, %v3150_v56  ;;  %v5514_v5 = vld [vmem:[#allocation4 + $0x180] ss:$2 sm:$0xff]  ;;  %v4533_v12 = vadd.f32 %v9306_v63, %v3165_v0  ;;  %v3160_v30 = vadd.f32 %v3159_v52, %v10177_v22 }
 0x327   : > { %v5088_v50 = vld [vmem:[#allocation3 + $0x1d9] sm:$0xff]  ;;  %5517 = vst.msk [vmem:[%s9231_s13 + $0x54] sm:$0xff] %vm4807_vm4, %v5514_v5  ;;  %v5089_v24 = vld [vmem:[#allocation3 + $0x1e1] sm:$0xff]  ;;  %4872 = vst.msk [vmem:[#allocation3 + $0x200] sm:$0xff] %vm4807_vm4, %v4759_v17  ;;  %v4762_v2 = vmax.f32 %v4650_v43, 0.0  ;;  %v7136_v27 = vpop.f32.mrf.mxu1 }
 0x328   : > { %v5196_v28 = vmax.f32 %v9619_v60, %v5088_v50  ;;  %v4649_v31 = vadd.f32 %v9461_v47, %v4530_v8  ;;  %v5197_v20 = vmax.f32 %v4981_v19, %v5089_v24  ;;  %v4652_v49 = vadd.f32 %v9461_v47, %v4533_v12  ;;  %v4984_v17 = vld [vmem:[#allocation3 + $0x1f8] sm:$0xff]  ;;  %v10180_v0 = vld [vmem:[#allocation90_spill] sm:$0xff]  ;;  %v9650_v19 = vpop.f32.mrf.mxu0 }
 0x329   : > { %v4532_v62 = vadd.f32 %v9322_v14, %v3160_v30  ;;  %4875 = vst.msk [vmem:[#allocation3 + $0x218] sm:$0xff] %vm4807_vm4, %v4762_v2  ;;  %v3175_v23 = vadd.f32 %v7136_v27, %v10178_v35  ;;  %v3169_v63 = vpop.f32.mrf.mxu1 }
 0x32a   : > { %v4761_v36 = vmax.f32 %v4649_v31, 0.0  ;;  %v5316_v13 = vmax.f32 %v5193_v1, %v5197_v20  ;;  %v4764_v46 = vmax.f32 %v4652_v49, 0.0  ;;  %v3170_v56 = vadd.f32 %v3169_v63, %v10179_v15  ;;  %v10182_v63 = vld [vmem:[#allocation93_spill] sm:$0xff] }
 0x32b   : > { %v5516_v37 = vld [vmem:[#allocation4 + $0x190] ss:$2 sm:$0x3f]  ;;  %v4651_v14 = vadd.f32 %v9461_v47, %v4532_v62  ;;  %v4535_v26 = vadd.f32 %v9336_v55, %v3175_v23  ;;  %v7139_v60 = vpop.f32.mrf.mxu1 }
 0x32c   : > { %5518 = vst.msk [vmem:[%s9231_s13 + $0x5c] sm:$0x3f] %vm5481_vm5, %v5516_v37  ;;  %v4983_v29 = vld [vmem:[#allocation3 + $0x1f0] sm:$0xff]  ;;  %v4534_v6 = vadd.f32 %v9357_v59, %v3170_v56  ;;  %v3185_v5 = vadd.f32 %v7139_v60, %v10180_v0  ;;  %v10184_v60 = vld [vmem:[#allocation96_spill] sm:$0xff] }
 0x32d   : > { %v5090_v53 = vld [vmem:[#allocation3 + $0x1e9] sm:$0xff]  ;;  %v5091_v40 = vld [vmem:[#allocation3 + $0x1f1] sm:$0xff]  ;;  %4874 = vst.msk [vmem:[#allocation3 + $0x210] sm:$0xff] %vm4807_vm4, %v4761_v36  ;;  %5424 = vst.msk [vmem:[#allocation4 + $0x1c0] sm:$0xff] %vm4807_vm4, %v5316_v13  ;;  %v4763_v8 = vmax.f32 %v4651_v14, 0.0  ;;  %v4654_v12 = vadd.f32 %v9461_v47, %v4535_v26  ;;  %v3179_v22 = vpop.f32.mrf.mxu1 }
 0x32e   : > { %v5198_v1 = vmax.f32 %v4982_v32, %v5090_v53  ;;  %v5199_v48 = vmax.f32 %v4983_v29, %v5091_v40  ;;  %4877 = vst.msk [vmem:[#allocation3 + $0x228] sm:$0xff] %vm4807_vm4, %v4764_v46  ;;  %v4985_v52 = vld [vmem:[#allocation3 + $0x200] sm:$0xff]  ;;  %v4653_v20 = vadd.f32 %v9461_v47, %v4534_v6  ;;  %v4537_v59 = vadd.f32 %v9367_v58, %v3185_v5  ;;  %v9659_v36 = vld [vmem:[#allocation3 + $0x208] sm:$0xff]  ;;  %v9662_v32 = vpop.f32.mrf.mxu0  ;;  %v10183_v14 = vld [vmem:[#allocation95_spill] sm:$0xff] }
 0x32f   : > { %v5092_v24 = vld [vmem:[#allocation3 + $0x1f9] sm:$0xff]  ;;  %v5093_v31 = vld [vmem:[#allocation3 + $0x201] sm:$0xff]  ;;  %4876 = vst.msk [vmem:[#allocation3 + $0x220] sm:$0xff] %vm4807_vm4, %v4763_v8  ;;  %v7142_v27 = vpop.f32.mrf.mxu1 }
 0x330   : > { %v5317_v50 = vmax.f32 %v5194_v9, %v5198_v1  ;;  %v5318_v43 = vmax.f32 %v5195_v11, %v5199_v48  ;;  %v5200_v55 = vmax.f32 %v4984_v17, %v5092_v24  ;;  %v5201_v30 = vmax.f32 %v4985_v52, %v5093_v31  ;;  %v10181_v11 = vld [vmem:[#allocation92_spill] sm:$0xff]  ;;  %v9684_v8 = vpop.f32.mrf.mxu0 }
 0x331   : > { %v4766_v9 = vmax.f32 %v4654_v12, 0.0  ;;  %v3180_v2 = vadd.f32 %v3179_v22, %v10181_v11  ;;  %v4765_v62 = vmax.f32 %v4653_v20, 0.0  ;;  %v4656_v37 = vadd.f32 %v9461_v47, %v4537_v59  ;;  %v3189_v53 = vpop.f32.mrf.mxu1  ;;  %v9679_v48 = vld [vmem:[#allocation3 + $0x218] sm:$0xff] }
 0x332   : > { %5425 = vst.msk [vmem:[#allocation4 + $0x1c8] sm:$0xff] %vm4807_vm4, %v5317_v50  ;;  %5426 = vst.msk [vmem:[#allocation4 + $0x1d0] sm:$0xff] %vm4807_vm4, %v5318_v43  ;;  %v5319_v49 = vmax.f32 %v5196_v28, %v5200_v55  ;;  %v3195_v29 = vadd.f32 %v7142_v27, %v10182_v63  ;;  %v3190_v15 = vadd.f32 %v3189_v53, %v10183_v14  ;;  %v10185_v55 = vld [vmem:[#allocation98_spill] sm:$0xff] }
 0x333   : > { %4879 = vst.msk [vmem:[#allocation3 + $0x238] sm:$0xff] %vm4807_vm4, %v4766_v9  ;;  %v4536_v23 = vadd.f32 %v9383_v61, %v3180_v2  ;;  %4878 = vst.msk [vmem:[#allocation3 + $0x230] sm:$0xff] %vm4807_vm4, %v4765_v62  ;;  %v4768_v46 = vmax.f32 %v4656_v37, 0.0  ;;  %v7145_v61 = vpop.f32.mrf.mxu1 }
 0x334   : > { %v9664_v13 = vld [vmem:[#allocation3 + $0x210] sm:$0xff]  ;;  %5427 = vst.msk [vmem:[#allocation4 + $0x1d8] sm:$0xff] %vm4807_vm4, %v5319_v49  ;;  %v4539_v1 = vadd.f32 %v9395_v21, %v3195_v29  ;;  %v4538_v26 = vadd.f32 %v9413_v39, %v3190_v15  ;;  %v3205_v17 = vadd.f32 %v7145_v61, %v10184_v60  ;;  %v10187_v29 = vld [vmem:[#allocation101_spill] sm:$0xff]  ;;  %v10188_v61 = vld [vmem:[#allocation102_spill] sm:$0xff] }
 0x335   : > { %v5094_v35 = vld [vmem:[#allocation3 + $0x209] sm:$0xff]  ;;  %v9666_v58 = vld [vmem:[#allocation3 + $0x211] sm:$0xff]  ;;  %v4655_v56 = vadd.f32 %v9461_v47, %v4536_v23  ;;  %4881 = vst.msk [vmem:[#allocation3 + $0x248] sm:$0xff] %vm4807_vm4, %v4768_v46  ;;  %v3199_v21 = vpop.f32.mrf.mxu1 }
 0x336   : > { %v5202_v28 = vmax.f32 %v9659_v36, %v5094_v35  ;;  %v5203_v40 = vmax.f32 %v9664_v13, %v9666_v58  ;;  %v4989_v6 = vld [vmem:[#allocation3 + $0x220] sm:$0xff]  ;;  %v4658_v43 = vadd.f32 %v9461_v47, %v4539_v1  ;;  %v4657_v12 = vadd.f32 %v9461_v47, %v4538_v26  ;;  %v4990_v9 = vld [vmem:[#allocation3 + $0x228] sm:$0xff]  ;;  %v9698_v36 = vpop.f32.mrf.mxu0  ;;  %v10186_v13 = vld [vmem:[#allocation99_spill] sm:$0xff] }
 0x337   : > { %v9686_v0 = vld [vmem:[#allocation3 + $0x219] sm:$0xff]  ;;  %v5097_v5 = vld [vmem:[#allocation3 + $0x221] sm:$0xff]  ;;  %v4767_v50 = vmax.f32 %v4655_v56, 0.0  ;;  %v4541_v39 = vadd.f32 %v9437_v10, %v3205_v17  ;;  %v3200_v20 = vadd.f32 %v3199_v21, %v10185_v55  ;;  %v7148_v59 = vpop.f32.mrf.mxu1 }
 0x338   : > { %v5204_v24 = vmax.f32 %v9679_v48, %v9686_v0  ;;  %v5205_v31 = vmax.f32 %v4989_v6, %v5097_v5  ;;  %v4770_v22 = vmax.f32 %v4658_v43, 0.0  ;;  %v4769_v2 = vmax.f32 %v4657_v12, 0.0  ;;  %v9713_v26 = vpop.f32.mrf.mxu0 }
 0x339   : > { %v5520_v52 = vld [vmem:[#allocation4 + $0x1c0] ss:$2 sm:$0xff]  ;;  %4880 = vst.msk [vmem:[#allocation3 + $0x240] sm:$0xff] %vm4807_vm4, %v4767_v50  ;;  %v4660_v27 = vadd.f32 %v9461_v47, %v4541_v39  ;;  %v4540_v10 = vadd.f32 %v9452_v3, %v3200_v20  ;;  %v3215_v35 = vadd.f32 %v7148_v59, %v10186_v13  ;;  %v3209_v58 = vpop.f32.mrf.mxu1 }
 0x33a   : > { %5523 = vst.msk [vmem:[%s9231_s13 + $0x62] sm:$0xff] %vm4807_vm4, %v5520_v52  ;;  %v5324_v11 = vmax.f32 %v5201_v30, %v5205_v31  ;;  %v4991_v62 = vld [vmem:[#allocation3 + $0x230] sm:$0xff]  ;;  %4883 = vst.msk [vmem:[#allocation3 + $0x258] sm:$0xff] %vm4807_vm4, %v4770_v22  ;;  %v3210_v53 = vadd.f32 %v3209_v58, %v10187_v29  ;;  %v4992_v60 = vld [vmem:[#allocation3 + $0x238] sm:$0xff] }
 0x33b   : > { %v5522_v49 = vld [vmem:[#allocation4 + $0x1d0] ss:$2 sm:$0x3f]  ;;  %4882 = vst.msk [vmem:[#allocation3 + $0x250] sm:$0xff] %vm4807_vm4, %v4769_v2  ;;  %v4772_v63 = vmax.f32 %v4660_v27, 0.0  ;;  %v4659_v14 = vadd.f32 %v9461_v47, %v4540_v10  ;;  %v4543_v15 = vadd.f32 %v9471_v41, %v3215_v35  ;;  %v7151_v3 = vpop.f32.mrf.mxu1 }
 0x33c   : > { %v5098_v37 = vld [vmem:[#allocation3 + $0x229] sm:$0xff]  ;;  %5524 = vst.msk [vmem:[%s9231_s13 + $0x6a] sm:$0x3f] %vm5481_vm5, %v5522_v49  ;;  %v5099_v30 = vld [vmem:[#allocation3 + $0x231] sm:$0xff]  ;;  %v4542_v1 = vadd.f32 %v9483_v44, %v3210_v53  ;;  %v3225_v48 = vadd.f32 %v7151_v3, %v10188_v61 }
 0x33d   : > { %5432 = vst.msk [vmem:[#allocation4 + $0x200] sm:$0xff] %vm4807_vm4, %v5324_v11  ;;  %v5206_v23 = vmax.f32 %v4990_v9, %v5098_v37  ;;  %v5207_v46 = vmax.f32 %v4991_v62, %v5099_v30  ;;  %4885 = vst.msk [vmem:[#allocation3 + $0x268] sm:$0xff] %vm4807_vm4, %v4772_v63  ;;  %v4771_v6 = vmax.f32 %v4659_v14, 0.0  ;;  %v4662_v0 = vadd.f32 %v9461_v47, %v4543_v15  ;;  %v3219_v5 = vpop.f32.mrf.mxu1  ;;  %v10189_v44 = vld [vmem:[#allocation104_spill] sm:$0xff]  ;;  %v9722_v22 = vld [vmem:[#allocation3 + $0x248] sm:$0xff] }
 0x33e   : > { %v4545_v21 = vadd.f32 %v9503_v16, %v3225_v48  ;;  %v3220_v52 = vadd.f32 %v3219_v5, %v10189_v44  ;;  %v10190_v9 = vld [vmem:[#allocation105_spill] sm:$0xff]  ;;  %v9727_v16 = vpop.f32.mrf.mxu0  ;;  %v10192_v29 = vld [vmem:[#allocation108_spill] sm:$0xff]  ;;  %v10194_v44 = vld [vmem:[#allocation111_spill] sm:$0xff] }
 0x33f   : > { %v5325_v56 = vmax.f32 %v5202_v28, %v5206_v23  ;;  %v5326_v17 = vmax.f32 %v5203_v40, %v5207_v46  ;;  %v4661_v28 = vadd.f32 %v9461_v47, %v4542_v1  ;;  %4884 = vst.msk [vmem:[#allocation3 + $0x260] sm:$0xff] %vm4807_vm4, %v4771_v6  ;;  %v4774_v40 = vmax.f32 %v4662_v0, 0.0  ;;  %v7154_v39 = vpop.f32.mrf.mxu1 }
 0x340   : > { %v4993_v50 = vld [vmem:[#allocation3 + $0x240] sm:$0xff]  ;;  %v4664_v20 = vadd.f32 %v9461_v47, %v4545_v21  ;;  %v4544_v59 = vadd.f32 %v9519_v57, %v3220_v52  ;;  %v3235_v11 = vadd.f32 %v7154_v39, %v10190_v9  ;;  %v9738_v46 = vpop.f32.mrf.mxu0 }
 0x341   : > { %5433 = vst.msk [vmem:[#allocation4 + $0x208] sm:$0xff] %vm4807_vm4, %v5325_v56  ;;  %v5100_v41 = vld [vmem:[#allocation3 + $0x239] sm:$0xff]  ;;  %v5101_v43 = vld [vmem:[#allocation3 + $0x241] sm:$0xff]  ;;  %5434 = vst.msk [vmem:[#allocation4 + $0x210] sm:$0xff] %vm4807_vm4, %v5326_v17  ;;  %v4773_v55 = vmax.f32 %v4661_v28, 0.0  ;;  %v3229_v37 = vpop.f32.mrf.mxu1 }
 0x342   : > { %v5208_v31 = vmax.f32 %v4992_v60, %v5100_v41  ;;  %v5209_v12 = vmax.f32 %v4993_v50, %v5101_v43  ;;  %v4995_v27 = vld [vmem:[#allocation3 + $0x250] sm:$0xff]  ;;  %4887 = vst.msk [vmem:[#allocation3 + $0x278] sm:$0xff] %vm4807_vm4, %v4774_v40  ;;  %v4776_v35 = vmax.f32 %v4664_v20, 0.0  ;;  %v4663_v57 = vadd.f32 %v9461_v47, %v4544_v59  ;;  %v9740_v15 = vld [vmem:[#allocation3 + $0x258] sm:$0xff]  ;;  %v10193_v17 = vld [vmem:[#allocation110_spill] sm:$0xff] }
 0x343   : > { %v5102_v49 = vld [vmem:[#allocation3 + $0x249] sm:$0xff]  ;;  %v5103_v62 = vld [vmem:[#allocation3 + $0x251] sm:$0xff]  ;;  %4886 = vst.msk [vmem:[#allocation3 + $0x270] sm:$0xff] %vm4807_vm4, %v4773_v55  ;;  %v4547_v58 = vadd.f32 %v9533_v7, %v3235_v11  ;;  %v7157_v23 = vpop.f32.mrf.mxu1 }
 0x344   : > { %v5327_v2 = vmax.f32 %v5204_v24, %v5208_v31  ;;  %v5210_v10 = vmax.f32 %v9722_v22, %v5102_v49  ;;  %v5211_v13 = vmax.f32 %v4995_v27, %v5103_v62  ;;  %v10191_v24 = vld [vmem:[#allocation107_spill] sm:$0xff]  ;;  %4889 = vst.msk [vmem:[#allocation3 + $0x288] sm:$0xff] %vm4807_vm4, %v4776_v35  ;;  %v4775_v63 = vmax.f32 %v4663_v57, 0.0  ;;  %v9754_v31 = vpop.f32.mrf.mxu0 }
 0x345   : > { %v3230_v30 = vadd.f32 %v3229_v37, %v10191_v24  ;;  %v3245_v53 = vadd.f32 %v7157_v23, %v10192_v29  ;;  %v4666_v3 = vadd.f32 %v9461_v47, %v4547_v58  ;;  %v3239_v1 = vpop.f32.mrf.mxu1  ;;  %v10196_v24 = vld [vmem:[#allocation114_spill] sm:$0xff] }
 0x346   : > { %5435 = vst.msk [vmem:[#allocation4 + $0x218] sm:$0xff] %vm4807_vm4, %v5327_v2  ;;  %v4997_v7 = vld [vmem:[#allocation3 + $0x260] sm:$0xff]  ;;  %4888 = vst.msk [vmem:[#allocation3 + $0x280] sm:$0xff] %vm4807_vm4, %v4775_v63  ;;  %v3240_v6 = vadd.f32 %v3239_v1, %v10193_v17  ;;  %v9766_v23 = vpop.f32.mrf.mxu0 }
 0x347   : > { %v4546_v56 = vadd.f32 %v9548_v38, %v3230_v30  ;;  %v5104_v61 = vld [vmem:[#allocation3 + $0x259] sm:$0xff]  ;;  %v5105_v48 = vld [vmem:[#allocation3 + $0x261] sm:$0xff]  ;;  %v4549_v60 = vadd.f32 %v9558_v34, %v3245_v53  ;;  %v4778_v50 = vmax.f32 %v4666_v3, 0.0  ;;  %v7160_v43 = vpop.f32.mrf.mxu1 }
 0x348   : > { %v5526_v14 = vld [vmem:[#allocation4 + $0x200] ss:$2 sm:$0xff]  ;;  %v5212_v0 = vmax.f32 %v9740_v15, %v5104_v61  ;;  %v5213_v5 = vmax.f32 %v4997_v7, %v5105_v48  ;;  %v4548_v21 = vadd.f32 %v9574_v4, %v3240_v6  ;;  %v3255_v52 = vadd.f32 %v7160_v43, %v10194_v44  ;;  %v9789_v6 = vpop.f32.mrf.mxu0 }
 0x349   : > { %5529 = vst.msk [vmem:[%s9231_s13 + $0x70] sm:$0xff] %vm4807_vm4, %v5526_v14  ;;  %v4665_v41 = vadd.f32 %v9461_v47, %v4546_v56  ;;  %v4998_v38 = vld [vmem:[#allocation3 + $0x268] sm:$0xff]  ;;  %v4668_v28 = vadd.f32 %v9461_v47, %v4549_v60  ;;  %4891 = vst.msk [vmem:[#allocation3 + $0x298] sm:$0xff] %vm4807_vm4, %v4778_v50  ;;  %v3249_v20 = vpop.f32.mrf.mxu1  ;;  %v5000_v37 = vld [vmem:[#allocation3 + $0x278] sm:$0xff] }
 0x34a   : > { %v5332_v34 = vmax.f32 %v5209_v12, %v5213_v5  ;;  %v4999_v40 = vld [vmem:[#allocation3 + $0x270] sm:$0xff]  ;;  %v4667_v27 = vadd.f32 %v9461_v47, %v4548_v21  ;;  %v4551_v4 = vadd.f32 %v9586_v42, %v3255_v52  ;;  %v10195_v12 = vld [vmem:[#allocation113_spill] sm:$0xff] }
 0x34b   : > { %v5106_v39 = vld [vmem:[#allocation3 + $0x269] sm:$0xff]  ;;  %v5107_v22 = vld [vmem:[#allocation3 + $0x271] sm:$0xff]  ;;  %v4777_v55 = vmax.f32 %v4665_v41, 0.0  ;;  %v4780_v2 = vmax.f32 %v4668_v28, 0.0  ;;  %v3250_v49 = vadd.f32 %v3249_v20, %v10195_v12  ;;  %v7163_v62 = vpop.f32.mrf.mxu1  ;;  %v9785_v48 = vld [vmem:[%s9953_s4] ss:$0 sm:$0xff] }
 0x34c   : > { %v5214_v9 = vmax.f32 %v4998_v38, %v5106_v39  ;;  %v5215_v11 = vmax.f32 %v4999_v40, %v5107_v22  ;;  %5440 = vst.msk [vmem:[#allocation4 + $0x240] sm:$0xff] %vm4807_vm4, %v5332_v34  ;;  %v4779_v58 = vmax.f32 %v4667_v27, 0.0  ;;  %v3265_v30 = vadd.f32 %v7163_v62, %v10196_v24  ;;  %v9791_v5 = vld [vmem:[#allocation3 + $0x288] sm:$0xff] }
 0x34d   : > { %v5528_v59 = vld [vmem:[#allocation4 + $0x210] ss:$2 sm:$0x3f]  ;;  %4890 = vst.msk [vmem:[#allocation3 + $0x290] sm:$0xff] %vm4807_vm4, %v4777_v55  ;;  %4893 = vst.msk [vmem:[#allocation3 + $0x2a8] sm:$0xff] %vm4807_vm4, %v4780_v2  ;;  %v9768_v63 = vld [vmem:[#allocation3 + $0x280] sm:$0xff]  ;;  %v4670_v42 = vadd.f32 %v9461_v47, %v4551_v4  ;;  %v4550_v14 = vadd.f32 %v9604_v51, %v3250_v49  ;;  %v3259_v15 = vpop.f32.mrf.mxu1 }
 0x34e   : > { %5530 = vst.msk [vmem:[%s9231_s13 + $0x78] sm:$0x3f] %vm5481_vm5, %v5528_v59  ;;  %v5333_v35 = vmax.f32 %v5210_v10, %v5214_v9  ;;  %v5334_v57 = vmax.f32 %v5211_v13, %v5215_v11  ;;  %v5108_v29 = vld [vmem:[#allocation3 + $0x279] sm:$0xff]  ;;  %v9770_v53 = vld [vmem:[#allocation3 + $0x281] sm:$0xff]  ;;  %v4553_v3 = vadd.f32 %v9624_v18, %v3265_v30  ;;  %v3260_v56 = vadd.f32 %v3259_v15, %v8973_v45  ;;  %v10197_v18 = vld [vmem:[#allocation115_spill] sm:$0xff] }
 0x34f   : > { %v5216_v10 = vmax.f32 %v5000_v37, %v5108_v29  ;;  %v5217_v13 = vmax.f32 %v9768_v63, %v9770_v53  ;;  %4892 = vst.msk [vmem:[#allocation3 + $0x2a0] sm:$0xff] %vm4807_vm4, %v4779_v58  ;;  %v4782_v1 = vmax.f32 %v4670_v42, 0.0  ;;  %v4669_v7 = vadd.f32 %v9461_v47, %v4550_v14  ;;  %v7166_v61 = vpop.f32.mrf.mxu1  ;;  %v10198_v55 = vld [vmem:[#allocation116_spill] sm:$0xff]  ;;  %v10199_v42 = vld [vmem:[#allocation117_spill] sm:$0xff] }
 0x350   : > { %5441 = vst.msk [vmem:[#allocation4 + $0x248] sm:$0xff] %vm4807_vm4, %v5333_v35  ;;  %5442 = vst.msk [vmem:[#allocation4 + $0x250] sm:$0xff] %vm4807_vm4, %v5334_v57  ;;  %v4672_v60 = vadd.f32 %v9785_v48, %v4553_v3  ;;  %v4552_v17 = vadd.f32 %v9636_v33, %v3260_v56  ;;  %v3275_v47 = vadd.f32 %v7166_v61, %v10197_v18  ;;  %v9804_v40 = vld [vmem:[#allocation3 + $0x298] sm:$0xff]  ;;  %v10200_v56 = vld [vmem:[#allocation118_spill] sm:$0xff] }
 0x351   : > { %v5335_v51 = vmax.f32 %v5212_v0, %v5216_v10  ;;  %4895 = vst.msk [vmem:[#allocation3 + $0x2b8] sm:$0xff] %vm4807_vm4, %v4782_v1  ;;  %v4781_v45 = vmax.f32 %v4669_v7, 0.0  ;;  %v3269_v50 = vpop.f32.mrf.mxu1 }
 0x352   : > { %v4784_v38 = vmax.f32 %v4672_v60, 0.0  ;;  %v4671_v28 = vadd.f32 %v9785_v48, %v4552_v17  ;;  %v3270_v33 = vadd.f32 %v3269_v50, %v8981_v54  ;;  %v4555_v52 = vadd.f32 %v9650_v19, %v3275_v47  ;;  %v9809_v54 = vpop.f32.mrf.mxu0 }
 0x353   : > { %5443 = vst.msk [vmem:[#allocation4 + $0x258] sm:$0xff] %vm4807_vm4, %v5335_v51  ;;  %4894 = vst.msk [vmem:[#allocation3 + $0x2b0] sm:$0xff] %vm4807_vm4, %v4781_v45  ;;  %v7169_v34 = vpop.f32.mrf.mxu1  ;;  %v10201_v45 = vld [vmem:[#allocation119_spill] sm:$0xff] }
 0x354   : > { %v9796_v0 = vld [vmem:[#allocation3 + $0x290] sm:$0xff]  ;;  %4897 = vst.msk [vmem:[#allocation3 + $0x2c8] sm:$0xff] %vm4807_vm4, %v4784_v38  ;;  %v4783_v39 = vmax.f32 %v4671_v28, 0.0  ;;  %v4554_v22 = vadd.f32 %v9662_v32, %v3270_v33  ;;  %v3285_v20 = vadd.f32 %v7169_v34, %v10198_v55  ;;  %v4674_v2 = vadd.f32 %v9785_v48, %v4555_v52  ;;  %v9821_v30 = vpop.f32.mrf.mxu0  ;;  %v5006_v29 = vld [vmem:[#allocation3 + $0x2a8] sm:$0xff] }
 0x355   : > { %v5110_v41 = vld [vmem:[#allocation3 + $0x289] sm:$0xff]  ;;  %v5111_v43 = vld [vmem:[#allocation3 + $0x291] sm:$0xff]  ;;  %v3279_v27 = vpop.f32.mrf.mxu1 }
 0x356   : > { %v5218_v21 = vmax.f32 %v9791_v5, %v5110_v41  ;;  %v5219_v44 = vmax.f32 %v9796_v0, %v5111_v43  ;;  %v5005_v9 = vld [vmem:[#allocation3 + $0x2a0] sm:$0xff]  ;;  %4896 = vst.msk [vmem:[#allocation3 + $0x2c0] sm:$0xff] %vm4807_vm4, %v4783_v39  ;;  %v4673_v12 = vadd.f32 %v9785_v48, %v4554_v22  ;;  %v4557_v32 = vadd.f32 %v9684_v8, %v3285_v20  ;;  %v9835_v47 = vpop.f32.mrf.mxu0 }
 0x357   : > { %v5532_v59 = vld [vmem:[#allocation4 + $0x240] ss:$2 sm:$0xff]  ;;  %v3280_v49 = vadd.f32 %v3279_v27, %v8990_v25  ;;  %v4786_v37 = vmax.f32 %v4674_v2, 0.0  ;;  %v7172_v35 = vpop.f32.mrf.mxu1 }
 0x358   : > { %v5112_v11 = vld [vmem:[#allocation3 + $0x299] sm:$0xff]  ;;  %5535 = vst.msk [vmem:[%s9231_s13 + $0x7e] sm:$0xff] %vm4807_vm4, %v5532_v59  ;;  %v5113_v19 = vld [vmem:[#allocation3 + $0x2a1] sm:$0xff]  ;;  %v4785_v57 = vmax.f32 %v4673_v12, 0.0  ;;  %v4676_v58 = vadd.f32 %v9785_v48, %v4557_v32  ;;  %v3295_v14 = vadd.f32 %v7172_v35, %v10199_v42 }
 0x359   : > { %v5220_v4 = vmax.f32 %v9804_v40, %v5112_v11  ;;  %v5221_v62 = vmax.f32 %v5005_v9, %v5113_v19  ;;  %v4556_v24 = vadd.f32 %v9698_v36, %v3280_v49  ;;  %4899 = vst.msk [vmem:[#allocation3 + $0x2d8] sm:$0xff] %vm4807_vm4, %v4786_v37  ;;  %v3289_v8 = vpop.f32.mrf.mxu1  ;;  %v5008_v60 = vld [vmem:[#allocation3 + $0x2b8] sm:$0xff]  ;;  %v9847_v9 = vpop.f32.mrf.mxu0  ;;  %v10203_v19 = vld [vmem:[#allocation121_spill] sm:$0xff]  ;;  %v10204_v37 = vld [vmem:[#allocation122_spill] sm:$0xff] }
 0x35a   : > { %v5534_v63 = vld [vmem:[#allocation4 + $0x250] ss:$2 sm:$0x3f]  ;;  %4898 = vst.msk [vmem:[#allocation3 + $0x2d0] sm:$0xff] %vm4807_vm4, %v4785_v57  ;;  %v4788_v3 = vmax.f32 %v4676_v58, 0.0  ;;  %v3290_v1 = vadd.f32 %v3289_v8, %v10200_v56  ;;  %v4559_v61 = vadd.f32 %v9713_v26, %v3295_v14 }
 0x35b   : > { %v5340_v53 = vmax.f32 %v5217_v13, %v5221_v62  ;;  %5536 = vst.msk [vmem:[%s9231_s13 + $0x86] sm:$0x3f] %vm5481_vm5, %v5534_v63  ;;  %v5007_v25 = vld [vmem:[#allocation3 + $0x2b0] sm:$0xff]  ;;  %v4675_v36 = vadd.f32 %v9785_v48, %v4556_v24  ;;  %v7175_v51 = vpop.f32.mrf.mxu1  ;;  %v9844_v22 = vld [vmem:[#allocation3 + $0x2c8] sm:$0xff]  ;;  %v7379_v42 = vpop.f32.mrf.mxu0 }
 0x35c   : > { %v5114_v15 = vld [vmem:[#allocation3 + $0x2a9] sm:$0xff]  ;;  %v5115_v10 = vld [vmem:[#allocation3 + $0x2b1] sm:$0xff]  ;;  %4901 = vst.msk [vmem:[#allocation3 + $0x2e8] sm:$0xff] %vm4807_vm4, %v4788_v3  ;;  %v4558_v5 = vadd.f32 %v9727_v16, %v3290_v1  ;;  %v3305_v18 = vadd.f32 %v7175_v51, %v10201_v45  ;;  %v4678_v28 = vadd.f32 %v9785_v48, %v4559_v61 }
 0x35d   : > { %5448 = vst.msk [vmem:[#allocation4 + $0x280] sm:$0xff] %vm4807_vm4, %v5340_v53  ;;  %v5222_v13 = vmax.f32 %v5006_v29, %v5114_v15  ;;  %v5223_v7 = vmax.f32 %v5007_v25, %v5115_v10  ;;  %v4787_v17 = vmax.f32 %v4675_v36, 0.0  ;;  %v5009_v41 = vld [vmem:[#allocation3 + $0x2c0] sm:$0xff]  ;;  %v3299_v33 = vpop.f32.mrf.mxu1  ;;  %v10205_v29 = vld [vmem:[#allocation123_spill] sm:$0xff] }
 0x35e   : > { %v5116_v43 = vld [vmem:[#allocation3 + $0x2b9] sm:$0xff]  ;;  %v5117_v38 = vld [vmem:[#allocation3 + $0x2c1] sm:$0xff]  ;;  %v4677_v34 = vadd.f32 %v9785_v48, %v4558_v5  ;;  %v4561_v16 = vadd.f32 %v9738_v46, %v3305_v18  ;;  %v4425_v18 = vpop.f32.mrf.mxu0 }
 0x35f   : > { %v5341_v50 = vmax.f32 %v5218_v21, %v5222_v13  ;;  %v5342_v0 = vmax.f32 %v5219_v44, %v5223_v7  ;;  %v5224_v26 = vmax.f32 %v5008_v60, %v5116_v43  ;;  %v5225_v52 = vmax.f32 %v5009_v41, %v5117_v38  ;;  %4900 = vst.msk [vmem:[#allocation3 + $0x2e0] sm:$0xff] %vm4807_vm4, %v4787_v17  ;;  %v10202_v44 = vld [vmem:[#allocation120_spill] sm:$0xff]  ;;  %v7178_v39 = vpop.f32.mrf.mxu1  ;;  %v10207_v43 = vld [vmem:[#allocation125_spill] sm:$0xff] }
 0x360   : > { %v4790_v21 = vmax.f32 %v4678_v28, 0.0  ;;  %v3300_v40 = vadd.f32 %v3299_v33, %v10202_v44  ;;  %v4789_v20 = vmax.f32 %v4677_v34, 0.0  ;;  %v4680_v59 = vadd.f32 %v9785_v48, %v4561_v16  ;;  %v9864_v24 = vld [vmem:[#allocation3 + $0x2d8] sm:$0xff]  ;;  %v10208_v34 = vld [vmem:[#allocation126_spill] sm:$0xff] }
 0x361   : > { %5449 = vst.msk [vmem:[#allocation4 + $0x288] sm:$0xff] %vm4807_vm4, %v5341_v50  ;;  %5450 = vst.msk [vmem:[#allocation4 + $0x290] sm:$0xff] %vm4807_vm4, %v5342_v0  ;;  %v5343_v55 = vmax.f32 %v5220_v4, %v5224_v26  ;;  %v9849_v11 = vld [vmem:[#allocation3 + $0x2d0] sm:$0xff]  ;;  %v3315_v12 = vadd.f32 %v7178_v39, %v10203_v19  ;;  %v3309_v32 = vpop.f32.mrf.mxu1  ;;  %v10206_v7 = vld [vmem:[#allocation124_spill] sm:$0xff] }
 0x362   : > { %v5118_v2 = vld [vmem:[#allocation3 + $0x2c9] sm:$0xff]  ;;  %v9851_v46 = vld [vmem:[#allocation3 + $0x2d1] sm:$0xff]  ;;  %4903 = vst.msk [vmem:[#allocation3 + $0x2f8] sm:$0xff] %vm4807_vm4, %v4790_v21  ;;  %v4560_v27 = vadd.f32 %v9754_v31, %v3300_v40  ;;  %4902 = vst.msk [vmem:[#allocation3 + $0x2f0] sm:$0xff] %vm4807_vm4, %v4789_v20  ;;  %v4792_v62 = vmax.f32 %v4680_v59, 0.0  ;;  %v3310_v35 = vadd.f32 %v3309_v32, %v10204_v37  ;;  %v7382_v59 = vpop.f32.mrf.mxu0 }
 0x363   : > { %5451 = vst.msk [vmem:[#allocation4 + $0x298] sm:$0xff] %vm4807_vm4, %v5343_v55  ;;  %v5226_v4 = vmax.f32 %v9844_v22, %v5118_v2  ;;  %v5227_v49 = vmax.f32 %v9849_v11, %v9851_v46  ;;  %v4563_v58 = vadd.f32 %v9766_v23, %v3315_v12  ;;  %v7181_v31 = vpop.f32.mrf.mxu1  ;;  %v5014_v60 = vld [vmem:[#allocation3 + $0x2e8] sm:$0xff]  ;;  %v10209_v55 = vld [vmem:[#allocation127_spill] sm:$0xff]  ;;  %v10210_v37 = vld [vmem:[#allocation128_spill] sm:$0xff] }
 0x364   : > { %v4679_v57 = vadd.f32 %v9785_v48, %v4560_v27  ;;  %4905 = vst.msk [vmem:[#allocation3 + $0x308] sm:$0xff] %vm4807_vm4, %v4792_v62  ;;  %v4562_v63 = vadd.f32 %v9789_v6, %v3310_v35  ;;  %v3325_v53 = vadd.f32 %v7181_v31, %v10205_v29 }
 0x365   : > { %v4682_v10 = vadd.f32 %v9785_v48, %v4563_v58  ;;  %v3319_v3 = vpop.f32.mrf.mxu1 }
 0x366   : > { %v5013_v14 = vld [vmem:[#allocation3 + $0x2e0] sm:$0xff]  ;;  %v4791_v15 = vmax.f32 %v4679_v57, 0.0  ;;  %v4681_v1 = vadd.f32 %v9785_v48, %v4562_v63  ;;  %v4565_v6 = vadd.f32 %v9809_v54, %v3325_v53  ;;  %v3320_v61 = vadd.f32 %v3319_v3, %v10206_v7 }
 0x367   : > { %v9869_v8 = vld [vmem:[#allocation3 + $0x2d9] sm:$0xff]  ;;  %v5121_v25 = vld [vmem:[#allocation3 + $0x2e1] sm:$0xff]  ;;  %v4794_v13 = vmax.f32 %v4682_v10, 0.0  ;;  %v7184_v51 = vpop.f32.mrf.mxu1 }
 0x368   : > { %v5538_v23 = vld [vmem:[#allocation4 + $0x280] ss:$2 sm:$0xff]  ;;  %v5228_v36 = vmax.f32 %v9864_v24, %v9869_v8  ;;  %v5229_v56 = vmax.f32 %v5013_v14, %v5121_v25  ;;  %4904 = vst.msk [vmem:[#allocation3 + $0x300] sm:$0xff] %vm4807_vm4, %v4791_v15  ;;  %v4793_v5 = vmax.f32 %v4681_v1, 0.0  ;;  %v4684_v45 = vadd.f32 %v9785_v48, %v4565_v6  ;;  %v4435_v8 = vpop.f32.mrf.mxu0 }
 0x369   : > { %5541 = vst.msk [vmem:[%s9231_s13 + $0x8c] sm:$0xff] %vm4807_vm4, %v5538_v23  ;;  %v5015_v0 = vld [vmem:[#allocation3 + $0x2f0] sm:$0xff]  ;;  %4907 = vst.msk [vmem:[#allocation3 + $0x318] sm:$0xff] %vm4807_vm4, %v4794_v13  ;;  %v4564_v54 = vadd.f32 %v9821_v30, %v3320_v61  ;;  %v3335_v38 = vadd.f32 %v7184_v51, %v10207_v43  ;;  %v3329_v28 = vpop.f32.mrf.mxu1  ;;  %v5016_v11 = vld [vmem:[#allocation3 + $0x2f8] sm:$0xff] }
 0x36a   : > { %v5348_v17 = vmax.f32 %v5225_v52, %v5229_v56  ;;  %v5540_v50 = vld [vmem:[#allocation4 + $0x290] ss:$2 sm:$0x3f]  ;;  %4906 = vst.msk [vmem:[#allocation3 + $0x310] sm:$0xff] %vm4807_vm4, %v4793_v5  ;;  %v4796_v52 = vmax.f32 %v4684_v45, 0.0  ;;  %v3330_v16 = vadd.f32 %v3329_v28, %v10208_v34  ;;  %v10211_v53 = vld [vmem:[#allocation129_spill] sm:$0xff]  ;;  %v7385_v13 = vpop.f32.mrf.mxu0 }
 0x36b   : > { %v5122_v41 = vld [vmem:[#allocation3 + $0x2e9] sm:$0xff]  ;;  %5542 = vst.msk [vmem:[%s9231_s13 + $0x94] sm:$0x3f] %vm5481_vm5, %v5540_v50  ;;  %v5123_v33 = vld [vmem:[#allocation3 + $0x2f1] sm:$0xff]  ;;  %v4683_v44 = vadd.f32 %v9785_v48, %v4564_v54  ;;  %v4567_v40 = vadd.f32 %v9835_v47, %v3335_v38  ;;  %v7187_v30 = vpop.f32.mrf.mxu1 }
 0x36c   : > { %5456 = vst.msk [vmem:[#allocation4 + $0x2c0] sm:$0xff] %vm4807_vm4, %v5348_v17  ;;  %v5230_v26 = vmax.f32 %v5014_v60, %v5122_v41  ;;  %v5231_v21 = vmax.f32 %v5015_v0, %v5123_v33  ;;  %4909 = vst.msk [vmem:[#allocation3 + $0x328] sm:$0xff] %vm4807_vm4, %v4796_v52  ;;  %v4566_v22 = vadd.f32 %v9847_v9, %v3330_v16  ;;  %v9900_v31 = vld [vmem:[#allocation3 + $0x308] sm:$0xff]  ;;  %v10213_v17 = vld [vmem:[#allocation131_spill] sm:$0xff]  ;;  %v4445_v16 = vpop.f32.mrf.mxu0 }
 0x36d   : > { %v3345_v20 = vadd.f32 %v7187_v30, %v10209_v55  ;;  %v4795_v46 = vmax.f32 %v4683_v44, 0.0  ;;  %v4686_v27 = vadd.f32 %v9785_v48, %v4567_v40  ;;  %v3339_v19 = vpop.f32.mrf.mxu1  ;;  %v10214_v33 = vld [vmem:[#allocation132_spill] sm:$0xff] }
 0x36e   : > { %v5349_v39 = vmax.f32 %v5226_v4, %v5230_v26  ;;  %v5350_v2 = vmax.f32 %v5227_v49, %v5231_v21  ;;  %v4685_v4 = vadd.f32 %v9785_v48, %v4566_v22  ;;  %v3340_v35 = vadd.f32 %v3339_v19, %v10210_v37  ;;  %v10216_v37 = vld [vmem:[#allocation134_spill] sm:$0xff] }
 0x36f   : > { %v5017_v12 = vld [vmem:[#allocation3 + $0x300] sm:$0xff]  ;;  %v4569_v62 = vadd.f32 %v7379_v42, %v3345_v20  ;;  %4908 = vst.msk [vmem:[#allocation3 + $0x320] sm:$0xff] %vm4807_vm4, %v4795_v46  ;;  %v4798_v49 = vmax.f32 %v4686_v27, 0.0  ;;  %v7190_v58 = vpop.f32.mrf.mxu1 }
 0x370   : > { %5457 = vst.msk [vmem:[#allocation4 + $0x2c8] sm:$0xff] %vm4807_vm4, %v5349_v39  ;;  %v5124_v32 = vld [vmem:[#allocation3 + $0x2f9] sm:$0xff]  ;;  %v5125_v47 = vld [vmem:[#allocation3 + $0x301] sm:$0xff]  ;;  %5458 = vst.msk [vmem:[#allocation4 + $0x2d0] sm:$0xff] %vm4807_vm4, %v5350_v2  ;;  %v4797_v24 = vmax.f32 %v4685_v4, 0.0  ;;  %v4568_v29 = vadd.f32 %v4425_v18, %v3340_v35  ;;  %v3355_v14 = vadd.f32 %v7190_v58, %v10211_v53 }
 0x371   : > { %v5232_v9 = vmax.f32 %v5016_v11, %v5124_v32  ;;  %v5233_v57 = vmax.f32 %v5017_v12, %v5125_v47  ;;  %v4688_v63 = vadd.f32 %v9785_v48, %v4569_v62  ;;  %v5019_v25 = vld [vmem:[#allocation3 + $0x310] sm:$0xff]  ;;  %4911 = vst.msk [vmem:[#allocation3 + $0x338] sm:$0xff] %vm4807_vm4, %v4798_v49  ;;  %v3349_v3 = vpop.f32.mrf.mxu1  ;;  %v5020_v18 = vld [vmem:[#allocation3 + $0x318] sm:$0xff]  ;;  %v10215_v46 = vld [vmem:[#allocation133_spill] sm:$0xff] }
 0x372   : > { %v5126_v15 = vld [vmem:[#allocation3 + $0x309] sm:$0xff]  ;;  %v5127_v10 = vld [vmem:[#allocation3 + $0x311] sm:$0xff]  ;;  %4910 = vst.msk [vmem:[#allocation3 + $0x330] sm:$0xff] %vm4807_vm4, %v4797_v24  ;;  %v4687_v6 = vadd.f32 %v9785_v48, %v4568_v29  ;;  %v4571_v7 = vadd.f32 %v7382_v59, %v3355_v14 }
 0x373   : > { %v5351_v42 = vmax.f32 %v5228_v36, %v5232_v9  ;;  %v5234_v23 = vmax.f32 %v9900_v31, %v5126_v15  ;;  %v5235_v56 = vmax.f32 %v5019_v25, %v5127_v10  ;;  %v4800_v1 = vmax.f32 %v4688_v63, 0.0  ;;  %v10212_v36 = vld [vmem:[#allocation130_spill] sm:$0xff]  ;;  %v7193_v51 = vpop.f32.mrf.mxu1 }
 0x374   : > { %v3350_v61 = vadd.f32 %v3349_v3, %v10212_v36  ;;  %v4799_v60 = vmax.f32 %v4687_v6, 0.0  ;;  %v3365_v5 = vadd.f32 %v7193_v51, %v10213_v17  ;;  %v4690_v50 = vadd.f32 %v9785_v48, %v4571_v7  ;;  %v5022_v30 = vld [vmem:[#allocation3 + $0x328] sm:$0xff] }
 0x375   : > { %5459 = vst.msk [vmem:[#allocation4 + $0x2d8] sm:$0xff] %vm4807_vm4, %v5351_v42  ;;  %4913 = vst.msk [vmem:[#allocation3 + $0x348] sm:$0xff] %vm4807_vm4, %v4800_v1  ;;  %v3359_v41 = vpop.f32.mrf.mxu1 }
 0x376   : > { %v4570_v0 = vadd.f32 %v4435_v8, %v3350_v61  ;;  %v5021_v54 = vld [vmem:[#allocation3 + $0x320] sm:$0xff]  ;;  %4912 = vst.msk [vmem:[#allocation3 + $0x340] sm:$0xff] %vm4807_vm4, %v4799_v60  ;;  %v4573_v28 = vadd.f32 %v7385_v13, %v3365_v5  ;;  %v3360_v26 = vadd.f32 %v3359_v41, %v10214_v33  ;;  %v4802_v21 = vmax.f32 %v4690_v50, 0.0 }
 0x377   : > { %v5544_v45 = vld [vmem:[#allocation4 + $0x2c0] ss:$2 sm:$0xff]  ;;  %v7196_v40 = vpop.f32.mrf.mxu1 }
 0x378   : > { %5547 = vst.msk [vmem:[%s9231_s13 + $0x9a] sm:$0xff] %vm4807_vm4, %v5544_v45  ;;  %v5128_v43 = vld [vmem:[#allocation3 + $0x319] sm:$0xff]  ;;  %v5129_v38 = vld [vmem:[#allocation3 + $0x321] sm:$0xff]  ;;  %v4689_v44 = vadd.f32 %v9785_v48, %v4570_v0  ;;  %v4692_v39 = vadd.f32 %v9785_v48, %v4573_v28  ;;  %v4572_v22 = vadd.f32 %v4445_v16, %v3360_v26  ;;  %4915 = vst.msk [vmem:[#allocation3 + $0x358] sm:$0xff] %vm4807_vm4, %v4802_v21 }
 0x379   : > { %v5236_v52 = vmax.f32 %v5020_v18, %v5128_v43  ;;  %v5237_v34 = vmax.f32 %v5021_v54, %v5129_v38  ;;  %v5023_v20 = vld [vmem:[#allocation3 + $0x330] sm:$0xff]  ;;  %v3375_v27 = vadd.f32 %v7196_v40, %v10215_v46  ;;  %v3369_v19 = vpop.f32.mrf.mxu1 }
 0x37a   : > { %v5130_v59 = vld [vmem:[#allocation3 + $0x329] sm:$0xff]  ;;  %v5131_v11 = vld [vmem:[#allocation3 + $0x331] sm:$0xff]  ;;  %v4801_v2 = vmax.f32 %v4689_v44, 0.0  ;;  %v4804_v4 = vmax.f32 %v4692_v39, 0.0  ;;  %v4691_v62 = vadd.f32 %v9785_v48, %v4572_v22  ;;  %v3370_v35 = vadd.f32 %v3369_v19, %v10216_v37 }
 0x37b   : > { %v5356_v55 = vmax.f32 %v5233_v57, %v5237_v34  ;;  %v5238_v32 = vmax.f32 %v5022_v30, %v5130_v59  ;;  %v5239_v47 = vmax.f32 %v5023_v20, %v5131_v11  ;;  %v7388_v9 = vpop.f32.mrf.mxu1  ;;  %v5024_v57 = vld [vmem:[#allocation3 + $0x338] sm:$0xff] }
 0x37c   : > { %v5546_v12 = vld [vmem:[#allocation4 + $0x2d0] ss:$2 sm:$0x3f]  ;;  %4914 = vst.msk [vmem:[#allocation3 + $0x350] sm:$0xff] %vm4807_vm4, %v4801_v2  ;;  %4917 = vst.msk [vmem:[#allocation3 + $0x368] sm:$0xff] %vm4807_vm4, %v4804_v4  ;;  %v4803_v31 = vmax.f32 %v4691_v62, 0.0  ;;  %v4575_v24 = vadd.f32 %v7388_v9, %v3375_v27 }
 0x37d   : > { %5548 = vst.msk [vmem:[%s9231_s13 + $0xa2] sm:$0x3f] %vm5481_vm5, %v5546_v12  ;;  %v5357_v49 = vmax.f32 %v5234_v23, %v5238_v32  ;;  %v5358_v58 = vmax.f32 %v5235_v56, %v5239_v47  ;;  %v5025_v63 = vld [vmem:[#allocation3 + $0x340] sm:$0xff]  ;;  %v4455_v14 = vpop.f32.mrf.mxu1  ;;  %v5026_v56 = vld [vmem:[#allocation3 + $0x348] sm:$0xff] }
 0x37e   : > { %5464 = vst.msk [vmem:[#allocation4 + $0x300] sm:$0xff] %vm4807_vm4, %v5356_v55  ;;  %v5132_v29 = vld [vmem:[#allocation3 + $0x339] sm:$0xff]  ;;  %v5133_v53 = vld [vmem:[#allocation3 + $0x341] sm:$0xff]  ;;  %4916 = vst.msk [vmem:[#allocation3 + $0x360] sm:$0xff] %vm4807_vm4, %v4803_v31  ;;  %v4694_v25 = vadd.f32 %v9785_v48, %v4575_v24  ;;  %v4574_v15 = vadd.f32 %v4455_v14, %v3370_v35 }
 0x37f   : > { %5465 = vst.msk [vmem:[#allocation4 + $0x308] sm:$0xff] %vm4807_vm4, %v5357_v49  ;;  %5466 = vst.msk [vmem:[#allocation4 + $0x310] sm:$0xff] %vm4807_vm4, %v5358_v58  ;;  %v5240_v8 = vmax.f32 %v5024_v57, %v5132_v29  ;;  %v5241_v42 = vmax.f32 %v5025_v63, %v5133_v53  ;;  %v5136_v45 = vld [vmem:[#allocation3 + $0x359] sm:$0x7] }
 0x380   : > { %v4806_v3 = vmax.f32 %v4694_v25, 0.0  ;;  %v4693_v23 = vadd.f32 %v9785_v48, %v4574_v15  ;;  %v5028_v48 = vld [vmem:[#allocation3 + $0x358] sm:$0x7] }
 0x381   : > { %v5359_v10 = vmax.f32 %v5236_v52, %v5240_v8  ;;  %v5244_v43 = vmax.f32 %v5028_v48, %v5136_v45 }
 0x382   : > { %4920 = vst.msk [vmem:[#allocation3 + $0x378] sm:$0xf] %vm4919_vm6, %v4806_v3  ;;  %v4805_v7 = vmax.f32 %v4693_v23, 0.0 }
 0x383   : > { %5467 = vst.msk [vmem:[#allocation4 + $0x318] sm:$0xff] %vm4807_vm4, %v5359_v10  ;;  %v5027_v1 = vld [vmem:[#allocation3 + $0x350] sm:$0xff]  ;;  %v5247_v54 = vld [vmem:[#allocation3 + $0x368] sm:$0xff] }
 0x384   : > { %v5134_v6 = vld [vmem:[#allocation3 + $0x349] sm:$0xff]  ;;  %v5135_v13 = vld [vmem:[#allocation3 + $0x351] sm:$0xff]  ;;  %4918 = vst.msk [vmem:[#allocation3 + $0x370] sm:$0xff] %vm4807_vm4, %v4805_v7 }
 0x385   : > { %v5242_v36 = vmax.f32 %v5026_v56, %v5134_v6  ;;  %v5243_v61 = vmax.f32 %v5027_v1, %v5135_v13  ;;  %v5246_v60 = vld [vmem:[#allocation3 + $0x360] sm:$0xff] }
 0x386   : > { %v5550_v51 = vld [vmem:[#allocation4 + $0x300] ss:$2 sm:$0xff] }
 0x387   : > { %5553 = vst.msk [vmem:[%s9231_s13 + $0xa8] sm:$0xff] %vm4807_vm4, %v5550_v51  ;;  %v5251_v17 = vld [vmem:[#allocation3 + $0x361] sm:$0xff] }
 0x388   : > { %v5256_v5 = vmax.f32 %v5246_v60, %v5251_v17 }
 0x389   : > { %v5249_v0 = vld [vmem:[#allocation3 + $0x378] sm:$0x7] }
 0x38a   : > { %v5552_v18 = vld [vmem:[#allocation4 + $0x310] ss:$2 sm:$0x3f]  ;;  %v5364_v50 = vmax.f32 %v5241_v42, %v5256_v5 }
 0x38b   : > { %5554 = vst.msk [vmem:[%s9231_s13 + $0xb0] sm:$0x3f] %vm5481_vm5, %v5552_v18  ;;  %v5254_v41 = vld [vmem:[#allocation3 + $0x379] sm:$0x7]  ;;  %v5248_v28 = vld [vmem:[#allocation3 + $0x370] sm:$0xff] }
 0x38c   : > { %5472 = vst.msk [vmem:[#allocation4 + $0x340] sm:$0xff] %vm4807_vm4, %v5364_v50  ;;  %v5259_v38 = vmax.f32 %v5249_v0, %v5254_v41  ;;  %v5252_v33 = vld [vmem:[#allocation3 + $0x369] sm:$0xff]  ;;  %v5253_v26 = vld [vmem:[#allocation3 + $0x371] sm:$0xff] }
 0x38d   : > { %v5257_v52 = vmax.f32 %v5247_v54, %v5252_v33  ;;  %v5258_v34 = vmax.f32 %v5248_v28, %v5253_v26 }
 0x38e   : > { %v5367_v16 = vmax.f32 %v5244_v43, %v5259_v38 }
 0x38f   : > { %v5365_v21 = vmax.f32 %v5242_v36, %v5257_v52  ;;  %v5366_v44 = vmax.f32 %v5243_v61, %v5258_v34 }
 0x390   : > { %5476 = vst.msk [vmem:[#allocation4 + $0x358] sm:$0x7] %vm5475_vm7, %v5367_v16 }
 0x391   : > { %5473 = vst.msk [vmem:[#allocation4 + $0x348] sm:$0xff] %vm4807_vm4, %v5365_v21  ;;  %5474 = vst.msk [vmem:[#allocation4 + $0x350] sm:$0xff] %vm4807_vm4, %v5366_v44 }
 0x398   : > { %v5556_v40 = vld [vmem:[#allocation4 + $0x340] ss:$2 sm:$0xff]  ;;  %v5558_v30 = vld [vmem:[#allocation4 + $0x350] ss:$2 sm:$0x3f] }
 0x399   : > { %5559 = vst.msk [vmem:[%s9231_s13 + $0xb6] sm:$0xff] %vm4807_vm4, %v5556_v40 }
 0x39a   : > { %5560 = vst.msk [vmem:[%s9231_s13 + $0xbe] sm:$0x3f] %vm5481_vm5, %v5558_v30 }
 0x39b PF: > { %s15_s18 = sadd.s32 1, %s7518_s18  }
 0x39c   : > { %p12_p4 = scmp.ge.s32.totalorder %s15_s18, 4  }
 0x39e   :  { %14 = sbr.rel (!%p12_p4) target bundleno = 1 (0x1), region = 99 }

</bundles_post_ra>
